<compile_context>
chip_gen: v6e
topology: v6e:2x2x1
jax: 0.10.0
libtpu: 0.0.40
codegen_flags: <defaults>
</compile_context>

<pallas_src>
import functools
import math

import jax
import jax.numpy as jnp
from jax import lax
from jax.experimental import pallas as pl
from jax.experimental.pallas import tpu as pltpu


# ----------------------------- kernel helpers -------------------------------

def _layernorm(x, gamma, beta, eps=1e-5):
    mean = jnp.mean(x, axis=-1, keepdims=True)
    var = jnp.mean((x - mean) ** 2, axis=-1, keepdims=True)
    return (x - mean) * lax.rsqrt(var + eps) * gamma + beta


def _vmem_limit_bytes():
    # v5e/v6e: 128 MiB physical VMEM; v7x: 64 MiB.  Leave headroom for the
    # compiler's own scratch; conservative fallback that fits every generation.
    try:
        cap = int(pltpu.get_tpu_info().vmem_capacity_bytes)
        return int(min(cap * 0.8, 100 * 1024 * 1024))
    except Exception:
        return 48 * 1024 * 1024


# --------------------------- fused transformer kernel ------------------------

def clip_stack_kernel(x_ref, mask_ref,
                      ln1_g_ref, ln1_b_ref,
                      wqkv_ref, bqkv_ref, wo_ref, bo_ref,
                      ln2_g_ref, ln2_b_ref,
                      w1_ref, b1_ref, w2_ref, b2_ref,
                      fin_g_ref, fin_b_ref,
                      o_ref, acc_ref, *, n_heads, n_layers):
    layer = pl.program_id(1)
    bf16 = jnp.bfloat16

    # Load this batch-block's embeddings into the VMEM-resident residual stream
    # once; it never round-trips to HBM between layers.
    @pl.when(layer == 0)
    def _():
        acc_ref[...] = x_ref[...]

    Bt, S, D = acc_ref.shape
    H = n_heads
    dh = D // H

    x = acc_ref[...].reshape(Bt * S, D)          # (Bt*S, D) f32 residual stream
    mask = mask_ref[...]                         # (S, S) causal additive mask

    # ---------------- self-attention block (pre-LN, causal) -----------------
    h = _layernorm(x, ln1_g_ref[0], ln1_b_ref[0]).astype(bf16)
    # Fused QKV projection: one full-width (Bt*S, D) @ (D, 3D) MXU matmul.
    qkv = (jnp.dot(h, wqkv_ref[0], preferred_element_type=jnp.float32)
           + bqkv_ref[0]).reshape(Bt, S, 3 * D)
    q = qkv[:, :, 0:D].astype(bf16)              # 1/sqrt(dh) folded into wq/bq
    k = qkv[:, :, D:2 * D].astype(bf16)
    v = qkv[:, :, 2 * D:3 * D].astype(bf16)

    head_outs = []
    for hd in range(H):
        sl = slice(hd * dh, (hd + 1) * dh)
        s = jnp.einsum("bsd,btd->bst", q[:, :, sl], k[:, :, sl],
                       preferred_element_type=jnp.float32) + mask
        s = s - jnp.max(s, axis=-1, keepdims=True)
        p = jnp.exp(s)
        p = p * pl.reciprocal(jnp.sum(p, axis=-1, keepdims=True), approx=True)
        head_outs.append(
            jnp.einsum("bst,btd->bsd", p.astype(bf16), v[:, :, sl],
                       preferred_element_type=jnp.float32))

    # Concatenated head outputs (head-major lane order) -> single (D, D) proj.
    o = jnp.concatenate(head_outs, axis=-1).astype(bf16).reshape(Bt * S, D)
    x = x + jnp.dot(o, wo_ref[0], preferred_element_type=jnp.float32) + bo_ref[0]

    # -------------------- MLP block with quick-GELU --------------------------
    h2 = _layernorm(x, ln2_g_ref[0], ln2_b_ref[0]).astype(bf16)
    m = jnp.dot(h2, w1_ref[0], preferred_element_type=jnp.float32) + b1_ref[0]
    m = m * jax.nn.sigmoid(1.702 * m)
    x = x + jnp.dot(m.astype(bf16), w2_ref[0],
                    preferred_element_type=jnp.float32) + b2_ref[0]

    acc_ref[...] = x.reshape(Bt, S, D)

    # Final LayerNorm fused into the last layer's epilogue.
    @pl.when(layer == n_layers - 1)
    def _():
        o_ref[...] = _layernorm(x, fin_g_ref[...], fin_b_ref[...]).reshape(Bt, S, D)


def _pick_batch_block(B):
    for bt in (8, 4, 2, 1):
        if B % bt == 0:
            return bt
    return 1


def clip_layers_fused(x, params, *, n_heads, batch_block=None):
    B, S, D = x.shape
    n_layers = params["ln1_g"].shape[0]
    dh = D // n_heads
    bt = batch_block if batch_block is not None else _pick_batch_block(B)
    assert B % bt == 0

    # One-time host-side weight transform: fold 1/sqrt(dh) into the q columns of
    # the fused QKV weight/bias (exact in bf16 when dh is a power of two).
    scale = 1.0 / math.sqrt(dh)
    wqkv = jnp.concatenate(
        [params["wqkv"][..., :D] * jnp.asarray(scale, params["wqkv"].dtype),
         params["wqkv"][..., D:]], axis=-1)
    bqkv = jnp.concatenate(
        [params["bqkv"][..., :D] * scale, params["bqkv"][..., D:]], axis=-1)

    # Causal mask: constant index_map => DMA'd once, stays VMEM-resident.
    row = lax.broadcasted_iota(jnp.int32, (S, S), 0)
    col = lax.broadcasted_iota(jnp.int32, (S, S), 1)
    mask = jnp.where(col > row, -1e30, 0.0).astype(jnp.float32)

    def layer_spec(arr):
        nd = arr.ndim
        return pl.BlockSpec((1,) + arr.shape[1:],
                            lambda g, l: (l,) + (0,) * (nd - 1))

    def const_spec(arr):
        nd = arr.ndim
        return pl.BlockSpec(arr.shape, lambda g, l: (0,) * nd)

    layer_args = [
        params["ln1_g"], params["ln1_b"], wqkv, bqkv,
        params["wo"], params["bo"],
        params["ln2_g"], params["ln2_b"],
        params["w1"], params["b1"], params["w2"], params["b2"],
    ]

    in_specs = ([pl.BlockSpec((bt, S, D), lambda g, l: (g, 0, 0)),
                 const_spec(mask)]
                + [layer_spec(a) for a in layer_args]
                + [const_spec(params["final_g"]), const_spec(params["final_b"])])
    args = [x, mask] + layer_args + [params["final_g"], params["final_b"]]

    # TODO(synk): on v7x, very large batch blocks would need the MLP weights
    # K-chunked (pltpu.emit_pipeline) to fit the 64 MiB VMEM; not needed here.
    return pl.pallas_call(
        functools.partial(clip_stack_kernel, n_heads=n_heads, n_layers=n_layers),
        out_shape=jax.ShapeDtypeStruct((B, S, D), jnp.float32),
        grid_spec=pltpu.PrefetchScalarGridSpec(
            num_scalar_prefetch=0,
            grid=(B // bt, n_layers),                 # layers innermost, in order
            in_specs=in_specs,
            out_specs=pl.BlockSpec((bt, S, D), lambda g, l: (g, 0, 0)),
            scratch_shapes=[pltpu.VMEM((bt, S, D), jnp.float32)],
        ),
        compiler_params=pltpu.CompilerParams(
            dimension_semantics=("parallel", "arbitrary"),
            vmem_limit_bytes=_vmem_limit_bytes(),
        ),
    )(*args)


# ------------------------------ full CLIP forward ---------------------------

def clip_forward(tokens, params, *, n_heads):
    # TODO(synk): the data-dependent vocab-embedding gather stays in plain XLA;
    # it has no clean BlockSpec formulation.
    state = (params["token_emb"][tokens] + params["pos_emb"][None]).astype(jnp.float32)
    B, S, D = state.shape
    pad = -S % 128                     # lane-width padding (trailing, causal-masked)
    if pad:
        state = jnp.pad(state, ((0, 0), (0, pad), (0, 0)))
    out = clip_layers_fused(state, params, n_heads=n_heads)
    return out[:, :S] if pad else out


# ------------------------------ pure-JAX reference --------------------------

def clip_forward_ref(tokens, params, n_heads):
    f32 = lambda a: a.astype(jnp.float32)
    x = (params["token_emb"][tokens] + params["pos_emb"][None]).astype(jnp.float32)
    B, S, D = x.shape
    n_layers = params["ln1_g"].shape[0]
    H = n_heads
    dh = D // H
    row = lax.broadcasted_iota(jnp.int32, (S, S), 0)
    col = lax.broadcasted_iota(jnp.int32, (S, S), 1)
    mask = jnp.where(col > row, -1e30, 0.0)
    for l in range(n_layers):
        h = _layernorm(x, params["ln1_g"][l], params["ln1_b"][l])
        qkv = h @ f32(params["wqkv"][l]) + params["bqkv"][l]
        q, k, v = qkv[..., :D], qkv[..., D:2 * D], qkv[..., 2 * D:]
        q = q.reshape(B, S, H, dh).transpose(0, 2, 1, 3)
        k = k.reshape(B, S, H, dh).transpose(0, 2, 1, 3)
        v = v.reshape(B, S, H, dh).transpose(0, 2, 1, 3)
        s = jnp.einsum("bhse,bhte->bhst", q, k) / math.sqrt(dh) + mask
        p = jax.nn.softmax(s, axis=-1)
        o = jnp.einsum("bhst,bhte->bhse", p, v)
        o = o.transpose(0, 2, 1, 3).reshape(B, S, D)
        x = x + (o @ f32(params["wo"][l]) + params["bo"][l])
        hh = _layernorm(x, params["ln2_g"][l], params["ln2_b"][l])
        m = hh @ f32(params["w1"][l]) + params["b1"][l]
        m = m * jax.nn.sigmoid(1.702 * m)
        x = x + (m @ f32(params["w2"][l]) + params["b2"][l])
    return _layernorm(x, params["final_g"], params["final_b"])


# ------------------------------ parameter init ------------------------------

def init_params(key, *, n_vocab, n_embed, n_tokens, n_heads, n_layers):
    D, L = n_embed, n_layers
    del n_heads  # head split is implicit in the fused (D, 3D) QKV layout
    ks = jax.random.split(key, 16)
    std = 0.02

    def w(k, shape):   # matmul weights stored in bf16
        return (std * jax.random.normal(k, shape, jnp.float32)).astype(jnp.bfloat16)

    def b(k, shape):   # biases stay f32
        return 0.02 * jax.random.normal(k, shape, jnp.float32)

    return {
        "token_emb": std * jax.random.normal(ks[0], (n_vocab, D), jnp.float32),
        "pos_emb": std * jax.random.normal(ks[1], (n_tokens, D), jnp.float32),
        "ln1_g": 1.0 + 0.1 * jax.random.normal(ks[2], (L, 1, D), jnp.float32),
        "ln1_b": b(ks[3], (L, 1, D)),
        "wqkv": w(ks[4], (L, D, 3 * D)),
        "bqkv": b(ks[5], (L, 1, 3 * D)),
        "wo": w(ks[6], (L, D, D)),
        "bo": b(ks[7], (L, 1, D)),
        "ln2_g": 1.0 + 0.1 * jax.random.normal(ks[8], (L, 1, D), jnp.float32),
        "ln2_b": b(ks[9], (L, 1, D)),
        "w1": w(ks[10], (L, D, 4 * D)),
        "b1": b(ks[11], (L, 1, 4 * D)),
        "w2": w(ks[12], (L, 4 * D, D)),
        "b2": b(ks[13], (L, 1, D)),
        "final_g": 1.0 + 0.1 * jax.random.normal(ks[14], (1, D), jnp.float32),
        "final_b": b(ks[15], (1, D)),
    }


# ------------------------------ main -----------------------------------------

if __name__ == "__main__":
    # Small config consistent with CLIP(49408, 768, 77; 12 heads x 12 layers),
    # scaled down: vocab=1000, d=64, seq=13 (padded to 128 inside the wrapper),
    # 4 heads, 2 layers, batch=2.
    N_VOCAB, N_EMBED, N_TOKENS, N_HEADS, N_LAYERS, BATCH = 1000, 64, 13, 4, 2, 2

    key = jax.random.PRNGKey(0)
    pkey, tkey = jax.random.split(key)
    params = init_params(pkey, n_vocab=N_VOCAB, n_embed=N_EMBED,
                         n_tokens=N_TOKENS, n_heads=N_HEADS, n_layers=N_LAYERS)
    tokens = jax.random.randint(tkey, (BATCH, N_TOKENS), 0, N_VOCAB, dtype=jnp.int32)

    out = jax.block_until_ready(clip_forward(tokens, params, n_heads=N_HEADS))
    ref = jax.block_until_ready(clip_forward_ref(tokens, params, N_HEADS))

    assert out.shape == (BATCH, N_TOKENS, N_EMBED)
    # bf16 matmul operands + approximate softmax reciprocal in the kernel vs f32
    # activations in the reference (same bf16-quantized weights) -> loosened tol.
    assert bool(jnp.allclose(out, ref, atol=3e-2, rtol=3e-2)), \
        "mismatch vs pure-JAX reference"

    print("KERNEL_OK")
</pallas_src>

<mosaic_0001>
module attributes {stable_mosaic.version = 11 : i64} {
  func.func @clip_stack_kernel(%arg0: i32, %arg1: i32, %arg2: memref<2x128x64xf32, #tpu.memory_space<vmem>>, %arg3: memref<128x128xf32, #tpu.memory_space<vmem>>, %arg4: memref<1x1x64xf32, #tpu.memory_space<vmem>>, %arg5: memref<1x1x64xf32, #tpu.memory_space<vmem>>, %arg6: memref<1x64x192xbf16, #tpu.memory_space<vmem>>, %arg7: memref<1x1x192xf32, #tpu.memory_space<vmem>>, %arg8: memref<1x64x64xbf16, #tpu.memory_space<vmem>>, %arg9: memref<1x1x64xf32, #tpu.memory_space<vmem>>, %arg10: memref<1x1x64xf32, #tpu.memory_space<vmem>>, %arg11: memref<1x1x64xf32, #tpu.memory_space<vmem>>, %arg12: memref<1x64x256xbf16, #tpu.memory_space<vmem>>, %arg13: memref<1x1x256xf32, #tpu.memory_space<vmem>>, %arg14: memref<1x256x64xbf16, #tpu.memory_space<vmem>>, %arg15: memref<1x1x64xf32, #tpu.memory_space<vmem>>, %arg16: memref<1x64xf32, #tpu.memory_space<vmem>>, %arg17: memref<1x64xf32, #tpu.memory_space<vmem>>, %arg18: memref<2x128x64xf32, #tpu.memory_space<vmem>>, %arg19: memref<2x128x64xf32, #tpu.memory_space<vmem>>) attributes {dimension_semantics = [#tpu.dimension_semantics<parallel>, #tpu.dimension_semantics<arbitrary>], iteration_bounds = array<i64: 1, 2>, scalar_prefetch = 0 : i64, scratch_operands = 1 : i64, tpu.core_type = #tpu.core_type<tc>, window_params = [{transform_indices = @transform_0, window_bounds = array<i64: 2, 128, 64>}, {pipeline_mode = #tpu.pipeline_mode<synchronous>, transform_indices = @transform_1, window_bounds = array<i64: 128, 128>}, {transform_indices = @transform_2, window_bounds = array<i64: 1, 1, 64>}, {transform_indices = @transform_3, window_bounds = array<i64: 1, 1, 64>}, {transform_indices = @transform_4, window_bounds = array<i64: 1, 64, 192>}, {transform_indices = @transform_5, window_bounds = array<i64: 1, 1, 192>}, {transform_indices = @transform_6, window_bounds = array<i64: 1, 64, 64>}, {transform_indices = @transform_7, window_bounds = array<i64: 1, 1, 64>}, {transform_indices = @transform_8, window_bounds = array<i64: 1, 1, 64>}, {transform_indices = @transform_9, window_bounds = array<i64: 1, 1, 64>}, {transform_indices = @transform_10, window_bounds = array<i64: 1, 64, 256>}, {transform_indices = @transform_11, window_bounds = array<i64: 1, 1, 256>}, {transform_indices = @transform_12, window_bounds = array<i64: 1, 256, 64>}, {transform_indices = @transform_13, window_bounds = array<i64: 1, 1, 64>}, {pipeline_mode = #tpu.pipeline_mode<synchronous>, transform_indices = @transform_14, window_bounds = array<i64: 1, 64>}, {pipeline_mode = #tpu.pipeline_mode<synchronous>, transform_indices = @transform_15, window_bounds = array<i64: 1, 64>}, {transform_indices = @transform_16, window_bounds = array<i64: 2, 128, 64>}]} {
    %c0_i32 = arith.constant 0 : i32
    %0 = arith.cmpi eq, %arg1, %c0_i32 : i32
    %1 = arith.extui %0 : i1 to i32
    %c0_i32_0 = arith.constant 0 : i32
    %2 = arith.cmpi ne, %1, %c0_i32_0 : i32
    scf.if %2 {
      %c0_76 = arith.constant 0 : index
      %c0_77 = arith.constant 0 : index
      %c0_78 = arith.constant 0 : index
      %190 = vector.load %arg2[%c0_76, %c0_77, %c0_78] : memref<2x128x64xf32, #tpu.memory_space<vmem>>, vector<2x128x64xf32>
      %c0_79 = arith.constant 0 : index
      %c0_80 = arith.constant 0 : index
      %c0_81 = arith.constant 0 : index
      %191 = vector.load %arg19[%c0_79, %c0_80, %c0_81] : memref<2x128x64xf32, #tpu.memory_space<vmem>>, vector<2x128x64xf32>
      tpu.vector_store %arg19[%c0_79, %c0_80, %c0_81], %190 {strides = array<i32>} : memref<2x128x64xf32, #tpu.memory_space<vmem>>, vector<2x128x64xf32>,
    } else {
    }
    %c0 = arith.constant 0 : index
    %c0_1 = arith.constant 0 : index
    %c0_2 = arith.constant 0 : index
    %3 = vector.load %arg19[%c0, %c0_1, %c0_2] : memref<2x128x64xf32, #tpu.memory_space<vmem>>, vector<2x128x64xf32>
    %4 = vector.shape_cast %3 : vector<2x128x64xf32> to vector<256x64xf32>
    %c0_3 = arith.constant 0 : index
    %c0_4 = arith.constant 0 : index
    %5 = vector.load %arg3[%c0_3, %c0_4] : memref<128x128xf32, #tpu.memory_space<vmem>>, vector<128x128xf32>
    %c0_5 = arith.constant 0 : index
    %c0_6 = arith.constant 0 : index
    %c0_7 = arith.constant 0 : index
    %6 = vector.load %arg4[%c0_5, %c0_6, %c0_7] : memref<1x1x64xf32, #tpu.memory_space<vmem>>, vector<1x1x64xf32>
    %7 = vector.shape_cast %6 : vector<1x1x64xf32> to vector<1x64xf32>
    %c0_8 = arith.constant 0 : index
    %c0_9 = arith.constant 0 : index
    %c0_10 = arith.constant 0 : index
    %8 = vector.load %arg5[%c0_8, %c0_9, %c0_10] : memref<1x1x64xf32, #tpu.memory_space<vmem>>, vector<1x1x64xf32>
    %9 = vector.shape_cast %8 : vector<1x1x64xf32> to vector<1x64xf32>
    %cst = arith.constant dense<0.000000e+00> : vector<256xf32>
    %10 = vector.multi_reduction <add>, %4, %cst [1] : vector<256x64xf32> to vector<256xf32>
    %11 = vector.shape_cast %10 : vector<256xf32> to vector<256x1xf32>
    %cst_11 = arith.constant 6.400000e+01 : f32
    %12 = vector.broadcast %cst_11 : f32 to vector<256x1xf32>
    %13 = arith.divf %11, %12 : vector<256x1xf32>
    %14 = vector.broadcast %13 : vector<256x1xf32> to vector<256x64xf32>
    %15 = arith.subf %4, %14 : vector<256x64xf32>
    %16 = arith.mulf %15, %15 : vector<256x64xf32>
    %cst_12 = arith.constant dense<0.000000e+00> : vector<256xf32>
    %17 = vector.multi_reduction <add>, %16, %cst_12 [1] : vector<256x64xf32> to vector<256xf32>
    %18 = vector.shape_cast %17 : vector<256xf32> to vector<256x1xf32>
    %cst_13 = arith.constant 6.400000e+01 : f32
    %19 = vector.broadcast %cst_13 : f32 to vector<256x1xf32>
    %20 = arith.divf %18, %19 : vector<256x1xf32>
    %21 = vector.broadcast %13 : vector<256x1xf32> to vector<256x64xf32>
    %22 = arith.subf %4, %21 : vector<256x64xf32>
    %cst_14 = arith.constant 9.99999974E-6 : f32
    %23 = vector.broadcast %cst_14 : f32 to vector<256x1xf32>
    %24 = arith.addf %20, %23 : vector<256x1xf32>
    %25 = math.rsqrt %24 : vector<256x1xf32>
    %26 = vector.broadcast %25 : vector<256x1xf32> to vector<256x64xf32>
    %27 = arith.mulf %22, %26 : vector<256x64xf32>
    %28 = vector.broadcast %7 : vector<1x64xf32> to vector<256x64xf32>
    %29 = arith.mulf %27, %28 : vector<256x64xf32>
    %30 = vector.broadcast %9 : vector<1x64xf32> to vector<256x64xf32>
    %31 = arith.addf %29, %30 : vector<256x64xf32>
    %32 = arith.truncf %31 : vector<256x64xf32> to vector<256x64xbf16>
    %c0_15 = arith.constant 0 : index
    %c0_16 = arith.constant 0 : index
    %c0_17 = arith.constant 0 : index
    %33 = vector.load %arg6[%c0_15, %c0_16, %c0_17] : memref<1x64x192xbf16, #tpu.memory_space<vmem>>, vector<1x64x192xbf16>
    %34 = vector.shape_cast %33 : vector<1x64x192xbf16> to vector<64x192xbf16>
    %cst_18 = arith.constant dense<0.000000e+00> : vector<256x192xf32>
    %35 = tpu.matmul %32, %34, %cst_18 {dimension_numbers = #tpu.dot_dimension_numbers<[1], [0], [0], [1], [0, 0, 1, 1], [], []>} : vector<256x64xbf16>, vector<64x192xbf16>, vector<256x192xf32> -> vector<256x192xf32>
    %c0_19 = arith.constant 0 : index
    %c0_20 = arith.constant 0 : index
    %c0_21 = arith.constant 0 : index
    %36 = vector.load %arg7[%c0_19, %c0_20, %c0_21] : memref<1x1x192xf32, #tpu.memory_space<vmem>>, vector<1x1x192xf32>
    %37 = vector.shape_cast %36 : vector<1x1x192xf32> to vector<1x192xf32>
    %38 = vector.broadcast %37 : vector<1x192xf32> to vector<256x192xf32>
    %39 = arith.addf %35, %38 : vector<256x192xf32>
    %40 = vector.shape_cast %39 : vector<256x192xf32> to vector<2x128x192xf32>
    %41 = vector.extract_strided_slice %40 {offsets = [0, 0, 0], sizes = [2, 128, 64], strides = [1, 1, 1]} : vector<2x128x192xf32> to vector<2x128x64xf32>
    %42 = arith.truncf %41 : vector<2x128x64xf32> to vector<2x128x64xbf16>
    %43 = vector.extract_strided_slice %40 {offsets = [0, 0, 64], sizes = [2, 128, 64], strides = [1, 1, 1]} : vector<2x128x192xf32> to vector<2x128x64xf32>
    %44 = arith.truncf %43 : vector<2x128x64xf32> to vector<2x128x64xbf16>
    %45 = vector.extract_strided_slice %40 {offsets = [0, 0, 128], sizes = [2, 128, 64], strides = [1, 1, 1]} : vector<2x128x192xf32> to vector<2x128x64xf32>
    %46 = arith.truncf %45 : vector<2x128x64xf32> to vector<2x128x64xbf16>
    %47 = vector.extract_strided_slice %42 {offsets = [0, 0, 0], sizes = [2, 128, 16], strides = [1, 1, 1]} : vector<2x128x64xbf16> to vector<2x128x16xbf16>
    %48 = vector.extract_strided_slice %44 {offsets = [0, 0, 0], sizes = [2, 128, 16], strides = [1, 1, 1]} : vector<2x128x64xbf16> to vector<2x128x16xbf16>
    "tpu.trace_start"() <{level = 10 : i32, message = "bsd,btd->bst"}> : () -> ()
    %cst_22 = arith.constant dense<0.000000e+00> : vector<2x128x128xf32>
    %49 = tpu.matmul %47, %48, %cst_22 {dimension_numbers = #tpu.dot_dimension_numbers<[2], [2], [1], [1], [0, 0, 0, 1, 1, 1], [0], [0]>} : vector<2x128x16xbf16>, vector<2x128x16xbf16>, vector<2x128x128xf32> -> vector<2x128x128xf32>
    "tpu.trace_stop"() : () -> ()
    %50 = vector.shape_cast %5 : vector<128x128xf32> to vector<1x128x128xf32>
    %51 = vector.broadcast %50 : vector<1x128x128xf32> to vector<2x128x128xf32>
    %52 = arith.addf %49, %51 : vector<2x128x128xf32>
    %cst_23 = arith.constant dense<0xFF800000> : vector<2x128xf32>
    %53 = vector.multi_reduction <maximumf>, %52, %cst_23 [2] : vector<2x128x128xf32> to vector<2x128xf32>
    %54 = vector.shape_cast %53 : vector<2x128xf32> to vector<2x128x1xf32>
    %55 = vector.broadcast %54 : vector<2x128x1xf32> to vector<2x128x128xf32>
    %56 = arith.subf %52, %55 : vector<2x128x128xf32>
    %57 = math.exp %56 : vector<2x128x128xf32>
    %cst_24 = arith.constant dense<0.000000e+00> : vector<2x128xf32>
    %58 = vector.multi_reduction <add>, %57, %cst_24 [2] : vector<2x128x128xf32> to vector<2x128xf32>
    %59 = vector.shape_cast %58 : vector<2x128xf32> to vector<2x128x1xf32>
    %60 = tpu.reciprocal %59 {approx = true} : vector<2x128x1xf32> -> vector<2x128x1xf32>
    %61 = vector.broadcast %60 : vector<2x128x1xf32> to vector<2x128x128xf32>
    %62 = arith.mulf %57, %61 : vector<2x128x128xf32>
    %63 = arith.truncf %62 : vector<2x128x128xf32> to vector<2x128x128xbf16>
    %64 = vector.extract_strided_slice %46 {offsets = [0, 0, 0], sizes = [2, 128, 16], strides = [1, 1, 1]} : vector<2x128x64xbf16> to vector<2x128x16xbf16>
    "tpu.trace_start"() <{level = 10 : i32, message = "bst,btd->bsd"}> : () -> ()
    %cst_25 = arith.constant dense<0.000000e+00> : vector<2x128x16xf32>
    %65 = tpu.matmul %63, %64, %cst_25 {dimension_numbers = #tpu.dot_dimension_numbers<[2], [1], [1], [2], [0, 0, 0, 1, 1, 2], [0], [0]>} : vector<2x128x128xbf16>, vector<2x128x16xbf16>, vector<2x128x16xf32> -> vector<2x128x16xf32>
    "tpu.trace_stop"() : () -> ()
    %66 = vector.extract_strided_slice %42 {offsets = [0, 0, 16], sizes = [2, 128, 16], strides = [1, 1, 1]} : vector<2x128x64xbf16> to vector<2x128x16xbf16>
    %67 = vector.extract_strided_slice %44 {offsets = [0, 0, 16], sizes = [2, 128, 16], strides = [1, 1, 1]} : vector<2x128x64xbf16> to vector<2x128x16xbf16>
    "tpu.trace_start"() <{level = 10 : i32, message = "bsd,btd->bst"}> : () -> ()
    %cst_26 = arith.constant dense<0.000000e+00> : vector<2x128x128xf32>
    %68 = tpu.matmul %66, %67, %cst_26 {dimension_numbers = #tpu.dot_dimension_numbers<[2], [2], [1], [1], [0, 0, 0, 1, 1, 1], [0], [0]>} : vector<2x128x16xbf16>, vector<2x128x16xbf16>, vector<2x128x128xf32> -> vector<2x128x128xf32>
    "tpu.trace_stop"() : () -> ()
    %69 = vector.shape_cast %5 : vector<128x128xf32> to vector<1x128x128xf32>
    %70 = vector.broadcast %69 : vector<1x128x128xf32> to vector<2x128x128xf32>
    %71 = arith.addf %68, %70 : vector<2x128x128xf32>
    %cst_27 = arith.constant dense<0xFF800000> : vector<2x128xf32>
    %72 = vector.multi_reduction <maximumf>, %71, %cst_27 [2] : vector<2x128x128xf32> to vector<2x128xf32>
    %73 = vector.shape_cast %72 : vector<2x128xf32> to vector<2x128x1xf32>
    %74 = vector.broadcast %73 : vector<2x128x1xf32> to vector<2x128x128xf32>
    %75 = arith.subf %71, %74 : vector<2x128x128xf32>
    %76 = math.exp %75 : vector<2x128x128xf32>
    %cst_28 = arith.constant dense<0.000000e+00> : vector<2x128xf32>
    %77 = vector.multi_reduction <add>, %76, %cst_28 [2] : vector<2x128x128xf32> to vector<2x128xf32>
    %78 = vector.shape_cast %77 : vector<2x128xf32> to vector<2x128x1xf32>
    %79 = tpu.reciprocal %78 {approx = true} : vector<2x128x1xf32> -> vector<2x128x1xf32>
    %80 = vector.broadcast %79 : vector<2x128x1xf32> to vector<2x128x128xf32>
    %81 = arith.mulf %76, %80 : vector<2x128x128xf32>
    %82 = arith.truncf %81 : vector<2x128x128xf32> to vector<2x128x128xbf16>
    %83 = vector.extract_strided_slice %46 {offsets = [0, 0, 16], sizes = [2, 128, 16], strides = [1, 1, 1]} : vector<2x128x64xbf16> to vector<2x128x16xbf16>
    "tpu.trace_start"() <{level = 10 : i32, message = "bst,btd->bsd"}> : () -> ()
    %cst_29 = arith.constant dense<0.000000e+00> : vector<2x128x16xf32>
    %84 = tpu.matmul %82, %83, %cst_29 {dimension_numbers = #tpu.dot_dimension_numbers<[2], [1], [1], [2], [0, 0, 0, 1, 1, 2], [0], [0]>} : vector<2x128x128xbf16>, vector<2x128x16xbf16>, vector<2x128x16xf32> -> vector<2x128x16xf32>
    "tpu.trace_stop"() : () -> ()
    %85 = vector.extract_strided_slice %42 {offsets = [0, 0, 32], sizes = [2, 128, 16], strides = [1, 1, 1]} : vector<2x128x64xbf16> to vector<2x128x16xbf16>
    %86 = vector.extract_strided_slice %44 {offsets = [0, 0, 32], sizes = [2, 128, 16], strides = [1, 1, 1]} : vector<2x128x64xbf16> to vector<2x128x16xbf16>
    "tpu.trace_start"() <{level = 10 : i32, message = "bsd,btd->bst"}> : () -> ()
    %cst_30 = arith.constant dense<0.000000e+00> : vector<2x128x128xf32>
    %87 = tpu.matmul %85, %86, %cst_30 {dimension_numbers = #tpu.dot_dimension_numbers<[2], [2], [1], [1], [0, 0, 0, 1, 1, 1], [0], [0]>} : vector<2x128x16xbf16>, vector<2x128x16xbf16>, vector<2x128x128xf32> -> vector<2x128x128xf32>
    "tpu.trace_stop"() : () -> ()
    %88 = vector.shape_cast %5 : vector<128x128xf32> to vector<1x128x128xf32>
    %89 = vector.broadcast %88 : vector<1x128x128xf32> to vector<2x128x128xf32>
    %90 = arith.addf %87, %89 : vector<2x128x128xf32>
    %cst_31 = arith.constant dense<0xFF800000> : vector<2x128xf32>
    %91 = vector.multi_reduction <maximumf>, %90, %cst_31 [2] : vector<2x128x128xf32> to vector<2x128xf32>
    %92 = vector.shape_cast %91 : vector<2x128xf32> to vector<2x128x1xf32>
    %93 = vector.broadcast %92 : vector<2x128x1xf32> to vector<2x128x128xf32>
    %94 = arith.subf %90, %93 : vector<2x128x128xf32>
    %95 = math.exp %94 : vector<2x128x128xf32>
    %cst_32 = arith.constant dense<0.000000e+00> : vector<2x128xf32>
    %96 = vector.multi_reduction <add>, %95, %cst_32 [2] : vector<2x128x128xf32> to vector<2x128xf32>
    %97 = vector.shape_cast %96 : vector<2x128xf32> to vector<2x128x1xf32>
    %98 = tpu.reciprocal %97 {approx = true} : vector<2x128x1xf32> -> vector<2x128x1xf32>
    %99 = vector.broadcast %98 : vector<2x128x1xf32> to vector<2x128x128xf32>
    %100 = arith.mulf %95, %99 : vector<2x128x128xf32>
    %101 = arith.truncf %100 : vector<2x128x128xf32> to vector<2x128x128xbf16>
    %102 = vector.extract_strided_slice %46 {offsets = [0, 0, 32], sizes = [2, 128, 16], strides = [1, 1, 1]} : vector<2x128x64xbf16> to vector<2x128x16xbf16>
    "tpu.trace_start"() <{level = 10 : i32, message = "bst,btd->bsd"}> : () -> ()
    %cst_33 = arith.constant dense<0.000000e+00> : vector<2x128x16xf32>
    %103 = tpu.matmul %101, %102, %cst_33 {dimension_numbers = #tpu.dot_dimension_numbers<[2], [1], [1], [2], [0, 0, 0, 1, 1, 2], [0], [0]>} : vector<2x128x128xbf16>, vector<2x128x16xbf16>, vector<2x128x16xf32> -> vector<2x128x16xf32>
    "tpu.trace_stop"() : () -> ()
    %104 = vector.extract_strided_slice %42 {offsets = [0, 0, 48], sizes = [2, 128, 16], strides = [1, 1, 1]} : vector<2x128x64xbf16> to vector<2x128x16xbf16>
    %105 = vector.extract_strided_slice %44 {offsets = [0, 0, 48], sizes = [2, 128, 16], strides = [1, 1, 1]} : vector<2x128x64xbf16> to vector<2x128x16xbf16>
    "tpu.trace_start"() <{level = 10 : i32, message = "bsd,btd->bst"}> : () -> ()
    %cst_34 = arith.constant dense<0.000000e+00> : vector<2x128x128xf32>
    %106 = tpu.matmul %104, %105, %cst_34 {dimension_numbers = #tpu.dot_dimension_numbers<[2], [2], [1], [1], [0, 0, 0, 1, 1, 1], [0], [0]>} : vector<2x128x16xbf16>, vector<2x128x16xbf16>, vector<2x128x128xf32> -> vector<2x128x128xf32>
    "tpu.trace_stop"() : () -> ()
    %107 = vector.shape_cast %5 : vector<128x128xf32> to vector<1x128x128xf32>
    %108 = vector.broadcast %107 : vector<1x128x128xf32> to vector<2x128x128xf32>
    %109 = arith.addf %106, %108 : vector<2x128x128xf32>
    %cst_35 = arith.constant dense<0xFF800000> : vector<2x128xf32>
    %110 = vector.multi_reduction <maximumf>, %109, %cst_35 [2] : vector<2x128x128xf32> to vector<2x128xf32>
    %111 = vector.shape_cast %110 : vector<2x128xf32> to vector<2x128x1xf32>
    %112 = vector.broadcast %111 : vector<2x128x1xf32> to vector<2x128x128xf32>
    %113 = arith.subf %109, %112 : vector<2x128x128xf32>
    %114 = math.exp %113 : vector<2x128x128xf32>
    %cst_36 = arith.constant dense<0.000000e+00> : vector<2x128xf32>
    %115 = vector.multi_reduction <add>, %114, %cst_36 [2] : vector<2x128x128xf32> to vector<2x128xf32>
    %116 = vector.shape_cast %115 : vector<2x128xf32> to vector<2x128x1xf32>
    %117 = tpu.reciprocal %116 {approx = true} : vector<2x128x1xf32> -> vector<2x128x1xf32>
    %118 = vector.broadcast %117 : vector<2x128x1xf32> to vector<2x128x128xf32>
    %119 = arith.mulf %114, %118 : vector<2x128x128xf32>
    %120 = arith.truncf %119 : vector<2x128x128xf32> to vector<2x128x128xbf16>
    %121 = vector.extract_strided_slice %46 {offsets = [0, 0, 48], sizes = [2, 128, 16], strides = [1, 1, 1]} : vector<2x128x64xbf16> to vector<2x128x16xbf16>
    "tpu.trace_start"() <{level = 10 : i32, message = "bst,btd->bsd"}> : () -> ()
    %cst_37 = arith.constant dense<0.000000e+00> : vector<2x128x16xf32>
    %122 = tpu.matmul %120, %121, %cst_37 {dimension_numbers = #tpu.dot_dimension_numbers<[2], [1], [1], [2], [0, 0, 0, 1, 1, 2], [0], [0]>} : vector<2x128x128xbf16>, vector<2x128x16xbf16>, vector<2x128x16xf32> -> vector<2x128x16xf32>
    "tpu.trace_stop"() : () -> ()
    %123 = tpu.concatenate %65, %84, %103, %122 in 2 : vector<2x128x16xf32>, vector<2x128x16xf32>, vector<2x128x16xf32>, vector<2x128x16xf32> -> vector<2x128x64xf32>
    %124 = arith.truncf %123 : vector<2x128x64xf32> to vector<2x128x64xbf16>
    %125 = vector.shape_cast %124 : vector<2x128x64xbf16> to vector<256x64xbf16>
    %c0_38 = arith.constant 0 : index
    %c0_39 = arith.constant 0 : index
    %c0_40 = arith.constant 0 : index
    %126 = vector.load %arg8[%c0_38, %c0_39, %c0_40] : memref<1x64x64xbf16, #tpu.memory_space<vmem>>, vector<1x64x64xbf16>
    %127 = vector.shape_cast %126 : vector<1x64x64xbf16> to vector<64x64xbf16>
    %cst_41 = arith.constant dense<0.000000e+00> : vector<256x64xf32>
    %128 = tpu.matmul %125, %127, %cst_41 {dimension_numbers = #tpu.dot_dimension_numbers<[1], [0], [0], [1], [0, 0, 1, 1], [], []>} : vector<256x64xbf16>, vector<64x64xbf16>, vector<256x64xf32> -> vector<256x64xf32>
    %129 = arith.addf %4, %128 : vector<256x64xf32>
    %c0_42 = arith.constant 0 : index
    %c0_43 = arith.constant 0 : index
    %c0_44 = arith.constant 0 : index
    %130 = vector.load %arg9[%c0_42, %c0_43, %c0_44] : memref<1x1x64xf32, #tpu.memory_space<vmem>>, vector<1x1x64xf32>
    %131 = vector.shape_cast %130 : vector<1x1x64xf32> to vector<1x64xf32>
    %132 = vector.broadcast %131 : vector<1x64xf32> to vector<256x64xf32>
    %133 = arith.addf %129, %132 : vector<256x64xf32>
    %c0_45 = arith.constant 0 : index
    %c0_46 = arith.constant 0 : index
    %c0_47 = arith.constant 0 : index
    %134 = vector.load %arg10[%c0_45, %c0_46, %c0_47] : memref<1x1x64xf32, #tpu.memory_space<vmem>>, vector<1x1x64xf32>
    %135 = vector.shape_cast %134 : vector<1x1x64xf32> to vector<1x64xf32>
    %c0_48 = arith.constant 0 : index
    %c0_49 = arith.constant 0 : index
    %c0_50 = arith.constant 0 : index
    %136 = vector.load %arg11[%c0_48, %c0_49, %c0_50] : memref<1x1x64xf32, #tpu.memory_space<vmem>>, vector<1x1x64xf32>
    %137 = vector.shape_cast %136 : vector<1x1x64xf32> to vector<1x64xf32>
    %cst_51 = arith.constant dense<0.000000e+00> : vector<256xf32>
    %138 = vector.multi_reduction <add>, %133, %cst_51 [1] : vector<256x64xf32> to vector<256xf32>
    %139 = vector.shape_cast %138 : vector<256xf32> to vector<256x1xf32>
    %cst_52 = arith.constant 6.400000e+01 : f32
    %140 = vector.broadcast %cst_52 : f32 to vector<256x1xf32>
    %141 = arith.divf %139, %140 : vector<256x1xf32>
    %142 = vector.broadcast %141 : vector<256x1xf32> to vector<256x64xf32>
    %143 = arith.subf %133, %142 : vector<256x64xf32>
    %144 = arith.mulf %143, %143 : vector<256x64xf32>
    %cst_53 = arith.constant dense<0.000000e+00> : vector<256xf32>
    %145 = vector.multi_reduction <add>, %144, %cst_53 [1] : vector<256x64xf32> to vector<256xf32>
    %146 = vector.shape_cast %145 : vector<256xf32> to vector<256x1xf32>
    %cst_54 = arith.constant 6.400000e+01 : f32
    %147 = vector.broadcast %cst_54 : f32 to vector<256x1xf32>
    %148 = arith.divf %146, %147 : vector<256x1xf32>
    %149 = vector.broadcast %141 : vector<256x1xf32> to vector<256x64xf32>
    %150 = arith.subf %133, %149 : vector<256x64xf32>
    %cst_55 = arith.constant 9.99999974E-6 : f32
    %151 = vector.broadcast %cst_55 : f32 to vector<256x1xf32>
    %152 = arith.addf %148, %151 : vector<256x1xf32>
    %153 = math.rsqrt %152 : vector<256x1xf32>
    %154 = vector.broadcast %153 : vector<256x1xf32> to vector<256x64xf32>
    %155 = arith.mulf %150, %154 : vector<256x64xf32>
    %156 = vector.broadcast %135 : vector<1x64xf32> to vector<256x64xf32>
    %157 = arith.mulf %155, %156 : vector<256x64xf32>
    %158 = vector.broadcast %137 : vector<1x64xf32> to vector<256x64xf32>
    %159 = arith.addf %157, %158 : vector<256x64xf32>
    %160 = arith.truncf %159 : vector<256x64xf32> to vector<256x64xbf16>
    %c0_56 = arith.constant 0 : index
    %c0_57 = arith.constant 0 : index
    %c0_58 = arith.constant 0 : index
    %161 = vector.load %arg12[%c0_56, %c0_57, %c0_58] : memref<1x64x256xbf16, #tpu.memory_space<vmem>>, vector<1x64x256xbf16>
    %162 = vector.shape_cast %161 : vector<1x64x256xbf16> to vector<64x256xbf16>
    %cst_59 = arith.constant dense<0.000000e+00> : vector<256x256xf32>
    %163 = tpu.matmul %160, %162, %cst_59 {dimension_numbers = #tpu.dot_dimension_numbers<[1], [0], [0], [1], [0, 0, 1, 1], [], []>} : vector<256x64xbf16>, vector<64x256xbf16>, vector<256x256xf32> -> vector<256x256xf32>
    %c0_60 = arith.constant 0 : index
    %c0_61 = arith.constant 0 : index
    %c0_62 = arith.constant 0 : index
    %164 = vector.load %arg13[%c0_60, %c0_61, %c0_62] : memref<1x1x256xf32, #tpu.memory_space<vmem>>, vector<1x1x256xf32>
    %165 = vector.shape_cast %164 : vector<1x1x256xf32> to vector<1x256xf32>
    %166 = vector.broadcast %165 : vector<1x256xf32> to vector<256x256xf32>
    %167 = arith.addf %163, %166 : vector<256x256xf32>
    %cst_63 = arith.constant 1.702000e+00 : f32
    %168 = vector.broadcast %cst_63 : f32 to vector<256x256xf32>
    %169 = arith.mulf %168, %167 : vector<256x256xf32>
    %170 = arith.negf %169 : vector<256x256xf32>
    %171 = math.exp %170 : vector<256x256xf32>
    %cst_64 = arith.constant 1.000000e+00 : f32
    %172 = vector.broadcast %cst_64 : f32 to vector<256x256xf32>
    %173 = arith.addf %172, %171 : vector<256x256xf32>
    %174 = arith.divf %172, %173 : vector<256x256xf32>
    %175 = arith.mulf %167, %174 : vector<256x256xf32>
    %176 = arith.truncf %175 : vector<256x256xf32> to vector<256x256xbf16>
    %c0_65 = arith.constant 0 : index
    %c0_66 = arith.constant 0 : index
    %c0_67 = arith.constant 0 : index
    %177 = vector.load %arg14[%c0_65, %c0_66, %c0_67] : memref<1x256x64xbf16, #tpu.memory_space<vmem>>, vector<1x256x64xbf16>
    %178 = vector.shape_cast %177 : vector<1x256x64xbf16> to vector<256x64xbf16>
    %cst_68 = arith.constant dense<0.000000e+00> : vector<256x64xf32>
    %179 = tpu.matmul %176, %178, %cst_68 {dimension_numbers = #tpu.dot_dimension_numbers<[1], [0], [0], [1], [0, 0, 1, 1], [], []>} : vector<256x256xbf16>, vector<256x64xbf16>, vector<256x64xf32> -> vector<256x64xf32>
    %180 = arith.addf %133, %179 : vector<256x64xf32>
    %c0_69 = arith.constant 0 : index
    %c0_70 = arith.constant 0 : index
    %c0_71 = arith.constant 0 : index
    %181 = vector.load %arg15[%c0_69, %c0_70, %c0_71] : memref<1x1x64xf32, #tpu.memory_space<vmem>>, vector<1x1x64xf32>
    %182 = vector.shape_cast %181 : vector<1x1x64xf32> to vector<1x64xf32>
    %183 = vector.broadcast %182 : vector<1x64xf32> to vector<256x64xf32>
    %184 = arith.addf %180, %183 : vector<256x64xf32>
    %185 = vector.shape_cast %184 : vector<256x64xf32> to vector<2x128x64xf32>
    %c0_72 = arith.constant 0 : index
    %c0_73 = arith.constant 0 : index
    %c0_74 = arith.constant 0 : index
    %186 = vector.load %arg19[%c0_72, %c0_73, %c0_74] : memref<2x128x64xf32, #tpu.memory_space<vmem>>, vector<2x128x64xf32>
    tpu.vector_store %arg19[%c0_72, %c0_73, %c0_74], %185 {strides = array<i32>} : memref<2x128x64xf32, #tpu.memory_space<vmem>>, vector<2x128x64xf32>,
    %c1_i32 = arith.constant 1 : i32
    %187 = arith.cmpi eq, %arg1, %c1_i32 : i32
    %188 = arith.extui %187 : i1 to i32
    %c0_i32_75 = arith.constant 0 : i32
    %189 = arith.cmpi ne, %188, %c0_i32_75 : i32
    scf.if %189 {
      %c0_76 = arith.constant 0 : index
      %c0_77 = arith.constant 0 : index
      %190 = vector.load %arg16[%c0_76, %c0_77] : memref<1x64xf32, #tpu.memory_space<vmem>>, vector<1x64xf32>
      %c0_78 = arith.constant 0 : index
      %c0_79 = arith.constant 0 : index
      %191 = vector.load %arg17[%c0_78, %c0_79] : memref<1x64xf32, #tpu.memory_space<vmem>>, vector<1x64xf32>
      %cst_80 = arith.constant dense<0.000000e+00> : vector<256xf32>
      %192 = vector.multi_reduction <add>, %184, %cst_80 [1] : vector<256x64xf32> to vector<256xf32>
      %193 = vector.shape_cast %192 : vector<256xf32> to vector<256x1xf32>
      %cst_81 = arith.constant 6.400000e+01 : f32
      %194 = vector.broadcast %cst_81 : f32 to vector<256x1xf32>
      %195 = arith.divf %193, %194 : vector<256x1xf32>
      %196 = vector.broadcast %195 : vector<256x1xf32> to vector<256x64xf32>
      %197 = arith.subf %184, %196 : vector<256x64xf32>
      %198 = arith.mulf %197, %197 : vector<256x64xf32>
      %cst_82 = arith.constant dense<0.000000e+00> : vector<256xf32>
      %199 = vector.multi_reduction <add>, %198, %cst_82 [1] : vector<256x64xf32> to vector<256xf32>
      %200 = vector.shape_cast %199 : vector<256xf32> to vector<256x1xf32>
      %cst_83 = arith.constant 6.400000e+01 : f32
      %201 = vector.broadcast %cst_83 : f32 to vector<256x1xf32>
      %202 = arith.divf %200, %201 : vector<256x1xf32>
      %203 = vector.broadcast %195 : vector<256x1xf32> to vector<256x64xf32>
      %204 = arith.subf %184, %203 : vector<256x64xf32>
      %cst_84 = arith.constant 9.99999974E-6 : f32
      %205 = vector.broadcast %cst_84 : f32 to vector<256x1xf32>
      %206 = arith.addf %202, %205 : vector<256x1xf32>
      %207 = math.rsqrt %206 : vector<256x1xf32>
      %208 = vector.broadcast %207 : vector<256x1xf32> to vector<256x64xf32>
      %209 = arith.mulf %204, %208 : vector<256x64xf32>
      %210 = vector.broadcast %190 : vector<1x64xf32> to vector<256x64xf32>
      %211 = arith.mulf %209, %210 : vector<256x64xf32>
      %212 = vector.broadcast %191 : vector<1x64xf32> to vector<256x64xf32>
      %213 = arith.addf %211, %212 : vector<256x64xf32>
      %214 = vector.shape_cast %213 : vector<256x64xf32> to vector<2x128x64xf32>
      %c0_85 = arith.constant 0 : index
      %c0_86 = arith.constant 0 : index
      %c0_87 = arith.constant 0 : index
      %215 = vector.load %arg18[%c0_85, %c0_86, %c0_87] : memref<2x128x64xf32, #tpu.memory_space<vmem>>, vector<2x128x64xf32>
      tpu.vector_store %arg18[%c0_85, %c0_86, %c0_87], %214 {strides = array<i32>} : memref<2x128x64xf32, #tpu.memory_space<vmem>>, vector<2x128x64xf32>,
    } else {
    }
    return
  }
  func.func @transform_0(%arg0: i32, %arg1: i32) -> (i32, i32, i32) {
    %c0_i32 = arith.constant 0 : i32
    %c0_i32_0 = arith.constant 0 : i32
    %c0_i32_1 = arith.constant 0 : i32
    return %arg0, %c0_i32, %c0_i32_0 : i32, i32, i32
  }
  func.func @transform_1(%arg0: i32, %arg1: i32) -> (i32, i32) {
    %c0_i32 = arith.constant 0 : i32
    %c0_i32_0 = arith.constant 0 : i32
    %c0_i32_1 = arith.constant 0 : i32
    return %c0_i32, %c0_i32_0 : i32, i32
  }
  func.func @transform_2(%arg0: i32, %arg1: i32) -> (i32, i32, i32) {
    %c0_i32 = arith.constant 0 : i32
    %c0_i32_0 = arith.constant 0 : i32
    %c0_i32_1 = arith.constant 0 : i32
    return %arg1, %c0_i32, %c0_i32_0 : i32, i32, i32
  }
  func.func @transform_3(%arg0: i32, %arg1: i32) -> (i32, i32, i32) {
    %c0_i32 = arith.constant 0 : i32
    %c0_i32_0 = arith.constant 0 : i32
    %c0_i32_1 = arith.constant 0 : i32
    return %arg1, %c0_i32, %c0_i32_0 : i32, i32, i32
  }
  func.func @transform_4(%arg0: i32, %arg1: i32) -> (i32, i32, i32) {
    %c0_i32 = arith.constant 0 : i32
    %c0_i32_0 = arith.constant 0 : i32
    %c0_i32_1 = arith.constant 0 : i32
    return %arg1, %c0_i32, %c0_i32_0 : i32, i32, i32
  }
  func.func @transform_5(%arg0: i32, %arg1: i32) -> (i32, i32, i32) {
    %c0_i32 = arith.constant 0 : i32
    %c0_i32_0 = arith.constant 0 : i32
    %c0_i32_1 = arith.constant 0 : i32
    return %arg1, %c0_i32, %c0_i32_0 : i32, i32, i32
  }
  func.func @transform_6(%arg0: i32, %arg1: i32) -> (i32, i32, i32) {
    %c0_i32 = arith.constant 0 : i32
    %c0_i32_0 = arith.constant 0 : i32
    %c0_i32_1 = arith.constant 0 : i32
    return %arg1, %c0_i32, %c0_i32_0 : i32, i32, i32
  }
  func.func @transform_7(%arg0: i32, %arg1: i32) -> (i32, i32, i32) {
    %c0_i32 = arith.constant 0 : i32
    %c0_i32_0 = arith.constant 0 : i32
    %c0_i32_1 = arith.constant 0 : i32
    return %arg1, %c0_i32, %c0_i32_0 : i32, i32, i32
  }
  func.func @transform_8(%arg0: i32, %arg1: i32) -> (i32, i32, i32) {
    %c0_i32 = arith.constant 0 : i32
    %c0_i32_0 = arith.constant 0 : i32
    %c0_i32_1 = arith.constant 0 : i32
    return %arg1, %c0_i32, %c0_i32_0 : i32, i32, i32
  }
  func.func @transform_9(%arg0: i32, %arg1: i32) -> (i32, i32, i32) {
    %c0_i32 = arith.constant 0 : i32
    %c0_i32_0 = arith.constant 0 : i32
    %c0_i32_1 = arith.constant 0 : i32
    return %arg1, %c0_i32, %c0_i32_0 : i32, i32, i32
  }
  func.func @transform_10(%arg0: i32, %arg1: i32) -> (i32, i32, i32) {
    %c0_i32 = arith.constant 0 : i32
    %c0_i32_0 = arith.constant 0 : i32
    %c0_i32_1 = arith.constant 0 : i32
    return %arg1, %c0_i32, %c0_i32_0 : i32, i32, i32
  }
  func.func @transform_11(%arg0: i32, %arg1: i32) -> (i32, i32, i32) {
    %c0_i32 = arith.constant 0 : i32
    %c0_i32_0 = arith.constant 0 : i32
    %c0_i32_1 = arith.constant 0 : i32
    return %arg1, %c0_i32, %c0_i32_0 : i32, i32, i32
  }
  func.func @transform_12(%arg0: i32, %arg1: i32) -> (i32, i32, i32) {
    %c0_i32 = arith.constant 0 : i32
    %c0_i32_0 = arith.constant 0 : i32
    %c0_i32_1 = arith.constant 0 : i32
    return %arg1, %c0_i32, %c0_i32_0 : i32, i32, i32
  }
  func.func @transform_13(%arg0: i32, %arg1: i32) -> (i32, i32, i32) {
    %c0_i32 = arith.constant 0 : i32
    %c0_i32_0 = arith.constant 0 : i32
    %c0_i32_1 = arith.constant 0 : i32
    return %arg1, %c0_i32, %c0_i32_0 : i32, i32, i32
  }
  func.func @transform_14(%arg0: i32, %arg1: i32) -> (i32, i32) {
    %c0_i32 = arith.constant 0 : i32
    %c0_i32_0 = arith.constant 0 : i32
    %c0_i32_1 = arith.constant 0 : i32
    return %c0_i32, %c0_i32_0 : i32, i32
  }
  func.func @transform_15(%arg0: i32, %arg1: i32) -> (i32, i32) {
    %c0_i32 = arith.constant 0 : i32
    %c0_i32_0 = arith.constant 0 : i32
    %c0_i32_1 = arith.constant 0 : i32
    return %c0_i32, %c0_i32_0 : i32, i32
  }
  func.func @transform_16(%arg0: i32, %arg1: i32) -> (i32, i32, i32) {
    %c0_i32 = arith.constant 0 : i32
    %c0_i32_0 = arith.constant 0 : i32
    %c0_i32_1 = arith.constant 0 : i32
    return %arg0, %c0_i32, %c0_i32_0 : i32, i32, i32
  }
}

</mosaic_0001>

<bundles_post_ra>
// kernel: tpu_custom_call.1
= control target key start
LH: loop header
LB: loop body
LE: loop exit
PB: predicated region body
PF: predicated region fallthrough
CT: control target
= control target key end

     0   :  { %s11266_s21 = smov 0   ;;  %s11268_s22 = smov 0   ;;  %s16495_s0 = inlined_call_operand.vmem [shape: f32[2,128,64], index: 0, kind: input, shape index: {}]   ;;  %s16496_s1 = inlined_call_operand.vmem [shape: f32[128,128], index: 1, kind: input, shape index: {}]   ;;  %s16497_s2 = inlined_call_operand.vmem [shape: f32[2,1,64], index: 2, kind: input, shape index: {}]   ;;  %s16498_s3 = inlined_call_operand.vmem [shape: f32[2,1,64], index: 3, kind: input, shape index: {}]   ;;  %s16499_s4 = inlined_call_operand.vmem [shape: bf16[2,64,192], index: 4, kind: input, shape index: {}]   ;;  %s16500_s5 = inlined_call_operand.vmem [shape: f32[2,1,192], index: 5, kind: input, shape index: {}]   ;;  %s16501_s6 = inlined_call_operand.vmem [shape: bf16[2,64,64], index: 6, kind: input, shape index: {}]   ;;  %s16502_s7 = inlined_call_operand.vmem [shape: f32[2,1,64], index: 7, kind: input, shape index: {}]   ;;  %s16503_s8 = inlined_call_operand.vmem [shape: f32[2,1,64], index: 8, kind: input, shape index: {}]   ;;  %s16504_s9 = inlined_call_operand.vmem [shape: f32[2,1,64], index: 9, kind: input, shape index: {}]   ;;  %s16505_s10 = inlined_call_operand.vmem [shape: bf16[2,64,256], index: 10, kind: input, shape index: {}]   ;;  %s16506_s11 = inlined_call_operand.vmem [shape: f32[2,1,256], index: 11, kind: input, shape index: {}]   ;;  %s16507_s12 = inlined_call_operand.vmem [shape: bf16[2,256,64], index: 12, kind: input, shape index: {}]   ;;  %s16508_s13 = inlined_call_operand.vmem [shape: f32[2,1,64], index: 13, kind: input, shape index: {}]   ;;  %s16509_s14 = inlined_call_operand.vmem [shape: f32[1,64], index: 14, kind: input, shape index: {}]   ;;  %s16510_s15 = inlined_call_operand.vmem [shape: f32[1,64], index: 15, kind: input, shape index: {}]   ;;  %s16511_s16 = inlined_call_operand.vmem [shape: f32[2,128,64], index: 16, kind: output, shape index: {}]  }
   0x1   :  { %16650 = sst [smem:[#allocation97_spill]] %s16495_s0  ;;  %s11270_s23 = smov 0  }
   0x2   :  { %16651 = sst [smem:[#allocation98_spill]] %s16496_s1 }
   0x3   :  { %16652 = sst [smem:[#allocation99_spill]] %s16499_s4 }
   0x4   :  { %16653 = sst [smem:[#allocation100_spill]] %s16500_s5 }
   0x5   :  { %16654 = sst [smem:[#allocation101_spill]] %s16509_s14 }
   0x6   :  { %16655 = sst [smem:[#allocation102_spill]] %s16510_s15 }
   0x7   :  { %16656 = sst [smem:[#allocation103_spill]] %s16511_s16 }
   0x8 LB: > { %16657 = sst [smem:[#allocation3_spill]] %s11167_s22  ;;  %s35_s24 = sadd.s32 1, %s11167_s22  ;;  %s11171_s23 = sphi %s11270_s23, %s26_s23   ;;  %s11167_s22 = sphi %s11268_s22, %s17048_s22   ;;  %s11163_s21 = sphi %s11266_s21, %s17047_s21  }
   0x9   : > { %16658 = sst [smem:[#allocation4_spill]] %s11171_s23  ;;  %p8540_p0 = scmp.ge.s32.totalorder %s11171_s23, 1 }
   0xa   : > { %p36_p1 = scmp.ge.s32.totalorder %s35_s24, 2  ;;  %p582_p2 = scmp.lt.s32.totalorder %s11171_s23, 3 }
   0xc   : > { %s17050_s24 = smov (%p36_p1, %s35_s24), 0  ;;  %p583_p3 = pnand %p8540_p0, %p582_p2 }
   0xd   : > { %16659 = sst [smem:[#allocation5_spill]] %s17050_s24 }
   0xe   : > { %586 = sbr.rel (%p583_p3) target bundleno = 5097 (0x13e9), region = 84 }
  0x13   : > { %p687_p4 = scmp.lt.s32.totalorder %s11163_s21, 1  ;;  %s16660_s4 = sld [smem:[#allocation99_spill]] }
  0x14   : > { %s16661_s5 = sld [smem:[#allocation100_spill]]  ;;  %p8551_p5 = scmp.ne.s32.totalorder %s11163_s21, 0 }
  0x15   : > { %s11288_s25 = scalar_select %p687_p4, %s11163_s21, 1 }
  0x16   : > { %s16663_s20 = sld [smem:[#allocation97_spill]] (!%p8551_p5) }
  0x17   : > { %s8777_s17 = sshll.u32 %s11288_s25, 6  ;;  %s8543_s18 = sshll.u32 %s11288_s25, 1 }
  0x18   : > { %s8778_s23 = sshll.u32 %s11288_s25, 5  ;;  %s715_s24 = scalar_lea.vmem %s16504_s9, %s11288_s25 }
  0x19   : > { %s11303_s26 = scalar_lea.vmem %s16660_s4, %s8777_s17  ;;  %s11318_s30 = scalar_lea.vmem %s16501_s6, %s8778_s23 }
  0x1a   : > { %s11308_s22 = scalar_lea.vmem %s16661_s5, %s8543_s18  ;;  %s11336_s28 = scalar_lea.vmem %s16506_s11, %s8543_s18 }
  0x1b   : > { %16662 = sst [smem:[#allocation6_spill]] %s11308_s22  ;;  %s11331_s22 = scalar_lea.vmem %s16505_s10, %s8777_s17 }
  0x1c   : > { %s8780_s14 = sshll.u32 %s11288_s25, 7  ;;  %s732_s4 = scalar_lea.vmem %s16508_s13, %s11288_s25 }
  0x1d   : > { %s11342_s1 = scalar_lea.vmem %s16507_s12, %s8780_s14  ;;  %744 = sbr.rel (%p8551_p5) target bundleno = 51 (0x33), region = 88 }
  0x22   : > { %v745_v0 = vld [vmem:[%s16663_s20] sm:$0xff]  ;;  %vm777_vm0 = vcmask 523264   ;;  %v746_v1 = vld [vmem:[%s16663_s20 + $0x8] sm:$0xff]  ;;  %v747_v2 = vld [vmem:[%s16663_s20 + $0x10] sm:$0xff] }
  0x23   : > { %778 = vst.msk [vmem:[#allocation2] sm:$0xff] %vm777_vm0, %v745_v0  ;;  %779 = vst.msk [vmem:[#allocation2 + $0x8] sm:$0xff] %vm777_vm0, %v746_v1  ;;  %v748_v3 = vld [vmem:[%s16663_s20 + $0x18] sm:$0xff]  ;;  %v749_v4 = vld [vmem:[%s16663_s20 + $0x20] sm:$0xff] }
  0x24   : > { %780 = vst.msk [vmem:[#allocation2 + $0x10] sm:$0xff] %vm777_vm0, %v747_v2  ;;  %v750_v5 = vld [vmem:[%s16663_s20 + $0x28] sm:$0xff]  ;;  %781 = vst.msk [vmem:[#allocation2 + $0x18] sm:$0xff] %vm777_vm0, %v748_v3  ;;  %v751_v6 = vld [vmem:[%s16663_s20 + $0x30] sm:$0xff] }
  0x25   : > { %782 = vst.msk [vmem:[#allocation2 + $0x20] sm:$0xff] %vm777_vm0, %v749_v4  ;;  %783 = vst.msk [vmem:[#allocation2 + $0x28] sm:$0xff] %vm777_vm0, %v750_v5  ;;  %v752_v7 = vld [vmem:[%s16663_s20 + $0x38] sm:$0xff]  ;;  %v753_v8 = vld [vmem:[%s16663_s20 + $0x40] sm:$0xff] }
  0x26   : > { %784 = vst.msk [vmem:[#allocation2 + $0x30] sm:$0xff] %vm777_vm0, %v751_v6  ;;  %785 = vst.msk [vmem:[#allocation2 + $0x38] sm:$0xff] %vm777_vm0, %v752_v7  ;;  %v754_v9 = vld [vmem:[%s16663_s20 + $0x48] sm:$0xff]  ;;  %v755_v10 = vld [vmem:[%s16663_s20 + $0x50] sm:$0xff] }
  0x27   : > { %786 = vst.msk [vmem:[#allocation2 + $0x40] sm:$0xff] %vm777_vm0, %v753_v8  ;;  %v756_v11 = vld [vmem:[%s16663_s20 + $0x58] sm:$0xff]  ;;  %787 = vst.msk [vmem:[#allocation2 + $0x48] sm:$0xff] %vm777_vm0, %v754_v9  ;;  %v757_v12 = vld [vmem:[%s16663_s20 + $0x60] sm:$0xff] }
  0x28   : > { %788 = vst.msk [vmem:[#allocation2 + $0x50] sm:$0xff] %vm777_vm0, %v755_v10  ;;  %789 = vst.msk [vmem:[#allocation2 + $0x58] sm:$0xff] %vm777_vm0, %v756_v11  ;;  %v758_v13 = vld [vmem:[%s16663_s20 + $0x68] sm:$0xff]  ;;  %v759_v14 = vld [vmem:[%s16663_s20 + $0x70] sm:$0xff] }
  0x29   : > { %790 = vst.msk [vmem:[#allocation2 + $0x60] sm:$0xff] %vm777_vm0, %v757_v12  ;;  %791 = vst.msk [vmem:[#allocation2 + $0x68] sm:$0xff] %vm777_vm0, %v758_v13  ;;  %v760_v15 = vld [vmem:[%s16663_s20 + $0x78] sm:$0xff]  ;;  %v761_v16 = vld [vmem:[%s16663_s20 + $0x80] sm:$0xff] }
  0x2a   : > { %792 = vst.msk [vmem:[#allocation2 + $0x70] sm:$0xff] %vm777_vm0, %v759_v14  ;;  %v762_v17 = vld [vmem:[%s16663_s20 + $0x88] sm:$0xff]  ;;  %793 = vst.msk [vmem:[#allocation2 + $0x78] sm:$0xff] %vm777_vm0, %v760_v15  ;;  %v763_v18 = vld [vmem:[%s16663_s20 + $0x90] sm:$0xff] }
  0x2b   : > { %794 = vst.msk [vmem:[#allocation2 + $0x80] sm:$0xff] %vm777_vm0, %v761_v16  ;;  %795 = vst.msk [vmem:[#allocation2 + $0x88] sm:$0xff] %vm777_vm0, %v762_v17  ;;  %v764_v19 = vld [vmem:[%s16663_s20 + $0x98] sm:$0xff]  ;;  %v765_v20 = vld [vmem:[%s16663_s20 + $0xa0] sm:$0xff] }
  0x2c   : > { %796 = vst.msk [vmem:[#allocation2 + $0x90] sm:$0xff] %vm777_vm0, %v763_v18  ;;  %797 = vst.msk [vmem:[#allocation2 + $0x98] sm:$0xff] %vm777_vm0, %v764_v19  ;;  %v766_v21 = vld [vmem:[%s16663_s20 + $0xa8] sm:$0xff]  ;;  %v767_v22 = vld [vmem:[%s16663_s20 + $0xb0] sm:$0xff] }
  0x2d   : > { %798 = vst.msk [vmem:[#allocation2 + $0xa0] sm:$0xff] %vm777_vm0, %v765_v20  ;;  %v768_v23 = vld [vmem:[%s16663_s20 + $0xb8] sm:$0xff]  ;;  %799 = vst.msk [vmem:[#allocation2 + $0xa8] sm:$0xff] %vm777_vm0, %v766_v21  ;;  %v769_v24 = vld [vmem:[%s16663_s20 + $0xc0] sm:$0xff] }
  0x2e   : > { %800 = vst.msk [vmem:[#allocation2 + $0xb0] sm:$0xff] %vm777_vm0, %v767_v22  ;;  %801 = vst.msk [vmem:[#allocation2 + $0xb8] sm:$0xff] %vm777_vm0, %v768_v23  ;;  %v770_v25 = vld [vmem:[%s16663_s20 + $0xc8] sm:$0xff]  ;;  %v771_v26 = vld [vmem:[%s16663_s20 + $0xd0] sm:$0xff] }
  0x2f   : > { %802 = vst.msk [vmem:[#allocation2 + $0xc0] sm:$0xff] %vm777_vm0, %v769_v24  ;;  %803 = vst.msk [vmem:[#allocation2 + $0xc8] sm:$0xff] %vm777_vm0, %v770_v25  ;;  %v772_v27 = vld [vmem:[%s16663_s20 + $0xd8] sm:$0xff]  ;;  %v773_v28 = vld [vmem:[%s16663_s20 + $0xe0] sm:$0xff] }
  0x30   : > { %804 = vst.msk [vmem:[#allocation2 + $0xd0] sm:$0xff] %vm777_vm0, %v771_v26  ;;  %v774_v29 = vld [vmem:[%s16663_s20 + $0xe8] sm:$0xff]  ;;  %805 = vst.msk [vmem:[#allocation2 + $0xd8] sm:$0xff] %vm777_vm0, %v772_v27  ;;  %v775_v30 = vld [vmem:[%s16663_s20 + $0xf0] sm:$0xff] }
  0x31   : > { %806 = vst.msk [vmem:[#allocation2 + $0xe0] sm:$0xff] %vm777_vm0, %v773_v28  ;;  %807 = vst.msk [vmem:[#allocation2 + $0xe8] sm:$0xff] %vm777_vm0, %v774_v29  ;;  %v776_v31 = vld [vmem:[%s16663_s20 + $0xf8] sm:$0xff] }
  0x32   : > { %808 = vst.msk [vmem:[#allocation2 + $0xf0] sm:$0xff] %vm777_vm0, %v775_v30  ;;  %809 = vst.msk [vmem:[#allocation2 + $0xf8] sm:$0xff] %vm777_vm0, %v776_v31 }
  0x33 PF: > { %v11477_v32 = vld [vmem:[#allocation2] sm:$0xff]  ;;  %vm860_vm1 = vcmask 523264   ;;  %v11479_v33 = vld [vmem:[#allocation2 + $0x8] sm:$0xff]  ;;  %v11481_v34 = vld [vmem:[#allocation2 + $0x10] sm:$0xff]  ;;  %s16664_s0 = scalar_lea.vmem %s16497_s2, %s11288_s25  ;;  %s16665_s18 = scalar_lea.vmem %s16498_s3, %s11288_s25  ;;  %vm1727_vm2 = vcmask 130048   ;;  %vm5672_vm3 = vcmask 261120  }
  0x34   : > { %v861_v35 = vsel %vm860_vm1, %v11477_v32, 0.0  ;;  %v867_v36 = vsel %vm860_vm1, %v11481_v34, 0.0  ;;  %v11487_v37 = vld [vmem:[#allocation2 + $0x18] sm:$0xff]  ;;  %v864_v38 = vsel %vm860_vm1, %v11479_v33, 0.0  ;;  %v11493_v40 = vld [vmem:[#allocation2 + $0x20] sm:$0xff]  ;;  %v11495_v41 = vld [vmem:[#allocation2 + $0x28] sm:$0xff] }
  0x35   : > { %862 = vadd.xlane.f32.xlu0 %v861_v35  ;;  %868 = vadd.xlane.f32.xlu1 %v867_v36  ;;  %v870_v39 = vsel %vm860_vm1, %v11487_v37, 0.0  ;;  %v11497_v42 = vld [vmem:[#allocation2 + $0x30] sm:$0xff]  ;;  %v11499_v43 = vld [vmem:[#allocation2 + $0x38] sm:$0xff]  ;;  %v873_v44 = vsel %vm860_vm1, %v11493_v40, 0.0  ;;  %v876_v45 = vsel %vm860_vm1, %v11495_v41, 0.0  ;;  %v11509_v48 = vld [vmem:[#allocation2 + $0x40] sm:$0xff] }
  0x36   : > { %v879_v46 = vsel %vm860_vm1, %v11497_v42, 0.0  ;;  %v882_v47 = vsel %vm860_vm1, %v11499_v43, 0.0  ;;  %v11511_v49 = vld [vmem:[#allocation2 + $0x48] sm:$0xff]  ;;  %v885_v50 = vsel %vm860_vm1, %v11509_v48, 0.0  ;;  %v11517_v52 = vld [vmem:[#allocation2 + $0x50] sm:$0xff]  ;;  %v11519_v53 = vld [vmem:[#allocation2 + $0x58] sm:$0xff] }
  0x37   : > { %v888_v51 = vsel %vm860_vm1, %v11511_v49, 0.0  ;;  %v11521_v54 = vld [vmem:[#allocation2 + $0x60] sm:$0xff]  ;;  %v11523_v55 = vld [vmem:[#allocation2 + $0x68] sm:$0xff]  ;;  %v891_v56 = vsel %vm860_vm1, %v11517_v52, 0.0  ;;  %v894_v57 = vsel %vm860_vm1, %v11519_v53, 0.0  ;;  %v11533_v60 = vld [vmem:[#allocation2 + $0x70] sm:$0xff] }
  0x38   : > { %v897_v58 = vsel %vm860_vm1, %v11521_v54, 0.0  ;;  %v900_v59 = vsel %vm860_vm1, %v11523_v55, 0.0  ;;  %v11535_v61 = vld [vmem:[#allocation2 + $0x78] sm:$0xff]  ;;  %v903_v62 = vsel %vm860_vm1, %v11533_v60, 0.0  ;;  %v11541_v0 = vld [vmem:[#allocation2 + $0x80] sm:$0xff]  ;;  %v11543_v1 = vld [vmem:[#allocation2 + $0x88] sm:$0xff] }
  0x39   : > { %865 = vadd.xlane.f32.xlu0 %v864_v38  ;;  %871 = vadd.xlane.f32.xlu1 %v870_v39  ;;  %v906_v63 = vsel %vm860_vm1, %v11535_v61, 0.0  ;;  %v909_v2 = vsel %vm860_vm1, %v11541_v0, 0.0  ;;  %v912_v3 = vsel %vm860_vm1, %v11543_v1, 0.0  ;;  %v11549_v4 = vld [vmem:[#allocation2 + $0x90] sm:$0xff]  ;;  %v11551_v5 = vld [vmem:[#allocation2 + $0x98] sm:$0xff]  ;;  %v11565_v19 = vld [vmem:[#allocation2 + $0xa0] sm:$0xff] }
  0x3a   : > { %v915_v6 = vsel %vm860_vm1, %v11549_v4, 0.0  ;;  %v918_v7 = vsel %vm860_vm1, %v11551_v5, 0.0  ;;  %v921_v22 = vsel %vm860_vm1, %v11565_v19, 0.0  ;;  %v11580_v27 = vld [vmem:[#allocation2 + $0xa8] sm:$0xff]  ;;  %v11589_v35 = vld [vmem:[#allocation2 + $0xb0] sm:$0xff]  ;;  %s16666_s27 = sld [smem:[#allocation6_spill]] }
  0x3b   : > { %v924_v31 = vsel %vm860_vm1, %v11580_v27, 0.0  ;;  %v927_v38 = vsel %vm860_vm1, %v11589_v35, 0.0  ;;  %s11174_s15 = smov 64   ;;  %s11175_s16 = smov 48   ;;  %vm5705_vm4 = vcmask 392192  }
  0x3c   : > { %s11176_s19 = smov 112   ;;  %s11177_s17 = smov 32  }
  0x3d   : > { %874 = vadd.xlane.f32.xlu0 %v873_v44  ;;  %877 = vadd.xlane.f32.xlu1 %v876_v45  ;;  %v11599_v45 = vld [vmem:[#allocation2 + $0xb8] sm:$0xff]  ;;  %p8770_p6 = scmp.ne.s32.totalorder %s11163_s21, 1 }
  0x3e   : > { %s17044_s29 = sld [smem:[#allocation102_spill]] (!%p8770_p6) }
  0x41   : > { %880 = vadd.xlane.f32.xlu0 %v879_v46  ;;  %883 = vadd.xlane.f32.xlu1 %v882_v47 }
  0x45   : > { %886 = vadd.xlane.f32.xlu0 %v885_v50  ;;  %889 = vadd.xlane.f32.xlu1 %v888_v51  ;;  %v930_v50 = vsel %vm860_vm1, %v11599_v45, 0.0 }
  0x49   : > { %892 = vadd.xlane.f32.xlu0 %v891_v56  ;;  %895 = vadd.xlane.f32.xlu1 %v894_v57 }
  0x4d   : > { %898 = vadd.xlane.f32.xlu0 %v897_v58  ;;  %901 = vadd.xlane.f32.xlu1 %v900_v59  ;;  %v11611_v58 = vld [vmem:[#allocation2 + $0xc0] sm:$0xff] }
  0x51   : > { %904 = vadd.xlane.f32.xlu0 %v903_v62  ;;  %907 = vadd.xlane.f32.xlu1 %v906_v63  ;;  %v933_v62 = vsel %vm860_vm1, %v11611_v58, 0.0 }
  0x55   : > { %910 = vadd.xlane.f32.xlu0 %v909_v2  ;;  %913 = vadd.xlane.f32.xlu1 %v912_v3  ;;  %v11619_v2 = vld [vmem:[#allocation2 + $0xc8] sm:$0xff] }
  0x59   : > { %916 = vadd.xlane.f32.xlu0 %v915_v6  ;;  %919 = vadd.xlane.f32.xlu1 %v918_v7 }
  0xbe   : > { %v863_v8 = vpop.xlane.xlu0 %862  ;;  %v869_v9 = vpop.xlane.xlu1 %868 }
  0xbf   : > { %v958_v10 = vmul.f32 0.015625, %v863_v8  ;;  %v960_v11 = vmul.f32 0.015625, %v869_v9  ;;  %v936_v8 = vsel %vm860_vm1, %v11619_v2, 0.0 }
  0xc1   : > { %v11558_v12 = vsub.f32 %v11477_v32, %v958_v10  ;;  %v11561_v16 = vsub.f32 %v11481_v34, %v960_v11 }
  0xc2   : > { %v866_v13 = vpop.xlane.xlu0 %865  ;;  %v872_v14 = vpop.xlane.xlu1 %871 }
  0xc3   : > { %v959_v15 = vmul.f32 0.015625, %v866_v13  ;;  %v1022_v17 = vmul.f32 %v11558_v12, %v11558_v12  ;;  %v961_v18 = vmul.f32 0.015625, %v872_v14  ;;  %v1024_v26 = vmul.f32 %v11561_v16, %v11561_v16  ;;  %v11631_v14 = vld [vmem:[#allocation2 + $0xd0] sm:$0xff] }
  0xc5   : > { %v11568_v20 = vsub.f32 %v11479_v33, %v959_v15  ;;  %v1054_v21 = vsel %vm860_vm1, %v1022_v17, 0.0  ;;  %v11574_v24 = vsub.f32 %v11487_v37, %v961_v18  ;;  %v1060_v32 = vsel %vm860_vm1, %v1024_v26, 0.0  ;;  %v10065_v15 = vld [vmem:[%s11303_s26 + $0x34] ss:$8 sps:$4 sm:$0xff]   ;;  %v10067_v17 = vld [vmem:[%s11303_s26 + $0x30] ss:$8 sps:$4 sm:$0xff]  }
  0xc6   : > { %1055 = vadd.xlane.f32.xlu0 %v1054_v21  ;;  %v875_v23 = vpop.xlane.xlu0 %874  ;;  %v878_v29 = vpop.xlane.xlu1 %877  ;;  %v939_v18 = vsel %vm860_vm1, %v11631_v14, 0.0  ;;  %1486 = vmatprep.subr.bf16.mxu0 %v10065_v15 }
  0xc7   : > { %v1023_v25 = vmul.f32 %v11568_v20, %v11568_v20  ;;  %v962_v28 = vmul.f32 0.015625, %v875_v23  ;;  %v963_v34 = vmul.f32 0.015625, %v878_v29  ;;  %v1025_v36 = vmul.f32 %v11574_v24, %v11574_v24  ;;  %1487 = vmatpush1.bf16.msra.mxu0 %v10067_v17  ;;  %v10068_v29 = vld [vmem:[%s11303_s26 + $0x24] ss:$8 sps:$4 sm:$0xff]  }
  0xc8   : > { %1488 = vmatprep.subr.bf16.mxu0 %v10068_v29 }
  0xc9   : > { %v1057_v30 = vsel %vm860_vm1, %v1023_v25, 0.0  ;;  %v11587_v33 = vsub.f32 %v11493_v40, %v962_v28  ;;  %v11596_v39 = vsub.f32 %v11495_v41, %v963_v34  ;;  %v1063_v44 = vsel %vm860_vm1, %v1025_v36, 0.0  ;;  %v11641_v25 = vld [vmem:[#allocation2 + $0xd8] sm:$0xff] }
  0xca   : > { %922 = vadd.xlane.f32.xlu0 %v921_v22  ;;  %1058 = vadd.xlane.f32.xlu1 %v1057_v30  ;;  %v881_v37 = vpop.xlane.xlu0 %880  ;;  %v884_v47 = vpop.xlane.xlu1 %883  ;;  %v10070_v30 = vld [vmem:[%s11303_s26 + $0x20] ss:$8 sps:$4 sm:$0xff]  }
  0xcb   : > { %v1026_v40 = vmul.f32 %v11587_v33, %v11587_v33  ;;  %v964_v46 = vmul.f32 0.015625, %v881_v37  ;;  %v965_v41 = vmul.f32 0.015625, %v884_v47  ;;  %v1027_v57 = vmul.f32 %v11596_v39, %v11596_v39  ;;  %1489 = vmatpush1.bf16.msra.mxu0 %v10070_v30 }
  0xcd   : > { %v1066_v51 = vsel %vm860_vm1, %v1026_v40, 0.0  ;;  %v11607_v56 = vsub.f32 %v11497_v42, %v964_v46  ;;  %v11616_v63 = vsub.f32 %v11499_v43, %v965_v41  ;;  %v1069_v42 = vsel %vm860_vm1, %v1027_v57, 0.0  ;;  %v10071_v40 = vld [vmem:[%s11303_s26 + $0x14] ss:$8 sps:$4 sm:$0xff]   ;;  %v10073_v46 = vld [vmem:[%s11303_s26 + $0x10] ss:$8 sps:$4 sm:$0xff]  }
  0xce   : > { %1061 = vadd.xlane.f32.xlu0 %v1060_v32  ;;  %925 = vadd.xlane.f32.xlu1 %v924_v31  ;;  %v887_v59 = vpop.xlane.xlu0 %886  ;;  %v890_v7 = vpop.xlane.xlu1 %889 }
  0xcf   : > { %v1028_v3 = vmul.f32 %v11607_v56, %v11607_v56  ;;  %v966_v6 = vmul.f32 0.015625, %v887_v59  ;;  %v967_v11 = vmul.f32 0.015625, %v890_v7  ;;  %v1029_v13 = vmul.f32 %v11616_v63, %v11616_v63  ;;  %1490 = vmatprep.subr.bf16.mxu0 %v10071_v40 }
  0xd0   : > { %1491 = vmatpush1.bf16.msra.mxu0 %v10073_v46 }
  0xd1   : > { %v1072_v10 = vsel %vm860_vm1, %v1028_v3, 0.0  ;;  %v11627_v43 = vsub.f32 %v11509_v48, %v966_v6  ;;  %v11638_v48 = vsub.f32 %v11511_v49, %v967_v11  ;;  %v1075_v23 = vsel %vm860_vm1, %v1029_v13, 0.0 }
  0xd2   : > { %928 = vadd.xlane.f32.xlu0 %v927_v38  ;;  %1064 = vadd.xlane.f32.xlu1 %v1063_v44  ;;  %v893_v9 = vpop.xlane.xlu0 %892  ;;  %v896_v21 = vpop.xlane.xlu1 %895  ;;  %v942_v49 = vsel %vm860_vm1, %v11641_v25, 0.0  ;;  %v11655_v38 = vld [vmem:[#allocation2 + $0xe0] sm:$0xff]  ;;  %v16519_v13 = vmov 0  }
  0xd3   : > { %v1030_v26 = vmul.f32 %v11627_v43, %v11627_v43  ;;  %v968_v28 = vmul.f32 0.015625, %v893_v9  ;;  %v969_v36 = vmul.f32 0.015625, %v896_v21  ;;  %v1031_v37 = vmul.f32 %v11638_v48, %v11638_v48  ;;  %1510 = vmatprep.mubr.bf16.mxu0 %v16519_v13 }
  0xd4   : > { %v945_v47 = vsel %vm860_vm1, %v11655_v38, 0.0 }
  0xd5   : > { %v1078_v32 = vsel %vm860_vm1, %v1030_v26, 0.0  ;;  %v11651_v34 = vsub.f32 %v11517_v52, %v968_v28  ;;  %v11662_v52 = vsub.f32 %v11519_v53, %v969_v36 }
  0xd6   : > { %931 = vadd.xlane.f32.xlu1 %v930_v50  ;;  %1067 = vadd.xlane.f32.xlu0 %v1066_v51  ;;  %v899_v22 = vpop.xlane.xlu0 %898  ;;  %v902_v31 = vpop.xlane.xlu1 %901  ;;  %v1081_v50 = vsel %vm860_vm1, %v1031_v37, 0.0  ;;  %v11665_v51 = vld [vmem:[#allocation2 + $0xe8] sm:$0xff] }
  0xd7   : > { %v1032_v41 = vmul.f32 %v11651_v34, %v11651_v34  ;;  %v970_v57 = vmul.f32 0.015625, %v899_v22  ;;  %v948_v3 = vsel %vm860_vm1, %v11665_v51, 0.0  ;;  %v971_v53 = vmul.f32 0.015625, %v902_v31 }
  0xd8   : > { %v1033_v9 = vmul.f32 %v11662_v52, %v11662_v52 }
  0xd9   : > { %v1084_v7 = vsel %vm860_vm1, %v1032_v41, 0.0  ;;  %v11683_v15 = vsub.f32 %v11523_v55, %v971_v53 }
  0xda   : > { %1070 = vadd.xlane.f32.xlu1 %v1069_v42  ;;  %934 = vadd.xlane.f32.xlu0 %v933_v62  ;;  %v905_v44 = vpop.xlane.xlu0 %904  ;;  %v908_v59 = vpop.xlane.xlu1 %907  ;;  %v10074_v62 = vld [vmem:[%s11303_s26 + $0x4] ss:$8 sps:$4 sm:$0xff]   ;;  %v10076_v42 = vld [vmem:[%s11303_s26] ss:$8 sps:$4 sm:$0xff]   ;;  %v1087_v21 = vsel %vm860_vm1, %v1033_v9, 0.0  ;;  %s16702_s26 = sld [smem:[#allocation98_spill]] }
  0xdb   : > { %v972_v11 = vmul.f32 0.015625, %v905_v44  ;;  %1492 = vmatprep.subr.bf16.mxu0 %v10074_v62  ;;  %v973_v17 = vmul.f32 0.015625, %v908_v59 }
  0xdc   : > { %1493 = vmatpush1.bf16.msra.mxu0 %v10076_v42 }
  0xdd   : > { %v11689_v22 = vsub.f32 %v11533_v60, %v972_v11  ;;  %v11696_v55 = vsub.f32 %v11535_v61, %v973_v17  ;;  %v1035_v60 = vmul.f32 %v11683_v15, %v11683_v15 }
  0xde   : > { %937 = vadd.xlane.f32.xlu1 %v936_v8  ;;  %1073 = vadd.xlane.f32.xlu0 %v1072_v10  ;;  %v911_v6 = vpop.xlane.xlu0 %910  ;;  %v11675_v8 = vsub.f32 %v11521_v54, %v970_v57  ;;  %v11679_v10 = vld [vmem:[#allocation2 + $0xf0] sm:$0xff] }
  0xdf   : > { %v951_v54 = vsel %vm860_vm1, %v11679_v10, 0.0  ;;  %v974_v28 = vmul.f32 0.015625, %v911_v6  ;;  %v1036_v36 = vmul.f32 %v11689_v22, %v11689_v22  ;;  %v1093_v40 = vsel %vm860_vm1, %v1035_v60, 0.0 }
  0xe0   : > { %v1034_v26 = vmul.f32 %v11675_v8, %v11675_v8  ;;  %v1037_v46 = vmul.f32 %v11696_v55, %v11696_v55 }
  0xe2   : > { %1076 = vadd.xlane.f32.xlu1 %v1075_v23  ;;  %940 = vadd.xlane.f32.xlu0 %v939_v18  ;;  %v914_v18 = vpop.xlane.xlu1 %913  ;;  %v11691_v23 = vld [vmem:[#allocation2 + $0xf8] sm:$0xff]  ;;  %v917_v29 = vpop.xlane.xlu0 %916  ;;  %v1090_v31 = vsel %vm860_vm1, %v1034_v26, 0.0  ;;  %v1099_v57 = vsel %vm860_vm1, %v1037_v46, 0.0 }
  0xe3   : > { %v954_v30 = vsel %vm860_vm1, %v11691_v23, 0.0  ;;  %v976_v37 = vmul.f32 0.015625, %v917_v29 }
  0xe6   : > { %943 = vadd.xlane.f32.xlu1 %v942_v49  ;;  %1079 = vadd.xlane.f32.xlu0 %v1078_v32  ;;  %v975_v49 = vmul.f32 0.015625, %v914_v18  ;;  %v11704_v32 = vsub.f32 %v11541_v0, %v974_v28  ;;  %v920_v44 = vpop.xlane.xlu1 %919  ;;  %v11716_v0 = vsub.f32 %v11549_v4, %v976_v37 }
  0xe8   : > { %v11709_v61 = vsub.f32 %v11543_v1, %v975_v49  ;;  %v1038_v41 = vmul.f32 %v11704_v32, %v11704_v32  ;;  %v1040_v4 = vmul.f32 %v11716_v0, %v11716_v0 }
  0xea   : > { %1082 = vadd.xlane.f32.xlu1 %v1081_v50  ;;  %946 = vadd.xlane.f32.xlu0 %v945_v47  ;;  %v1096_v47 = vsel %vm860_vm1, %v1036_v36, 0.0  ;;  %v977_v50 = vmul.f32 0.015625, %v920_v44  ;;  %v1102_v59 = vsel %vm860_vm1, %v1038_v41, 0.0  ;;  %v1039_v62 = vmul.f32 %v11709_v61, %v11709_v61 }
  0xec   : > { %v11722_v1 = vsub.f32 %v11551_v5, %v977_v50  ;;  %v1105_v42 = vsel %vm860_vm1, %v1039_v62, 0.0 }
  0xee   : > { %949 = vadd.xlane.f32.xlu1 %v948_v3  ;;  %1085 = vadd.xlane.f32.xlu0 %v1084_v7  ;;  %v1108_v3 = vsel %vm860_vm1, %v1040_v4, 0.0  ;;  %v1041_v53 = vmul.f32 %v11722_v1, %v11722_v1 }
  0xf0   : > { %v1111_v5 = vsel %vm860_vm1, %v1041_v53, 0.0 }
  0xf2   : > { %1088 = vadd.xlane.f32.xlu1 %v1087_v21  ;;  %952 = vadd.xlane.f32.xlu0 %v951_v54 }
  0xf6   : > { %955 = vadd.xlane.f32.xlu1 %v954_v30  ;;  %1091 = vadd.xlane.f32.xlu0 %v1090_v31 }
  0xfa   : > { %1094 = vadd.xlane.f32.xlu1 %v1093_v40  ;;  %1097 = vadd.xlane.f32.xlu0 %v1096_v47 }
  0xfe   : > { %1100 = vadd.xlane.f32.xlu1 %v1099_v57  ;;  %1103 = vadd.xlane.f32.xlu0 %v1102_v59 }
 0x102   : > { %1106 = vadd.xlane.f32.xlu1 %v1105_v42  ;;  %1109 = vadd.xlane.f32.xlu0 %v1108_v3 }
 0x106   : > { %1112 = vadd.xlane.f32.xlu1 %v1111_v5 }
 0x14f   : > { %v1056_v6 = vpop.xlane.xlu0 %1055 }
 0x150   : > { %v1150_v7 = vmul.f32 0.015625, %v1056_v6 }
 0x152   : > { %v1182_v9 = vadd.f32 1e-05, %v1150_v7 }
 0x153   : > { %v1059_v11 = vpop.xlane.xlu1 %1058  ;;  %v923_v54 = vpop.xlane.xlu0 %922 }
 0x154   : > { %10109 = vrsqrt.f32 %v1182_v9  ;;  %v1151_v17 = vmul.f32 0.015625, %v1059_v11  ;;  %v978_v18 = vmul.f32 0.015625, %v923_v54 }
 0x156   : > { %v1183_v21 = vadd.f32 1e-05, %v1151_v17  ;;  %v11735_v26 = vsub.f32 %v11565_v19, %v978_v18 }
 0x157   : > { %v926_v28 = vpop.xlane.xlu1 %925  ;;  %v1062_v29 = vpop.xlane.xlu0 %1061 }
 0x158   : > { %10111 = vrsqrt.f32 %v1183_v21  ;;  %v979_v30 = vmul.f32 0.015625, %v926_v28  ;;  %v1152_v49 = vmul.f32 0.015625, %v1062_v29  ;;  %v1042_v60 = vmul.f32 %v11735_v26, %v11735_v26 }
 0x15a   : > { %v11740_v31 = vsub.f32 %v11580_v27, %v979_v30  ;;  %v1184_v36 = vadd.f32 1e-05, %v1152_v49  ;;  %v1114_v37 = vsel %vm860_vm1, %v1042_v60, 0.0 }
 0x15b   : > { %v1065_v44 = vpop.xlane.xlu1 %1064  ;;  %1115 = vadd.xlane.f32.xlu0 %v1114_v37  ;;  %v929_v40 = vpop.xlane.xlu0 %928 }
 0x15c   : > { %10113 = vrsqrt.f32 %v1184_v36  ;;  %v1153_v19 = vmul.f32 0.015625, %v1065_v44  ;;  %v980_v46 = vmul.f32 0.015625, %v929_v40  ;;  %v1043_v47 = vmul.f32 %v11740_v31, %v11740_v31 }
 0x15e   : > { %v1185_v50 = vadd.f32 1e-05, %v1153_v19  ;;  %v11746_v41 = vsub.f32 %v11589_v35, %v980_v46  ;;  %v1117_v57 = vsel %vm860_vm1, %v1043_v47, 0.0 }
 0x15f   : > { %1118 = vadd.xlane.f32.xlu1 %v1117_v57  ;;  %v932_v27 = vpop.xlane.xlu1 %931  ;;  %v1068_v59 = vpop.xlane.xlu0 %1067 }
 0x160   : > { %10115 = vrsqrt.f32 %v1185_v50  ;;  %v981_v62 = vmul.f32 0.015625, %v932_v27  ;;  %v1154_v4 = vmul.f32 0.015625, %v1068_v59  ;;  %v1044_v42 = vmul.f32 %v11746_v41, %v11746_v41 }
 0x161   : > { %v10110_v3 = vpop.eup %10109 }
 0x162   : > { %v11752_v53 = vsub.f32 %v11599_v45, %v981_v62  ;;  %v1186_v5 = vadd.f32 1e-05, %v1154_v4  ;;  %v1120_v35 = vsel %vm860_vm1, %v1044_v42, 0.0  ;;  %v1246_v9 = vmul.f32 %v10110_v3, %v11558_v12  ;;  %v11763_v45 = vld [vmem:[%s16664_s0] ss:$0 sm:$0xff] }
 0x163   : > { %v1071_v6 = vpop.xlane.xlu1 %1070  ;;  %1121 = vadd.xlane.f32.xlu0 %v1120_v35  ;;  %v935_v7 = vpop.xlane.xlu0 %934 }
 0x164   : > { %10117 = vrsqrt.f32 %v1186_v5  ;;  %v1155_v11 = vmul.f32 0.015625, %v1071_v6  ;;  %v982_v54 = vmul.f32 0.015625, %v935_v7  ;;  %v1045_v17 = vmul.f32 %v11752_v53, %v11752_v53 }
 0x165   : > { %v10112_v18 = vpop.eup %10111  ;;  %v1284_v60 = vmul.f32 %v11763_v45, %v1246_v9 }
 0x166   : > { %v1187_v21 = vadd.f32 1e-05, %v1155_v11  ;;  %v11766_v28 = vsub.f32 %v11611_v58, %v982_v54  ;;  %v1123_v12 = vsel %vm860_vm1, %v1045_v17, 0.0  ;;  %v1247_v29 = vmul.f32 %v10112_v18, %v11568_v20  ;;  %v11778_v58 = vld [vmem:[%s16665_s18] ss:$0 sm:$0xff]  ;;  %s11178_s18 = smov 96  }
 0x167   : > { %1124 = vadd.xlane.f32.xlu1 %v1123_v12  ;;  %v938_v30 = vpop.xlane.xlu1 %937  ;;  %v1074_v49 = vpop.xlane.xlu0 %1073  ;;  %v1322_v27 = vadd.f32 %v11778_v58, %v1284_v60 }
 0x168   : > { %10119 = vrsqrt.f32 %v1187_v21  ;;  %v983_v36 = vmul.f32 0.015625, %v938_v30  ;;  %v1156_v37 = vmul.f32 0.015625, %v1074_v49  ;;  %v1046_v44 = vmul.f32 %v11766_v28, %v11766_v28 }
 0x169   : > { %v10114_v40 = vpop.eup %10113  ;;  %v1285_v20 = vmul.f32 %v11763_v45, %v1247_v29 }
 0x16a   : > { %v11782_v19 = vsub.f32 %v11619_v2, %v983_v36  ;;  %v1188_v46 = vadd.f32 1e-05, %v1156_v37  ;;  %v1126_v47 = vsel %vm860_vm1, %v1046_v44, 0.0  ;;  %v1248_v62 = vmul.f32 %v10114_v40, %v11561_v16 }
 0x16b   : > { %v1077_v50 = vpop.xlane.xlu1 %1076  ;;  %1127 = vadd.xlane.f32.xlu0 %v1126_v47  ;;  %v941_v57 = vpop.xlane.xlu0 %940  ;;  %v1323_v59 = vadd.f32 %v11778_v58, %v1285_v20 }
 0x16c   : > { %10121 = vrsqrt.f32 %v1188_v46  ;;  %v1157_v4 = vmul.f32 0.015625, %v1077_v50  ;;  %v984_v42 = vmul.f32 0.015625, %v941_v57  ;;  %v1047_v3 = vmul.f32 %v11782_v19, %v11782_v19 }
 0x16d   : > { %v10116_v2 = vpop.eup %10115  ;;  %v1354_v5 = vpack.c.bf16 %v1323_v59, %v1322_v27  ;;  %v1286_v54 = vmul.f32 %v11763_v45, %v1248_v62 }
 0x16e   : > { %v1189_v35 = vadd.f32 1e-05, %v1157_v4  ;;  %v11791_v6 = vsub.f32 %v11631_v14, %v984_v42  ;;  %v1129_v7 = vsel %vm860_vm1, %v1047_v3, 0.0  ;;  %v1249_v9 = vmul.f32 %v10116_v2, %v11574_v24 }
 0x16f   : > { %8562 = vmatmul.mubr.msk.bf16.vlgmr.msra.gmra.mxu0 %vm860_vm1, %v1354_v5  ;;  %1130 = vadd.xlane.f32.xlu1 %v1129_v7  ;;  %v944_v16 = vpop.xlane.xlu1 %943  ;;  %v1080_v11 = vpop.xlane.xlu0 %1079  ;;  %v1324_v36 = vadd.f32 %v11778_v58, %v1286_v54 }
 0x170   : > { %10123 = vrsqrt.f32 %v1189_v35  ;;  %v985_v17 = vmul.f32 0.015625, %v944_v16  ;;  %v1158_v18 = vmul.f32 0.015625, %v1080_v11  ;;  %v1048_v21 = vmul.f32 %v11791_v6, %v11791_v6  ;;  %1520 = vmatprep.mubr.bf16.mxu0 %v16519_v13 }
 0x171   : > { %v10118_v14 = vpop.eup %10117  ;;  %v1287_v12 = vmul.f32 %v11763_v45, %v1249_v9 }
 0x172   : > { %v11802_v24 = vsub.f32 %v11641_v25, %v985_v17  ;;  %v1190_v29 = vadd.f32 1e-05, %v1158_v18  ;;  %v1132_v30 = vsel %vm860_vm1, %v1048_v21, 0.0  ;;  %v1250_v44 = vmul.f32 %v10118_v14, %v11587_v33 }
 0x173   : > { %v1083_v49 = vpop.xlane.xlu1 %1082  ;;  %1133 = vadd.xlane.f32.xlu0 %v1132_v30  ;;  %v947_v60 = vpop.xlane.xlu0 %946  ;;  %v1325_v37 = vadd.f32 %v11778_v58, %v1287_v12 }
 0x174   : > { %10125 = vrsqrt.f32 %v1190_v29  ;;  %v1159_v40 = vmul.f32 0.015625, %v1083_v49  ;;  %v986_v20 = vmul.f32 0.015625, %v947_v60  ;;  %v1049_v46 = vmul.f32 %v11802_v24, %v11802_v24 }
 0x175   : > { %v10120_v25 = vpop.eup %10119  ;;  %v1355_v47 = vpack.c.bf16 %v1325_v37, %v1324_v36  ;;  %v1288_v4 = vmul.f32 %v11763_v45, %v1250_v44 }
 0x176   : > { %v1191_v50 = vadd.f32 1e-05, %v1159_v40  ;;  %v11811_v57 = vsub.f32 %v11655_v38, %v986_v20  ;;  %v1135_v27 = vsel %vm860_vm1, %v1049_v46, 0.0  ;;  %v1251_v59 = vmul.f32 %v10120_v25, %v11596_v39 }
 0x177   : > { %8563 = vmatmul.mubr.msk.bf16.gmra.mxu0 %vm860_vm1, %v1355_v47  ;;  %1136 = vadd.xlane.f32.xlu1 %v1135_v27  ;;  %v950_v33 = vpop.xlane.xlu1 %949  ;;  %v1086_v62 = vpop.xlane.xlu0 %1085  ;;  %v1326_v11 = vadd.f32 %v11778_v58, %v1288_v4 }
 0x178   : > { %10127 = vrsqrt.f32 %v1191_v50  ;;  %v987_v42 = vmul.f32 0.015625, %v950_v33  ;;  %v1160_v3 = vmul.f32 0.015625, %v1086_v62  ;;  %v1050_v2 = vmul.f32 %v11811_v57, %v11811_v57  ;;  %1530 = vmatprep.mubr.bf16.mxu0 %v16519_v13 }
 0x179   : > { %v10122_v38 = vpop.eup %10121  ;;  %v1289_v5 = vmul.f32 %v11763_v45, %v1251_v59 }
 0x17a   : > { %v11822_v39 = vsub.f32 %v11665_v51, %v987_v42  ;;  %v1192_v35 = vadd.f32 1e-05, %v1160_v3  ;;  %v1138_v7 = vsel %vm860_vm1, %v1050_v2, 0.0  ;;  %v1252_v17 = vmul.f32 %v10122_v38, %v11607_v56 }
 0x17b   : > { %v1089_v9 = vpop.xlane.xlu1 %1088  ;;  %1139 = vadd.xlane.f32.xlu0 %v1138_v7  ;;  %v953_v16 = vpop.xlane.xlu0 %952  ;;  %v1327_v54 = vadd.f32 %v11778_v58, %v1289_v5 }
 0x17c   : > { %10129 = vrsqrt.f32 %v1192_v35  ;;  %v1161_v18 = vmul.f32 0.015625, %v1089_v9  ;;  %v988_v21 = vmul.f32 0.015625, %v953_v16  ;;  %v1051_v14 = vmul.f32 %v11822_v39, %v11822_v39 }
 0x17d   : > { %v10124_v51 = vpop.eup %10123  ;;  %v1356_v12 = vpack.c.bf16 %v1327_v54, %v1326_v11  ;;  %v1290_v37 = vmul.f32 %v11763_v45, %v1252_v17 }
 0x17e   : > { %v1193_v29 = vadd.f32 1e-05, %v1161_v18  ;;  %v11831_v30 = vsub.f32 %v11679_v10, %v988_v21  ;;  %v1141_v49 = vsel %vm860_vm1, %v1051_v14, 0.0  ;;  %v1253_v60 = vmul.f32 %v10124_v51, %v11616_v63 }
 0x17f   : > { %8564 = vmatmul.mubr.msk.bf16.gmra.mxu0 %vm860_vm1, %v1356_v12  ;;  %1142 = vadd.xlane.f32.xlu1 %v1141_v49  ;;  %v956_v56 = vpop.xlane.xlu1 %955  ;;  %v1092_v36 = vpop.xlane.xlu0 %1091  ;;  %v1328_v33 = vadd.f32 %v11778_v58, %v1290_v37 }
 0x180   : > { %10131 = vrsqrt.f32 %v1193_v29  ;;  %v989_v44 = vmul.f32 0.015625, %v956_v56  ;;  %v1162_v40 = vmul.f32 0.015625, %v1092_v36  ;;  %v1052_v20 = vmul.f32 %v11831_v30, %v11831_v30  ;;  %1540 = vmatprep.mubr.bf16.mxu0 %v16519_v13 }
 0x181   : > { %v10126_v10 = vpop.eup %10125  ;;  %v1291_v46 = vmul.f32 %v11763_v45, %v1253_v60 }
 0x182   : > { %v11842_v63 = vsub.f32 %v11691_v23, %v989_v44  ;;  %v1194_v25 = vadd.f32 1e-05, %v1162_v40  ;;  %v1144_v47 = vsel %vm860_vm1, %v1052_v20, 0.0  ;;  %v1254_v50 = vmul.f32 %v10126_v10, %v11627_v43 }
 0x183   : > { %v1095_v27 = vpop.xlane.xlu1 %1094  ;;  %1145 = vadd.xlane.f32.xlu0 %v1144_v47  ;;  %v1098_v59 = vpop.xlane.xlu0 %1097  ;;  %v1329_v62 = vadd.f32 %v11778_v58, %v1291_v46 }
 0x184   : > { %10133 = vrsqrt.f32 %v1194_v25  ;;  %v1163_v4 = vmul.f32 0.015625, %v1095_v27  ;;  %v1164_v42 = vmul.f32 0.015625, %v1098_v59  ;;  %v1053_v3 = vmul.f32 %v11842_v63, %v11842_v63 }
 0x185   : > { %v10128_v23 = vpop.eup %10127  ;;  %v1357_v2 = vpack.c.bf16 %v1329_v62, %v1328_v33  ;;  %v1292_v35 = vmul.f32 %v11763_v45, %v1254_v50 }
 0x186   : > { %v1195_v38 = vadd.f32 1e-05, %v1163_v4  ;;  %v1147_v5 = vsel %vm860_vm1, %v1053_v3, 0.0  ;;  %v1255_v43 = vmul.f32 %v10128_v23, %v11638_v48  ;;  %v1196_v7 = vadd.f32 1e-05, %v1164_v42 }
 0x187   : > { %8565 = vmatmul.mubr.msk.bf16.gmra.mxu0 %vm860_vm1, %v1357_v2  ;;  %1148 = vadd.xlane.f32.xlu1 %v1147_v5  ;;  %v1101_v9 = vpop.xlane.xlu1 %1100  ;;  %v1104_v11 = vpop.xlane.xlu0 %1103  ;;  %v1330_v21 = vadd.f32 %v11778_v58, %v1292_v35 }
 0x188   : > { %10135 = vrsqrt.f32 %v1195_v38  ;;  %v1165_v16 = vmul.f32 0.015625, %v1101_v9  ;;  %1550 = vmatprep.mubr.bf16.mxu0 %v16519_v13  ;;  %v1293_v54 = vmul.f32 %v11763_v45, %v1255_v43  ;;  %v1166_v51 = vmul.f32 0.015625, %v1104_v11 }
 0x189   : > { %v10130_v17 = vpop.eup %10129  ;;  %10137 = vrsqrt.f32 %v1196_v7 }
 0x18a   : > { %v1197_v18 = vadd.f32 1e-05, %v1165_v16  ;;  %v1331_v48 = vadd.f32 %v11778_v58, %v1293_v54  ;;  %v1256_v14 = vmul.f32 %v10130_v17, %v11651_v34  ;;  %v1198_v44 = vadd.f32 1e-05, %v1166_v51 }
 0x18b   : > { %v1107_v12 = vpop.xlane.xlu1 %1106  ;;  %v1110_v20 = vpop.xlane.xlu0 %1109 }
 0x18c   : > { %10139 = vrsqrt.f32 %v1197_v18  ;;  %v1167_v29 = vmul.f32 0.015625, %v1107_v12  ;;  %v1358_v49 = vpack.c.bf16 %v1331_v48, %v1330_v21  ;;  %v1294_v37 = vmul.f32 %v11763_v45, %v1256_v14 }
 0x18d   : > { %v10132_v60 = vpop.eup %10131  ;;  %v1168_v50 = vmul.f32 0.015625, %v1110_v20 }
 0x18e   : > { %v1199_v56 = vadd.f32 1e-05, %v1167_v29  ;;  %v1257_v36 = vmul.f32 %v10132_v60, %v11662_v52  ;;  %v1332_v25 = vadd.f32 %v11778_v58, %v1294_v37 }
 0x18f   : > { %8566 = vmatmul.mubr.msk.bf16.gmra.mxu0 %vm860_vm1, %v1358_v49  ;;  %v1113_v40 = vpop.xlane.xlu1 %1112  ;;  %v1200_v42 = vadd.f32 1e-05, %v1168_v50 }
 0x190   : > { %1560 = vmatprep.mubr.bf16.mxu0 %v16519_v13  ;;  %v1295_v34 = vmul.f32 %v11763_v45, %v1257_v36  ;;  %10141 = vrsqrt.f32 %v1199_v56  ;;  %v1169_v46 = vmul.f32 0.015625, %v1113_v40 }
 0x191   : > { %v10134_v10 = vpop.eup %10133  ;;  %10143 = vrsqrt.f32 %v1198_v44 }
 0x192   : > { %v1333_v47 = vadd.f32 %v11778_v58, %v1295_v34  ;;  %v1258_v52 = vmul.f32 %v10134_v10, %v11675_v8  ;;  %v1201_v33 = vadd.f32 1e-05, %v1169_v46 }
 0x194   : > { %v1359_v27 = vpack.c.bf16 %v1333_v47, %v1332_v25  ;;  %v1296_v4 = vmul.f32 %v11763_v45, %v1258_v52  ;;  %10145 = vrsqrt.f32 %v1201_v33 }
 0x195   : > { %v10136_v59 = vpop.eup %10135  ;;  %10147 = vrsqrt.f32 %v1200_v42 }
 0x196   : > { %v1259_v62 = vmul.f32 %v10136_v59, %v11683_v15  ;;  %v10138_v3 = vpop.eup %10137  ;;  %v1334_v8 = vadd.f32 %v11778_v58, %v1296_v4 }
 0x197   : > { %8567 = vmatmul.mubr.msk.bf16.gmra.mxu0 %vm860_vm1, %v1359_v27  ;;  %v1260_v15 = vmul.f32 %v10138_v3, %v11689_v22 }
 0x198   : > { %1570 = vmatprep.mubr.bf16.mxu0 %v16519_v13  ;;  %v1297_v23 = vmul.f32 %v11763_v45, %v1259_v62 }
 0x199   : > { %v10140_v2 = vpop.eup %10139  ;;  %v1298_v9 = vmul.f32 %v11763_v45, %v1260_v15 }
 0x19a   : > { %v1335_v38 = vadd.f32 %v11778_v58, %v1297_v23  ;;  %v1261_v5 = vmul.f32 %v10140_v2, %v11696_v55 }
 0x19b   : > { %v1336_v55 = vadd.f32 %v11778_v58, %v1298_v9 }
 0x19c   : > { %v1360_v43 = vpack.c.bf16 %v1335_v38, %v1334_v8  ;;  %v1299_v35 = vmul.f32 %v11763_v45, %v1261_v5 }
 0x19d   : > { %v10142_v7 = vpop.eup %10141 }
 0x19e   : > { %v10144_v16 = vpop.eup %10143  ;;  %v1337_v11 = vadd.f32 %v11778_v58, %v1299_v35  ;;  %v1263_v54 = vmul.f32 %v10142_v7, %v11709_v61 }
 0x19f   : > { %8568 = vmatmul.mubr.msk.bf16.gmra.mxu0 %vm860_vm1, %v1360_v43  ;;  %v1262_v17 = vmul.f32 %v10144_v16, %v11704_v32 }
 0x1a0   : > { %1580 = vmatprep.mubr.bf16.mxu0 %v16519_v13  ;;  %v1361_v22 = vpack.c.bf16 %v1337_v11, %v1336_v55  ;;  %v1301_v18 = vmul.f32 %v11763_v45, %v1263_v54 }
 0x1a1   : > { %v10146_v21 = vpop.eup %10145  ;;  %v1300_v48 = vmul.f32 %v11763_v45, %v1262_v17 }
 0x1a2   : > { %v10148_v14 = vpop.eup %10147  ;;  %v1339_v51 = vadd.f32 %v11778_v58, %v1301_v18  ;;  %v1265_v12 = vmul.f32 %v10146_v21, %v11722_v1 }
 0x1a3   : > { %v1338_v61 = vadd.f32 %v11778_v58, %v1300_v48  ;;  %v1264_v29 = vmul.f32 %v10148_v14, %v11716_v0 }
 0x1a4   : > { %v1303_v49 = vmul.f32 %v11763_v45, %v1265_v12 }
 0x1a5   : > { %v1362_v32 = vpack.c.bf16 %v1339_v51, %v1338_v61  ;;  %v1302_v60 = vmul.f32 %v11763_v45, %v1264_v29 }
 0x1a6   : > { %v1341_v56 = vadd.f32 %v11778_v58, %v1303_v49 }
 0x1a7   : > { %8569 = vmatmul.mubr.msk.bf16.gmra.mxu0 %vm860_vm1, %v1361_v22  ;;  %v1340_v36 = vadd.f32 %v11778_v58, %v1302_v60 }
 0x1a8   : > { %1590 = vmatprep.mubr.bf16.mxu0 %v16519_v13 }
 0x1a9   : > { %v1363_v37 = vpack.c.bf16 %v1341_v56, %v1340_v36 }
 0x1af   : > { %8570 = vmatmul.mubr.msk.bf16.gmra.mxu0 %vm860_vm1, %v1362_v32 }
 0x1b0   : > { %1600 = vmatprep.mubr.bf16.mxu0 %v16519_v13 }
 0x1b7   : > { %8571 = vmatmul.mubr.msk.bf16.gmra.mxu0 %vm860_vm1, %v1363_v37 }
 0x1b8   : > { %1610 = vmatprep.mubr.bf16.mxu0 %v16519_v13 }
 0x1e4   : > { %v1116_v1 = vpop.xlane.xlu0 %1115 }
 0x1e5   : > { %v1170_v0 = vmul.f32 0.015625, %v1116_v1 }
 0x1e7   : > { %v1202_v44 = vadd.f32 1e-05, %v1170_v0 }
 0x1e8   : > { %v1119_v40 = vpop.xlane.xlu1 %1118 }
 0x1e9   : > { %10149 = vrsqrt.f32 %v1202_v44  ;;  %v1171_v20 = vmul.f32 0.015625, %v1119_v40 }
 0x1eb   : > { %v1203_v34 = vadd.f32 1e-05, %v1171_v20 }
 0x1ec   : > { %v1122_v10 = vpop.xlane.xlu0 %1121 }
 0x1ed   : > { %10151 = vrsqrt.f32 %v1203_v34  ;;  %v1172_v46 = vmul.f32 0.015625, %v1122_v10 }
 0x1ef   : > { %v1204_v25 = vadd.f32 1e-05, %v1172_v46 }
 0x1f0   : > { %v1125_v47 = vpop.xlane.xlu1 %1124 }
 0x1f1   : > { %10153 = vrsqrt.f32 %v1204_v25  ;;  %v1173_v52 = vmul.f32 0.015625, %v1125_v47 }
 0x1f3   : > { %v1205_v50 = vadd.f32 1e-05, %v1173_v52 }
 0x1f4   : > { %v1128_v27 = vpop.xlane.xlu0 %1127 }
 0x1f5   : > { %10155 = vrsqrt.f32 %v1205_v50  ;;  %v1174_v59 = vmul.f32 0.015625, %v1128_v27 }
 0x1f6   : > { %v10150_v33 = vpop.eup %10149 }
 0x1f7   : > { %v1206_v62 = vadd.f32 1e-05, %v1174_v59  ;;  %v1266_v4 = vmul.f32 %v10150_v33, %v11735_v26 }
 0x1f8   : > { %v1131_v42 = vpop.xlane.xlu1 %1130 }
 0x1f9   : > { %10157 = vrsqrt.f32 %v1206_v62  ;;  %v1175_v3 = vmul.f32 0.015625, %v1131_v42  ;;  %v1304_v38 = vmul.f32 %v11763_v45, %v1266_v4 }
 0x1fa   : > { %v10152_v23 = vpop.eup %10151 }
 0x1fb   : > { %v1207_v2 = vadd.f32 1e-05, %v1175_v3  ;;  %v1267_v8 = vmul.f32 %v10152_v23, %v11740_v31  ;;  %v1342_v9 = vadd.f32 %v11778_v58, %v1304_v38 }
 0x1fc   : > { %v1134_v5 = vpop.xlane.xlu0 %1133 }
 0x1fd   : > { %10159 = vrsqrt.f32 %v1207_v2  ;;  %v1176_v15 = vmul.f32 0.015625, %v1134_v5  ;;  %v1305_v43 = vmul.f32 %v11763_v45, %v1267_v8 }
 0x1fe   : > { %v10154_v35 = vpop.eup %10153 }
 0x1ff   : > { %v1208_v7 = vadd.f32 1e-05, %v1176_v15  ;;  %v1343_v26 = vadd.f32 %v11778_v58, %v1305_v43  ;;  %v1268_v16 = vmul.f32 %v10154_v35, %v11746_v41 }
 0x200   : > { %v1137_v11 = vpop.xlane.xlu1 %1136 }
 0x201   : > { %10161 = vrsqrt.f32 %v1208_v7  ;;  %v1177_v54 = vmul.f32 0.015625, %v1137_v11  ;;  %v1364_v55 = vpack.c.bf16 %v1343_v26, %v1342_v9  ;;  %v1306_v18 = vmul.f32 %v11763_v45, %v1268_v16 }
 0x202   : > { %v10156_v31 = vpop.eup %10155  ;;  %v1380_v7 = vlaneseq }
 0x203   : > { %v1209_v17 = vadd.f32 1e-05, %v1177_v54  ;;  %8572 = vmatmul.mubr.msk.bf16.gmra.mxu0 %vm860_vm1, %v1364_v55  ;;  %v1269_v22 = vmul.f32 %v10156_v31, %v11752_v53  ;;  %v1344_v12 = vadd.f32 %v11778_v58, %v1306_v18  ;;  %v1378_v55 = vld [vmem:[%s16666_s27] sm:$0x3]  ;;  %s11180_s27 = smov 80  }
 0x204   : > { %v1140_v21 = vpop.xlane.xlu0 %1139  ;;  %1620 = vmatprep.mubr.bf16.mxu0 %v16519_v13  ;;  %v11946_v11 = vshrl.u32 %v1380_v7, 7 }
 0x205   : > { %10163 = vrsqrt.f32 %v1209_v17  ;;  %v1178_v48 = vmul.f32 0.015625, %v1140_v21  ;;  %v1307_v14 = vmul.f32 %v11763_v45, %v1269_v22 }
 0x206   : > { %v10158_v41 = vpop.eup %10157  ;;  %16667 = vst [vmem:[#allocation7_spill] sm:$0xff] %v11946_v11  ;;  %v16518_v54 = vsub.s32 0, %v11946_v11 }
 0x207   : > { %v1210_v51 = vadd.f32 1e-05, %v1178_v48  ;;  %v1345_v61 = vadd.f32 %v11778_v58, %v1307_v14  ;;  %v1270_v29 = vmul.f32 %v10158_v41, %v11766_v28 }
 0x208   : > { %v1143_v32 = vpop.xlane.xlu1 %1142  ;;  %v11953_v31 = vrot.slane %v1378_v55, %v16518_v54 }
 0x209   : > { %10165 = vrsqrt.f32 %v1210_v51  ;;  %v1179_v53 = vmul.f32 0.015625, %v1143_v32  ;;  %v1365_v49 = vpack.c.bf16 %v1345_v61, %v1344_v12  ;;  %v1308_v37 = vmul.f32 %v11763_v45, %v1270_v29 }
 0x20a   : > { %v10160_v60 = vpop.eup %10159 }
 0x20b   : > { %v1211_v56 = vadd.f32 1e-05, %v1179_v53  ;;  %8573 = vmatmul.mubr.msk.bf16.gmra.mxu0 %vm860_vm1, %v1365_v49  ;;  %v1271_v36 = vmul.f32 %v10160_v60, %v11782_v19  ;;  %v1346_v20 = vadd.f32 %v11778_v58, %v1308_v37 }
 0x20c   : > { %v1146_v1 = vpop.xlane.xlu0 %1145  ;;  %1630 = vmatprep.mubr.bf16.mxu0 %v16519_v13 }
 0x20d   : > { %10167 = vrsqrt.f32 %v1211_v56  ;;  %v1180_v0 = vmul.f32 0.015625, %v1146_v1  ;;  %v1309_v44 = vmul.f32 %v11763_v45, %v1271_v36 }
 0x20e   : > { %v10162_v28 = vpop.eup %10161 }
 0x20f   : > { %v1212_v40 = vadd.f32 1e-05, %v1180_v0  ;;  %v1347_v34 = vadd.f32 %v11778_v58, %v1309_v44  ;;  %v1272_v10 = vmul.f32 %v10162_v28, %v11791_v6 }
 0x210   : > { %v1149_v46 = vpop.xlane.xlu1 %1148 }
 0x211   : > { %10169 = vrsqrt.f32 %v1212_v40  ;;  %v1181_v19 = vmul.f32 0.015625, %v1149_v46  ;;  %v1366_v25 = vpack.c.bf16 %v1347_v34, %v1346_v20  ;;  %v1310_v27 = vmul.f32 %v11763_v45, %v1272_v10 }
 0x212   : > { %v10164_v47 = vpop.eup %10163 }
 0x213   : > { %v1213_v52 = vadd.f32 1e-05, %v1181_v19  ;;  %8574 = vmatmul.mubr.msk.bf16.gmra.mxu0 %vm860_vm1, %v1366_v25  ;;  %v1273_v50 = vmul.f32 %v10164_v47, %v11802_v24  ;;  %v1348_v6 = vadd.f32 %v11778_v58, %v1310_v27 }
 0x214   : > { %1640 = vmatprep.mubr.bf16.mxu0 %v16519_v13 }
 0x215   : > { %10171 = vrsqrt.f32 %v1213_v52  ;;  %v1311_v59 = vmul.f32 %v11763_v45, %v1273_v50 }
 0x216   : > { %v10166_v33 = vpop.eup %10165 }
 0x217   : > { %v1349_v62 = vadd.f32 %v11778_v58, %v1311_v59  ;;  %v1274_v4 = vmul.f32 %v10166_v33, %v11811_v57  ;;  %v16517_v59 = vsub.s32 1, %v11946_v11 }
 0x219   : > { %v1367_v42 = vpack.c.bf16 %v1349_v62, %v1348_v6  ;;  %v1312_v23 = vmul.f32 %v11763_v45, %v1274_v4 }
 0x21a   : > { %v10168_v3 = vpop.eup %10167 }
 0x21b   : > { %8575 = vmatmul.mubr.msk.bf16.gmra.mxu0 %vm860_vm1, %v1367_v42  ;;  %v1275_v24 = vmul.f32 %v10168_v3, %v11822_v39  ;;  %v1350_v38 = vadd.f32 %v11778_v58, %v1312_v23 }
 0x21c   : > { %1650 = vmatprep.mubr.bf16.mxu0 %v16519_v13 }
 0x21d   : > { %v1313_v2 = vmul.f32 %v11763_v45, %v1275_v24  ;;  %v11994_v24 = vrot.slane %v1378_v55, %v16517_v59  ;;  %v12416_v59 = vld [vmem:[%s16702_s26 + $0x28] sm:$0xff] }
 0x21e   : > { %v10170_v8 = vpop.eup %10169 }
 0x21f   : > { %v1351_v5 = vadd.f32 %v11778_v58, %v1313_v2  ;;  %v1276_v57 = vmul.f32 %v10170_v8, %v11831_v30 }
 0x221   : > { %v1368_v15 = vpack.c.bf16 %v1351_v5, %v1350_v38  ;;  %v1314_v35 = vmul.f32 %v11763_v45, %v1276_v57 }
 0x222   : > { %v10172_v43 = vpop.eup %10171 }
 0x223   : > { %8576 = vmatmul.mubr.msk.bf16.gmra.mxu0 %vm860_vm1, %v1368_v15  ;;  %v1277_v39 = vmul.f32 %v10172_v43, %v11842_v63  ;;  %v1352_v26 = vadd.f32 %v11778_v58, %v1314_v35 }
 0x224   : > { %1660 = vmatprep.mubr.bf16.mxu0 %v16519_v13  ;;  %v12429_v13 = vld [vmem:[%s16702_s26 + $0x50] sm:$0xff] }
 0x225   : > { %v1315_v9 = vmul.f32 %v11763_v45, %v1277_v39 }
 0x227   : > { %v1353_v16 = vadd.f32 %v11778_v58, %v1315_v9 }
 0x229   : > { %v1369_v30 = vpack.c.bf16 %v1353_v16, %v1352_v26 }
 0x22b   : > { %8577 = vmatmul.mubr.msk.bf16.gmra.mxu0 %vm860_vm1, %v1369_v30 }
 0x22f   : > { %v1512_v63 = vpop.f32.mrf.mxu0 }
 0x230   : > { %v1513_v22 = vadd.f32 %v1512_v63, %v11953_v31 }
 0x231   : > { %v11955_v17 = vpop.f32.mrf.mxu0 }
 0x233   : > { %v1516_v45 = vpop.f32.mrf.mxu0 }
 0x234   : > { %v1517_v58 = vadd.f32 %v1516_v45, %v11953_v31 }
 0x235   : > { %v11959_v18 = vpop.f32.mrf.mxu0 }
 0x236   : > { %v11961_v21 = vpack.c.bf16 %v1517_v58, %v1513_v22 }
 0x237   : > { %v11963_v48 = vpop.f32.mrf.mxu0 }
 0x238   : > { %16668 = vst [vmem:[#allocation8_spill] sm:$0xff] %v11961_v21  ;;  %9185 = vmatprep.mubr.msk.bf16.mxu1 %vm1727_vm2, %v11961_v21 }
 0x239   : > { %v11967_v14 = vpop.f32.mrf.mxu0 }
 0x23b   : > { %v1526_v41 = vpop.f32.mrf.mxu0 }
 0x23c   : > { %v1527_v45 = vadd.f32 %v1526_v41, %v11953_v31 }
 0x23d   : > { %v11969_v51 = vpop.f32.mrf.mxu0 }
 0x23f   : > { %v1532_v12 = vpop.f32.mrf.mxu0 }
 0x240   : > { %v1533_v7 = vadd.f32 %v1532_v12, %v11953_v31  ;;  %v1523_v12 = vadd.f32 %v11963_v48, %v11953_v31 }
 0x241   : > { %v11971_v61 = vpop.f32.mrf.mxu0 }
 0x243   : > { %v1536_v29 = vpop.f32.mrf.mxu0 }
 0x244   : > { %v1537_v8 = vadd.f32 %v1536_v29, %v11953_v31 }
 0x245   : > { %v11973_v32 = vpop.f32.mrf.mxu0 }
 0x246   : > { %v12018_v30 = vpack.c.bf16 %v1537_v8, %v1533_v7 }
 0x247   : > { %v1542_v53 = vpop.f32.mrf.mxu0 }
 0x248   : > { %v1543_v16 = vadd.f32 %v1542_v53, %v11953_v31  ;;  %16672 = vst [vmem:[#allocation12_spill] sm:$0xff] %v12018_v30  ;;  %v12039_v53 = vpack.c.bf16 %v1527_v45, %v1523_v12 }
 0x249   : > { %v11975_v49 = vpop.f32.mrf.mxu0 }
 0x24a   : > { %16676 = vst [vmem:[#allocation16_spill] sm:$0xff] %v12039_v53 }
 0x24b   : > { %v1546_v60 = vpop.f32.mrf.mxu0 }
 0x24c   : > { %v1547_v35 = vadd.f32 %v1546_v60, %v11953_v31 }
 0x24d   : > { %v11977_v56 = vpop.f32.mrf.mxu0 }
 0x24e   : > { %v12025_v22 = vpack.c.bf16 %v1547_v35, %v1543_v16  ;;  %v1549_v48 = vadd.f32 %v11977_v56, %v11994_v24  ;;  %v1529_v56 = vadd.f32 %v11969_v51, %v11994_v24 }
 0x24f   : > { %v1552_v36 = vpop.f32.mrf.mxu0 }
 0x250   : > { %v1553_v42 = vadd.f32 %v1552_v36, %v11953_v31  ;;  %16674 = vst [vmem:[#allocation14_spill] sm:$0xff] %v12025_v22 }
 0x251   : > { %v1554_v37 = vpop.f32.mrf.mxu0 }
 0x252   : > { %v1555_v60 = vadd.f32 %v1554_v37, %v11994_v24  ;;  %v1539_v37 = vadd.f32 %v11973_v32, %v11994_v24  ;;  %v1519_v32 = vadd.f32 %v11959_v18, %v11994_v24 }
 0x253   : > { %v1556_v1 = vpop.f32.mrf.mxu0 }
 0x254   : > { %v1557_v6 = vadd.f32 %v1556_v1, %v11953_v31  ;;  %v1545_v1 = vadd.f32 %v11975_v49, %v11994_v24  ;;  %v1525_v49 = vadd.f32 %v11967_v14, %v11994_v24 }
 0x255   : > { %v1558_v0 = vpop.f32.mrf.mxu0 }
 0x256   : > { %v12001_v38 = vpack.c.bf16 %v1557_v6, %v1553_v42  ;;  %v1559_v29 = vadd.f32 %v1558_v0, %v11994_v24  ;;  %v12058_v0 = vpack.c.bf16 %v1549_v48, %v1545_v1 }
 0x257   : > { %v1562_v44 = vpop.f32.mrf.mxu0 }
 0x258   : > { %v1563_v33 = vadd.f32 %v1562_v44, %v11953_v31  ;;  %16669 = vst [vmem:[#allocation9_spill] sm:$0xff] %v12001_v38  ;;  %v12050_v36 = vpack.c.bf16 %v1559_v29, %v1555_v60  ;;  %16678 = vst [vmem:[#allocation18_spill] sm:$0xff] %v12058_v0  ;;  %v1535_v44 = vadd.f32 %v11971_v61, %v11994_v24 }
 0x259   : > { %v1564_v28 = vpop.f32.mrf.mxu0  ;;  %v1515_v61 = vadd.f32 %v11955_v17, %v11994_v24 }
 0x25a   : > { %v1565_v58 = vadd.f32 %v1564_v28, %v11994_v24  ;;  %16677 = vst [vmem:[#allocation17_spill] sm:$0xff] %v12050_v36  ;;  %v12066_v28 = vpack.c.bf16 %v1539_v37, %v1535_v44 }
 0x25b   : > { %v1566_v40 = vpop.f32.mrf.mxu0  ;;  %v12080_v51 = vpack.c.bf16 %v1519_v32, %v1515_v61 }
 0x25c   : > { %v1567_v52 = vadd.f32 %v1566_v40, %v11953_v31  ;;  %16679 = vst [vmem:[#allocation19_spill] sm:$0xff] %v12066_v28  ;;  %v12074_v40 = vpack.c.bf16 %v1529_v56, %v1525_v49 }
 0x25d   : > { %v1568_v20 = vpop.f32.mrf.mxu0  ;;  %16681 = vst [vmem:[#allocation21_spill] sm:$0xff] %v12080_v51 }
 0x25e   : > { %v11989_v4 = vpack.c.bf16 %v1567_v52, %v1563_v33  ;;  %v1569_v55 = vadd.f32 %v1568_v20, %v11994_v24  ;;  %16680 = vst [vmem:[#allocation20_spill] sm:$0xff] %v12074_v40 }
 0x25f   : > { %v1572_v34 = vpop.f32.mrf.mxu0 }
 0x260   : > { %v1573_v19 = vadd.f32 %v1572_v34, %v11953_v31  ;;  %v12037_v41 = vpack.c.bf16 %v1569_v55, %v1565_v58 }
 0x261   : > { %v1574_v10 = vpop.f32.mrf.mxu0 }
 0x262   : > { %v1575_v9 = vadd.f32 %v1574_v10, %v11994_v24  ;;  %16675 = vst [vmem:[#allocation15_spill] sm:$0xff] %v12037_v41 }
 0x263   : > { %v1576_v46 = vpop.f32.mrf.mxu0 }
 0x264   : > { %v1577_v25 = vadd.f32 %v1576_v46, %v11953_v31 }
 0x265   : > { %v1578_v47 = vpop.f32.mrf.mxu0 }
 0x266   : > { %v11982_v50 = vpack.c.bf16 %v1577_v25, %v1573_v19  ;;  %v1579_v57 = vadd.f32 %v1578_v47, %v11994_v24 }
 0x267   : > { %v1582_v27 = vpop.f32.mrf.mxu0 }
 0x268   : > { %1723 = vrot.lane.b32.xlu1 %v11982_v50, %s11174_s15  ;;  %v1583_v23 = vadd.f32 %v1582_v27, %v11953_v31  ;;  %v12021_v63 = vpack.c.bf16 %v1579_v57, %v1575_v9 }
 0x269   : > { %v1584_v62 = vpop.f32.mrf.mxu0 }
 0x26a   : > { %v1585_v15 = vadd.f32 %v1584_v62, %v11994_v24  ;;  %16673 = vst [vmem:[#allocation13_spill] sm:$0xff] %v12021_v63 }
 0x26b   : > { %v1586_v3 = vpop.f32.mrf.mxu0 }
 0x26c   : > { %v1587_v2 = vadd.f32 %v1586_v3, %v11953_v31  ;;  %1721 = vrot.lane.b32.xlu1 %v11989_v4, %s11174_s15 }
 0x26d   : > { %v1588_v5 = vpop.f32.mrf.mxu0 }
 0x26e   : > { %v12005_v43 = vpack.c.bf16 %v1587_v2, %v1583_v23  ;;  %v1589_v39 = vadd.f32 %v1588_v5, %v11994_v24 }
 0x26f   : > { %v1592_v14 = vpop.f32.mrf.mxu0 }
 0x270   : > { %16670 = vst [vmem:[#allocation10_spill] sm:$0xff] %v12005_v43  ;;  %v12011_v26 = vpack.c.bf16 %v1589_v39, %v1585_v15  ;;  %1719 = vrot.lane.b32.xlu1 %v12001_v38, %s11174_s15  ;;  %1725 = vrot.lane.b32.xlu0 %v12005_v43, %s11174_s15 }
 0x271   : > { %v12085_v20 = vpop.f32.mrf.mxu0 }
 0x272   : > { %16671 = vst [vmem:[#allocation11_spill] sm:$0xff] %v12011_v26  ;;  %9233 = vmatprep.subr.bf16.mxu0 %v12011_v26 }
 0x273   : > { %9234 = vmatpush3.bf16.msra.mxu0 %v12011_v26  ;;  %v1596_v18 = vpop.f32.mrf.mxu0 }
 0x274   : > { %1715 = vrot.lane.b32.xlu1 %v12018_v30, %s11174_s15  ;;  %9235 = vmatprep.subr.bf16.mxu0 %v12021_v63 }
 0x275   : > { %1717 = vrot.lane.b32.xlu0 %v12025_v22, %s11174_s15  ;;  %v12087_v34 = vpop.f32.mrf.mxu0 }
 0x277   : > { %9236 = vmatpush3.bf16.msra.mxu0 %v12021_v63  ;;  %v12089_v10 = vpop.f32.mrf.mxu0 }
 0x278   : > { %1711 = vrot.lane.b32.xlu1 %v11961_v21, %s11174_s15  ;;  %9237 = vmatprep.subr.bf16.mxu0 %v12037_v41 }
 0x279   : > { %1713 = vrot.lane.b32.xlu0 %v12039_v53, %s11174_s15  ;;  %v12091_v46 = vpop.f32.mrf.mxu0 }
 0x27b   : > { %9238 = vmatpush3.bf16.msra.mxu0 %v12037_v41  ;;  %v12093_v17 = vpop.f32.mrf.mxu0 }
 0x27c   : > { %9239 = vmatprep.subr.bf16.mxu0 %v12050_v36 }
 0x27d   : > { %v12095_v19 = vpop.f32.mrf.mxu0 }
 0x27f   : > { %9240 = vmatpush3.bf16.msra.mxu0 %v12050_v36 }
 0x280   : > { %9241 = vmatprep.subr.bf16.mxu0 %v12058_v0 }
 0x283   : > { %9242 = vmatpush3.bf16.msra.mxu0 %v12058_v0 }
 0x284   : > { %9243 = vmatprep.subr.bf16.mxu0 %v12066_v28 }
 0x287   : > { %9244 = vmatpush3.bf16.msra.mxu0 %v12066_v28 }
 0x288   : > { %9245 = vmatprep.subr.bf16.mxu0 %v12074_v40 }
 0x28b   : > { %9246 = vmatpush3.bf16.msra.mxu0 %v12074_v40 }
 0x28c   : > { %9247 = vmatprep.subr.bf16.mxu0 %v12080_v51 }
 0x28f   : > { %9248 = vmatpush3.bf16.msra.mxu0 %v12080_v51 }
 0x2c3   : > { %v1612_v25 = vpop.f32.mrf.mxu0 }
 0x2c5   : > { %v12097_v47 = vpop.f32.mrf.mxu0 }
 0x2c7   : > { %v1616_v52 = vpop.f32.mrf.mxu0 }
 0x2c8   : > { %v1617_v32 = vadd.f32 %v1616_v52, %v11953_v31 }
 0x2c9   : > { %v12099_v27 = vpop.f32.mrf.mxu0 }
 0x2cb   : > { %v1622_v33 = vpop.f32.mrf.mxu0 }
 0x2cd   : > { %v12101_v6 = vpop.f32.mrf.mxu0 }
 0x2cf   : > { %v1626_v62 = vpop.f32.mrf.mxu0 }
 0x2d1   : > { %v12103_v42 = vpop.f32.mrf.mxu0 }
 0x2d3   : > { %v1632_v3 = vpop.f32.mrf.mxu0 }
 0x2d4   : > { %v1633_v44 = vadd.f32 %v1632_v3, %v11953_v31 }
 0x2d5   : > { %v12105_v23 = vpop.f32.mrf.mxu0 }
 0x2d7   : > { %v1636_v2 = vpop.f32.mrf.mxu0 }
 0x2d8   : > { %v1637_v60 = vadd.f32 %v1636_v2, %v11953_v31 }
 0x2d9   : > { %v12107_v8 = vpop.f32.mrf.mxu0 }
 0x2da   : > { %v1724_v16 = vpop.permute.xlu1 %1723  ;;  %v12133_v61 = vpack.c.bf16 %v1637_v60, %v1633_v44 }
 0x2db   : > { %v1642_v5 = vpop.f32.mrf.mxu0  ;;  %v1771_v37 = vsel %vm1727_vm2, %v1724_v16, 0 }
 0x2dc   : > { %16683 = vst [vmem:[#allocation23_spill] sm:$0xff] %v12133_v61  ;;  %v1643_v60 = vadd.f32 %v1642_v5, %v11953_v31  ;;  %v1607_v5 = vadd.f32 %v12093_v17, %v11953_v31 }
 0x2dd   : > { %v12109_v57 = vpop.f32.mrf.mxu0 }
 0x2de   : > { %v1722_v56 = vpop.permute.xlu1 %1721 }
 0x2df   : > { %v1646_v15 = vpop.f32.mrf.mxu0 }
 0x2e0   : > { %v1647_v52 = vadd.f32 %v1646_v15, %v11953_v31  ;;  %v1627_v15 = vadd.f32 %v1626_v62, %v11953_v31  ;;  %v1603_v62 = vadd.f32 %v12089_v10, %v11953_v31 }
 0x2e1   : > { %v12111_v39 = vpop.f32.mrf.mxu0 }
 0x2e2   : > { %v1726_v35 = vpop.permute.xlu0 %1725 }
 0x2e3   : > { %9729 = vmatprep.subr.msk.bf16.mxu1 %vm1727_vm2, %v1726_v35  ;;  %v1652_v7 = vpop.f32.mrf.mxu0  ;;  %v1774_v9 = vsel %vm1727_vm2, %v1726_v35, 0  ;;  %v1613_v35 = vadd.f32 %v1612_v25, %v11953_v31  ;;  %v1720_v25 = vpop.permute.xlu1 %1719 }
 0x2e4   : > { %9170 = vmatpush3.bf16.xpose.msra.mxu1 %v1774_v9  ;;  %v1653_v58 = vadd.f32 %v1652_v7, %v11953_v31  ;;  %v1597_v9 = vadd.f32 %v1596_v18, %v11953_v31  ;;  %v1765_v44 = vsel %vm1727_vm2, %v1720_v25, 0 }
 0x2e5   : > { %9730 = vmatprep.subr.msk.bf16.mxu1 %vm1727_vm2, %v1724_v16  ;;  %v12116_v55 = vpop.f32.mrf.mxu0  ;;  %v12141_v16 = vpack.c.bf16 %v1617_v32, %v1613_v35 }
 0x2e7   : > { %v1656_v45 = vpop.f32.mrf.mxu0  ;;  %16684 = vst [vmem:[#allocation24_spill] sm:$0xff] %v12141_v16  ;;  %v1716_v32 = vpop.permute.xlu1 %1715 }
 0x2e8   : > { %v1657_v12 = vadd.f32 %v1656_v45, %v11953_v31 }
 0x2e9   : > { %v12120_v29 = vpop.f32.mrf.mxu0 }
 0x2ea   : > { %v12123_v48 = vpack.c.bf16 %v1657_v12, %v1653_v58  ;;  %v1768_v58 = vsel %vm1727_vm2, %v1722_v56, 0  ;;  %v1593_v12 = vadd.f32 %v1592_v14, %v11953_v31  ;;  %v1623_v14 = vadd.f32 %v1622_v33, %v11953_v31 }
 0x2eb   : > { %v1662_v1 = vpop.f32.mrf.mxu0  ;;  %v12176_v33 = vpack.c.bf16 %v1607_v5, %v1603_v62  ;;  %v1712_v35 = vpop.permute.xlu1 %1711 }
 0x2ec   : > { %16682 = vst [vmem:[#allocation22_spill] sm:$0xff] %v12123_v48  ;;  %9172 = vmatpush3.bf16.xpose.msra.mxu1 %v1771_v37  ;;  %1893 = vrot.lane.b32.xlu1 %v12123_v48, %s11174_s15  ;;  %v1663_v7 = vadd.f32 %v1662_v1, %v11953_v31  ;;  %v12154_v18 = vpack.c.bf16 %v1597_v9, %v1593_v12 }
 0x2ed   : > { %9731 = vmatprep.subr.msk.bf16.mxu1 %vm1727_vm2, %v1722_v56  ;;  %v12130_v49 = vpop.f32.mrf.mxu0  ;;  %v12157_v1 = vpack.c.bf16 %v1647_v52, %v1643_v60  ;;  %v12166_v37 = vpack.c.bf16 %v1627_v15, %v1623_v14  ;;  %v1718_v56 = vpop.permute.xlu0 %1717  ;;  %16687 = vst [vmem:[#allocation27_spill] sm:$0xff] %v12176_v33 }
 0x2ee   : > { %v1762_v17 = vsel %vm1727_vm2, %v1718_v56, 0 }
 0x2ef   : > { %v1666_v2 = vpop.f32.mrf.mxu0  ;;  %16686 = vst [vmem:[#allocation26_spill] sm:$0xff] %v12157_v1 }
 0x2f0   : > { %v1667_v3 = vadd.f32 %v1666_v2, %v11953_v31  ;;  %1889 = vrot.lane.b32.xlu1 %v12133_v61, %s11174_s15  ;;  %v1759_v31 = vsel %vm1727_vm2, %v1716_v32, 0 }
 0x2f1   : > { %v1714_v10 = vpop.permute.xlu0 %1713 }
 0x2f2   : > { %v12143_v45 = vpack.c.bf16 %v1667_v3, %v1663_v7  ;;  %v1756_v2 = vsel %vm1727_vm2, %v1714_v10, 0  ;;  %v1753_v7 = vsel %vm1727_vm2, %v1712_v35, 0 }
 0x2f4   : > { %16685 = vst [vmem:[#allocation25_spill] sm:$0xff] %v12143_v45  ;;  %9174 = vmatpush3.bf16.xpose.msra.mxu1 %v1768_v58  ;;  %1885 = vrot.lane.b32.xlu1 %v12141_v16, %s11174_s15 }
 0x2f5   : > { %1895 = vrot.lane.b32.xlu0 %v12143_v45, %s11174_s15  ;;  %9732 = vmatprep.subr.msk.bf16.mxu1 %vm1727_vm2, %v1720_v25 }
 0x2f8   : > { %1881 = vrot.lane.b32.xlu1 %v12154_v18, %s11174_s15 }
 0x2f9   : > { %1891 = vrot.lane.b32.xlu0 %v12157_v1, %s11174_s15 }
 0x2fc   : > { %9176 = vmatpush3.bf16.xpose.msra.mxu1 %v1765_v44  ;;  %2568 = vrot.lane.b32.xlu1 %v11982_v50, %s11175_s16 }
 0x2fd   : > { %1887 = vrot.lane.b32.xlu0 %v12166_v37, %s11174_s15  ;;  %9733 = vmatprep.subr.msk.bf16.mxu1 %vm1727_vm2, %v1718_v56 }
 0x300   : > { %2562 = vrot.lane.b32.xlu1 %v12025_v22, %s11175_s16 }
 0x301   : > { %1883 = vrot.lane.b32.xlu0 %v12176_v33, %s11174_s15 }
 0x304   : > { %9178 = vmatpush3.bf16.xpose.msra.mxu1 %v1762_v17  ;;  %2558 = vrot.lane.b32.xlu1 %v12039_v53, %s11175_s16 }
 0x305   : > { %2570 = vrot.lane.b32.xlu0 %v12005_v43, %s11175_s16  ;;  %9734 = vmatprep.subr.msk.bf16.mxu1 %vm1727_vm2, %v1716_v32 }
 0x308   : > { %2745 = vrot.lane.b32.xlu1 %v12123_v48, %s11175_s16 }
 0x309   : > { %2566 = vrot.lane.b32.xlu0 %v11989_v4, %s11175_s16 }
 0x30c   : > { %9180 = vmatpush3.bf16.xpose.msra.mxu1 %v1759_v31  ;;  %2741 = vrot.lane.b32.xlu1 %v12133_v61, %s11175_s16 }
 0x30d   : > { %2564 = vrot.lane.b32.xlu0 %v12001_v38, %s11175_s16  ;;  %9735 = vmatprep.subr.msk.bf16.mxu1 %vm1727_vm2, %v1714_v10 }
 0x310   : > { %2544 = vrot.lane.b32.xlu1 %v12018_v30, %s11176_s19 }
 0x311   : > { %2560 = vrot.lane.b32.xlu0 %v12018_v30, %s11175_s16 }
 0x314   : > { %9182 = vmatpush3.bf16.xpose.msra.mxu1 %v1756_v2  ;;  %2737 = vrot.lane.b32.xlu1 %v12141_v16, %s11175_s16  ;;  %v1668_v2 = vpop.f32.mrf.mxu0 }
 0x315   : > { %2556 = vrot.lane.b32.xlu0 %v11961_v21, %s11175_s16  ;;  %9736 = vmatprep.subr.msk.bf16.mxu1 %vm1727_vm2, %v1712_v35 }
 0x319   : > { %2540 = vrot.lane.b32.xlu0 %v11961_v21, %s11176_s19 }
 0x31c   : > { %9184 = vmatpush3.bf16.xpose.msra.mxu1 %v1753_v7 }
 0x31d   : > { %2542 = vrot.lane.b32.xlu0 %v12039_v53, %s11176_s19 }
 0x321   : > { %2743 = vrot.lane.b32.xlu0 %v12157_v1, %s11175_s16 }
 0x323   : > { %9186 = vmatmul.mubr.msk.bf16.vlgmr.msra.gmra.mxu1 %vm1727_vm2, %v12039_v53  ;;  %v12470_v53 = vld [vmem:[%s16702_s26 + $0x78] sm:$0xff] }
 0x324   : > { %9189 = vmatprep.mubr.msk.bf16.mxu1 %vm1727_vm2, %v12018_v30 }
 0x325   : > { %2739 = vrot.lane.b32.xlu0 %v12166_v37, %s11175_s16 }
 0x329   : > { %2546 = vrot.lane.b32.xlu0 %v12025_v22, %s11176_s19 }
 0x32b   : > { %9190 = vmatmul.mubr.msk.bf16.gmra.mxu1 %vm1727_vm2, %v12025_v22 }
 0x32c   : > { %9193 = vmatprep.mubr.msk.bf16.mxu1 %vm1727_vm2, %v12001_v38 }
 0x32d   : > { %2747 = vrot.lane.b32.xlu0 %v12143_v45, %s11175_s16 }
 0x333   : > { %9194 = vmatmul.mubr.msk.bf16.gmra.mxu1 %vm1727_vm2, %v11989_v4 }
 0x334   : > { %9197 = vmatprep.mubr.msk.bf16.mxu1 %vm1727_vm2, %v11982_v50 }
 0x33b   : > { %9198 = vmatmul.mubr.msk.bf16.gmra.mxu1 %vm1727_vm2, %v12005_v43 }
 0x33c   : > { %9217 = vmatprep.mubr.msk.bf16.mxu1 %vm1727_vm2, %v12154_v18 }
 0x35e   : > { %v1894_v52 = vpop.permute.xlu1 %1893 }
 0x35f   : > { %v1940_v25 = vsel %vm1727_vm2, %v1894_v52, 0 }
 0x362   : > { %v1890_v5 = vpop.permute.xlu1 %1889 }
 0x363   : > { %v1934_v44 = vsel %vm1727_vm2, %v1890_v5, 0 }
 0x366   : > { %v1886_v62 = vpop.permute.xlu1 %1885 }
 0x367   : > { %v1896_v3 = vpop.permute.xlu0 %1895  ;;  %v1928_v32 = vsel %vm1727_vm2, %v1886_v62, 0 }
 0x368   : > { %9737 = vmatprep.subr.msk.bf16.mxu1 %vm1727_vm2, %v1896_v3  ;;  %v1943_v9 = vsel %vm1727_vm2, %v1896_v3, 0  ;;  %v1669_v3 = vadd.f32 %v1668_v2, %v11994_v24  ;;  %v1609_v2 = vadd.f32 %v12095_v19, %v11994_v24  ;;  %v1599_v19 = vadd.f32 %v12087_v34, %v11994_v24 }
 0x369   : > { %9202 = vmatpush3.bf16.xpose.msra.mxu1 %v1943_v9  ;;  %v1665_v9 = vadd.f32 %v12130_v49, %v11994_v24  ;;  %v1649_v49 = vadd.f32 %v12111_v39, %v11994_v24 }
 0x36a   : > { %9738 = vmatprep.subr.msk.bf16.mxu1 %vm1727_vm2, %v1894_v52  ;;  %v1882_v35 = vpop.permute.xlu1 %1881 }
 0x36b   : > { %v1892_v58 = vpop.permute.xlu0 %1891  ;;  %v12265_v52 = vpack.c.bf16 %v1669_v3, %v1665_v9  ;;  %v1595_v3 = vadd.f32 %v12085_v20, %v11994_v24 }
 0x36c   : > { %v1937_v14 = vsel %vm1727_vm2, %v1892_v58, 0 }
 0x36d   : > { %16688 = vst [vmem:[#allocation28_spill] sm:$0xff] %v12265_v52 }
 0x36e   : > { %v12500_v30 = vpop.permute.xlu1 %2568 }
 0x36f   : > { %v1888_v12 = vpop.permute.xlu0 %1887 }
 0x370   : > { %v1931_v56 = vsel %vm1727_vm2, %v1888_v12, 0 }
 0x371   : > { %9204 = vmatpush3.bf16.xpose.msra.mxu1 %v1940_v25  ;;  %v1659_v25 = vadd.f32 %v12120_v29, %v11994_v24  ;;  %v1645_v29 = vadd.f32 %v12109_v57, %v11994_v24 }
 0x372   : > { %9739 = vmatprep.subr.msk.bf16.mxu1 %vm1727_vm2, %v1892_v58  ;;  %v1922_v58 = vsel %vm1727_vm2, %v1882_v35, 0  ;;  %v12502_v40 = vpop.permute.xlu1 %2562 }
 0x373   : > { %v1884_v60 = vpop.permute.xlu0 %1883 }
 0x374   : > { %v1925_v10 = vsel %vm1727_vm2, %v1884_v60, 0 }
 0x377   : > { %v12242_v15 = vpop.permute.xlu0 %2570 }
 0x378   : > { %9745 = vmatprep.subr.msk.bf16.mxu0 %vm1727_vm2, %v12242_v15 }
 0x379   : > { %9206 = vmatpush3.bf16.xpose.msra.mxu1 %v1937_v14 }
 0x37a   : > { %9740 = vmatprep.subr.msk.bf16.mxu1 %vm1727_vm2, %v1890_v5 }
 0x37b   : > { %v12252_v17 = vpop.permute.xlu0 %2566 }
 0x37f   : > { %v12256_v31 = vpop.permute.xlu0 %2564 }
 0x381   : > { %9208 = vmatpush3.bf16.xpose.msra.mxu1 %v1934_v44  ;;  %v12291_v44 = vpack.c.bf16 %v1649_v49, %v1645_v29  ;;  %v12373_v29 = vld [vmem:[%s16702_s26 + $0x8] sm:$0xff] }
 0x382   : > { %9741 = vmatprep.subr.msk.bf16.mxu1 %vm1727_vm2, %v1888_v12 }
 0x383   : > { %v12260_v7 = vpop.permute.xlu0 %2560  ;;  %16691 = vst [vmem:[#allocation31_spill] sm:$0xff] %v12291_v44 }
 0x387   : > { %v12268_v12 = vpop.permute.xlu0 %2556 }
 0x389   : > { %9210 = vmatpush3.bf16.xpose.msra.mxu1 %v1931_v56  ;;  %v1635_v56 = vadd.f32 %v12105_v23, %v11994_v24 }
 0x38a   : > { %9742 = vmatprep.subr.msk.bf16.mxu1 %vm1727_vm2, %v1886_v62  ;;  %v1629_v62 = vadd.f32 %v12103_v42, %v11994_v24  ;;  %v1619_v42 = vadd.f32 %v12099_v27, %v11994_v24 }
 0x38b   : > { %v12275_v14 = vpop.permute.xlu0 %2540 }
 0x38c   : > { %16689 = vst [vmem:[#allocation29_spill] sm:$0xff] %v12275_v14 }
 0x38f   : > { %v12293_v39 = vpop.permute.xlu0 %2542 }
 0x390   : > { %16692 = vst [vmem:[#allocation32_spill] sm:$0xff] %v12293_v39 }
 0x391   : > { %9212 = vmatpush3.bf16.xpose.msra.mxu1 %v1928_v32 }
 0x392   : > { %9743 = vmatprep.subr.msk.bf16.mxu1 %vm1727_vm2, %v1884_v60  ;;  %v1655_v60 = vadd.f32 %v12116_v55, %v11994_v24  ;;  %v1639_v55 = vadd.f32 %v12107_v8, %v11994_v24  ;;  %v1625_v8 = vadd.f32 %v12101_v6, %v11994_v24 }
 0x393   : > { %v12311_v23 = vpop.permute.xlu0 %2743 }
 0x394   : > { %v12279_v5 = vpack.c.bf16 %v1659_v25, %v1655_v60  ;;  %v12301_v57 = vpack.c.bf16 %v1639_v55, %v1635_v56  ;;  %16694 = vst [vmem:[#allocation34_spill] sm:$0xff] %v12311_v23  ;;  %v12315_v32 = vpack.c.bf16 %v1629_v62, %v1625_v8  ;;  %v12367_v60 = vld [vmem:[%s16702_s26] sm:$0xff]  ;;  %v12381_v56 = vld [vmem:[%s16702_s26 + $0x18] sm:$0xff] }
 0x396   : > { %16690 = vst [vmem:[#allocation30_spill] sm:$0xff] %v12279_v5  ;;  %16693 = vst [vmem:[#allocation33_spill] sm:$0xff] %v12301_v57 }
 0x397   : > { %16695 = vst [vmem:[#allocation35_spill] sm:$0xff] %v12315_v32 }
 0x399   : > { %9214 = vmatpush3.bf16.xpose.msra.mxu1 %v1925_v10  ;;  %v1615_v10 = vadd.f32 %v12097_v47, %v11994_v24  ;;  %v1605_v47 = vadd.f32 %v12091_v46, %v11994_v24  ;;  %v12359_v24 = vld [vmem:[%s16702_s26 + $0x10] sm:$0xff] }
 0x39a   : > { %9744 = vmatprep.subr.msk.bf16.mxu1 %vm1727_vm2, %v1882_v35  ;;  %v12327_v35 = vpop.permute.xlu0 %2739 }
 0x39b   : > { %v12323_v6 = vpack.c.bf16 %v1619_v42, %v1615_v10  ;;  %16697 = vst [vmem:[#allocation37_spill] sm:$0xff] %v12327_v35  ;;  %v12337_v27 = vpack.c.bf16 %v1609_v2, %v1605_v47  ;;  %v12394_v2 = vld [vmem:[%s16702_s26 + $0x30] sm:$0xff]  ;;  %v12434_v35 = vld [vmem:[%s16702_s26 + $0x58] sm:$0xff] }
 0x39d   : > { %16696 = vst [vmem:[#allocation36_spill] sm:$0xff] %v12323_v6  ;;  %16698 = vst [vmem:[#allocation38_spill] sm:$0xff] %v12337_v27 }
 0x39e   : > { %v12343_v9 = vpop.permute.xlu0 %2546 }
 0x39f   : > { %16699 = vst [vmem:[#allocation39_spill] sm:$0xff] %v12343_v9  ;;  %v12488_v9 = vld [vmem:[%s16702_s26 + $0x68] sm:$0xff] }
 0x3a1   : > { %9216 = vmatpush3.bf16.xpose.msra.mxu1 %v1922_v58  ;;  %v12345_v58 = vpack.c.bf16 %v1599_v19, %v1595_v3  ;;  %v12399_v19 = vld [vmem:[%s16702_s26 + $0x38] sm:$0xff] }
 0x3a2   : > { %9265 = vmatprep.subr.bf16.mxu1 %v12265_v52  ;;  %v12351_v34 = vpop.permute.xlu0 %2747 }
 0x3a3   : > { %16700 = vst [vmem:[#allocation40_spill] sm:$0xff] %v12345_v58  ;;  %16701 = vst [vmem:[#allocation41_spill] sm:$0xff] %v12351_v34 }
 0x3a8   : > { %9218 = vmatmul.mubr.msk.bf16.vlgmr.msra.gmra.mxu1 %vm1727_vm2, %v12176_v33 }
 0x3a9   : > { %9221 = vmatprep.mubr.msk.bf16.mxu1 %vm1727_vm2, %v12141_v16  ;;  %9266 = vmatpush3.bf16.msra.mxu1 %v12265_v52 }
 0x3aa   : > { %9267 = vmatprep.subr.bf16.mxu1 %v12279_v5 }
 0x3ad   : > { %9268 = vmatpush3.bf16.msra.mxu1 %v12279_v5  ;;  %v12504_v5 = vpop.permute.xlu1 %2558 }
 0x3ae   : > { %9269 = vmatprep.subr.bf16.mxu1 %v12291_v44 }
 0x3b0   : > { %9222 = vmatmul.mubr.msk.bf16.gmra.mxu1 %vm1727_vm2, %v12166_v37 }
 0x3b1   : > { %9225 = vmatprep.mubr.msk.bf16.mxu1 %vm1727_vm2, %v12133_v61  ;;  %9270 = vmatpush3.bf16.msra.mxu1 %v12291_v44 }
 0x3b2   : > { %9271 = vmatprep.subr.bf16.mxu1 %v12301_v57 }
 0x3b5   : > { %9272 = vmatpush3.bf16.msra.mxu1 %v12301_v57 }
 0x3b6   : > { %9273 = vmatprep.subr.bf16.mxu1 %v12315_v32 }
 0x3b8   : > { %9226 = vmatmul.mubr.msk.bf16.gmra.mxu1 %vm1727_vm2, %v12157_v1 }
 0x3b9   : > { %9229 = vmatprep.mubr.msk.bf16.mxu1 %vm1727_vm2, %v12123_v48  ;;  %9274 = vmatpush3.bf16.msra.mxu1 %v12315_v32  ;;  %v12483_v32 = vld [vmem:[%s16702_s26 + $0x60] sm:$0xff] }
 0x3ba   : > { %9275 = vmatprep.subr.bf16.mxu1 %v12323_v6 }
 0x3bd   : > { %9276 = vmatpush3.bf16.msra.mxu1 %v12323_v6 }
 0x3be   : > { %9277 = vmatprep.subr.bf16.mxu1 %v12337_v27 }
 0x3c0   : > { %9230 = vmatmul.mubr.msk.bf16.gmra.mxu1 %vm1727_vm2, %v12143_v45 }
 0x3c1   : > { %9278 = vmatpush3.bf16.msra.mxu1 %v12337_v27  ;;  %v12465_v27 = vld [vmem:[%s16702_s26 + $0x70] sm:$0xff] }
 0x3c2   : > { %9279 = vmatprep.subr.bf16.mxu1 %v12345_v58 }
 0x3c5   : > { %9280 = vmatpush3.bf16.msra.mxu1 %v12345_v58  ;;  %v12452_v58 = vld [vmem:[%s16702_s26 + $0x48] sm:$0xff] }
 0x3c6   : > { %9753 = vmatprep.subr.msk.bf16.mxu1 %vm1727_vm2, %v12351_v34  ;;  %v12447_v34 = vld [vmem:[%s16702_s26 + $0x40] sm:$0xff] }
 0x3e3   : > { %v9187_v20 = vpop.f32.mrf.mxu1 }
 0x3e4   : > { %v12362_v46 = vadd.f32 %v9187_v20, %v12359_v24 }
 0x3e5   : > { %v1810_v25 = vpop.f32.mrf.mxu1 }
 0x3e6   : > { %2046 = vmax.xlane.f32.xlu0 %v12362_v46  ;;  %v12376_v55 = vadd.f32 %v1810_v25, %v12367_v60 }
 0x3e7   : > { %v9188_v49 = vpop.f32.mrf.mxu1 }
 0x3e8   : > { %v12388_v10 = vadd.f32 %v9188_v49, %v12381_v56  ;;  %v12411_v49 = vld [vmem:[%s16702_s26 + $0x20] sm:$0xff] }
 0x3e9   : > { %v1813_v62 = vpop.f32.mrf.mxu1 }
 0x3ea   : > { %2042 = vmax.xlane.f32.xlu0 %v12376_v55  ;;  %v12385_v8 = vadd.f32 %v1813_v62, %v12373_v29 }
 0x3eb   : > { %v9191_v42 = vpop.f32.mrf.mxu1 }
 0x3ec   : > { %2044 = vmax.xlane.f32.xlu1 %v12385_v8  ;;  %v12403_v20 = vadd.f32 %v9191_v42, %v12394_v2 }
 0x3ed   : > { %v1826_v47 = vpop.f32.mrf.mxu1 }
 0x3ee   : > { %2048 = vmax.xlane.f32.xlu0 %v12388_v10  ;;  %v12421_v54 = vadd.f32 %v1826_v47, %v12411_v49 }
 0x3ef   : > { %v9192_v3 = vpop.f32.mrf.mxu1 }
 0x3f0   : > { %v12406_v25 = vadd.f32 %v9192_v3, %v12399_v19 }
 0x3f1   : > { %v1829_v62 = vpop.f32.mrf.mxu1 }
 0x3f2   : > { %2056 = vmax.xlane.f32.xlu1 %v12406_v25  ;;  %2054 = vmax.xlane.f32.xlu0 %v12403_v20  ;;  %v12424_v3 = vadd.f32 %v1829_v62, %v12416_v59 }
 0x3f3   : > { %v9195_v42 = vpop.f32.mrf.mxu1 }
 0x3f4   : > { %v12439_v23 = vadd.f32 %v9195_v42, %v12429_v13 }
 0x3f5   : > { %v1842_v11 = vpop.f32.mrf.mxu1 }
 0x3f6   : > { %2052 = vmax.xlane.f32.xlu1 %v12424_v3  ;;  %2050 = vmax.xlane.f32.xlu0 %v12421_v54  ;;  %v12457_v6 = vadd.f32 %v1842_v11, %v12447_v34 }
 0x3f7   : > { %v9196_v47 = vpop.f32.mrf.mxu1 }
 0x3f8   : > { %v12442_v62 = vadd.f32 %v9196_v47, %v12434_v35 }
 0x3f9   : > { %v1845_v21 = vpop.f32.mrf.mxu1 }
 0x3fa   : > { %2064 = vmax.xlane.f32.xlu1 %v12442_v62  ;;  %2062 = vmax.xlane.f32.xlu0 %v12439_v23  ;;  %v12460_v47 = vadd.f32 %v1845_v21, %v12452_v58 }
 0x3fb   : > { %v9199_v42 = vpop.f32.mrf.mxu1 }
 0x3fc   : > { %v12475_v22 = vadd.f32 %v9199_v42, %v12465_v27 }
 0x3fd   : > { %v1858_v44 = vpop.f32.mrf.mxu1 }
 0x3fe   : > { %2060 = vmax.xlane.f32.xlu1 %v12460_v47  ;;  %2058 = vmax.xlane.f32.xlu0 %v12457_v6  ;;  %v12493_v42 = vadd.f32 %v1858_v44, %v12483_v32  ;;  %v12509_v44 = vpop.permute.xlu1 %2745 }
 0x3ff   : > { %v9200_v11 = vpop.f32.mrf.mxu1  ;;  %16703 = vst [vmem:[#allocation42_spill] sm:$0xff] %v12509_v44 }
 0x400   : > { %v12478_v21 = vadd.f32 %v9200_v11, %v12470_v53 }
 0x401   : > { %v1861_v57 = vpop.f32.mrf.mxu1 }
 0x402   : > { %2072 = vmax.xlane.f32.xlu1 %v12478_v21  ;;  %2070 = vmax.xlane.f32.xlu0 %v12475_v22  ;;  %v12496_v11 = vadd.f32 %v1861_v57, %v12488_v9  ;;  %v12521_v51 = vpop.permute.xlu1 %2741 }
 0x403   : > { %16704 = vst [vmem:[#allocation43_spill] sm:$0xff] %v12521_v51 }
 0x406   : > { %2068 = vmax.xlane.f32.xlu1 %v12496_v11  ;;  %2066 = vmax.xlane.f32.xlu0 %v12493_v42 }
 0x468   : > { %v9219_v39 = vpop.f32.mrf.mxu1 }
 0x469   : > { %v12507_v0 = vadd.f32 %v9219_v39, %v12359_v24 }
 0x46a   : > { %v1979_v52 = vpop.f32.mrf.mxu1 }
 0x46b   : > { %2078 = vmax.xlane.f32.xlu0 %v12507_v0  ;;  %v12513_v36 = vadd.f32 %v1979_v52, %v12367_v60 }
 0x46c   : > { %v9220_v57 = vpop.f32.mrf.mxu1 }
 0x46d   : > { %v12516_v14 = vadd.f32 %v9220_v57, %v12381_v56 }
 0x46e   : > { %v1982_v41 = vpop.f32.mrf.mxu1 }
 0x46f   : > { %2080 = vmax.xlane.f32.xlu1 %v12516_v14  ;;  %2074 = vmax.xlane.f32.xlu0 %v12513_v36  ;;  %v2047_v26 = vpop.xlane.xlu0 %2046  ;;  %v12524_v44 = vadd.f32 %v1982_v41, %v12373_v29 }
 0x470   : > { %v2108_v39 = vsub.f32 %v12362_v46, %v2047_v26  ;;  %v9223_v24 = vpop.f32.mrf.mxu1 }
 0x471   : > { %v12527_v52 = vadd.f32 %v9223_v24, %v12394_v2  ;;  %v12538_v24 = vpop.permute.xlu1 %2544 }
 0x472   : > { %v2142_v60 = vmul.f32 1.442695, %v2108_v39  ;;  %v1995_v56 = vpop.f32.mrf.mxu1  ;;  %16705 = vst [vmem:[#allocation44_spill] sm:$0xff] %v12538_v24 }
 0x473   : > { %2076 = vmax.xlane.f32.xlu1 %v12524_v44  ;;  %2086 = vmax.xlane.f32.xlu0 %v12527_v52  ;;  %v2043_v57 = vpop.xlane.xlu0 %2042  ;;  %v12533_v46 = vadd.f32 %v1995_v56, %v12411_v49 }
 0x474   : > { %10173 = vpow2.f32 %v2142_v60  ;;  %v2106_v48 = vsub.f32 %v12376_v55, %v2043_v57  ;;  %v9224_v26 = vpop.f32.mrf.mxu1 }
 0x475   : > { %v12536_v41 = vadd.f32 %v9224_v26, %v12399_v19  ;;  %v12550_v19 = vpop.permute.xlu1 %2737 }
 0x476   : > { %v2138_v29 = vmul.f32 1.442695, %v2106_v48  ;;  %v1998_v2 = vpop.f32.mrf.mxu1  ;;  %16706 = vst [vmem:[#allocation45_spill] sm:$0xff] %v12550_v19 }
 0x477   : > { %2088 = vmax.xlane.f32.xlu1 %v12536_v41  ;;  %2082 = vmax.xlane.f32.xlu0 %v12533_v46  ;;  %v12543_v60 = vadd.f32 %v1998_v2, %v12416_v59  ;;  %v2049_v26 = vpop.xlane.xlu0 %2048 }
 0x478   : > { %10175 = vpow2.f32 %v2138_v29  ;;  %v9227_v39 = vpop.f32.mrf.mxu1  ;;  %v2109_v29 = vsub.f32 %v12388_v10, %v2049_v26 }
 0x479   : > { %v12546_v55 = vadd.f32 %v9227_v39, %v12429_v13  ;;  %v2045_v39 = vpop.xlane.xlu1 %2044 }
 0x47a   : > { %v2011_v49 = vpop.f32.mrf.mxu1 }
 0x47b   : > { %2084 = vmax.xlane.f32.xlu1 %v12543_v60  ;;  %2094 = vmax.xlane.f32.xlu0 %v12546_v55  ;;  %v12553_v56 = vadd.f32 %v2011_v49, %v12447_v34  ;;  %v2107_v34 = vsub.f32 %v12385_v8, %v2045_v39  ;;  %v2144_v49 = vmul.f32 1.442695, %v2109_v29  ;;  %v2055_v39 = vpop.xlane.xlu0 %2054 }
 0x47c   : > { %v9228_v48 = vpop.f32.mrf.mxu1 }
 0x47d   : > { %v12556_v57 = vadd.f32 %v9228_v48, %v12434_v35  ;;  %10177 = vpow2.f32 %v2144_v49 }
 0x47e   : > { %v2014_v59 = vpop.f32.mrf.mxu1 }
 0x47f   : > { %2096 = vmax.xlane.f32.xlu1 %v12556_v57  ;;  %2090 = vmax.xlane.f32.xlu0 %v12553_v56  ;;  %v12564_v2 = vadd.f32 %v2014_v59, %v12452_v58  ;;  %v2140_v58 = vmul.f32 1.442695, %v2107_v34  ;;  %v2051_v49 = vpop.xlane.xlu0 %2050 }
 0x480   : > { %v9231_v19 = vpop.f32.mrf.mxu1 }
 0x481   : > { %v12560_v13 = vpop.eup %10173  ;;  %v12572_v48 = vadd.f32 %v9231_v19, %v12465_v27  ;;  %10179 = vpow2.f32 %v2140_v58  ;;  %v2057_v27 = vpop.xlane.xlu1 %2056 }
 0x482   : > { %v2027_v51 = vpop.f32.mrf.mxu1  ;;  %v2113_v24 = vsub.f32 %v12406_v25, %v2057_v27 }
 0x483   : > { %2092 = vmax.xlane.f32.xlu1 %v12564_v2  ;;  %2206 = vadd.xlane.f32.xlu0 %v12560_v13  ;;  %v12577_v10 = vadd.f32 %v2027_v51, %v12483_v32 }
 0x484   : > { %v9232_v26 = vpop.f32.mrf.mxu1  ;;  %v2152_v63 = vmul.f32 1.442695, %v2113_v24 }
 0x485   : > { %v12568_v35 = vpop.eup %10175  ;;  %v12581_v8 = vadd.f32 %v9232_v26, %v12470_v53  ;;  %v2053_v51 = vpop.xlane.xlu1 %2052 }
 0x486   : > { %v2030_v59 = vpop.f32.mrf.mxu1 }
 0x487   : > { %2102 = vmax.xlane.f32.xlu1 %v12572_v48  ;;  %2202 = vadd.xlane.f32.xlu0 %v12568_v35  ;;  %v12585_v19 = vadd.f32 %v2030_v59, %v12488_v9  ;;  %v2112_v9 = vsub.f32 %v12403_v20, %v2055_v39  ;;  %v2110_v59 = vsub.f32 %v12421_v54, %v2051_v49  ;;  %v2063_v20 = vpop.xlane.xlu0 %2062 }
 0x488   : > { %v2111_v39 = vsub.f32 %v12424_v3, %v2053_v51  ;;  %v2116_v25 = vsub.f32 %v12439_v23, %v2063_v20 }
 0x489   : > { %v2065_v53 = vpop.xlane.xlu1 %2064  ;;  %v2150_v26 = vmul.f32 1.442695, %v2112_v9  ;;  %v2146_v28 = vmul.f32 1.442695, %v2110_v59 }
 0x48a   : > { %v12588_v29 = vpop.eup %10177  ;;  %v2148_v54 = vmul.f32 1.442695, %v2111_v39 }
 0x48b   : > { %2098 = vmax.xlane.f32.xlu1 %v12577_v10  ;;  %10181 = vpow2.f32 %v2150_v26  ;;  %v2059_v49 = vpop.xlane.xlu0 %2058 }
 0x48c   : > { %10183 = vpow2.f32 %v2146_v28  ;;  %v2158_v28 = vmul.f32 1.442695, %v2116_v25 }
 0x48d   : > { %v2061_v34 = vpop.xlane.xlu1 %2060  ;;  %10185 = vpow2.f32 %v2152_v63 }
 0x48e   : > { %v12591_v32 = vpop.eup %10179  ;;  %v2115_v24 = vsub.f32 %v12460_v47, %v2061_v34 }
 0x48f   : > { %2104 = vmax.xlane.f32.xlu1 %v12581_v8  ;;  %v2071_v23 = vpop.xlane.xlu0 %2070 }
 0x490   : > { %v2156_v51 = vmul.f32 1.442695, %v2115_v24 }
 0x491   : > { %v2073_v58 = vpop.xlane.xlu1 %2072 }
 0x492   : > { %v2121_v47 = vsub.f32 %v12478_v21, %v2073_v58 }
 0x493   : > { %2100 = vmax.xlane.f32.xlu1 %v12585_v19  ;;  %v2067_v59 = vpop.xlane.xlu0 %2066 }
 0x495   : > { %v2069_v61 = vpop.xlane.xlu1 %2068 }
 0x497   : > { %2208 = vadd.xlane.f32.xlu1 %v12588_v29 }
 0x498   : > { %v12603_v9 = vpop.eup %10181 }
 0x499   : > { %v12607_v27 = vpop.eup %10183 }
 0x49a   : > { %v12611_v63 = vpop.eup %10185 }
 0x49b   : > { %2204 = vadd.xlane.f32.xlu1 %v12591_v32 }
 0x49d   : > { %2548 = vrot.lane.b32.xlu0 %v12001_v38, %s11176_s19  ;;  %v2119_v38 = vsub.f32 %v12496_v11, %v2069_v61  ;;  %v2117_v61 = vsub.f32 %v12442_v62, %v2065_v53  ;;  %v2118_v53 = vsub.f32 %v12493_v42, %v2067_v59 }
 0x49f   : > { %v2164_v16 = vmul.f32 1.442695, %v2119_v38  ;;  %v2114_v38 = vsub.f32 %v12457_v6, %v2059_v49  ;;  %v2160_v11 = vmul.f32 1.442695, %v2117_v61  ;;  %v2120_v6 = vsub.f32 %v12475_v22, %v2071_v23 }
 0x4a0   : > { %v2162_v34 = vmul.f32 1.442695, %v2118_v53  ;;  %v2168_v22 = vmul.f32 1.442695, %v2121_v47 }
 0x4a1   : > { %10187 = vpow2.f32 %v2164_v16  ;;  %v2154_v16 = vmul.f32 1.442695, %v2114_v38  ;;  %v2166_v62 = vmul.f32 1.442695, %v2120_v6 }
 0x4a2   : > { %10189 = vpow2.f32 %v2148_v54 }
 0x4a3   : > { %10191 = vpow2.f32 %v2158_v28 }
 0x4a4   : > { %10193 = vpow2.f32 %v2154_v16 }
 0x4a5   : > { %10195 = vpow2.f32 %v2160_v11 }
 0x4a6   : > { %10197 = vpow2.f32 %v2156_v51 }
 0x4a7   : > { %10199 = vpow2.f32 %v2166_v62 }
 0x4a8   : > { %10201 = vpow2.f32 %v2162_v34 }
 0x4a9   : > { %10203 = vpow2.f32 %v2168_v22 }
 0x4ac   : > { %2550 = vrot.lane.b32.xlu1 %v11989_v4, %s11176_s19 }
 0x4ae   : > { %v12615_v3 = vpop.eup %10187 }
 0x4af   : > { %v12620_v26 = vpop.eup %10189 }
 0x4b0   : > { %v12624_v20 = vpop.eup %10191 }
 0x4b1   : > { %v12628_v39 = vpop.eup %10193 }
 0x4b2   : > { %v12631_v54 = vpop.eup %10195 }
 0x4b3   : > { %v12634_v42 = vpop.eup %10197 }
 0x4b4   : > { %v12637_v25 = vpop.eup %10199 }
 0x4b5   : > { %v12640_v21 = vpop.eup %10201 }
 0x4b6   : > { %v12643_v58 = vpop.eup %10203 }
 0x4bc   : > { %2214 = vadd.xlane.f32.xlu0 %v12603_v9 }
 0x4c0   : > { %2210 = vadd.xlane.f32.xlu0 %v12607_v27 }
 0x4c4   : > { %2216 = vadd.xlane.f32.xlu0 %v12611_v63 }
 0x4c8   : > { %2228 = vadd.xlane.f32.xlu0 %v12615_v3 }
 0x4d0   : > { %2212 = vadd.xlane.f32.xlu1 %v12620_v26 }
 0x4d4   : > { %2222 = vadd.xlane.f32.xlu1 %v12624_v20 }
 0x4d8   : > { %2218 = vadd.xlane.f32.xlu1 %v12628_v39 }
 0x4dc   : > { %2224 = vadd.xlane.f32.xlu1 %v12631_v54 }
 0x4e0   : > { %2220 = vadd.xlane.f32.xlu1 %v12634_v42 }
 0x4e4   : > { %2230 = vadd.xlane.f32.xlu1 %v12637_v25 }
 0x4e8   : > { %2226 = vadd.xlane.f32.xlu1 %v12640_v21 }
 0x4ec   : > { %2232 = vadd.xlane.f32.xlu1 %v12643_v58 }
 0x4f4   : > { %v2079_v49 = vpop.xlane.xlu0 %2078 }
 0x4f5   : > { %v2124_v28 = vsub.f32 %v12507_v0, %v2079_v49 }
 0x4f7   : > { %v2174_v38 = vmul.f32 1.442695, %v2124_v28 }
 0x4f8   : > { %v2081_v61 = vpop.xlane.xlu1 %2080  ;;  %v2075_v16 = vpop.xlane.xlu0 %2074 }
 0x4f9   : > { %10205 = vpow2.f32 %v2174_v38  ;;  %v2125_v23 = vsub.f32 %v12516_v14, %v2081_v61  ;;  %v2122_v11 = vsub.f32 %v12513_v36, %v2075_v16 }
 0x4fb   : > { %v2176_v24 = vmul.f32 1.442695, %v2125_v23  ;;  %v2170_v51 = vmul.f32 1.442695, %v2122_v11 }
 0x4fc   : > { %v2077_v6 = vpop.xlane.xlu1 %2076  ;;  %v2087_v59 = vpop.xlane.xlu0 %2086 }
 0x4fd   : > { %10207 = vpow2.f32 %v2176_v24  ;;  %v2123_v62 = vsub.f32 %v12524_v44, %v2077_v6  ;;  %v2128_v53 = vsub.f32 %v12527_v52, %v2087_v59 }
 0x4fe   : > { %10209 = vpow2.f32 %v2170_v51 }
 0x4ff   : > { %v2172_v47 = vmul.f32 1.442695, %v2123_v62  ;;  %v2182_v22 = vmul.f32 1.442695, %v2128_v53 }
 0x500   : > { %v2089_v0 = vpop.xlane.xlu1 %2088  ;;  %v2083_v34 = vpop.xlane.xlu0 %2082 }
 0x501   : > { %10211 = vpow2.f32 %v2172_v47  ;;  %v2126_v49 = vsub.f32 %v12533_v46, %v2083_v34  ;;  %v2129_v36 = vsub.f32 %v12536_v41, %v2089_v0 }
 0x502   : > { %10213 = vpow2.f32 %v2182_v22 }
 0x503   : > { %v2178_v28 = vmul.f32 1.442695, %v2126_v49  ;;  %v2184_v61 = vmul.f32 1.442695, %v2129_v36 }
 0x504   : > { %v2085_v14 = vpop.xlane.xlu1 %2084  ;;  %v2095_v41 = vpop.xlane.xlu0 %2094 }
 0x505   : > { %10215 = vpow2.f32 %v2178_v28  ;;  %v2127_v36 = vsub.f32 %v12543_v60, %v2085_v14  ;;  %v2132_v28 = vsub.f32 %v12546_v55, %v2095_v41 }
 0x506   : > { %v12653_v38 = vpop.eup %10205  ;;  %10217 = vpow2.f32 %v2184_v61 }
 0x507   : > { %16707 = vst [vmem:[#allocation46_spill] sm:$0xff] %v12653_v38  ;;  %2238 = vadd.xlane.f32.xlu0 %v12653_v38 }
 0x508   : > { %v2097_v44 = vpop.xlane.xlu1 %2096  ;;  %v2091_v51 = vpop.xlane.xlu0 %2090 }
 0x50a   : > { %v12656_v52 = vpop.eup %10207 }
 0x50b   : > { %v12658_v16 = vpop.eup %10209  ;;  %2240 = vadd.xlane.f32.xlu0 %v12656_v52 }
 0x50c   : > { %16708 = vst [vmem:[#allocation47_spill] sm:$0xff] %v12658_v16  ;;  %2234 = vadd.xlane.f32.xlu1 %v12658_v16  ;;  %v2093_v46 = vpop.xlane.xlu1 %2092  ;;  %v2207_v47 = vpop.xlane.xlu0 %2206 }
 0x50e   : > { %v12662_v23 = vpop.eup %10211 }
 0x50f   : > { %16709 = vst [vmem:[#allocation48_spill] sm:$0xff] %v12662_v23  ;;  %2236 = vadd.xlane.f32.xlu0 %v12662_v23  ;;  %v12665_v24 = vpop.eup %10213  ;;  %v2190_v23 = vmul.f32 1.442695, %v2132_v28 }
 0x510   : > { %v2103_v11 = vpop.xlane.xlu1 %2102  ;;  %16710 = vst [vmem:[#allocation49_spill] sm:$0xff] %v12665_v24  ;;  %v2203_v34 = vpop.xlane.xlu0 %2202 }
 0x512   : > { %v12668_v59 = vpop.eup %10215 }
 0x513   : > { %2246 = vadd.xlane.f32.xlu0 %v12665_v24  ;;  %16711 = vst [vmem:[#allocation50_spill] sm:$0xff] %v12668_v59  ;;  %v12671_v53 = vpop.eup %10217  ;;  %v2180_v24 = vmul.f32 1.442695, %v2127_v36 }
 0x514   : > { %v2099_v6 = vpop.xlane.xlu1 %2098  ;;  %16712 = vst [vmem:[#allocation51_spill] sm:$0xff] %v12671_v53 }
 0x517   : > { %2242 = vadd.xlane.f32.xlu0 %v12668_v59 }
 0x518   : > { %v2105_v62 = vpop.xlane.xlu1 %2104 }
 0x51b   : > { %2248 = vadd.xlane.f32.xlu0 %v12671_v53 }
 0x51c   : > { %v2101_v0 = vpop.xlane.xlu1 %2100 }
 0x51d   : > { %2552 = vrot.lane.b32.xlu1 %v11982_v50, %s11176_s19 }
 0x520   : > { %v2209_v22 = vpop.xlane.xlu1 %2208 }
 0x521   : > { %10219 = vrcp.f32 %v2209_v22  ;;  %v2133_v22 = vsub.f32 %v12556_v57, %v2097_v44  ;;  %v2135_v44 = vsub.f32 %v12585_v19, %v2101_v0  ;;  %v12704_v19 = vpop.permute.xlu0 %2548 }
 0x522   : > { %10221 = vrcp.f32 %v2203_v34 }
 0x523   : > { %10223 = vrcp.f32 %v2207_v47  ;;  %v2130_v47 = vsub.f32 %v12553_v56, %v2091_v51  ;;  %v2136_v56 = vsub.f32 %v12572_v48, %v2103_v11 }
 0x524   : > { %v2205_v49 = vpop.xlane.xlu1 %2204 }
 0x525   : > { %10225 = vrcp.f32 %v2205_v49  ;;  %v2186_v49 = vmul.f32 1.442695, %v2130_v47 }
 0x526   : > { %10227 = vpow2.f32 %v2180_v24 }
 0x527   : > { %10229 = vpow2.f32 %v2190_v23  ;;  %v2137_v23 = vsub.f32 %v12581_v8, %v2105_v62  ;;  %v2612_v8 = vsel %vm1727_vm2, %v12252_v17, 0 }
 0x528   : > { %10231 = vpow2.f32 %v2186_v49  ;;  %v12732_v36 = vpop.permute.xlu1 %2550 }
 0x52e   : > { %v10220_v61 = vpop.eup %10219 }
 0x52f   : > { %v10222_v59 = vpop.eup %10221  ;;  %v2301_v16 = vmul.f32 %v10220_v61, %v12588_v29  ;;  %v2618_v29 = vsel %vm1727_vm2, %v12242_v15, 0  ;;  %v2615_v15 = vsel %vm1727_vm2, %v12500_v30, 0 }
 0x530   : > { %v10224_v38 = vpop.eup %10223  ;;  %v2298_v34 = vmul.f32 %v10222_v59, %v12568_v35  ;;  %v2192_v35 = vmul.f32 1.442695, %v2133_v22 }
 0x531   : > { %2735 = vrot.lane.b32.xlu0 %v12176_v33, %s11175_s16  ;;  %v2300_v55 = vmul.f32 %v10224_v38, %v12560_v13  ;;  %v2131_v13 = vsub.f32 %v12564_v2, %v2093_v46  ;;  %v2134_v38 = vsub.f32 %v12577_v10, %v2099_v6  ;;  %v2196_v2 = vmul.f32 1.442695, %v2135_v44 }
 0x532   : > { %v10226_v53 = vpop.eup %10225  ;;  %10233 = vpow2.f32 %v2192_v35 }
 0x533   : > { %v2299_v60 = vmul.f32 %v10226_v53, %v12591_v32  ;;  %v2331_v41 = vpack.c.bf16 %v2301_v16, %v2300_v55  ;;  %v2198_v32 = vmul.f32 1.442695, %v2136_v56  ;;  %v2188_v57 = vmul.f32 1.442695, %v2131_v13  ;;  %v12694_v16 = vpop.eup %10227 }
 0x534   : > { %v2194_v48 = vmul.f32 1.442695, %v2134_v38  ;;  %v12702_v10 = vpop.eup %10229 }
 0x535   : > { %v2330_v14 = vpack.c.bf16 %v2299_v60, %v2298_v34  ;;  %10235 = vpow2.f32 %v2198_v32  ;;  %v12707_v46 = vpop.eup %10231  ;;  %v2603_v34 = vsel %vm1727_vm2, %v12260_v7, 0 }
 0x536   : > { %10237 = vpow2.f32 %v2188_v57 }
 0x537   : > { %9249 = vmatprep.mubr.bf16.mxu0 %v2330_v14  ;;  %10239 = vpow2.f32 %v2194_v48 }
 0x538   : > { %9250 = vmatmul.mubr.bf16.vlgmr.msra.gmra.mxu0 %v2331_v41  ;;  %10241 = vpow2.f32 %v2196_v2 }
 0x539   : > { %9298 = vmatpush3.bf16.xpose.msra.mxu0 %v2618_v29 }
 0x53a   : > { %9746 = vmatprep.subr.msk.bf16.mxu0 %vm1727_vm2, %v12500_v30  ;;  %v2200_v30 = vmul.f32 1.442695, %v2137_v23 }
 0x53c   : > { %10243 = vpow2.f32 %v2200_v30 }
 0x53f   : > { %v12714_v24 = vpop.eup %10233 }
 0x541   : > { %2244 = vadd.xlane.f32.xlu1 %v12694_v16  ;;  %9300 = vmatpush3.bf16.xpose.msra.mxu0 %v2615_v15 }
 0x542   : > { %9747 = vmatprep.subr.msk.bf16.mxu0 %vm1727_vm2, %v12252_v17  ;;  %v12717_v6 = vpop.eup %10235  ;;  %v2609_v17 = vsel %vm1727_vm2, %v12256_v31, 0 }
 0x543   : > { %v12719_v59 = vpop.eup %10237 }
 0x544   : > { %v12727_v62 = vpop.eup %10239 }
 0x545   : > { %2254 = vadd.xlane.f32.xlu1 %v12702_v10  ;;  %v2215_v11 = vpop.xlane.xlu0 %2214  ;;  %v12729_v53 = vpop.eup %10241 }
 0x549   : > { %2250 = vadd.xlane.f32.xlu1 %v12707_v46  ;;  %9302 = vmatpush3.bf16.xpose.msra.mxu0 %v2612_v8  ;;  %v2211_v51 = vpop.xlane.xlu0 %2210  ;;  %v12735_v28 = vpop.eup %10243  ;;  %v16714_v8 = vld [vmem:[#allocation13_spill] sm:$0xff] }
 0x54a   : > { %9748 = vmatprep.subr.msk.bf16.mxu0 %vm1727_vm2, %v12256_v31  ;;  %v2606_v31 = vsel %vm1727_vm2, %v12502_v40, 0 }
 0x54d   : > { %2256 = vadd.xlane.f32.xlu1 %v12714_v24  ;;  %v2217_v0 = vpop.xlane.xlu0 %2216 }
 0x54e   : > { %10245 = vrcp.f32 %v2217_v0 }
 0x54f   : > { %10247 = vrcp.f32 %v2211_v51  ;;  %v16715_v51 = vld [vmem:[#allocation23_spill] sm:$0xff] }
 0x550   : > { %2262 = vadd.xlane.f32.xlu0 %v12717_v6  ;;  %10249 = vrcp.f32 %v2215_v11 }
 0x551   : > { %2252 = vadd.xlane.f32.xlu1 %v12719_v59  ;;  %9304 = vmatpush3.bf16.xpose.msra.mxu0 %v2609_v17 }
 0x552   : > { %9749 = vmatprep.subr.msk.bf16.mxu0 %vm1727_vm2, %v12502_v40 }
 0x554   : > { %2258 = vadd.xlane.f32.xlu0 %v12727_v62 }
 0x555   : > { %2260 = vadd.xlane.f32.xlu1 %v12729_v53 }
 0x558   : > { %2264 = vadd.xlane.f32.xlu0 %v12735_v28 }
 0x559   : > { %9306 = vmatpush3.bf16.xpose.msra.mxu0 %v2606_v31  ;;  %v2213_v61 = vpop.xlane.xlu1 %2212 }
 0x55a   : > { %10251 = vrcp.f32 %v2213_v61  ;;  %9750 = vmatprep.subr.msk.bf16.mxu0 %vm1727_vm2, %v12260_v7  ;;  %v2600_v7 = vsel %vm1727_vm2, %v12504_v5, 0  ;;  %v16716_v61 = vld [vmem:[#allocation19_spill] sm:$0xff] }
 0x55b   : > { %v10246_v55 = vpop.eup %10245 }
 0x55c   : > { %v10248_v14 = vpop.eup %10247  ;;  %v2305_v49 = vmul.f32 %v10246_v55, %v12611_v63 }
 0x55d   : > { %v2223_v47 = vpop.xlane.xlu1 %2222  ;;  %v10250_v40 = vpop.eup %10249  ;;  %v2302_v29 = vmul.f32 %v10248_v14, %v12607_v27 }
 0x55e   : > { %v2304_v13 = vmul.f32 %v10250_v40, %v12603_v9  ;;  %v2597_v9 = vsel %vm1727_vm2, %v12268_v12, 0 }
 0x560   : > { %v2333_v32 = vpack.c.bf16 %v2305_v49, %v2304_v13  ;;  %v16722_v49 = vld [vmem:[#allocation17_spill] sm:$0xff]  ;;  %v16728_v13 = vld [vmem:[#allocation20_spill] sm:$0xff] }
 0x561   : > { %9308 = vmatpush3.bf16.xpose.msra.mxu0 %v2603_v34  ;;  %v2219_v60 = vpop.xlane.xlu1 %2218  ;;  %v16718_v34 = vld [vmem:[#allocation21_spill] sm:$0xff] }
 0x562   : > { %9751 = vmatprep.subr.msk.bf16.mxu0 %vm1727_vm2, %v12504_v5  ;;  %v2229_v5 = vpop.xlane.xlu0 %2228 }
 0x565   : > { %v2225_v41 = vpop.xlane.xlu1 %2224 }
 0x566   : > { %2733 = vrot.lane.b32.xlu1 %v12154_v18, %s11175_s16  ;;  %10253 = vrcp.f32 %v2225_v41 }
 0x567   : > { %v10252_v22 = vpop.eup %10251  ;;  %10255 = vrcp.f32 %v2219_v60  ;;  %v16719_v60 = vld [vmem:[#allocation11_spill] sm:$0xff] }
 0x568   : > { %v2303_v56 = vmul.f32 %v10252_v22, %v12620_v26  ;;  %10257 = vrcp.f32 %v2223_v47  ;;  %v16721_v22 = vld [vmem:[#allocation29_spill] sm:$0xff] }
 0x569   : > { %9310 = vmatpush3.bf16.xpose.msra.mxu0 %v2600_v7  ;;  %v2221_v35 = vpop.xlane.xlu1 %2220  ;;  %v16725_v7 = vld [vmem:[#allocation32_spill] sm:$0xff] }
 0x56a   : > { %10259 = vrcp.f32 %v2221_v35  ;;  %2719 = vrot.lane.b32.xlu1 %v12176_v33, %s11176_s19  ;;  %9752 = vmatprep.subr.msk.bf16.mxu0 %vm1727_vm2, %v12268_v12  ;;  %v2332_v63 = vpack.c.bf16 %v2303_v56, %v2302_v29  ;;  %v16713_v12 = vld [vmem:[#allocation24_spill] sm:$0xff]  ;;  %v16727_v35 = vld [vmem:[#allocation30_spill] sm:$0xff] }
 0x56b   : > { %10261 = vrcp.f32 %v2229_v5  ;;  %v16726_v56 = vld [vmem:[#allocation44_spill] sm:$0xff] }
 0x56c   : > { %9253 = vmatprep.mubr.bf16.mxu0 %v2332_v63  ;;  %v16729_v5 = vld [vmem:[#allocation12_spill] sm:$0xff] }
 0x56d   : > { %v2231_v38 = vpop.xlane.xlu1 %2230  ;;  %9254 = vmatmul.mubr.bf16.gmra.mxu0 %v2333_v32 }
 0x56e   : > { %2723 = vrot.lane.b32.xlu1 %v12166_v37, %s11176_s19  ;;  %2554 = vrot.lane.b32.xlu0 %v12005_v43, %s11176_s19 }
 0x571   : > { %9312 = vmatpush3.bf16.xpose.msra.mxu0 %v2597_v9  ;;  %v2227_v27 = vpop.xlane.xlu1 %2226 }
 0x572   : > { %10263 = vrcp.f32 %v2227_v27  ;;  %2727 = vrot.lane.b32.xlu1 %v12157_v1, %s11176_s19  ;;  %2717 = vrot.lane.b32.xlu0 %v12154_v18, %s11176_s19  ;;  %v16731_v27 = vld [vmem:[#allocation33_spill] sm:$0xff] }
 0x573   : > { %v10254_v26 = vpop.eup %10253  ;;  %10265 = vrcp.f32 %v2231_v38  ;;  %v16730_v38 = vld [vmem:[#allocation39_spill] sm:$0xff] }
 0x574   : > { %v10256_v57 = vpop.eup %10255  ;;  %v2309_v23 = vmul.f32 %v10254_v26, %v12631_v54  ;;  %v16732_v26 = vld [vmem:[#allocation9_spill] sm:$0xff] }
 0x575   : > { %v2233_v44 = vpop.xlane.xlu1 %2232  ;;  %v10258_v15 = vpop.eup %10257  ;;  %v2306_v2 = vmul.f32 %v10256_v57, %v12628_v39  ;;  %v16717_v39 = vld [vmem:[#allocation22_spill] sm:$0xff]  ;;  %v16733_v57 = vld [vmem:[#allocation35_spill] sm:$0xff] }
 0x576   : > { %10267 = vrcp.f32 %v2233_v44  ;;  %2731 = vrot.lane.b32.xlu1 %v12143_v45, %s11176_s19  ;;  %2721 = vrot.lane.b32.xlu0 %v16713_v12, %s11176_s19  ;;  %v2308_v11 = vmul.f32 %v10258_v15, %v12624_v20  ;;  %v16734_v44 = vld [vmem:[#allocation14_spill] sm:$0xff] }
 0x577   : > { %v10260_v48 = vpop.eup %10259 }
 0x578   : > { %v2307_v30 = vmul.f32 %v10260_v48, %v12634_v42  ;;  %v2335_v0 = vpack.c.bf16 %v2309_v23, %v2308_v11  ;;  %v10262_v31 = vpop.eup %10261  ;;  %v16736_v48 = vld [vmem:[#allocation31_spill] sm:$0xff] }
 0x579   : > { %v2311_v42 = vmul.f32 %v10262_v31, %v12615_v3  ;;  %v16720_v3 = vld [vmem:[#allocation15_spill] sm:$0xff] }
 0x57a   : > { %3218 = vrot.lane.b32.xlu1 %v16714_v8, %s11176_s19  ;;  %2725 = vrot.lane.b32.xlu0 %v16715_v51, %s11176_s19  ;;  %v2334_v17 = vpack.c.bf16 %v2307_v30, %v2306_v2  ;;  %v16739_v31 = vld [vmem:[#allocation47_spill] sm:$0xff] }
 0x57c   : > { %9257 = vmatprep.mubr.bf16.mxu0 %v2334_v17  ;;  %v16737_v17 = vld [vmem:[#allocation38_spill] sm:$0xff] }
 0x57d   : > { %9258 = vmatmul.mubr.bf16.gmra.mxu0 %v2335_v0  ;;  %v16738_v0 = vld [vmem:[#allocation36_spill] sm:$0xff] }
 0x57e   : > { %3210 = vrot.lane.b32.xlu1 %v16716_v61, %s11176_s19  ;;  %2729 = vrot.lane.b32.xlu0 %v16717_v39, %s11176_s19 }
 0x57f   : > { %v10264_v54 = vpop.eup %10263 }
 0x580   : > { %v2310_v20 = vmul.f32 %v10264_v54, %v12640_v21  ;;  %v10266_v47 = vpop.eup %10265 }
 0x581   : > { %v2312_v41 = vmul.f32 %v10266_v47, %v12637_v25  ;;  %v16723_v25 = vld [vmem:[#allocation28_spill] sm:$0xff]  ;;  %v16741_v47 = vld [vmem:[#allocation46_spill] sm:$0xff] }
 0x582   : > { %3206 = vrot.lane.b32.xlu1 %v16718_v34, %s11176_s19  ;;  %3220 = vrot.lane.b32.xlu0 %v16719_v60, %s11176_s19  ;;  %v2336_v55 = vpack.c.bf16 %v2311_v42, %v2310_v20  ;;  %v16740_v20 = vld [vmem:[#allocation48_spill] sm:$0xff] }
 0x583   : > { %v10268_v14 = vpop.eup %10267 }
 0x584   : > { %9261 = vmatprep.mubr.bf16.mxu0 %v2336_v55  ;;  %v2313_v40 = vmul.f32 %v10268_v14, %v12643_v58  ;;  %v16724_v58 = vld [vmem:[#allocation18_spill] sm:$0xff] }
 0x586   : > { %3484 = vrot.lane.b32.xlu1 %v11982_v50, %s11177_s17  ;;  %3216 = vrot.lane.b32.xlu0 %v16720_v3, %s11176_s19  ;;  %v2337_v21 = vpack.c.bf16 %v2313_v40, %v2312_v41  ;;  %v16742_v41 = vld [vmem:[#allocation40_spill] sm:$0xff] }
 0x587   : > { %v16743_v40 = vld [vmem:[#allocation8_spill] sm:$0xff] }
 0x588   : > { %9262 = vmatmul.mubr.bf16.gmra.mxu0 %v2337_v21 }
 0x589   : > { %9313 = vmatprep.mubr.msk.bf16.mxu0 %vm1727_vm2, %v16721_v22  ;;  %v16744_v22 = vld [vmem:[#allocation41_spill] sm:$0xff] }
 0x58a   : > { %3482 = vrot.lane.b32.xlu1 %v11989_v4, %s11177_s17  ;;  %3214 = vrot.lane.b32.xlu0 %v16722_v49, %s11176_s19 }
 0x58e   : > { %3349 = vrot.lane.b32.xlu1 %v16723_v25, %s11176_s19  ;;  %3212 = vrot.lane.b32.xlu0 %v16724_v58, %s11176_s19 }
 0x590   : > { %9314 = vmatmul.mubr.msk.bf16.vlgmr.msra.gmra.mxu0 %vm1727_vm2, %v16725_v7  ;;  %v2239_v29 = vpop.xlane.xlu0 %2238  ;;  %v2795_v7 = vsel %vm1727_vm2, %v16744_v22, 0 }
 0x591   : > { %9317 = vmatprep.mubr.msk.bf16.mxu0 %vm1727_vm2, %v16726_v56  ;;  %v16746_v56 = vld [vmem:[#allocation34_spill] sm:$0xff] }
 0x592   : > { %3347 = vrot.lane.b32.xlu1 %v16727_v35, %s11176_s19  ;;  %3208 = vrot.lane.b32.xlu0 %v16728_v13, %s11176_s19 }
 0x594   : > { %v2241_v63 = vpop.xlane.xlu0 %2240 }
 0x595   : > { %v2235_v32 = vpop.xlane.xlu1 %2234  ;;  %10269 = vrcp.f32 %v2241_v63 }
 0x596   : > { %3476 = vrot.lane.b32.xlu1 %v16729_v5, %s11177_s17  ;;  %3486 = vrot.lane.b32.xlu0 %v12005_v43, %s11177_s17  ;;  %10271 = vrcp.f32 %v2235_v32  ;;  %v2789_v32 = vsel %vm1727_vm2, %v16746_v56, 0 }
 0x597   : > { %10273 = vrcp.f32 %v2239_v29 }
 0x598   : > { %9318 = vmatmul.mubr.msk.bf16.gmra.mxu0 %vm1727_vm2, %v16730_v38  ;;  %v2237_v9 = vpop.xlane.xlu0 %2236  ;;  %v16747_v38 = vld [vmem:[#allocation43_spill] sm:$0xff] }
 0x599   : > { %10275 = vrcp.f32 %v2237_v9  ;;  %9321 = vmatprep.mubr.msk.bf16.mxu0 %vm1727_vm2, %v12704_v19  ;;  %v2553_v15 = vpop.permute.xlu1 %2552  ;;  %v16735_v19 = vld [vmem:[#allocation16_spill] sm:$0xff] }
 0x59a   : > { %3343 = vrot.lane.b32.xlu1 %v16731_v27, %s11176_s19  ;;  %3480 = vrot.lane.b32.xlu0 %v16732_v26, %s11177_s17 }
 0x59c   : > { %v2247_v63 = vpop.xlane.xlu0 %2246 }
 0x59e   : > { %3341 = vrot.lane.b32.xlu1 %v16733_v57, %s11176_s19  ;;  %3478 = vrot.lane.b32.xlu0 %v16734_v44, %s11177_s17 }
 0x5a0   : > { %9322 = vmatmul.mubr.msk.bf16.gmra.mxu0 %vm1727_vm2, %v12732_v36  ;;  %v2243_v9 = vpop.xlane.xlu0 %2242 }
 0x5a1   : > { %9325 = vmatprep.mubr.msk.bf16.mxu0 %vm1727_vm2, %v2553_v15  ;;  %v2786_v15 = vsel %vm1727_vm2, %v16747_v38, 0 }
 0x5a2   : > { %3474 = vrot.lane.b32.xlu1 %v16735_v19, %s11177_s17  ;;  %3345 = vrot.lane.b32.xlu0 %v16736_v48, %s11176_s19  ;;  %v10270_v23 = vpop.eup %10269  ;;  %v13065_v48 = vld [vmem:[%s16702_s26 + $0x40] sm:$0xff] }
 0x5a3   : > { %v10272_v2 = vpop.eup %10271  ;;  %v2317_v36 = vmul.f32 %v10270_v23, %v12656_v52  ;;  %v16745_v52 = vld [vmem:[#allocation42_spill] sm:$0xff] }
 0x5a4   : > { %v10274_v30 = vpop.eup %10273  ;;  %v2314_v54 = vmul.f32 %v10272_v2, %v16739_v31  ;;  %v2792_v29 = vsel %vm1727_vm2, %v16745_v52, 0  ;;  %v2249_v23 = vpop.xlane.xlu0 %2248  ;;  %v16748_v2 = vld [vmem:[#allocation37_spill] sm:$0xff] }
 0x5a5   : > { %v2316_v55 = vmul.f32 %v10274_v30, %v16741_v47  ;;  %10277 = vrcp.f32 %v2249_v23  ;;  %v16749_v31 = vld [vmem:[#allocation45_spill] sm:$0xff] }
 0x5a6   : > { %v10276_v11 = vpop.eup %10275  ;;  %3337 = vrot.lane.b32.xlu1 %v16737_v17, %s11176_s19  ;;  %3339 = vrot.lane.b32.xlu0 %v16738_v0, %s11176_s19  ;;  %10279 = vrcp.f32 %v2243_v9  ;;  %v16752_v9 = vld [vmem:[#allocation49_spill] sm:$0xff] }
 0x5a7   : > { %v2315_v42 = vmul.f32 %v10276_v11, %v16740_v20  ;;  %v2339_v21 = vpack.c.bf16 %v2317_v36, %v2316_v55  ;;  %10281 = vrcp.f32 %v2247_v63  ;;  %v2783_v11 = vsel %vm1727_vm2, %v16748_v2, 0 }
 0x5a8   : > { %v2780_v20 = vsel %vm1727_vm2, %v16749_v31, 0  ;;  %v2736_v47 = vpop.permute.xlu0 %2735 }
 0x5a9   : > { %v2338_v14 = vpack.c.bf16 %v2315_v42, %v2314_v54 }
 0x5aa   : > { %3335 = vrot.lane.b32.xlu1 %v16742_v41, %s11176_s19  ;;  %3472 = vrot.lane.b32.xlu0 %v16743_v40, %s11177_s17  ;;  %s11179_s19 = smov 16  }
 0x5ab   : > { %9281 = vmatprep.mubr.bf16.mxu1 %v2338_v14 }
 0x5ac   : > { %9282 = vmatmul.mubr.bf16.vlgmr.msra.gmra.mxu1 %v2339_v21 }
 0x5ad   : > { %9330 = vmatpush3.bf16.xpose.msra.mxu1 %v2795_v7  ;;  %v16750_v7 = vld [vmem:[#allocation51_spill] sm:$0xff] }
 0x5ae   : > { %3458 = vrot.lane.b32.xlu1 %v16735_v19, %s11178_s18  ;;  %9754 = vmatprep.subr.msk.bf16.mxu1 %vm1727_vm2, %v16745_v52 }
 0x5af   : > { %3456 = vrot.lane.b32.xlu0 %v16743_v40, %s11178_s18  ;;  %v13055_v40 = vld [vmem:[%s16702_s26 + $0x58] sm:$0xff] }
 0x5b2   : > { %3661 = vrot.lane.b32.xlu1 %v16717_v39, %s11177_s17  ;;  %v10278_v42 = vpop.eup %10277 }
 0x5b3   : > { %3663 = vrot.lane.b32.xlu0 %v12143_v45, %s11177_s17  ;;  %v10280_v55 = vpop.eup %10279  ;;  %v2321_v52 = vmul.f32 %v10278_v42, %v16750_v7 }
 0x5b4   : > { %v10282_v21 = vpop.eup %10281 }
 0x5b5   : > { %9332 = vmatpush3.bf16.xpose.msra.mxu1 %v2792_v29 }
 0x5b6   : > { %3657 = vrot.lane.b32.xlu1 %v16715_v51, %s11177_s17  ;;  %9755 = vmatprep.subr.msk.bf16.mxu1 %vm1727_vm2, %v16746_v56  ;;  %v16751_v56 = vld [vmem:[#allocation50_spill] sm:$0xff] }
 0x5b7   : > { %3659 = vrot.lane.b32.xlu0 %v12157_v1, %s11177_s17  ;;  %v2318_v63 = vmul.f32 %v10280_v55, %v16751_v56 }
 0x5ba   : > { %3460 = vrot.lane.b32.xlu1 %v16729_v5, %s11178_s18 }
 0x5bb   : > { %3655 = vrot.lane.b32.xlu0 %v12166_v37, %s11177_s17 }
 0x5bd   : > { %9334 = vmatpush3.bf16.xpose.msra.mxu1 %v2789_v32 }
 0x5be   : > { %3653 = vrot.lane.b32.xlu1 %v16713_v12, %s11177_s17  ;;  %9756 = vmatprep.subr.msk.bf16.mxu1 %vm1727_vm2, %v16747_v38 }
 0x5bf   : > { %3462 = vrot.lane.b32.xlu0 %v16734_v44, %s11178_s18  ;;  %v13073_v44 = vld [vmem:[%s16702_s26 + $0x48] sm:$0xff] }
 0x5c5   : > { %9336 = vmatpush3.bf16.xpose.msra.mxu1 %v2786_v15  ;;  %v2320_v15 = vmul.f32 %v10282_v21, %v16752_v9 }
 0x5c6   : > { %9757 = vmatprep.subr.msk.bf16.mxu1 %vm1727_vm2, %v16748_v2  ;;  %v2777_v2 = vsel %vm1727_vm2, %v2736_v47, 0 }
 0x5ca   : > { %v2245_v30 = vpop.xlane.xlu1 %2244 }
 0x5cb   : > { %10283 = vrcp.f32 %v2245_v30  ;;  %v2341_v30 = vpack.c.bf16 %v2321_v52, %v2320_v15 }
 0x5cd   : > { %9338 = vmatpush3.bf16.xpose.msra.mxu1 %v2783_v11 }
 0x5ce   : > { %v2255_v36 = vpop.xlane.xlu1 %2254  ;;  %9758 = vmatprep.subr.msk.bf16.mxu1 %vm1727_vm2, %v16749_v31 }
 0x5d2   : > { %v2251_v54 = vpop.xlane.xlu1 %2250 }
 0x5d5   : > { %9340 = vmatpush3.bf16.xpose.msra.mxu1 %v2780_v20 }
 0x5d6   : > { %v2257_v14 = vpop.xlane.xlu1 %2256  ;;  %9759 = vmatprep.subr.msk.bf16.mxu1 %vm1727_vm2, %v2736_v47 }
 0x5d7   : > { %10285 = vrcp.f32 %v2257_v14 }
 0x5d8   : > { %v10284_v22 = vpop.eup %10283  ;;  %10287 = vrcp.f32 %v2251_v54 }
 0x5d9   : > { %v2263_v29 = vpop.xlane.xlu0 %2262  ;;  %v2319_v32 = vmul.f32 %v10284_v22, %v12694_v16  ;;  %10289 = vrcp.f32 %v2255_v36 }
 0x5da   : > { %v2253_v38 = vpop.xlane.xlu1 %2252 }
 0x5db   : > { %10291 = vrcp.f32 %v2253_v38  ;;  %v2340_v23 = vpack.c.bf16 %v2319_v32, %v2318_v63 }
 0x5dd   : > { %9285 = vmatprep.mubr.bf16.mxu1 %v2340_v23  ;;  %9342 = vmatpush3.bf16.xpose.msra.mxu1 %v2777_v2  ;;  %v2259_v11 = vpop.xlane.xlu0 %2258 }
 0x5de   : > { %v2261_v31 = vpop.xlane.xlu1 %2260  ;;  %9286 = vmatmul.mubr.bf16.gmra.mxu1 %v2341_v30  ;;  %10293 = vrcp.f32 %v2259_v11 }
 0x5df   : > { %10295 = vrcp.f32 %v2261_v31 }
 0x5e0   : > { %10297 = vrcp.f32 %v2263_v29 }
 0x5e1   : > { %v2265_v54 = vpop.xlane.xlu0 %2264 }
 0x5e2   : > { %v2734_v20 = vpop.permute.xlu1 %2733  ;;  %10299 = vrcp.f32 %v2265_v54 }
 0x5e3   : > { %9760 = vmatprep.subr.msk.bf16.mxu1 %vm1727_vm2, %v2734_v20  ;;  %v2774_v16 = vsel %vm1727_vm2, %v2734_v20, 0 }
 0x5e4   : > { %v10286_v36 = vpop.eup %10285 }
 0x5e5   : > { %9344 = vmatpush3.bf16.xpose.msra.mxu1 %v2774_v16  ;;  %v2555_v42 = vpop.permute.xlu0 %2554  ;;  %v10288_v47 = vpop.eup %10287  ;;  %v2325_v22 = vmul.f32 %v10286_v36, %v12714_v24 }
 0x5e6   : > { %v2720_v55 = vpop.permute.xlu1 %2719  ;;  %9326 = vmatmul.mubr.msk.bf16.gmra.mxu0 %vm1727_vm2, %v2555_v42  ;;  %v10290_v14 = vpop.eup %10289  ;;  %v2322_v52 = vmul.f32 %v10288_v47, %v12707_v46 }
 0x5e7   : > { %v2324_v63 = vmul.f32 %v10290_v14, %v12702_v10 }
 0x5e8   : > { %v10292_v21 = vpop.eup %10291 }
 0x5e9   : > { %v2718_v7 = vpop.permute.xlu0 %2717  ;;  %v2323_v29 = vmul.f32 %v10292_v21, %v12719_v59  ;;  %v2343_v15 = vpack.c.bf16 %v2325_v22, %v2324_v63 }
 0x5ea   : > { %v2724_v56 = vpop.permute.xlu1 %2723 }
 0x5eb   : > { %v10294_v32 = vpop.eup %10293  ;;  %v2342_v38 = vpack.c.bf16 %v2323_v29, %v2322_v52 }
 0x5ec   : > { %v10296_v9 = vpop.eup %10295  ;;  %v2326_v23 = vmul.f32 %v10294_v32, %v12727_v62 }
 0x5ed   : > { %v10298_v2 = vpop.eup %10297  ;;  %9289 = vmatprep.mubr.bf16.mxu1 %v2342_v38  ;;  %v2722_v30 = vpop.permute.xlu0 %2721  ;;  %v2327_v11 = vmul.f32 %v10296_v9, %v12729_v53 }
 0x5ee   : > { %v2728_v24 = vpop.permute.xlu1 %2727  ;;  %9290 = vmatmul.mubr.bf16.gmra.mxu1 %v2343_v15  ;;  %v2328_v59 = vmul.f32 %v10298_v2, %v12717_v6 }
 0x5ef   : > { %v10300_v31 = vpop.eup %10299  ;;  %v2344_v46 = vpack.c.bf16 %v2327_v11, %v2326_v23 }
 0x5f0   : > { %v2329_v54 = vmul.f32 %v10300_v31, %v12735_v28 }
 0x5f1   : > { %9293 = vmatprep.mubr.bf16.mxu1 %v2344_v46  ;;  %v2726_v10 = vpop.permute.xlu0 %2725 }
 0x5f2   : > { %v2732_v20 = vpop.permute.xlu1 %2731  ;;  %v2345_v16 = vpack.c.bf16 %v2329_v54, %v2328_v59 }
 0x5f5   : > { %v2730_v36 = vpop.permute.xlu0 %2729 }
 0x5f6   : > { %v3219_v42 = vpop.permute.xlu1 %3218  ;;  %9294 = vmatmul.mubr.bf16.gmra.mxu1 %v2345_v16 }
 0x5f7   : > { %9345 = vmatprep.mubr.msk.bf16.mxu1 %vm1727_vm2, %v2718_v7 }
 0x5f9   : > { %v3221_v62 = vpop.permute.xlu0 %3220 }
 0x5fa   : > { %v3211_v47 = vpop.permute.xlu1 %3210  ;;  %9361 = vmatprep.subr.bf16.mxu0 %v3221_v62 }
 0x5fb   : > { %9362 = vmatpush3.bf16.msra.mxu0 %v3221_v62 }
 0x5fc   : > { %9363 = vmatprep.subr.bf16.mxu0 %v3219_v42 }
 0x5fd   : > { %v3217_v53 = vpop.permute.xlu0 %3216 }
 0x5fe   : > { %v3207_v14 = vpop.permute.xlu1 %3206  ;;  %9346 = vmatmul.mubr.msk.bf16.vlgmr.msra.gmra.mxu1 %vm1727_vm2, %v2720_v55 }
 0x5ff   : > { %9349 = vmatprep.mubr.msk.bf16.mxu1 %vm1727_vm2, %v2722_v30  ;;  %9364 = vmatpush3.bf16.msra.mxu0 %v3219_v42  ;;  %v12932_v30 = vpop.f32.mrf.mxu0 }
 0x600   : > { %9365 = vmatprep.subr.bf16.mxu0 %v3217_v53  ;;  %16753 = vst [vmem:[#allocation29_spill] sm:$0xff] %v12932_v30  ;;  %v13037_v30 = vld [vmem:[%s16702_s26 + $0x28] sm:$0xff] }
 0x601   : > { %v3215_v6 = vpop.permute.xlu0 %3214 }
 0x602   : > { %v12911_v28 = vpop.permute.xlu1 %3484 }
 0x603   : > { %9366 = vmatpush3.bf16.msra.mxu0 %v3217_v53 }
 0x604   : > { %9367 = vmatprep.subr.bf16.mxu0 %v3215_v6 }
 0x605   : > { %v3213_v21 = vpop.permute.xlu0 %3212 }
 0x606   : > { %v12913_v22 = vpop.permute.xlu1 %3482  ;;  %9350 = vmatmul.mubr.msk.bf16.gmra.mxu1 %vm1727_vm2, %v2724_v56 }
 0x607   : > { %9353 = vmatprep.mubr.msk.bf16.mxu1 %vm1727_vm2, %v2726_v10  ;;  %9368 = vmatpush3.bf16.msra.mxu0 %v3215_v6 }
 0x608   : > { %9369 = vmatprep.subr.bf16.mxu0 %v3213_v21 }
 0x609   : > { %v3209_v7 = vpop.permute.xlu0 %3208 }
 0x60a   : > { %v3350_v55 = vpop.permute.xlu1 %3349 }
 0x60b   : > { %9393 = vmatprep.subr.bf16.mxu1 %v3350_v55  ;;  %9370 = vmatpush3.bf16.msra.mxu0 %v3213_v21 }
 0x60c   : > { %9394 = vmatpush3.bf16.msra.mxu1 %v3350_v55  ;;  %9371 = vmatprep.subr.bf16.mxu0 %v3211_v47 }
 0x60d   : > { %v12917_v52 = vpop.permute.xlu0 %3486 }
 0x60e   : > { %v3348_v29 = vpop.permute.xlu1 %3347  ;;  %9354 = vmatmul.mubr.msk.bf16.gmra.mxu1 %vm1727_vm2, %v2728_v24  ;;  %v12936_v24 = vpop.f32.mrf.mxu0 }
 0x60f   : > { %9357 = vmatprep.mubr.msk.bf16.mxu1 %vm1727_vm2, %v2730_v36  ;;  %9395 = vmatprep.subr.bf16.mxu1 %v3348_v29  ;;  %16754 = vst [vmem:[#allocation32_spill] sm:$0xff] %v12936_v24 }
 0x610   : > { %9372 = vmatpush3.bf16.msra.mxu0 %v3211_v47  ;;  %9396 = vmatpush3.bf16.msra.mxu1 %v3348_v29  ;;  %v12938_v46 = vpop.f32.mrf.mxu0 }
 0x611   : > { %9373 = vmatprep.subr.bf16.mxu0 %v3209_v7  ;;  %v12921_v56 = vpop.permute.xlu0 %3480  ;;  %16755 = vst [vmem:[#allocation44_spill] sm:$0xff] %v12938_v46 }
 0x612   : > { %v12923_v63 = vpop.permute.xlu1 %3476  ;;  %v12942_v10 = vpop.f32.mrf.mxu0 }
 0x613   : > { %16757 = vst [vmem:[#allocation47_spill] sm:$0xff] %v12942_v10  ;;  %v13047_v10 = vld [vmem:[%s16702_s26 + $0x50] sm:$0xff] }
 0x614   : > { %9374 = vmatpush3.bf16.msra.mxu0 %v3209_v7 }
 0x615   : > { %9375 = vmatprep.subr.bf16.mxu0 %v3207_v14  ;;  %v12925_v32 = vpop.permute.xlu0 %3478 }
 0x616   : > { %v3344_v38 = vpop.permute.xlu1 %3343  ;;  %9358 = vmatmul.mubr.msk.bf16.gmra.mxu1 %vm1727_vm2, %v2732_v20 }
 0x618   : > { %9376 = vmatpush3.bf16.msra.mxu0 %v3207_v14 }
 0x619   : > { %9761 = vmatprep.subr.msk.bf16.mxu0 %vm1727_vm2, %v12917_v52  ;;  %v3346_v9 = vpop.permute.xlu0 %3345 }
 0x61a   : > { %v3342_v15 = vpop.permute.xlu1 %3341  ;;  %9397 = vmatprep.subr.bf16.mxu1 %v3346_v9 }
 0x61b   : > { %9398 = vmatpush3.bf16.msra.mxu1 %v3346_v9  ;;  %v12975_v9 = vld [vmem:[%s16702_s26 + $0x10] sm:$0xff] }
 0x61c   : > { %9399 = vmatprep.subr.bf16.mxu1 %v3344_v38 }
 0x61d   : > { %v3340_v23 = vpop.permute.xlu0 %3339 }
 0x61e   : > { %v12930_v2 = vpop.permute.xlu1 %3474 }
 0x61f   : > { %9400 = vmatpush3.bf16.msra.mxu1 %v3344_v38 }
 0x620   : > { %9401 = vmatprep.subr.bf16.mxu1 %v3342_v15 }
 0x621   : > { %v12934_v11 = vpop.permute.xlu0 %3472 }
 0x622   : > { %v3338_v31 = vpop.permute.xlu1 %3337 }
 0x623   : > { %9402 = vmatpush3.bf16.msra.mxu1 %v3342_v15 }
 0x624   : > { %9403 = vmatprep.subr.bf16.mxu1 %v3340_v23 }
 0x625   : > { %v12940_v59 = vpop.permute.xlu0 %3456 }
 0x626   : > { %16756 = vst [vmem:[#allocation39_spill] sm:$0xff] %v12940_v59  ;;  %v3336_v54 = vpop.permute.xlu1 %3335 }
 0x627   : > { %9404 = vmatpush3.bf16.msra.mxu1 %v3340_v23 }
 0x628   : > { %9405 = vmatprep.subr.bf16.mxu1 %v3338_v31 }
 0x629   : > { %v12944_v20 = vpop.permute.xlu0 %3663 }
 0x62a   : > { %16758 = vst [vmem:[#allocation48_spill] sm:$0xff] %v12944_v20 }
 0x62b   : > { %9406 = vmatpush3.bf16.msra.mxu1 %v3338_v31 }
 0x62c   : > { %9407 = vmatprep.subr.bf16.mxu1 %v3336_v54 }
 0x62d   : > { %v12946_v16 = vpop.f32.mrf.mxu0 }
 0x62e   : > { %16759 = vst [vmem:[#allocation46_spill] sm:$0xff] %v12946_v16 }
 0x62f   : > { %9408 = vmatpush3.bf16.msra.mxu1 %v3336_v54  ;;  %v12950_v36 = vpop.f32.mrf.mxu0  ;;  %v12984_v54 = vld [vmem:[%s16702_s26] sm:$0xff] }
 0x630   : > { %9769 = vmatprep.subr.msk.bf16.mxu1 %vm1727_vm2, %v12944_v20  ;;  %16760 = vst [vmem:[#allocation41_spill] sm:$0xff] %v12950_v36  ;;  %v13019_v36 = vld [vmem:[%s16702_s26 + $0x38] sm:$0xff] }
 0x631   : > { %v12952_v42 = vpop.f32.mrf.mxu0 }
 0x632   : > { %16761 = vst [vmem:[#allocation42_spill] sm:$0xff] %v12952_v42  ;;  %v13029_v42 = vld [vmem:[%s16702_s26 + $0x20] sm:$0xff] }
 0x633   : > { %v12954_v62 = vpop.f32.mrf.mxu0 }
 0x634   : > { %16762 = vst [vmem:[#allocation34_spill] sm:$0xff] %v12954_v62 }
 0x63d   : > { %v12956_v47 = vpop.f32.mrf.mxu0 }
 0x63e   : > { %16763 = vst [vmem:[#allocation43_spill] sm:$0xff] %v12956_v47 }
 0x63f   : > { %v12958_v53 = vpop.f32.mrf.mxu0 }
 0x640   : > { %16764 = vst [vmem:[#allocation37_spill] sm:$0xff] %v12958_v53  ;;  %v13001_v53 = vld [vmem:[%s16702_s26 + $0x18] sm:$0xff] }
 0x641   : > { %v12960_v14 = vpop.f32.mrf.mxu0 }
 0x642   : > { %16765 = vst [vmem:[#allocation45_spill] sm:$0xff] %v12960_v14 }
 0x643   : > { %v12962_v6 = vpop.f32.mrf.mxu0 }
 0x644   : > { %16766 = vst [vmem:[#allocation51_spill] sm:$0xff] %v12962_v6 }
 0x648   : > { %v12964_v21 = vpop.f32.mrf.mxu0 }
 0x649   : > { %16767 = vst [vmem:[#allocation50_spill] sm:$0xff] %v12964_v21  ;;  %v12992_v21 = vld [vmem:[%s16702_s26 + $0x8] sm:$0xff] }
 0x64a   : > { %v12966_v7 = vpop.f32.mrf.mxu0 }
 0x64b   : > { %16768 = vst [vmem:[#allocation49_spill] sm:$0xff] %v12966_v7 }
 0x64c   : > { %v12968_v55 = vpop.f32.mrf.mxu0 }
 0x64d   : > { %16769 = vst [vmem:[#allocation52_spill] sm:$0xff] %v12968_v55 }
 0x64e   : > { %v12970_v29 = vpop.f32.mrf.mxu0 }
 0x64f   : > { %16770 = vst [vmem:[#allocation53_spill] sm:$0xff] %v12970_v29 }
 0x650   : > { %v9315_v38 = vpop.f32.mrf.mxu0 }
 0x651   : > { %v12978_v15 = vadd.f32 %v12975_v9, %v9315_v38 }
 0x652   : > { %v2654_v23 = vpop.f32.mrf.mxu0 }
 0x653   : > { %2898 = vmax.xlane.f32.xlu0 %v12978_v15  ;;  %v12987_v7 = vadd.f32 %v12984_v54, %v2654_v23 }
 0x654   : > { %v9316_v31 = vpop.f32.mrf.mxu0 }
 0x655   : > { %v13004_v23 = vadd.f32 %v13001_v53, %v9316_v31 }
 0x656   : > { %v2657_v29 = vpop.f32.mrf.mxu0 }
 0x657   : > { %v12995_v38 = vadd.f32 %v12992_v21, %v2657_v29  ;;  %2894 = vmax.xlane.f32.xlu0 %v12987_v7  ;;  %v13011_v29 = vld [vmem:[%s16702_s26 + $0x30] sm:$0xff] }
 0x658   : > { %v9319_v55 = vpop.f32.mrf.mxu0 }
 0x659   : > { %2896 = vmax.xlane.f32.xlu1 %v12995_v38  ;;  %v13014_v14 = vadd.f32 %v13011_v29, %v9319_v55 }
 0x65a   : > { %v2670_v6 = vpop.f32.mrf.mxu0 }
 0x65b   : > { %2900 = vmax.xlane.f32.xlu0 %v13004_v23  ;;  %v13032_v55 = vadd.f32 %v13029_v42, %v2670_v6 }
 0x65c   : > { %v9320_v47 = vpop.f32.mrf.mxu0 }
 0x65d   : > { %v13022_v31 = vadd.f32 %v13019_v36, %v9320_v47 }
 0x65e   : > { %v2673_v62 = vpop.f32.mrf.mxu0 }
 0x65f   : > { %2908 = vmax.xlane.f32.xlu1 %v13022_v31  ;;  %2906 = vmax.xlane.f32.xlu0 %v13014_v14  ;;  %v13040_v47 = vadd.f32 %v13037_v30, %v2673_v62 }
 0x660   : > { %v9323_v16 = vpop.f32.mrf.mxu0 }
 0x661   : > { %v13050_v6 = vadd.f32 %v13047_v10, %v9323_v16 }
 0x662   : > { %v2686_v46 = vpop.f32.mrf.mxu0 }
 0x663   : > { %2904 = vmax.xlane.f32.xlu1 %v13040_v47  ;;  %2902 = vmax.xlane.f32.xlu0 %v13032_v55  ;;  %v13068_v16 = vadd.f32 %v13065_v48, %v2686_v46 }
 0x664   : > { %v9324_v24 = vpop.f32.mrf.mxu0 }
 0x665   : > { %v13058_v62 = vadd.f32 %v13055_v40, %v9324_v24 }
 0x666   : > { %v2689_v0 = vpop.f32.mrf.mxu0 }
 0x667   : > { %2916 = vmax.xlane.f32.xlu1 %v13058_v62  ;;  %2914 = vmax.xlane.f32.xlu0 %v13050_v6  ;;  %v13076_v24 = vadd.f32 %v13073_v44, %v2689_v0  ;;  %v11017_v0 = vld [vmem:[%s16702_s26 + $0x70] sm:$0xff] }
 0x66b   : > { %2912 = vmax.xlane.f32.xlu1 %v13076_v24  ;;  %2910 = vmax.xlane.f32.xlu0 %v13068_v16 }
 0x66c   : > { %v13080_v13 = vpop.f32.mrf.mxu1 }
 0x66d   : > { %16771 = vst [vmem:[#allocation54_spill] sm:$0xff] %v13080_v13 }
 0x66e   : > { %v13082_v58 = vpop.f32.mrf.mxu1 }
 0x66f   : > { %16772 = vst [vmem:[#allocation55_spill] sm:$0xff] %v13082_v58 }
 0x670   : > { %v13084_v49 = vpop.f32.mrf.mxu1 }
 0x671   : > { %16773 = vst [vmem:[#allocation56_spill] sm:$0xff] %v13084_v49 }
 0x672   : > { %v13086_v46 = vpop.f32.mrf.mxu1 }
 0x673   : > { %16774 = vst [vmem:[#allocation57_spill] sm:$0xff] %v13086_v46  ;;  %v11018_v46 = vld [vmem:[%s16702_s26 + $0x60] sm:$0xff] }
 0x69e   : > { %v13088_v3 = vpop.f32.mrf.mxu1 }
 0x69f   : > { %16775 = vst [vmem:[#allocation58_spill] sm:$0xff] %v13088_v3 }
 0x6a0   : > { %v13090_v41 = vpop.f32.mrf.mxu1 }
 0x6a1   : > { %16776 = vst [vmem:[#allocation59_spill] sm:$0xff] %v13090_v41  ;;  %v13108_v41 = vld [vmem:[%s16702_s26 + $0x78] sm:$0xff] }
 0x6a2   : > { %v13097_v20 = vpop.f32.mrf.mxu1 }
 0x6a3   : > { %16777 = vst [vmem:[#allocation60_spill] sm:$0xff] %v13097_v20 }
 0x6a4   : > { %v13113_v49 = vpop.f32.mrf.mxu1 }
 0x6a5   : > { %16778 = vst [vmem:[#allocation61_spill] sm:$0xff] %v13113_v49 }
 0x6a6   : > { %v9327_v60 = vpop.f32.mrf.mxu0 }
 0x6a7   : > { %v13095_v17 = vadd.f32 %v11017_v0, %v9327_v60 }
 0x6a8   : > { %v2702_v13 = vpop.f32.mrf.mxu0 }
 0x6a9   : > { %2922 = vmax.xlane.f32.xlu0 %v13095_v17  ;;  %v13103_v3 = vadd.f32 %v11018_v46, %v2702_v13  ;;  %v13122_v13 = vld [vmem:[%s16702_s26 + $0x68] sm:$0xff] }
 0x6aa   : > { %v9328_v58 = vpop.f32.mrf.mxu0 }
 0x6ab   : > { %v13111_v60 = vadd.f32 %v13108_v41, %v9328_v58 }
 0x6ac   : > { %v2705_v20 = vpop.f32.mrf.mxu0 }
 0x6ad   : > { %2924 = vmax.xlane.f32.xlu1 %v13111_v60  ;;  %2918 = vmax.xlane.f32.xlu0 %v13103_v3  ;;  %v13125_v19 = vadd.f32 %v13122_v13, %v2705_v20 }
 0x6ae   : > { %v13117_v39 = vpop.f32.mrf.mxu1 }
 0x6af   : > { %16779 = vst [vmem:[#allocation62_spill] sm:$0xff] %v13117_v39 }
 0x6b0   : > { %v13127_v51 = vpop.f32.mrf.mxu1 }
 0x6b1   : > { %16780 = vst [vmem:[#allocation63_spill] sm:$0xff] %v13127_v51  ;;  %2920 = vmax.xlane.f32.xlu1 %v13125_v19 }
 0x6b2   : > { %v13130_v58 = vpop.f32.mrf.mxu1 }
 0x6b3   : > { %16781 = vst [vmem:[#allocation64_spill] sm:$0xff] %v13130_v58 }
 0x6b4   : > { %v13132_v49 = vpop.f32.mrf.mxu1 }
 0x6b5   : > { %16782 = vst [vmem:[#allocation65_spill] sm:$0xff] %v13132_v49 }
 0x6b6   : > { %v13134_v57 = vpop.f32.mrf.mxu1 }
 0x6b7   : > { %16783 = vst [vmem:[#allocation66_spill] sm:$0xff] %v13134_v57 }
 0x6b8   : > { %v13136_v12 = vpop.f32.mrf.mxu1 }
 0x6b9   : > { %16784 = vst [vmem:[#allocation67_spill] sm:$0xff] %v13136_v12  ;;  %v13154_v12 = vpop.permute.xlu1 %3458 }
 0x6ba   : > { %v13138_v39 = vpop.f32.mrf.mxu1  ;;  %16787 = vst [vmem:[#allocation70_spill] sm:$0xff] %v13154_v12 }
 0x6bb   : > { %16785 = vst [vmem:[#allocation68_spill] sm:$0xff] %v13138_v39 }
 0x6bc   : > { %v13140_v27 = vpop.f32.mrf.mxu1 }
 0x6bd   : > { %16786 = vst [vmem:[#allocation69_spill] sm:$0xff] %v13140_v27 }
 0x6be   : > { %v9347_v5 = vpop.f32.mrf.mxu1 }
 0x6bf   : > { %v13143_v20 = vadd.f32 %v12975_v9, %v9347_v5 }
 0x6c0   : > { %v2831_v43 = vpop.f32.mrf.mxu1 }
 0x6c1   : > { %2930 = vmax.xlane.f32.xlu0 %v13143_v20  ;;  %v13147_v58 = vadd.f32 %v12984_v54, %v2831_v43  ;;  %v13160_v43 = vpop.permute.xlu0 %3659 }
 0x6c2   : > { %v9348_v51 = vpop.f32.mrf.mxu1  ;;  %16788 = vst [vmem:[#allocation71_spill] sm:$0xff] %v13160_v43 }
 0x6c3   : > { %v13150_v49 = vadd.f32 %v13001_v53, %v9348_v51  ;;  %v13165_v53 = vpop.permute.xlu1 %3661 }
 0x6c4   : > { %v2834_v57 = vpop.f32.mrf.mxu1  ;;  %16789 = vst [vmem:[#allocation72_spill] sm:$0xff] %v13165_v53 }
 0x6c5   : > { %2932 = vmax.xlane.f32.xlu1 %v13150_v49  ;;  %2926 = vmax.xlane.f32.xlu0 %v13147_v58  ;;  %v13157_v5 = vadd.f32 %v12992_v21, %v2834_v57  ;;  %v13171_v21 = vpop.permute.xlu0 %3655 }
 0x6c6   : > { %v9351_v27 = vpop.f32.mrf.mxu1  ;;  %16790 = vst [vmem:[#allocation73_spill] sm:$0xff] %v13171_v21 }
 0x6c7   : > { %v13174_v59 = vpop.permute.xlu1 %3657 }
 0x6c8   : > { %v2847_v9 = vpop.f32.mrf.mxu1  ;;  %16791 = vst [vmem:[#allocation74_spill] sm:$0xff] %v13174_v59 }
 0x6c9   : > { %2928 = vmax.xlane.f32.xlu1 %v13157_v5  ;;  %v13163_v51 = vadd.f32 %v13029_v42, %v2847_v9  ;;  %v13180_v25 = vpop.permute.xlu0 %3462 }
 0x6ca   : > { %v9352_v39 = vpop.f32.mrf.mxu1  ;;  %16792 = vst [vmem:[#allocation75_spill] sm:$0xff] %v13180_v25 }
 0x6cc   : > { %v2850_v54 = vpop.f32.mrf.mxu1 }
 0x6cd   : > { %2934 = vmax.xlane.f32.xlu1 %v13163_v51 }
 0x6ce   : > { %v9355_v35 = vpop.f32.mrf.mxu1 }
 0x6cf   : > { %v13169_v12 = vadd.f32 %v13047_v10, %v9355_v35  ;;  %v13184_v35 = vpop.permute.xlu1 %3460 }
 0x6d0   : > { %v2863_v57 = vpop.f32.mrf.mxu1  ;;  %16793 = vst [vmem:[#allocation76_spill] sm:$0xff] %v13184_v35 }
 0x6d1   : > { %2946 = vmax.xlane.f32.xlu1 %v13169_v12  ;;  %v13177_v42 = vadd.f32 %v13065_v48, %v2863_v57 }
 0x6d2   : > { %v9356_v43 = vpop.f32.mrf.mxu1 }
 0x6d3   : > { %v13193_v59 = vpop.permute.xlu1 %3653 }
 0x6d4   : > { %v2866_v9 = vpop.f32.mrf.mxu1  ;;  %16794 = vst [vmem:[#allocation77_spill] sm:$0xff] %v13193_v59 }
 0x6d5   : > { %2942 = vmax.xlane.f32.xlu1 %v13177_v42 }
 0x6d6   : > { %v9359_v53 = vpop.f32.mrf.mxu1 }
 0x6d7   : > { %v13182_v34 = vadd.f32 %v11017_v0, %v9359_v53 }
 0x6d8   : > { %v2879_v10 = vpop.f32.mrf.mxu1 }
 0x6d9   : > { %2954 = vmax.xlane.f32.xlu1 %v13182_v34  ;;  %v13187_v21 = vadd.f32 %v11018_v46, %v2879_v10 }
 0x6db   : > { %3464 = vrot.lane.b32.xlu0 %v16732_v26, %s11178_s18 }
 0x6dc   : > { %v2899_v48 = vpop.xlane.xlu0 %2898 }
 0x6dd   : > { %2950 = vmax.xlane.f32.xlu1 %v13187_v21  ;;  %v2960_v57 = vsub.f32 %v12978_v15, %v2899_v48 }
 0x6df   : > { %v2994_v25 = vmul.f32 1.442695, %v2960_v57 }
 0x6e0   : > { %v2895_v0 = vpop.xlane.xlu0 %2894 }
 0x6e1   : > { %10301 = vpow2.f32 %v2994_v25  ;;  %v2958_v53 = vsub.f32 %v12987_v7, %v2895_v0  ;;  %v13219_v7 = vadd.f32 %v13037_v30, %v2850_v54 }
 0x6e2   : > { %v2897_v35 = vpop.xlane.xlu1 %2896 }
 0x6e3   : > { %v2990_v61 = vmul.f32 1.442695, %v2958_v53  ;;  %v2959_v46 = vsub.f32 %v12995_v38, %v2897_v35 }
 0x6e4   : > { %v2901_v8 = vpop.xlane.xlu0 %2900 }
 0x6e5   : > { %10303 = vpow2.f32 %v2990_v61  ;;  %v2961_v10 = vsub.f32 %v13004_v23, %v2901_v8  ;;  %v2992_v45 = vmul.f32 1.442695, %v2959_v46  ;;  %v13208_v61 = vadd.f32 %v13011_v29, %v9351_v27 }
 0x6e6   : > { %v13224_v29 = vadd.f32 %v13055_v40, %v9356_v43 }
 0x6e7   : > { %v2996_v26 = vmul.f32 1.442695, %v2961_v10 }
 0x6e8   : > { %v2909_v27 = vpop.xlane.xlu1 %2908 }
 0x6e9   : > { %10305 = vpow2.f32 %v2996_v26  ;;  %v13215_v26 = vadd.f32 %v13019_v36, %v9352_v39  ;;  %v13229_v39 = vadd.f32 %v13073_v44, %v2866_v9  ;;  %v2965_v30 = vsub.f32 %v13022_v31, %v2909_v27 }
 0x6ea   : > { %10307 = vpow2.f32 %v2992_v45  ;;  %v2907_v45 = vpop.xlane.xlu0 %2906 }
 0x6eb   : > { %v2964_v38 = vsub.f32 %v13014_v14, %v2907_v45  ;;  %v9360_v14 = vpop.f32.mrf.mxu1  ;;  %v3004_v43 = vmul.f32 1.442695, %v2965_v30 }
 0x6ec   : > { %v2905_v54 = vpop.xlane.xlu1 %2904  ;;  %v13234_v40 = vadd.f32 %v13108_v41, %v9360_v14 }
 0x6ed   : > { %v3002_v35 = vmul.f32 1.442695, %v2964_v38  ;;  %v2882_v44 = vpop.f32.mrf.mxu1 }
 0x6ee   : > { %v13198_v15 = vpop.eup %10301  ;;  %v2903_v23 = vpop.xlane.xlu0 %2902  ;;  %v13241_v31 = vadd.f32 %v13122_v13, %v2882_v44 }
 0x6ef   : > { %3058 = vadd.xlane.f32.xlu1 %v13198_v15  ;;  %v2962_v57 = vsub.f32 %v13032_v55, %v2903_v23  ;;  %10309 = vpow2.f32 %v3002_v35  ;;  %v2963_v55 = vsub.f32 %v13040_v47, %v2905_v54 }
 0x6f0   : > { %v2917_v46 = vpop.xlane.xlu1 %2916 }
 0x6f1   : > { %v2998_v36 = vmul.f32 1.442695, %v2962_v57  ;;  %v3000_v9 = vmul.f32 1.442695, %v2963_v55  ;;  %v2969_v13 = vsub.f32 %v13058_v62, %v2917_v46 }
 0x6f2   : > { %v13201_v48 = vpop.eup %10303  ;;  %v2915_v0 = vpop.xlane.xlu0 %2914 }
 0x6f3   : > { %3054 = vadd.xlane.f32.xlu1 %v13201_v48  ;;  %10311 = vpow2.f32 %v2998_v36  ;;  %v2968_v53 = vsub.f32 %v13050_v6, %v2915_v0  ;;  %v3012_v35 = vmul.f32 1.442695, %v2969_v13 }
 0x6f4   : > { %10313 = vpow2.f32 %v3004_v43  ;;  %v2913_v38 = vpop.xlane.xlu1 %2912 }
 0x6f5   : > { %10315 = vpow2.f32 %v3000_v9  ;;  %v3010_v47 = vmul.f32 1.442695, %v2968_v53  ;;  %v2967_v6 = vsub.f32 %v13076_v24, %v2913_v38 }
 0x6f6   : > { %v13204_v25 = vpop.eup %10305  ;;  %v2911_v41 = vpop.xlane.xlu0 %2910 }
 0x6f7   : > { %3060 = vadd.xlane.f32.xlu1 %v13204_v25  ;;  %v13210_v8 = vpop.eup %10307  ;;  %v2966_v10 = vsub.f32 %v13068_v16, %v2911_v41  ;;  %10317 = vpow2.f32 %v3010_v47  ;;  %v3008_v16 = vmul.f32 1.442695, %v2967_v6 }
 0x6f9   : > { %v3006_v23 = vmul.f32 1.442695, %v2966_v10 }
 0x6fa   : > { %2938 = vmax.xlane.f32.xlu0 %v13208_v61 }
 0x6fb   : > { %3056 = vadd.xlane.f32.xlu1 %v13210_v8  ;;  %10319 = vpow2.f32 %v3006_v23 }
 0x6fc   : > { %v13246_v45 = vpop.eup %10309  ;;  %10321 = vpow2.f32 %v3012_v35 }
 0x6fd   : > { %10323 = vpow2.f32 %v3008_v16 }
 0x6fe   : > { %2940 = vmax.xlane.f32.xlu0 %v13215_v26 }
 0x700   : > { %v13250_v27 = vpop.eup %10311 }
 0x701   : > { %v13254_v57 = vpop.eup %10313 }
 0x702   : > { %2936 = vmax.xlane.f32.xlu0 %v13219_v7  ;;  %v13257_v30 = vpop.eup %10315 }
 0x704   : > { %v13260_v62 = vpop.eup %10317 }
 0x706   : > { %2948 = vmax.xlane.f32.xlu0 %v13224_v29 }
 0x708   : > { %v13263_v24 = vpop.eup %10319 }
 0x709   : > { %v13266_v36 = vpop.eup %10321 }
 0x70a   : > { %2944 = vmax.xlane.f32.xlu0 %v13229_v39  ;;  %v13269_v14 = vpop.eup %10323 }
 0x70c   : > { %3466 = vrot.lane.b32.xlu1 %v11989_v4, %s11178_s18 }
 0x70e   : > { %2956 = vmax.xlane.f32.xlu0 %v13234_v40 }
 0x712   : > { %2952 = vmax.xlane.f32.xlu0 %v13241_v31 }
 0x716   : > { %3066 = vadd.xlane.f32.xlu0 %v13246_v45 }
 0x71a   : > { %3062 = vadd.xlane.f32.xlu0 %v13250_v27 }
 0x71e   : > { %3068 = vadd.xlane.f32.xlu0 %v13254_v57 }
 0x722   : > { %3064 = vadd.xlane.f32.xlu0 %v13257_v30 }
 0x726   : > { %3074 = vadd.xlane.f32.xlu0 %v13260_v62 }
 0x72a   : > { %3070 = vadd.xlane.f32.xlu0 %v13263_v24 }
 0x72e   : > { %3076 = vadd.xlane.f32.xlu0 %v13266_v36 }
 0x730   : > { %3072 = vadd.xlane.f32.xlu1 %v13269_v14 }
 0x732   : > { %v2923_v54 = vpop.xlane.xlu0 %2922 }
 0x733   : > { %v2972_v0 = vsub.f32 %v13095_v17, %v2923_v54 }
 0x735   : > { %v3018_v43 = vmul.f32 1.442695, %v2972_v0 }
 0x736   : > { %v2925_v55 = vpop.xlane.xlu1 %2924  ;;  %v2919_v44 = vpop.xlane.xlu0 %2918 }
 0x737   : > { %10325 = vpow2.f32 %v3018_v43  ;;  %v2973_v9 = vsub.f32 %v13111_v60, %v2925_v55  ;;  %v2970_v53 = vsub.f32 %v13103_v3, %v2919_v44 }
 0x739   : > { %v3020_v46 = vmul.f32 1.442695, %v2973_v9  ;;  %v3014_v41 = vmul.f32 1.442695, %v2970_v53 }
 0x73a   : > { %v2921_v47 = vpop.xlane.xlu1 %2920 }
 0x73b   : > { %10327 = vpow2.f32 %v3020_v46  ;;  %v2971_v10 = vsub.f32 %v13125_v19, %v2921_v47 }
 0x73c   : > { %10329 = vpow2.f32 %v3014_v41 }
 0x73d   : > { %v3016_v38 = vmul.f32 1.442695, %v2971_v10 }
 0x73f   : > { %10331 = vpow2.f32 %v3016_v38 }
 0x744   : > { %v13276_v13 = vpop.eup %10325 }
 0x745   : > { %3082 = vadd.xlane.f32.xlu1 %v13276_v13 }
 0x748   : > { %v13279_v17 = vpop.eup %10327 }
 0x749   : > { %v13281_v23 = vpop.eup %10329  ;;  %3084 = vadd.xlane.f32.xlu1 %v13279_v17 }
 0x74a   : > { %3078 = vadd.xlane.f32.xlu0 %v13281_v23  ;;  %v2931_v3 = vpop.xlane.xlu0 %2930 }
 0x74b   : > { %v2976_v60 = vsub.f32 %v13143_v20, %v2931_v3 }
 0x74c   : > { %v13286_v6 = vpop.eup %10331 }
 0x74d   : > { %v3026_v19 = vmul.f32 1.442695, %v2976_v60  ;;  %3080 = vadd.xlane.f32.xlu1 %v13286_v6 }
 0x74e   : > { %v2933_v35 = vpop.xlane.xlu1 %2932  ;;  %v2927_v16 = vpop.xlane.xlu0 %2926 }
 0x74f   : > { %10333 = vpow2.f32 %v3026_v19  ;;  %v2974_v54 = vsub.f32 %v13147_v58, %v2927_v16  ;;  %v2977_v0 = vsub.f32 %v13150_v49, %v2933_v35 }
 0x751   : > { %v3022_v43 = vmul.f32 1.442695, %v2974_v54  ;;  %v3028_v9 = vmul.f32 1.442695, %v2977_v0 }
 0x752   : > { %v2929_v55 = vpop.xlane.xlu1 %2928  ;;  %v13310_v19 = vpop.permute.xlu0 %3464 }
 0x753   : > { %v2975_v44 = vsub.f32 %v13157_v5, %v2929_v55  ;;  %10335 = vpow2.f32 %v3022_v43 }
 0x755   : > { %v3024_v53 = vmul.f32 1.442695, %v2975_v44 }
 0x756   : > { %v2935_v46 = vpop.xlane.xlu1 %2934 }
 0x757   : > { %10337 = vpow2.f32 %v3024_v53  ;;  %v2978_v54 = vsub.f32 %v13163_v51, %v2935_v46 }
 0x758   : > { %10339 = vpow2.f32 %v3028_v9 }
 0x759   : > { %v3030_v9 = vmul.f32 1.442695, %v2978_v54 }
 0x75a   : > { %v2947_v47 = vpop.xlane.xlu1 %2946 }
 0x75c   : > { %v13292_v20 = vpop.eup %10333 }
 0x75d   : > { %16795 = vst [vmem:[#allocation78_spill] sm:$0xff] %v13292_v20  ;;  %3090 = vadd.xlane.f32.xlu1 %v13292_v20 }
 0x75e   : > { %v2943_v5 = vpop.xlane.xlu1 %2942 }
 0x760   : > { %v13295_v41 = vpop.eup %10335 }
 0x761   : > { %3086 = vadd.xlane.f32.xlu1 %v13295_v41 }
 0x762   : > { %v13304_v10 = vpop.xlane.xlu1 %2954 }
 0x764   : > { %v13298_v49 = vpop.eup %10337 }
 0x765   : > { %v13300_v58 = vpop.eup %10339  ;;  %3088 = vadd.xlane.f32.xlu0 %v13298_v49 }
 0x766   : > { %16796 = vst [vmem:[#allocation79_spill] sm:$0xff] %v13300_v58  ;;  %3092 = vadd.xlane.f32.xlu1 %v13300_v58  ;;  %v13306_v38 = vpop.xlane.xlu1 %2950 }
 0x777   : > { %3468 = vrot.lane.b32.xlu1 %v11982_v50, %s11178_s18 }
 0x778   : > { %v3059_v3 = vpop.xlane.xlu1 %3058 }
 0x77c   : > { %v3055_v60 = vpop.xlane.xlu1 %3054 }
 0x780   : > { %v3061_v35 = vpop.xlane.xlu1 %3060 }
 0x781   : > { %10341 = vrcp.f32 %v3061_v35  ;;  %v2984_v35 = vsub.f32 %v13169_v12, %v2947_v47 }
 0x782   : > { %10343 = vrcp.f32 %v3055_v60 }
 0x783   : > { %v2939_v16 = vpop.xlane.xlu0 %2938  ;;  %10345 = vrcp.f32 %v3059_v3  ;;  %v3042_v3 = vmul.f32 1.442695, %v2984_v35 }
 0x784   : > { %v2980_v0 = vsub.f32 %v13208_v61, %v2939_v16  ;;  %v3057_v43 = vpop.xlane.xlu1 %3056  ;;  %v2982_v16 = vsub.f32 %v13177_v42, %v2943_v5 }
 0x785   : > { %10347 = vrcp.f32 %v3057_v43 }
 0x786   : > { %v3034_v55 = vmul.f32 1.442695, %v2980_v0 }
 0x787   : > { %v2941_v44 = vpop.xlane.xlu0 %2940 }
 0x788   : > { %10349 = vpow2.f32 %v3034_v55  ;;  %v2981_v53 = vsub.f32 %v13215_v26, %v2941_v44 }
 0x789   : > { %10351 = vpow2.f32 %v3030_v9 }
 0x78a   : > { %v3036_v59 = vmul.f32 1.442695, %v2981_v53 }
 0x78b   : > { %v2937_v58 = vpop.xlane.xlu0 %2936 }
 0x78c   : > { %v2979_v60 = vsub.f32 %v13219_v7, %v2937_v58  ;;  %10353 = vpow2.f32 %v3036_v59  ;;  %v3038_v7 = vmul.f32 1.442695, %v2982_v16 }
 0x78e   : > { %v3032_v20 = vmul.f32 1.442695, %v2979_v60  ;;  %v10342_v51 = vpop.eup %10341  ;;  %v3531_v60 = vsel %vm1727_vm2, %v12911_v28, 0 }
 0x78f   : > { %v2949_v46 = vpop.xlane.xlu0 %2948  ;;  %v10344_v61 = vpop.eup %10343  ;;  %v3153_v26 = vmul.f32 %v10342_v51, %v13204_v25 }
 0x790   : > { %10355 = vpow2.f32 %v3032_v20  ;;  %v10346_v54 = vpop.eup %10345  ;;  %v3150_v55 = vmul.f32 %v10344_v61, %v13201_v48  ;;  %v2985_v47 = vsub.f32 %v13224_v29, %v2949_v46 }
 0x791   : > { %10357 = vpow2.f32 %v3042_v3  ;;  %v3152_v59 = vmul.f32 %v10346_v54, %v13198_v15  ;;  %v3528_v3 = vsel %vm1727_vm2, %v12913_v22, 0 }
 0x792   : > { %v10348_v0 = vpop.eup %10347  ;;  %10359 = vpow2.f32 %v3038_v7  ;;  %v3044_v25 = vmul.f32 1.442695, %v2985_v47 }
 0x793   : > { %v2945_v43 = vpop.xlane.xlu0 %2944  ;;  %v3151_v12 = vmul.f32 %v10348_v0, %v13210_v8  ;;  %v3183_v42 = vpack.c.bf16 %v3153_v26, %v3152_v59  ;;  %v3534_v8 = vsel %vm1727_vm2, %v12917_v52, 0 }
 0x794   : > { %v2983_v48 = vsub.f32 %v13229_v39, %v2945_v43  ;;  %10361 = vpow2.f32 %v3044_v25 }
 0x795   : > { %v13323_v58 = vpop.eup %10349  ;;  %v3182_v44 = vpack.c.bf16 %v3151_v12, %v3150_v55  ;;  %v13372_v55 = vpop.permute.xlu1 %3466 }
 0x796   : > { %3098 = vadd.xlane.f32.xlu0 %v13323_v58  ;;  %v13331_v29 = vpop.eup %10351  ;;  %v3040_v9 = vmul.f32 1.442695, %v2983_v48 }
 0x797   : > { %v13326_v20 = vpop.xlane.xlu0 %2956  ;;  %9377 = vmatprep.mubr.bf16.mxu0 %v3182_v44 }
 0x798   : > { %9378 = vmatmul.mubr.bf16.vlgmr.msra.gmra.mxu0 %v3183_v42  ;;  %10363 = vpow2.f32 %v3040_v9 }
 0x799   : > { %9426 = vmatpush3.bf16.xpose.msra.mxu0 %v3534_v8  ;;  %v13336_v5 = vpop.eup %10353 }
 0x79a   : > { %9762 = vmatprep.subr.msk.bf16.mxu0 %vm1727_vm2, %v12911_v28  ;;  %3094 = vadd.xlane.f32.xlu0 %v13331_v29 }
 0x79b   : > { %v2953_v15 = vpop.xlane.xlu0 %2952 }
 0x79c   : > { %v2987_v53 = vsub.f32 %v13241_v31, %v2953_v15 }
 0x79d   : > { %v13339_v39 = vpop.eup %10355 }
 0x79e   : > { %3100 = vadd.xlane.f32.xlu0 %v13336_v5  ;;  %3096 = vadd.xlane.f32.xlu1 %v13339_v39  ;;  %v3048_v35 = vmul.f32 1.442695, %v2987_v53  ;;  %v13345_v51 = vpop.eup %10357 }
 0x79f   : > { %v3067_v52 = vpop.xlane.xlu0 %3066  ;;  %v13350_v46 = vpop.eup %10359 }
 0x7a0   : > { %10365 = vpow2.f32 %v3048_v35  ;;  %v2986_v35 = vsub.f32 %v13187_v21, %v13306_v38  ;;  %v3516_v38 = vsel %vm1727_vm2, %v12930_v2, 0 }
 0x7a1   : > { %9428 = vmatpush3.bf16.xpose.msra.mxu0 %v3531_v60  ;;  %v13355_v16 = vpop.eup %10361 }
 0x7a2   : > { %9763 = vmatprep.subr.msk.bf16.mxu0 %vm1727_vm2, %v12913_v22  ;;  %3106 = vadd.xlane.f32.xlu1 %v13345_v51  ;;  %v3525_v22 = vsel %vm1727_vm2, %v12921_v56, 0 }
 0x7a3   : > { %v3063_v31 = vpop.xlane.xlu0 %3062 }
 0x7a5   : > { %v13360_v54 = vpop.eup %10363 }
 0x7a6   : > { %3102 = vadd.xlane.f32.xlu1 %v13350_v46 }
 0x7a7   : > { %v3069_v61 = vpop.xlane.xlu0 %3068 }
 0x7a8   : > { %10367 = vrcp.f32 %v3069_v61 }
 0x7a9   : > { %9430 = vmatpush3.bf16.xpose.msra.mxu0 %v3528_v3  ;;  %10369 = vrcp.f32 %v3063_v31 }
 0x7aa   : > { %9764 = vmatprep.subr.msk.bf16.mxu0 %vm1727_vm2, %v12921_v56  ;;  %3108 = vadd.xlane.f32.xlu1 %v13355_v16  ;;  %10371 = vrcp.f32 %v3067_v52  ;;  %v3522_v56 = vsel %vm1727_vm2, %v12925_v32, 0 }
 0x7ab   : > { %v3065_v28 = vpop.xlane.xlu0 %3064 }
 0x7ac   : > { %10373 = vrcp.f32 %v3065_v28 }
 0x7ad   : > { %v13365_v26 = vpop.eup %10365 }
 0x7ae   : > { %3104 = vadd.xlane.f32.xlu1 %v13360_v54 }
 0x7af   : > { %v3075_v0 = vpop.xlane.xlu0 %3074 }
 0x7b1   : > { %9432 = vmatpush3.bf16.xpose.msra.mxu0 %v3525_v22 }
 0x7b2   : > { %9765 = vmatprep.subr.msk.bf16.mxu0 %vm1727_vm2, %v12925_v32  ;;  %3112 = vadd.xlane.f32.xlu1 %v13365_v26  ;;  %v2988_v32 = vsub.f32 %v13182_v34, %v13304_v10  ;;  %v3046_v34 = vmul.f32 1.442695, %v2986_v35  ;;  %v16805_v35 = vld [vmem:[#allocation70_spill] sm:$0xff] }
 0x7b3   : > { %v3071_v43 = vpop.xlane.xlu0 %3070 }
 0x7b4   : > { %3651 = vrot.lane.b32.xlu0 %v12176_v33, %s11177_s17  ;;  %10375 = vrcp.f32 %v3071_v43  ;;  %v3050_v52 = vmul.f32 1.442695, %v2988_v32 }
 0x7b5   : > { %v10368_v12 = vpop.eup %10367 }
 0x7b6   : > { %v10370_v7 = vpop.eup %10369  ;;  %v3157_v25 = vmul.f32 %v10368_v12, %v13254_v57  ;;  %v3519_v57 = vsel %vm1727_vm2, %v12923_v63, 0  ;;  %v16799_v12 = vld [vmem:[#allocation19_spill] sm:$0xff] }
 0x7b7   : > { %v3077_v47 = vpop.xlane.xlu0 %3076  ;;  %v10372_v59 = vpop.eup %10371  ;;  %v3154_v48 = vmul.f32 %v10370_v7, %v13250_v27  ;;  %v16800_v7 = vld [vmem:[#allocation21_spill] sm:$0xff] }
 0x7b8   : > { %10377 = vrcp.f32 %v3077_v47  ;;  %v3156_v15 = vmul.f32 %v10372_v59, %v13246_v45 }
 0x7b9   : > { %v10374_v44 = vpop.eup %10373  ;;  %10379 = vrcp.f32 %v3075_v0  ;;  %9434 = vmatpush3.bf16.xpose.msra.mxu0 %v3522_v56  ;;  %v3073_v42 = vpop.xlane.xlu1 %3072 }
 0x7ba   : > { %9766 = vmatprep.subr.msk.bf16.mxu0 %vm1727_vm2, %v12923_v63  ;;  %10381 = vrcp.f32 %v3073_v42  ;;  %v3155_v8 = vmul.f32 %v10374_v44, %v13257_v30  ;;  %v3185_v53 = vpack.c.bf16 %v3157_v25, %v3156_v15  ;;  %v2989_v30 = vsub.f32 %v13234_v40, %v13326_v20  ;;  %v16797_v20 = vld [vmem:[#allocation25_spill] sm:$0xff] }
 0x7bb   : > { %10383 = vpow2.f32 %v3050_v52  ;;  %v16802_v52 = vld [vmem:[#allocation39_spill] sm:$0xff] }
 0x7bc   : > { %v3184_v9 = vpack.c.bf16 %v3155_v8, %v3154_v48  ;;  %10385 = vpow2.f32 %v3046_v34  ;;  %v3052_v61 = vmul.f32 1.442695, %v2989_v30  ;;  %v16808_v34 = vld [vmem:[#allocation33_spill] sm:$0xff]  ;;  %v16809_v30 = vld [vmem:[#allocation24_spill] sm:$0xff] }
 0x7be   : > { %9381 = vmatprep.mubr.bf16.mxu0 %v3184_v9  ;;  %10387 = vpow2.f32 %v3052_v61  ;;  %v16812_v61 = vld [vmem:[#allocation23_spill] sm:$0xff] }
 0x7bf   : > { %9382 = vmatmul.mubr.bf16.gmra.mxu0 %v3185_v53 }
 0x7c1   : > { %9436 = vmatpush3.bf16.xpose.msra.mxu0 %v3519_v57  ;;  %v10376_v45 = vpop.eup %10375  ;;  %v16801_v57 = vld [vmem:[#allocation28_spill] sm:$0xff] }
 0x7c2   : > { %9767 = vmatprep.subr.msk.bf16.mxu0 %vm1727_vm2, %v12930_v2  ;;  %v3158_v60 = vmul.f32 %v10376_v45, %v13263_v24  ;;  %v3513_v24 = vsel %vm1727_vm2, %v12934_v11, 0  ;;  %v16806_v45 = vld [vmem:[#allocation12_spill] sm:$0xff] }
 0x7c3   : > { %3649 = vrot.lane.b32.xlu1 %v12154_v18, %s11177_s17 }
 0x7c5   : > { %v10378_v27 = vpop.eup %10377 }
 0x7c6   : > { %v10380_v10 = vpop.eup %10379  ;;  %v3161_v21 = vmul.f32 %v10378_v27, %v13266_v36  ;;  %v16807_v27 = vld [vmem:[#allocation76_spill] sm:$0xff] }
 0x7c7   : > { %v10382_v63 = vpop.eup %10381  ;;  %3635 = vrot.lane.b32.xlu1 %v12176_v33, %s11178_s18  ;;  %v3160_v3 = vmul.f32 %v10380_v10, %v13260_v62 }
 0x7c8   : > { %v3159_v31 = vmul.f32 %v10382_v63, %v13269_v14  ;;  %v13410_v62 = vpop.eup %10383  ;;  %v16810_v63 = vld [vmem:[#allocation75_spill] sm:$0xff] }
 0x7c9   : > { %9438 = vmatpush3.bf16.xpose.msra.mxu0 %v3516_v38  ;;  %v3187_v36 = vpack.c.bf16 %v3161_v21, %v3160_v3  ;;  %v13415_v0 = vpop.eup %10385  ;;  %v16811_v38 = vld [vmem:[#allocation35_spill] sm:$0xff] }
 0x7ca   : > { %9768 = vmatprep.subr.msk.bf16.mxu0 %vm1727_vm2, %v12934_v11  ;;  %v3186_v40 = vpack.c.bf16 %v3159_v31, %v3158_v60  ;;  %v16798_v11 = vld [vmem:[#allocation13_spill] sm:$0xff] }
 0x7cb   : > { %3639 = vrot.lane.b32.xlu1 %v12166_v37, %s11178_s18  ;;  %v13420_v43 = vpop.eup %10387 }
 0x7cc   : > { %9385 = vmatprep.mubr.bf16.mxu0 %v3186_v40 }
 0x7cd   : > { %9386 = vmatmul.mubr.bf16.gmra.mxu0 %v3187_v36  ;;  %v16813_v36 = vld [vmem:[#allocation78_spill] sm:$0xff] }
 0x7ce   : > { %v3083_v2 = vpop.xlane.xlu1 %3082 }
 0x7cf   : > { %3643 = vrot.lane.b32.xlu1 %v12157_v1, %s11178_s18 }
 0x7d1   : > { %9440 = vmatpush3.bf16.xpose.msra.mxu0 %v3513_v24  ;;  %v16814_v24 = vld [vmem:[#allocation79_spill] sm:$0xff] }
 0x7d2   : > { %v3085_v14 = vpop.xlane.xlu1 %3084 }
 0x7d3   : > { %3114 = vadd.xlane.f32.xlu0 %v13410_v62  ;;  %3647 = vrot.lane.b32.xlu1 %v16797_v20, %s11178_s18  ;;  %v3079_v28 = vpop.xlane.xlu0 %3078  ;;  %10389 = vrcp.f32 %v3085_v14 }
 0x7d4   : > { %10391 = vrcp.f32 %v3079_v28  ;;  %v16815_v28 = vld [vmem:[#allocation16_spill] sm:$0xff] }
 0x7d5   : > { %10393 = vrcp.f32 %v3083_v2 }
 0x7d6   : > { %v3081_v22 = vpop.xlane.xlu1 %3080 }
 0x7d7   : > { %10395 = vrcp.f32 %v3081_v22  ;;  %3110 = vadd.xlane.f32.xlu0 %v13415_v0  ;;  %4126 = vrot.lane.b32.xlu1 %v16798_v11, %s11178_s18 }
 0x7db   : > { %3116 = vadd.xlane.f32.xlu0 %v13420_v43  ;;  %4118 = vrot.lane.b32.xlu1 %v16799_v12, %s11178_s18 }
 0x7df   : > { %4114 = vrot.lane.b32.xlu1 %v16800_v7, %s11178_s18 }
 0x7e0   : > { %v10390_v47 = vpop.eup %10389 }
 0x7e1   : > { %v10392_v59 = vpop.eup %10391  ;;  %v3165_v42 = vmul.f32 %v10390_v47, %v13279_v17 }
 0x7e2   : > { %v10394_v56 = vpop.eup %10393  ;;  %v3162_v25 = vmul.f32 %v10392_v59, %v13281_v23  ;;  %v16817_v59 = vld [vmem:[#allocation48_spill] sm:$0xff] }
 0x7e3   : > { %4384 = vrot.lane.b32.xlu1 %v11982_v50, %s11179_s19  ;;  %v3164_v15 = vmul.f32 %v10394_v56, %v13276_v13  ;;  %v16803_v13 = vld [vmem:[#allocation30_spill] sm:$0xff]  ;;  %v3711_v56 = vsel %vm1727_vm2, %v16817_v59, 0 }
 0x7e4   : > { %v10396_v44 = vpop.eup %10395 }
 0x7e5   : > { %v3163_v48 = vmul.f32 %v10396_v44, %v13286_v6  ;;  %v3189_v32 = vpack.c.bf16 %v3165_v42, %v3164_v15  ;;  %v16804_v6 = vld [vmem:[#allocation10_spill] sm:$0xff]  ;;  %v16819_v44 = vld [vmem:[#allocation72_spill] sm:$0xff]  ;;  %v16820_v42 = vld [vmem:[#allocation11_spill] sm:$0xff] }
 0x7e6   : > { %v3091_v8 = vpop.xlane.xlu1 %3090  ;;  %v16824_v15 = vld [vmem:[#allocation17_spill] sm:$0xff] }
 0x7e7   : > { %4382 = vrot.lane.b32.xlu1 %v11989_v4, %s11179_s19  ;;  %v3188_v9 = vpack.c.bf16 %v3163_v48, %v3162_v25  ;;  %v16821_v25 = vld [vmem:[#allocation40_spill] sm:$0xff]  ;;  %v16822_v48 = vld [vmem:[#allocation15_spill] sm:$0xff] }
 0x7e9   : > { %9389 = vmatprep.mubr.bf16.mxu0 %v3188_v9  ;;  %v16825_v9 = vld [vmem:[#allocation18_spill] sm:$0xff] }
 0x7ea   : > { %9390 = vmatmul.mubr.bf16.gmra.mxu0 %v3189_v32  ;;  %v3087_v53 = vpop.xlane.xlu1 %3086 }
 0x7eb   : > { %4249 = vrot.lane.b32.xlu1 %v16801_v57, %s11178_s18  ;;  %9441 = vmatprep.mubr.msk.bf16.mxu0 %vm1727_vm2, %v16802_v52  ;;  %10397 = vrcp.f32 %v3087_v53  ;;  %v16826_v53 = vld [vmem:[#allocation74_spill] sm:$0xff]  ;;  %v16827_v52 = vld [vmem:[#allocation20_spill] sm:$0xff] }
 0x7ec   : > { %10399 = vrcp.f32 %v3091_v8  ;;  %v16823_v8 = vld [vmem:[#allocation71_spill] sm:$0xff] }
 0x7ed   : > { %v3705_v32 = vsel %vm1727_vm2, %v16823_v8, 0 }
 0x7ee   : > { %v3089_v17 = vpop.xlane.xlu0 %3088 }
 0x7ef   : > { %v3093_v23 = vpop.xlane.xlu1 %3092  ;;  %10401 = vrcp.f32 %v3089_v17  ;;  %4247 = vrot.lane.b32.xlu1 %v16803_v13, %s11178_s18  ;;  %v3702_v17 = vsel %vm1727_vm2, %v16826_v53, 0 }
 0x7f0   : > { %10403 = vrcp.f32 %v3093_v23  ;;  %v16828_v23 = vld [vmem:[#allocation73_spill] sm:$0xff] }
 0x7f1   : > { %3470 = vrot.lane.b32.xlu0 %v16804_v6, %s11178_s18 }
 0x7f2   : > { %9442 = vmatmul.mubr.msk.bf16.vlgmr.msra.gmra.mxu0 %vm1727_vm2, %v16805_v35  ;;  %v16829_v35 = vld [vmem:[#allocation9_spill] sm:$0xff] }
 0x7f3   : > { %4376 = vrot.lane.b32.xlu1 %v16806_v45, %s11179_s19  ;;  %9445 = vmatprep.mubr.msk.bf16.mxu0 %vm1727_vm2, %v16807_v27 }
 0x7f5   : > { %3633 = vrot.lane.b32.xlu0 %v12154_v18, %s11178_s18 }
 0x7f7   : > { %4243 = vrot.lane.b32.xlu1 %v16808_v34, %s11178_s18 }
 0x7f8   : > { %v10398_v10 = vpop.eup %10397 }
 0x7f9   : > { %3637 = vrot.lane.b32.xlu0 %v16809_v30, %s11178_s18  ;;  %v10400_v21 = vpop.eup %10399  ;;  %v3166_v3 = vmul.f32 %v10398_v10, %v13295_v41  ;;  %v3469_v41 = vpop.permute.xlu1 %3468  ;;  %v16830_v10 = vld [vmem:[#allocation14_spill] sm:$0xff] }
 0x7fa   : > { %9446 = vmatmul.mubr.msk.bf16.gmra.mxu0 %vm1727_vm2, %v16810_v63  ;;  %v3168_v2 = vmul.f32 %v10400_v21, %v16813_v36  ;;  %v3699_v63 = vsel %vm1727_vm2, %v16828_v23, 0  ;;  %v16833_v36 = vld [vmem:[#allocation36_spill] sm:$0xff] }
 0x7fb   : > { %4241 = vrot.lane.b32.xlu1 %v16811_v38, %s11178_s18  ;;  %9449 = vmatprep.mubr.msk.bf16.mxu0 %vm1727_vm2, %v13310_v19  ;;  %v16816_v19 = vld [vmem:[#allocation22_spill] sm:$0xff] }
 0x7fc   : > { %v10402_v60 = vpop.eup %10401 }
 0x7fd   : > { %v10404_v31 = vpop.eup %10403  ;;  %3641 = vrot.lane.b32.xlu0 %v16812_v61, %s11178_s18  ;;  %v3167_v40 = vmul.f32 %v10402_v60, %v13298_v49  ;;  %v16818_v49 = vld [vmem:[#allocation38_spill] sm:$0xff]  ;;  %v16831_v60 = vld [vmem:[#allocation77_spill] sm:$0xff] }
 0x7fe   : > { %v3169_v14 = vmul.f32 %v10404_v31, %v16814_v24  ;;  %v16832_v31 = vld [vmem:[#allocation31_spill] sm:$0xff] }
 0x7ff   : > { %4374 = vrot.lane.b32.xlu1 %v16815_v28, %s11179_s19  ;;  %v3190_v22 = vpack.c.bf16 %v3167_v40, %v3166_v3 }
 0x800   : > { %v3191_v47 = vpack.c.bf16 %v3169_v14, %v3168_v2  ;;  %v3696_v2 = vsel %vm1727_vm2, %v16831_v60, 0 }
 0x801   : > { %3645 = vrot.lane.b32.xlu0 %v16816_v19, %s11178_s18  ;;  %9409 = vmatprep.mubr.bf16.mxu1 %v3190_v22 }
 0x802   : > { %9410 = vmatmul.mubr.bf16.vlgmr.msra.gmra.mxu1 %v3191_v47  ;;  %9450 = vmatmul.mubr.msk.bf16.gmra.mxu0 %vm1727_vm2, %v13372_v55  ;;  %v3708_v55 = vsel %vm1727_vm2, %v16819_v44, 0 }
 0x803   : > { %9458 = vmatpush3.bf16.xpose.msra.mxu1 %v3711_v56  ;;  %4237 = vrot.lane.b32.xlu1 %v16818_v49, %s11178_s18 }
 0x804   : > { %9770 = vmatprep.subr.msk.bf16.mxu1 %vm1727_vm2, %v16819_v44  ;;  %9453 = vmatprep.mubr.msk.bf16.mxu0 %vm1727_vm2, %v3469_v41 }
 0x805   : > { %4128 = vrot.lane.b32.xlu0 %v16820_v42, %s11178_s18 }
 0x807   : > { %4235 = vrot.lane.b32.xlu1 %v16821_v25, %s11178_s18 }
 0x809   : > { %4124 = vrot.lane.b32.xlu0 %v16822_v48, %s11178_s18 }
 0x80b   : > { %9460 = vmatpush3.bf16.xpose.msra.mxu1 %v3708_v55  ;;  %4358 = vrot.lane.b32.xlu1 %v16815_v28, %s11180_s27  ;;  %v16834_v28 = vld [vmem:[#allocation8_spill] sm:$0xff] }
 0x80c   : > { %9771 = vmatprep.subr.msk.bf16.mxu1 %vm1727_vm2, %v16823_v8 }
 0x80d   : > { %4122 = vrot.lane.b32.xlu0 %v16824_v15, %s11178_s18 }
 0x80f   : > { %4561 = vrot.lane.b32.xlu1 %v16816_v19, %s11179_s19 }
 0x811   : > { %4120 = vrot.lane.b32.xlu0 %v16825_v9, %s11178_s18 }
 0x813   : > { %9462 = vmatpush3.bf16.xpose.msra.mxu1 %v3705_v32 }
 0x814   : > { %9772 = vmatprep.subr.msk.bf16.mxu1 %vm1727_vm2, %v16826_v53 }
 0x815   : > { %4116 = vrot.lane.b32.xlu0 %v16827_v52, %s11178_s18 }
 0x819   : > { %4386 = vrot.lane.b32.xlu0 %v16804_v6, %s11179_s19 }
 0x81b   : > { %9464 = vmatpush3.bf16.xpose.msra.mxu1 %v3702_v17 }
 0x81c   : > { %9773 = vmatprep.subr.msk.bf16.mxu1 %vm1727_vm2, %v16828_v23 }
 0x81d   : > { %4380 = vrot.lane.b32.xlu0 %v16829_v35, %s11179_s19 }
 0x81f   : > { %v3099_v27 = vpop.xlane.xlu0 %3098 }
 0x821   : > { %4378 = vrot.lane.b32.xlu0 %v16830_v10, %s11179_s19 }
 0x823   : > { %9466 = vmatpush3.bf16.xpose.msra.mxu1 %v3699_v63  ;;  %v3095_v21 = vpop.xlane.xlu0 %3094 }
 0x824   : > { %9774 = vmatprep.subr.msk.bf16.mxu1 %vm1727_vm2, %v16831_v60  ;;  %10405 = vrcp.f32 %v3095_v21 }
 0x825   : > { %4245 = vrot.lane.b32.xlu0 %v16832_v31, %s11178_s18  ;;  %10407 = vrcp.f32 %v3099_v27 }
 0x827   : > { %v3097_v3 = vpop.xlane.xlu1 %3096  ;;  %v3101_v40 = vpop.xlane.xlu0 %3100 }
 0x828   : > { %10409 = vrcp.f32 %v3097_v3 }
 0x829   : > { %10411 = vrcp.f32 %v3101_v40  ;;  %4239 = vrot.lane.b32.xlu0 %v16833_v36, %s11178_s18  ;;  %s17045_s18 = sld [smem:[#allocation103_spill]] (!%p8770_p6) }
 0x82b   : > { %9468 = vmatpush3.bf16.xpose.msra.mxu1 %v3696_v2  ;;  %v3107_v24 = vpop.xlane.xlu1 %3106  ;;  %v3652_v14 = vpop.permute.xlu0 %3651 }
 0x82c   : > { %9775 = vmatprep.subr.msk.bf16.mxu1 %vm1727_vm2, %v3652_v14  ;;  %v3693_v47 = vsel %vm1727_vm2, %v3652_v14, 0 }
 0x82d   : > { %4372 = vrot.lane.b32.xlu0 %v16834_v28, %s11179_s19 }
 0x82f   : > { %v3103_v22 = vpop.xlane.xlu1 %3102 }
 0x831   : > { %4356 = vrot.lane.b32.xlu0 %v16834_v28, %s11180_s27  ;;  %v10406_v59 = vpop.eup %10405 }
 0x832   : > { %v10408_v41 = vpop.eup %10407  ;;  %v3170_v8 = vmul.f32 %v10406_v59, %v13331_v29 }
 0x833   : > { %9470 = vmatpush3.bf16.xpose.msra.mxu1 %v3693_v47  ;;  %v3109_v56 = vpop.xlane.xlu1 %3108  ;;  %v3172_v17 = vmul.f32 %v10408_v41, %v13323_v58 }
 0x834   : > { %10413 = vrcp.f32 %v3109_v56 }
 0x835   : > { %v10410_v44 = vpop.eup %10409  ;;  %4563 = vrot.lane.b32.xlu0 %v16797_v20, %s11179_s19  ;;  %10415 = vrcp.f32 %v3103_v22 }
 0x836   : > { %v10412_v55 = vpop.eup %10411  ;;  %v3171_v32 = vmul.f32 %v10410_v44, %v13339_v39  ;;  %10417 = vrcp.f32 %v3107_v24 }
 0x837   : > { %v3105_v53 = vpop.xlane.xlu1 %3104  ;;  %v3173_v23 = vmul.f32 %v10412_v55, %v13336_v5 }
 0x838   : > { %10419 = vrcp.f32 %v3105_v53  ;;  %v3192_v27 = vpack.c.bf16 %v3171_v32, %v3170_v8 }
 0x839   : > { %v3193_v63 = vpack.c.bf16 %v3173_v23, %v3172_v17 }
 0x83a   : > { %9413 = vmatprep.mubr.bf16.mxu1 %v3192_v27 }
 0x83b   : > { %v3113_v21 = vpop.xlane.xlu1 %3112  ;;  %9414 = vmatmul.mubr.bf16.gmra.mxu1 %v3193_v63 }
 0x83c   : > { %10421 = vrcp.f32 %v3113_v21 }
 0x83f   : > { %v3650_v60 = vpop.permute.xlu1 %3649 }
 0x840   : > { %9776 = vmatprep.subr.msk.bf16.mxu1 %vm1727_vm2, %v3650_v60  ;;  %v3690_v3 = vsel %vm1727_vm2, %v3650_v60, 0 }
 0x841   : > { %9472 = vmatpush3.bf16.xpose.msra.mxu1 %v3690_v3  ;;  %v10414_v29 = vpop.eup %10413 }
 0x842   : > { %v10416_v39 = vpop.eup %10415  ;;  %v3177_v58 = vmul.f32 %v10414_v29, %v13355_v16 }
 0x843   : > { %v3636_v40 = vpop.permute.xlu1 %3635  ;;  %v10418_v2 = vpop.eup %10417  ;;  %v3174_v5 = vmul.f32 %v10416_v39, %v13350_v46 }
 0x844   : > { %v3176_v22 = vmul.f32 %v10418_v2, %v13345_v51 }
 0x845   : > { %v10420_v24 = vpop.eup %10419 }
 0x846   : > { %v3175_v14 = vmul.f32 %v10420_v24, %v13360_v54  ;;  %v3195_v59 = vpack.c.bf16 %v3177_v58, %v3176_v22 }
 0x847   : > { %v13541_v28 = vpop.permute.xlu1 %3639 }
 0x848   : > { %v3194_v47 = vpack.c.bf16 %v3175_v14, %v3174_v5 }
 0x849   : > { %v10422_v3 = vpop.eup %10421 }
 0x84a   : > { %9417 = vmatprep.mubr.bf16.mxu1 %v3194_v47  ;;  %v3179_v21 = vmul.f32 %v10422_v3, %v13365_v26 }
 0x84b   : > { %v13544_v56 = vpop.permute.xlu1 %3643  ;;  %9418 = vmatmul.mubr.bf16.gmra.mxu1 %v3195_v59 }
 0x84f   : > { %v13546_v41 = vpop.permute.xlu1 %3647 }
 0x853   : > { %v4127_v44 = vpop.permute.xlu1 %4126 }
 0x857   : > { %v13548_v55 = vpop.permute.xlu1 %4118 }
 0x858   : > { %v13550_v16 = vpop.f32.mrf.mxu0 }
 0x859   : > { %16835 = vst [vmem:[#allocation39_spill] sm:$0xff] %v13550_v16 }
 0x85a   : > { %v13552_v46 = vpop.f32.mrf.mxu0 }
 0x85b   : > { %16836 = vst [vmem:[#allocation70_spill] sm:$0xff] %v13552_v46  ;;  %v13554_v54 = vpop.permute.xlu1 %4114 }
 0x85c   : > { %v3115_v8 = vpop.xlane.xlu0 %3114  ;;  %v13556_v32 = vpop.f32.mrf.mxu0 }
 0x85d   : > { %16837 = vst [vmem:[#allocation12_spill] sm:$0xff] %v13556_v32 }
 0x85f   : > { %v13560_v53 = vpop.permute.xlu1 %4384 }
 0x860   : > { %v3111_v17 = vpop.xlane.xlu0 %3110 }
 0x861   : > { %10423 = vrcp.f32 %v3111_v17 }
 0x862   : > { %10425 = vrcp.f32 %v3115_v8 }
 0x863   : > { %v13562_v23 = vpop.permute.xlu1 %4382 }
 0x864   : > { %v3117_v27 = vpop.xlane.xlu0 %3116 }
 0x865   : > { %10427 = vrcp.f32 %v3117_v27 }
 0x867   : > { %v4250_v63 = vpop.permute.xlu1 %4249 }
 0x868   : > { %9521 = vmatprep.subr.bf16.mxu1 %v4250_v63  ;;  %v3471_v60 = vpop.permute.xlu0 %3470 }
 0x869   : > { %9454 = vmatmul.mubr.msk.bf16.gmra.mxu0 %vm1727_vm2, %v3471_v60  ;;  %v13570_v60 = vpop.f32.mrf.mxu0 }
 0x86a   : > { %16838 = vst [vmem:[#allocation76_spill] sm:$0xff] %v13570_v60 }
 0x86c   : > { %v3634_v29 = vpop.permute.xlu0 %3633 }
 0x86e   : > { %v10424_v39 = vpop.eup %10423 }
 0x86f   : > { %v3178_v2 = vmul.f32 %v10424_v39, %v13415_v0  ;;  %v10426_v24 = vpop.eup %10425  ;;  %v4248_v0 = vpop.permute.xlu1 %4247 }
 0x870   : > { %v3638_v58 = vpop.permute.xlu0 %3637  ;;  %v3180_v22 = vmul.f32 %v10426_v24, %v13410_v62 }
 0x871   : > { %v3196_v5 = vpack.c.bf16 %v3179_v21, %v3178_v2 }
 0x872   : > { %v10428_v14 = vpop.eup %10427 }
 0x873   : > { %9421 = vmatprep.mubr.bf16.mxu1 %v3196_v5  ;;  %v3181_v47 = vmul.f32 %v10428_v14, %v13420_v43 }
 0x874   : > { %v3642_v59 = vpop.permute.xlu0 %3641 }
 0x875   : > { %v3197_v8 = vpack.c.bf16 %v3181_v47, %v3180_v22 }
 0x877   : > { %9422 = vmatmul.mubr.bf16.gmra.mxu1 %v3197_v8 }
 0x878   : > { %9473 = vmatprep.mubr.msk.bf16.mxu1 %vm1727_vm2, %v3634_v29  ;;  %v3646_v17 = vpop.permute.xlu0 %3645 }
 0x87c   : > { %v4129_v27 = vpop.permute.xlu0 %4128 }
 0x87d   : > { %9489 = vmatprep.subr.bf16.mxu0 %v4129_v27 }
 0x87e   : > { %9490 = vmatpush3.bf16.msra.mxu0 %v4129_v27 }
 0x87f   : > { %v13572_v26 = vpop.f32.mrf.mxu0  ;;  %9474 = vmatmul.mubr.msk.bf16.vlgmr.msra.gmra.mxu1 %vm1727_vm2, %v3636_v40  ;;  %9491 = vmatprep.subr.bf16.mxu0 %v4127_v44 }
 0x880   : > { %16839 = vst [vmem:[#allocation24_spill] sm:$0xff] %v13572_v26  ;;  %9522 = vmatpush3.bf16.msra.mxu1 %v4250_v63  ;;  %9477 = vmatprep.mubr.msk.bf16.mxu1 %vm1727_vm2, %v3638_v58  ;;  %v4125_v62 = vpop.permute.xlu0 %4124 }
 0x881   : > { %9523 = vmatprep.subr.bf16.mxu1 %v4248_v0  ;;  %v13576_v43 = vpop.f32.mrf.mxu0 }
 0x882   : > { %16840 = vst [vmem:[#allocation75_spill] sm:$0xff] %v13576_v43  ;;  %9492 = vmatpush3.bf16.msra.mxu0 %v4127_v44 }
 0x883   : > { %v13578_v3 = vpop.f32.mrf.mxu0  ;;  %9493 = vmatprep.subr.bf16.mxu0 %v4125_v62 }
 0x884   : > { %16841 = vst [vmem:[#allocation23_spill] sm:$0xff] %v13578_v3  ;;  %9524 = vmatpush3.bf16.msra.mxu1 %v4248_v0  ;;  %v4123_v39 = vpop.permute.xlu0 %4122 }
 0x885   : > { %v13585_v63 = vpop.f32.mrf.mxu0 }
 0x886   : > { %9494 = vmatpush3.bf16.msra.mxu0 %v4125_v62  ;;  %16842 = vst [vmem:[#allocation78_spill] sm:$0xff] %v13585_v63 }
 0x887   : > { %9478 = vmatmul.mubr.msk.bf16.gmra.mxu1 %vm1727_vm2, %v13541_v28  ;;  %9495 = vmatprep.subr.bf16.mxu0 %v4123_v39  ;;  %v13594_v28 = vpop.permute.xlu1 %4376 }
 0x888   : > { %9481 = vmatprep.mubr.msk.bf16.mxu1 %vm1727_vm2, %v3642_v59  ;;  %v4121_v40 = vpop.permute.xlu0 %4120 }
 0x88a   : > { %9496 = vmatpush3.bf16.msra.mxu0 %v4123_v39 }
 0x88b   : > { %9497 = vmatprep.subr.bf16.mxu0 %v4121_v40 }
 0x88c   : > { %v4117_v44 = vpop.permute.xlu0 %4116 }
 0x88d   : > { %v13587_v2 = vpop.f32.mrf.mxu0 }
 0x88e   : > { %16843 = vst [vmem:[#allocation79_spill] sm:$0xff] %v13587_v2  ;;  %9498 = vmatpush3.bf16.msra.mxu0 %v4121_v40 }
 0x88f   : > { %9482 = vmatmul.mubr.msk.bf16.gmra.mxu1 %vm1727_vm2, %v13544_v56  ;;  %9499 = vmatprep.subr.bf16.mxu0 %v13548_v55  ;;  %v13592_v21 = vpop.f32.mrf.mxu0  ;;  %v4244_v56 = vpop.permute.xlu1 %4243 }
 0x890   : > { %16844 = vst [vmem:[#allocation16_spill] sm:$0xff] %v13592_v21  ;;  %9485 = vmatprep.mubr.msk.bf16.mxu1 %vm1727_vm2, %v3646_v17  ;;  %v13597_v24 = vpop.permute.xlu0 %4386 }
 0x891   : > { %v13599_v58 = vpop.f32.mrf.mxu0 }
 0x892   : > { %16845 = vst [vmem:[#allocation48_spill] sm:$0xff] %v13599_v58  ;;  %9500 = vmatpush3.bf16.msra.mxu0 %v13548_v55 }
 0x893   : > { %9501 = vmatprep.subr.bf16.mxu0 %v4117_v44  ;;  %v4242_v47 = vpop.permute.xlu1 %4241  ;;  %v13618_v27 = vpop.f32.mrf.mxu0 }
 0x894   : > { %v13604_v14 = vpop.permute.xlu0 %4380  ;;  %16847 = vst [vmem:[#allocation71_spill] sm:$0xff] %v13618_v27  ;;  %v13683_v27 = vld [vmem:[%s16702_s26 + $0x38] sm:$0xff] }
 0x896   : > { %9502 = vmatpush3.bf16.msra.mxu0 %v4117_v44 }
 0x897   : > { %9486 = vmatmul.mubr.msk.bf16.gmra.mxu1 %vm1727_vm2, %v13546_v41  ;;  %9503 = vmatprep.subr.bf16.mxu0 %v13554_v54  ;;  %v13614_v8 = vpop.permute.xlu1 %4374 }
 0x898   : > { %v13609_v22 = vpop.permute.xlu0 %4378 }
 0x89a   : > { %9504 = vmatpush3.bf16.msra.mxu0 %v13554_v54 }
 0x89b   : > { %9777 = vmatprep.subr.msk.bf16.mxu0 %vm1727_vm2, %v13597_v24  ;;  %v4238_v17 = vpop.permute.xlu1 %4237 }
 0x89c   : > { %v4246_v59 = vpop.permute.xlu0 %4245 }
 0x89d   : > { %9525 = vmatprep.subr.bf16.mxu1 %v4246_v59 }
 0x89e   : > { %9526 = vmatpush3.bf16.msra.mxu1 %v4246_v59 }
 0x89f   : > { %9527 = vmatprep.subr.bf16.mxu1 %v4244_v56  ;;  %v4236_v39 = vpop.permute.xlu1 %4235 }
 0x8a0   : > { %v4240_v55 = vpop.permute.xlu0 %4239 }
 0x8a2   : > { %9528 = vmatpush3.bf16.msra.mxu1 %v4244_v56 }
 0x8a3   : > { %9529 = vmatprep.subr.bf16.mxu1 %v4242_v47  ;;  %v13841_v42 = vpop.permute.xlu1 %4358 }
 0x8a4   : > { %v13616_v41 = vpop.permute.xlu0 %4372  ;;  %16870 = vst [vmem:[#allocation96_spill] sm:$0xff] %v13841_v42 }
 0x8a5   : > { %16846 = vst [vmem:[#allocation72_spill] sm:$0xff] %v13616_v41 }
 0x8a6   : > { %9530 = vmatpush3.bf16.msra.mxu1 %v4242_v47 }
 0x8a7   : > { %9531 = vmatprep.subr.bf16.mxu1 %v4240_v55 }
 0x8a8   : > { %v13622_v0 = vpop.permute.xlu0 %4356 }
 0x8a9   : > { %16849 = vst [vmem:[#allocation73_spill] sm:$0xff] %v13622_v0 }
 0x8aa   : > { %9532 = vmatpush3.bf16.msra.mxu1 %v4240_v55  ;;  %v13620_v54 = vpop.f32.mrf.mxu0  ;;  %v13637_v55 = vld [vmem:[%s16702_s26 + $0x10] sm:$0xff] }
 0x8ab   : > { %16848 = vst [vmem:[#allocation74_spill] sm:$0xff] %v13620_v54  ;;  %9533 = vmatprep.subr.bf16.mxu1 %v4238_v17 }
 0x8ac   : > { %v13624_v62 = vpop.f32.mrf.mxu0  ;;  %v13632_v47 = vpop.permute.xlu0 %4563 }
 0x8ad   : > { %16850 = vst [vmem:[#allocation9_spill] sm:$0xff] %v13624_v62  ;;  %16853 = vst [vmem:[#allocation8_spill] sm:$0xff] %v13632_v47 }
 0x8ae   : > { %9534 = vmatpush3.bf16.msra.mxu1 %v4238_v17  ;;  %v13626_v40 = vpop.f32.mrf.mxu0 }
 0x8af   : > { %16851 = vst [vmem:[#allocation14_spill] sm:$0xff] %v13626_v40  ;;  %9535 = vmatprep.subr.bf16.mxu1 %v4236_v39 }
 0x8b0   : > { %v13630_v56 = vpop.f32.mrf.mxu0 }
 0x8b1   : > { %16852 = vst [vmem:[#allocation77_spill] sm:$0xff] %v13630_v56  ;;  %v13665_v56 = vld [vmem:[%s16702_s26 + $0x18] sm:$0xff] }
 0x8b2   : > { %9536 = vmatpush3.bf16.msra.mxu1 %v4236_v39  ;;  %v9443_v59 = vpop.f32.mrf.mxu0  ;;  %v13648_v39 = vld [vmem:[%s16702_s26] sm:$0xff] }
 0x8b3   : > { %v13640_v5 = vadd.f32 %v13637_v55, %v9443_v59  ;;  %9785 = vmatprep.subr.msk.bf16.mxu1 %vm1727_vm2, %v13632_v47  ;;  %v13656_v59 = vld [vmem:[%s16702_s26 + $0x8] sm:$0xff] }
 0x8b4   : > { %v3570_v17 = vpop.f32.mrf.mxu0 }
 0x8b5   : > { %3814 = vmax.xlane.f32.xlu0 %v13640_v5  ;;  %v13651_v29 = vadd.f32 %v13648_v39, %v3570_v17 }
 0x8b6   : > { %v9444_v44 = vpop.f32.mrf.mxu0 }
 0x8b7   : > { %v13668_v17 = vadd.f32 %v13665_v56, %v9444_v44 }
 0x8b8   : > { %v3573_v51 = vpop.f32.mrf.mxu0 }
 0x8b9   : > { %v13659_v54 = vadd.f32 %v13656_v59, %v3573_v51  ;;  %3810 = vmax.xlane.f32.xlu0 %v13651_v29  ;;  %v13675_v51 = vld [vmem:[%s16702_s26 + $0x30] sm:$0xff] }
 0x8ba   : > { %v9447_v40 = vpop.f32.mrf.mxu0 }
 0x8bb   : > { %3812 = vmax.xlane.f32.xlu1 %v13659_v54  ;;  %v13678_v58 = vadd.f32 %v13675_v51, %v9447_v40  ;;  %v13695_v40 = vld [vmem:[%s16702_s26 + $0x20] sm:$0xff] }
 0x8bc   : > { %v3586_v62 = vpop.f32.mrf.mxu0 }
 0x8bd   : > { %3816 = vmax.xlane.f32.xlu0 %v13668_v17  ;;  %v13698_v63 = vadd.f32 %v13695_v40, %v3586_v62  ;;  %v13717_v62 = vld [vmem:[%s16702_s26 + $0x50] sm:$0xff] }
 0x8be   : > { %v9448_v2 = vpop.f32.mrf.mxu0 }
 0x8bf   : > { %v13686_v44 = vadd.f32 %v13683_v27, %v9448_v2  ;;  %v13703_v2 = vld [vmem:[%s16702_s26 + $0x28] sm:$0xff] }
 0x8c0   : > { %v3589_v21 = vpop.f32.mrf.mxu0 }
 0x8c1   : > { %3824 = vmax.xlane.f32.xlu1 %v13686_v44  ;;  %3822 = vmax.xlane.f32.xlu0 %v13678_v58  ;;  %v13706_v43 = vadd.f32 %v13703_v2, %v3589_v21 }
 0x8c2   : > { %v13690_v26 = vpop.f32.mrf.mxu1  ;;  %v9451_v3 = vpop.f32.mrf.mxu0 }
 0x8c3   : > { %16854 = vst [vmem:[#allocation80_spill] sm:$0xff] %v13690_v26  ;;  %v13720_v25 = vadd.f32 %v13717_v62, %v9451_v3  ;;  %v13737_v3 = vld [vmem:[%s16702_s26 + $0x40] sm:$0xff]  ;;  %v13745_v26 = vld [vmem:[%s16702_s26 + $0x48] sm:$0xff] }
 0x8c4   : > { %v13708_v16 = vpop.f32.mrf.mxu1  ;;  %v3602_v32 = vpop.f32.mrf.mxu0 }
 0x8c5   : > { %16855 = vst [vmem:[#allocation81_spill] sm:$0xff] %v13708_v16  ;;  %3820 = vmax.xlane.f32.xlu1 %v13706_v43  ;;  %3818 = vmax.xlane.f32.xlu0 %v13698_v63  ;;  %v13727_v16 = vld [vmem:[%s16702_s26 + $0x58] sm:$0xff]  ;;  %v13740_v21 = vadd.f32 %v13737_v3, %v3602_v32 }
 0x8c6   : > { %v13712_v60 = vpop.f32.mrf.mxu1  ;;  %v9452_v46 = vpop.f32.mrf.mxu0 }
 0x8c7   : > { %16856 = vst [vmem:[#allocation82_spill] sm:$0xff] %v13712_v60  ;;  %v13730_v49 = vadd.f32 %v13727_v16, %v9452_v46 }
 0x8c8   : > { %v3605_v36 = vpop.f32.mrf.mxu0  ;;  %v13752_v60 = vpop.f32.mrf.mxu1 }
 0x8c9   : > { %3832 = vmax.xlane.f32.xlu1 %v13730_v49  ;;  %3830 = vmax.xlane.f32.xlu0 %v13720_v25  ;;  %v13748_v46 = vadd.f32 %v13745_v26, %v3605_v36  ;;  %16857 = vst [vmem:[#allocation83_spill] sm:$0xff] %v13752_v60 }
 0x8cd   : > { %3828 = vmax.xlane.f32.xlu1 %v13748_v46  ;;  %3826 = vmax.xlane.f32.xlu0 %v13740_v21 }
 0x8fb   : > { %v13754_v34 = vpop.f32.mrf.mxu1 }
 0x8fc   : > { %16858 = vst [vmem:[#allocation84_spill] sm:$0xff] %v13754_v34 }
 0x8fd   : > { %v13756_v38 = vpop.f32.mrf.mxu1 }
 0x8fe   : > { %16859 = vst [vmem:[#allocation85_spill] sm:$0xff] %v13756_v38  ;;  %v13775_v38 = vld [vmem:[%s16702_s26 + $0x70] sm:$0xff] }
 0x8ff   : > { %v13758_v32 = vpop.f32.mrf.mxu1 }
 0x900   : > { %16860 = vst [vmem:[#allocation86_spill] sm:$0xff] %v13758_v32  ;;  %v13802_v32 = vld [vmem:[%s16702_s26 + $0x68] sm:$0xff] }
 0x901   : > { %v13762_v31 = vpop.f32.mrf.mxu1 }
 0x902   : > { %16861 = vst [vmem:[#allocation87_spill] sm:$0xff] %v13762_v31 }
 0x90b   : > { %v13764_v13 = vpop.f32.mrf.mxu1 }
 0x90c   : > { %16862 = vst [vmem:[#allocation88_spill] sm:$0xff] %v13764_v13  ;;  %v13792_v13 = vld [vmem:[%s16702_s26 + $0x78] sm:$0xff] }
 0x90d   : > { %v13766_v36 = vpop.f32.mrf.mxu1 }
 0x90e   : > { %16863 = vst [vmem:[#allocation89_spill] sm:$0xff] %v13766_v36  ;;  %v13784_v36 = vld [vmem:[%s16702_s26 + $0x60] sm:$0xff] }
 0x90f   : > { %v13768_v7 = vpop.f32.mrf.mxu1 }
 0x910   : > { %16864 = vst [vmem:[#allocation90_spill] sm:$0xff] %v13768_v7 }
 0x911   : > { %v13808_v31 = vpop.f32.mrf.mxu1 }
 0x912   : > { %16865 = vst [vmem:[#allocation91_spill] sm:$0xff] %v13808_v31 }
 0x929   : > { %v9455_v12 = vpop.f32.mrf.mxu0 }
 0x92a   : > { %v13778_v9 = vadd.f32 %v13775_v38, %v9455_v12 }
 0x92b   : > { %v3618_v47 = vpop.f32.mrf.mxu0 }
 0x92c   : > { %3838 = vmax.xlane.f32.xlu0 %v13778_v9  ;;  %v13787_v60 = vadd.f32 %v13784_v36, %v3618_v47 }
 0x92d   : > { %v9456_v34 = vpop.f32.mrf.mxu0 }
 0x92e   : > { %v13795_v12 = vadd.f32 %v13792_v13, %v9456_v34 }
 0x92f   : > { %v3621_v7 = vpop.f32.mrf.mxu0 }
 0x930   : > { %3840 = vmax.xlane.f32.xlu1 %v13795_v12  ;;  %3834 = vmax.xlane.f32.xlu0 %v13787_v60  ;;  %v13805_v47 = vadd.f32 %v13802_v32, %v3621_v7 }
 0x934   : > { %3836 = vmax.xlane.f32.xlu1 %v13805_v47 }
 0x937   : > { %v13810_v11 = vpop.f32.mrf.mxu1 }
 0x938   : > { %16866 = vst [vmem:[#allocation92_spill] sm:$0xff] %v13810_v11 }
 0x939   : > { %v13812_v34 = vpop.f32.mrf.mxu1 }
 0x93a   : > { %16867 = vst [vmem:[#allocation93_spill] sm:$0xff] %v13812_v34 }
 0x93b   : > { %v13814_v20 = vpop.f32.mrf.mxu1 }
 0x93c   : > { %16868 = vst [vmem:[#allocation94_spill] sm:$0xff] %v13814_v20 }
 0x93d   : > { %v13818_v0 = vpop.f32.mrf.mxu1 }
 0x93e   : > { %16869 = vst [vmem:[#allocation95_spill] sm:$0xff] %v13818_v0  ;;  %v3815_v34 = vpop.xlane.xlu0 %3814 }
 0x93f   : > { %v9475_v52 = vpop.f32.mrf.mxu1 }
 0x940   : > { %v13821_v15 = vadd.f32 %v13637_v55, %v9475_v52 }
 0x941   : > { %v3747_v7 = vpop.f32.mrf.mxu1 }
 0x942   : > { %3846 = vmax.xlane.f32.xlu0 %v13821_v15  ;;  %v13825_v31 = vadd.f32 %v13648_v39, %v3747_v7 }
 0x943   : > { %v9476_v57 = vpop.f32.mrf.mxu1 }
 0x944   : > { %v13835_v39 = vadd.f32 %v13665_v56, %v9476_v57  ;;  %v13849_v56 = vpop.permute.xlu1 %4561 }
 0x945   : > { %4362 = vrot.lane.b32.xlu1 %v16830_v10, %s11180_s27  ;;  %v3750_v11 = vpop.f32.mrf.mxu1 }
 0x946   : > { %3842 = vmax.xlane.f32.xlu0 %v13825_v31  ;;  %v13839_v10 = vadd.f32 %v13656_v59, %v3750_v11 }
 0x947   : > { %v9479_v20 = vpop.f32.mrf.mxu1 }
 0x948   : > { %v13856_v6 = vadd.f32 %v13675_v51, %v9479_v20 }
 0x949   : > { %4559 = vrot.lane.b32.xlu1 %v12157_v1, %s11179_s19  ;;  %v3763_v52 = vpop.f32.mrf.mxu1  ;;  %v3811_v1 = vpop.xlane.xlu0 %3810 }
 0x94a   : > { %v13846_v41 = vadd.f32 %v13695_v40, %v3763_v52  ;;  %v3874_v11 = vsub.f32 %v13651_v29, %v3811_v1  ;;  %v3813_v40 = vpop.xlane.xlu1 %3812 }
 0x94b   : > { %v9480_v55 = vpop.f32.mrf.mxu1  ;;  %v3875_v20 = vsub.f32 %v13659_v54, %v3813_v40 }
 0x94d   : > { %v3766_v0 = vpop.f32.mrf.mxu1  ;;  %v3817_v57 = vpop.xlane.xlu0 %3816 }
 0x94f   : > { %v9483_v7 = vpop.f32.mrf.mxu1 }
 0x950   : > { %v13853_v59 = vadd.f32 %v13717_v62, %v9483_v7  ;;  %v13865_v62 = vadd.f32 %v13683_v27, %v9480_v55  ;;  %v3908_v55 = vmul.f32 1.442695, %v3875_v20 }
 0x951   : > { %v3779_v48 = vpop.f32.mrf.mxu1  ;;  %v3823_v1 = vpop.xlane.xlu0 %3822 }
 0x952   : > { %v13861_v52 = vadd.f32 %v13737_v3, %v3779_v48  ;;  %v13875_v3 = vadd.f32 %v13703_v2, %v3766_v0 }
 0x953   : > { %v9484_v33 = vpop.f32.mrf.mxu1 }
 0x955   : > { %v3782_v42 = vpop.f32.mrf.mxu1  ;;  %v3819_v27 = vpop.xlane.xlu0 %3818 }
 0x957   : > { %v9487_v29 = vpop.f32.mrf.mxu1 }
 0x958   : > { %v13870_v51 = vadd.f32 %v13775_v38, %v9487_v29  ;;  %v3825_v38 = vpop.xlane.xlu1 %3824 }
 0x959   : > { %v3795_v48 = vpop.f32.mrf.mxu1  ;;  %v3881_v0 = vsub.f32 %v13686_v44, %v3825_v38 }
 0x95a   : > { %v13879_v7 = vadd.f32 %v13784_v36, %v3795_v48  ;;  %v13892_v36 = vadd.f32 %v13745_v26, %v3782_v42 }
 0x95c   : > { %4360 = vrot.lane.b32.xlu0 %v16806_v45, %s11180_s27  ;;  %v3876_v45 = vsub.f32 %v13640_v5, %v3815_v34  ;;  %v3906_v5 = vmul.f32 1.442695, %v3874_v11  ;;  %v3877_v34 = vsub.f32 %v13668_v17, %v3817_v57  ;;  %v3880_v17 = vsub.f32 %v13678_v58, %v3823_v1  ;;  %v9488_v11 = vpop.f32.mrf.mxu1 }
 0x95d   : > { %v13884_v57 = vadd.f32 %v13727_v16, %v9484_v33  ;;  %v3831_v16 = vpop.xlane.xlu0 %3830  ;;  %v13900_v44 = vadd.f32 %v13792_v13, %v9488_v11 }
 0x95e   : > { %v3910_v19 = vmul.f32 1.442695, %v3876_v45  ;;  %v3918_v54 = vmul.f32 1.442695, %v3880_v17  ;;  %v3878_v45 = vsub.f32 %v13698_v63, %v3819_v27  ;;  %v3821_v63 = vpop.xlane.xlu1 %3820  ;;  %v3798_v42 = vpop.f32.mrf.mxu1  ;;  %v3884_v1 = vsub.f32 %v13720_v25, %v3831_v16 }
 0x95f   : > { %v3879_v40 = vsub.f32 %v13706_v43, %v3821_v63  ;;  %v13908_v29 = vadd.f32 %v13802_v32, %v3798_v42 }
 0x960   : > { %10429 = vpow2.f32 %v3910_v19  ;;  %v3912_v19 = vmul.f32 1.442695, %v3877_v34  ;;  %v3914_v2 = vmul.f32 1.442695, %v3878_v45  ;;  %v3926_v20 = vmul.f32 1.442695, %v3884_v1 }
 0x961   : > { %10431 = vpow2.f32 %v3906_v5  ;;  %v3920_v5 = vmul.f32 1.442695, %v3881_v0  ;;  %v3916_v34 = vmul.f32 1.442695, %v3879_v40  ;;  %v3827_v43 = vpop.xlane.xlu0 %3826 }
 0x962   : > { %10433 = vpow2.f32 %v3912_v19  ;;  %v3882_v19 = vsub.f32 %v13740_v21, %v3827_v43  ;;  %v3833_v17 = vpop.xlane.xlu1 %3832 }
 0x963   : > { %10435 = vpow2.f32 %v3908_v55  ;;  %v3885_v25 = vsub.f32 %v13730_v49, %v3833_v17 }
 0x964   : > { %10437 = vpow2.f32 %v3918_v54  ;;  %v3922_v32 = vmul.f32 1.442695, %v3882_v19 }
 0x965   : > { %10439 = vpow2.f32 %v3914_v2  ;;  %v3928_v55 = vmul.f32 1.442695, %v3885_v25 }
 0x966   : > { %10441 = vpow2.f32 %v3920_v5  ;;  %v3829_v0 = vpop.xlane.xlu1 %3828 }
 0x967   : > { %10443 = vpow2.f32 %v3916_v34  ;;  %v3883_v2 = vsub.f32 %v13748_v46, %v3829_v0 }
 0x968   : > { %10445 = vpow2.f32 %v3926_v20 }
 0x969   : > { %10447 = vpow2.f32 %v3922_v32  ;;  %v3924_v11 = vmul.f32 1.442695, %v3883_v2 }
 0x96a   : > { %10449 = vpow2.f32 %v3928_v55 }
 0x96b   : > { %10451 = vpow2.f32 %v3924_v11 }
 0x96d   : > { %3848 = vmax.xlane.f32.xlu1 %v13835_v39  ;;  %v13888_v58 = vpop.eup %10429 }
 0x96e   : > { %v13896_v33 = vpop.eup %10431 }
 0x96f   : > { %v13904_v26 = vpop.eup %10433 }
 0x970   : > { %v13912_v13 = vpop.eup %10435 }
 0x971   : > { %3844 = vmax.xlane.f32.xlu1 %v13839_v10  ;;  %v13916_v48 = vpop.eup %10437 }
 0x972   : > { %v13920_v27 = vpop.eup %10439 }
 0x973   : > { %v13923_v38 = vpop.eup %10441 }
 0x974   : > { %v13926_v21 = vpop.eup %10443 }
 0x975   : > { %3850 = vmax.xlane.f32.xlu1 %v13846_v41  ;;  %v13929_v54 = vpop.eup %10445 }
 0x976   : > { %v13934_v49 = vpop.eup %10447 }
 0x977   : > { %v13937_v45 = vpop.eup %10449 }
 0x978   : > { %v13945_v25 = vpop.eup %10451 }
 0x979   : > { %3862 = vmax.xlane.f32.xlu1 %v13853_v59 }
 0x97b   : > { %3854 = vmax.xlane.f32.xlu0 %v13856_v6 }
 0x97d   : > { %3858 = vmax.xlane.f32.xlu1 %v13861_v52 }
 0x97f   : > { %3856 = vmax.xlane.f32.xlu0 %v13865_v62 }
 0x981   : > { %3870 = vmax.xlane.f32.xlu1 %v13870_v51 }
 0x983   : > { %3852 = vmax.xlane.f32.xlu0 %v13875_v3 }
 0x985   : > { %3866 = vmax.xlane.f32.xlu1 %v13879_v7 }
 0x987   : > { %3864 = vmax.xlane.f32.xlu0 %v13884_v57 }
 0x989   : > { %3974 = vadd.xlane.f32.xlu1 %v13888_v58 }
 0x98b   : > { %3860 = vmax.xlane.f32.xlu0 %v13892_v36 }
 0x98d   : > { %3970 = vadd.xlane.f32.xlu1 %v13896_v33 }
 0x98f   : > { %3872 = vmax.xlane.f32.xlu0 %v13900_v44 }
 0x991   : > { %3976 = vadd.xlane.f32.xlu1 %v13904_v26 }
 0x993   : > { %3868 = vmax.xlane.f32.xlu0 %v13908_v29 }
 0x995   : > { %3972 = vadd.xlane.f32.xlu1 %v13912_v13 }
 0x997   : > { %3982 = vadd.xlane.f32.xlu0 %v13916_v48 }
 0x99b   : > { %3978 = vadd.xlane.f32.xlu0 %v13920_v27 }
 0x99f   : > { %3984 = vadd.xlane.f32.xlu0 %v13923_v38 }
 0x9a3   : > { %3980 = vadd.xlane.f32.xlu0 %v13926_v21 }
 0x9a6   : > { %4557 = vrot.lane.b32.xlu1 %v16812_v61, %s11179_s19 }
 0x9a7   : > { %3990 = vadd.xlane.f32.xlu0 %v13929_v54 }
 0x9ab   : > { %3986 = vadd.xlane.f32.xlu0 %v13934_v49 }
 0x9af   : > { %3992 = vadd.xlane.f32.xlu0 %v13937_v45 }
 0x9b5   : > { %v3839_v63 = vpop.xlane.xlu0 %3838 }
 0x9b6   : > { %v3888_v16 = vsub.f32 %v13778_v9, %v3839_v63 }
 0x9b8   : > { %v3934_v34 = vmul.f32 1.442695, %v3888_v16 }
 0x9b9   : > { %v3841_v5 = vpop.xlane.xlu1 %3840  ;;  %v3835_v40 = vpop.xlane.xlu0 %3834 }
 0x9ba   : > { %v3886_v42 = vsub.f32 %v13787_v60, %v3835_v40  ;;  %v3889_v1 = vsub.f32 %v13795_v12, %v3841_v5 }
 0x9bc   : > { %v3930_v43 = vmul.f32 1.442695, %v3886_v42  ;;  %v3936_v19 = vmul.f32 1.442695, %v3889_v1 }
 0x9bd   : > { %v3837_v20 = vpop.xlane.xlu1 %3836 }
 0x9be   : > { %10453 = vpow2.f32 %v3930_v43  ;;  %v3887_v17 = vsub.f32 %v13805_v47, %v3837_v20 }
 0x9bf   : > { %10455 = vpow2.f32 %v3934_v34 }
 0x9c0   : > { %10457 = vpow2.f32 %v3936_v19  ;;  %v3932_v46 = vmul.f32 1.442695, %v3887_v17 }
 0x9c1   : > { %v13968_v5 = vpop.permute.xlu1 %4362 }
 0x9c2   : > { %10459 = vpow2.f32 %v3932_v46 }
 0x9ca   : > { %3988 = vadd.xlane.f32.xlu1 %v13945_v25 }
 0x9cb   : > { %v3847_v9 = vpop.xlane.xlu0 %3846  ;;  %v13948_v60 = vpop.eup %10453 }
 0x9cc   : > { %v3892_v32 = vsub.f32 %v13821_v15, %v3847_v9  ;;  %v13951_v12 = vpop.eup %10455  ;;  %3994 = vadd.xlane.f32.xlu0 %v13948_v60 }
 0x9cd   : > { %v13956_v2 = vpop.eup %10457 }
 0x9ce   : > { %v3942_v55 = vmul.f32 1.442695, %v3892_v32  ;;  %3998 = vadd.xlane.f32.xlu1 %v13951_v12 }
 0x9cf   : > { %v3843_v47 = vpop.xlane.xlu0 %3842  ;;  %v13959_v11 = vpop.eup %10459 }
 0x9d0   : > { %10461 = vpow2.f32 %v3942_v55  ;;  %v3890_v0 = vsub.f32 %v13825_v31, %v3843_v47  ;;  %v13970_v31 = vpop.permute.xlu1 %4559 }
 0x9d2   : > { %v3938_v63 = vmul.f32 1.442695, %v3890_v0  ;;  %4000 = vadd.xlane.f32.xlu1 %v13956_v2 }
 0x9d3   : > { %v13974_v17 = vpop.permute.xlu0 %4360 }
 0x9d4   : > { %10463 = vpow2.f32 %v3938_v63 }
 0x9d6   : > { %3996 = vadd.xlane.f32.xlu1 %v13959_v11 }
 0x9dd   : > { %v13962_v15 = vpop.eup %10461 }
 0x9de   : > { %4006 = vadd.xlane.f32.xlu1 %v13962_v15 }
 0x9e1   : > { %v13965_v16 = vpop.eup %10463 }
 0x9e2   : > { %4002 = vadd.xlane.f32.xlu1 %v13965_v16 }
 0x9f6   : > { %v3849_v40 = vpop.xlane.xlu1 %3848 }
 0x9f7   : > { %v3893_v42 = vsub.f32 %v13835_v39, %v3849_v40 }
 0x9f9   : > { %v3944_v34 = vmul.f32 1.442695, %v3893_v42 }
 0x9fa   : > { %v3845_v1 = vpop.xlane.xlu1 %3844 }
 0x9fb   : > { %10465 = vpow2.f32 %v3944_v34  ;;  %v3891_v43 = vsub.f32 %v13839_v10, %v3845_v1 }
 0x9fd   : > { %v3940_v20 = vmul.f32 1.442695, %v3891_v43 }
 0x9fe   : > { %v3851_v19 = vpop.xlane.xlu1 %3850 }
 0x9ff   : > { %10467 = vpow2.f32 %v3940_v20  ;;  %v3894_v32 = vsub.f32 %v13846_v41, %v3851_v19 }
 0xa01   : > { %v3946_v40 = vmul.f32 1.442695, %v3894_v32 }
 0xa02   : > { %v3863_v46 = vpop.xlane.xlu1 %3862 }
 0xa04   : > { %v3855_v9 = vpop.xlane.xlu0 %3854 }
 0xa05   : > { %v3896_v55 = vsub.f32 %v13856_v6, %v3855_v9  ;;  %v3900_v6 = vsub.f32 %v13853_v59, %v3863_v46 }
 0xa06   : > { %v13978_v47 = vpop.xlane.xlu1 %3858 }
 0xa07   : > { %v3950_v0 = vmul.f32 1.442695, %v3896_v55  ;;  %v3958_v19 = vmul.f32 1.442695, %v3900_v6 }
 0xa08   : > { %v13980_v39 = vpop.eup %10465  ;;  %v3857_v63 = vpop.xlane.xlu0 %3856 }
 0xa09   : > { %10469 = vpow2.f32 %v3950_v0  ;;  %v3897_v10 = vsub.f32 %v13865_v62, %v3857_v63  ;;  %4008 = vadd.xlane.f32.xlu1 %v13980_v39 }
 0xa0a   : > { %v3871_v42 = vpop.xlane.xlu1 %3870  ;;  %10471 = vpow2.f32 %v3946_v40 }
 0xa0b   : > { %v3952_v41 = vmul.f32 1.442695, %v3897_v10  ;;  %v3904_v46 = vsub.f32 %v13870_v51, %v3871_v42 }
 0xa0c   : > { %v13984_v34 = vpop.eup %10467  ;;  %v13986_v1 = vpop.xlane.xlu0 %3852 }
 0xa0d   : > { %4004 = vadd.xlane.f32.xlu0 %v13984_v34  ;;  %10473 = vpow2.f32 %v3952_v41 }
 0xa0e   : > { %v3867_v43 = vpop.xlane.xlu1 %3866  ;;  %10475 = vpow2.f32 %v3958_v19 }
 0xa10   : > { %v3865_v20 = vpop.xlane.xlu0 %3864 }
 0xa11   : > { %v3901_v9 = vsub.f32 %v13884_v57, %v3865_v20  ;;  %v3902_v20 = vsub.f32 %v13879_v7, %v3867_v43 }
 0xa12   : > { %v3975_v62 = vpop.xlane.xlu1 %3974 }
 0xa13   : > { %v3960_v55 = vmul.f32 1.442695, %v3901_v9 }
 0xa14   : > { %v3861_v32 = vpop.xlane.xlu0 %3860 }
 0xa15   : > { %v3899_v0 = vsub.f32 %v13892_v36, %v3861_v32  ;;  %10477 = vpow2.f32 %v3960_v55  ;;  %v3966_v36 = vmul.f32 1.442695, %v3904_v46 }
 0xa16   : > { %v13992_v63 = vpop.eup %10469  ;;  %v3971_v40 = vpop.xlane.xlu1 %3970 }
 0xa17   : > { %4014 = vadd.xlane.f32.xlu0 %v13992_v63  ;;  %v3956_v10 = vmul.f32 1.442695, %v3899_v0  ;;  %v13996_v6 = vpop.eup %10471  ;;  %10479 = vrcp.f32 %v3971_v40 }
 0xa18   : > { %v3873_v59 = vpop.xlane.xlu0 %3872 }
 0xa19   : > { %v3905_v42 = vsub.f32 %v13900_v44, %v3873_v59  ;;  %v3895_v44 = vsub.f32 %v13875_v3, %v13986_v1 }
 0xa1a   : > { %v3977_v41 = vpop.xlane.xlu1 %3976  ;;  %4364 = vrot.lane.b32.xlu1 %v16829_v35, %s11180_s27  ;;  %v14002_v19 = vpop.eup %10473  ;;  %v3962_v35 = vmul.f32 1.442695, %v3902_v20 }
 0xa1b   : > { %4010 = vadd.xlane.f32.xlu0 %v13996_v6  ;;  %10481 = vrcp.f32 %v3977_v41  ;;  %v14007_v55 = vpop.eup %10475  ;;  %v3968_v7 = vmul.f32 1.442695, %v3905_v42 }
 0xa1c   : > { %v3869_v57 = vpop.xlane.xlu0 %3868  ;;  %10483 = vpow2.f32 %v3956_v10 }
 0xa1d   : > { %10485 = vrcp.f32 %v3975_v62  ;;  %v3903_v32 = vsub.f32 %v13908_v29, %v3869_v57  ;;  %v3898_v57 = vsub.f32 %v13861_v52, %v13978_v47 }
 0xa1e   : > { %v3973_v51 = vpop.xlane.xlu1 %3972 }
 0xa1f   : > { %10487 = vrcp.f32 %v3973_v51  ;;  %4016 = vadd.xlane.f32.xlu0 %v14002_v19  ;;  %v3964_v0 = vmul.f32 1.442695, %v3903_v32 }
 0xa20   : > { %v3983_v9 = vpop.xlane.xlu0 %3982  ;;  %10489 = vpow2.f32 %v3966_v36  ;;  %v3948_v36 = vmul.f32 1.442695, %v3895_v44 }
 0xa21   : > { %10491 = vpow2.f32 %v3962_v35 }
 0xa22   : > { %v14010_v62 = vpop.eup %10477  ;;  %10493 = vpow2.f32 %v3968_v7  ;;  %v3954_v7 = vmul.f32 1.442695, %v3898_v57 }
 0xa23   : > { %4022 = vadd.xlane.f32.xlu0 %v14007_v55  ;;  %10495 = vpow2.f32 %v3964_v0 }
 0xa24   : > { %v3979_v43 = vpop.xlane.xlu0 %3978  ;;  %v10480_v40 = vpop.eup %10479 }
 0xa25   : > { %v4066_v1 = vmul.f32 %v10480_v40, %v13896_v33 }
 0xa27   : > { %4024 = vadd.xlane.f32.xlu0 %v14010_v62 }
 0xa28   : > { %v3985_v59 = vpop.xlane.xlu0 %3984  ;;  %v10482_v46 = vpop.eup %10481 }
 0xa29   : > { %v14015_v29 = vpop.eup %10483  ;;  %10497 = vrcp.f32 %v3985_v59  ;;  %v4069_v20 = vmul.f32 %v10482_v46, %v13904_v26  ;;  %v4434_v26 = vsel %vm1727_vm2, %v13597_v24, 0  ;;  %v4431_v24 = vsel %vm1727_vm2, %v13560_v53, 0 }
 0xa2a   : > { %v10486_v10 = vpop.eup %10485  ;;  %10499 = vrcp.f32 %v3979_v43 }
 0xa2b   : > { %4020 = vadd.xlane.f32.xlu0 %v14015_v29  ;;  %10501 = vrcp.f32 %v3983_v9  ;;  %v4068_v35 = vmul.f32 %v10486_v10, %v13888_v58 }
 0xa2c   : > { %v10488_v41 = vpop.eup %10487  ;;  %v3981_v3 = vpop.xlane.xlu0 %3980 }
 0xa2d   : > { %10503 = vrcp.f32 %v3981_v3  ;;  %v4067_v51 = vmul.f32 %v10488_v41, %v13912_v13  ;;  %v14023_v42 = vpop.eup %10489  ;;  %v4099_v52 = vpack.c.bf16 %v4069_v20, %v4068_v35  ;;  %v14062_v20 = vpop.permute.xlu1 %4557 }
 0xa2e   : > { %10505 = vpow2.f32 %v3948_v36  ;;  %v14027_v47 = vpop.eup %10491 }
 0xa2f   : > { %4030 = vadd.xlane.f32.xlu0 %v14023_v42  ;;  %v4098_v32 = vpack.c.bf16 %v4067_v51, %v4066_v1  ;;  %10507 = vpow2.f32 %v3954_v7  ;;  %v14034_v58 = vpop.eup %10493 }
 0xa30   : > { %v14036_v33 = vpop.eup %10495  ;;  %v3991_v57 = vpop.xlane.xlu0 %3990 }
 0xa31   : > { %9505 = vmatprep.mubr.bf16.mxu0 %v4098_v32 }
 0xa32   : > { %9506 = vmatmul.mubr.bf16.vlgmr.msra.gmra.mxu0 %v4099_v52 }
 0xa33   : > { %9554 = vmatpush3.bf16.xpose.msra.mxu0 %v4434_v26  ;;  %4026 = vadd.xlane.f32.xlu0 %v14027_v47  ;;  %v4416_v26 = vsel %vm1727_vm2, %v13614_v8, 0 }
 0xa34   : > { %9778 = vmatprep.subr.msk.bf16.mxu0 %vm1727_vm2, %v13560_v53 }
 0xa36   : > { %v10498_v13 = vpop.eup %10497 }
 0xa37   : > { %4032 = vadd.xlane.f32.xlu0 %v14034_v58  ;;  %v10500_v9 = vpop.eup %10499  ;;  %v4073_v40 = vmul.f32 %v10498_v13, %v13923_v38 }
 0xa38   : > { %v10502_v43 = vpop.eup %10501  ;;  %v4070_v44 = vmul.f32 %v10500_v9, %v13920_v27  ;;  %v4428_v27 = vsel %vm1727_vm2, %v13562_v23, 0  ;;  %v16873_v9 = vld [vmem:[#allocation27_spill] sm:$0xff] }
 0xa39   : > { %v4072_v46 = vmul.f32 %v10502_v43, %v13916_v48  ;;  %v3987_v48 = vpop.xlane.xlu0 %3986 }
 0xa3a   : > { %v10504_v0 = vpop.eup %10503 }
 0xa3b   : > { %9556 = vmatpush3.bf16.xpose.msra.mxu0 %v4431_v24  ;;  %4028 = vadd.xlane.f32.xlu0 %v14036_v33  ;;  %v4071_v59 = vmul.f32 %v10504_v0, %v13926_v21  ;;  %v14048_v10 = vpop.eup %10505  ;;  %v4101_v53 = vpack.c.bf16 %v4073_v40, %v4072_v46  ;;  %v4425_v21 = vsel %vm1727_vm2, %v13604_v14, 0  ;;  %v16874_v0 = vld [vmem:[#allocation72_spill] sm:$0xff]  ;;  %v16875_v40 = vld [vmem:[#allocation11_spill] sm:$0xff]  ;;  %v16877_v46 = vld [vmem:[#allocation17_spill] sm:$0xff] }
 0xa3c   : > { %9779 = vmatprep.subr.msk.bf16.mxu0 %vm1727_vm2, %v13562_v23  ;;  %v14051_v38 = vpop.eup %10507  ;;  %v4422_v23 = vsel %vm1727_vm2, %v13609_v22, 0 }
 0xa3d   : > { %v4100_v41 = vpack.c.bf16 %v4071_v59, %v4070_v44  ;;  %v3993_v36 = vpop.xlane.xlu0 %3992 }
 0xa3e   : > { %4012 = vadd.xlane.f32.xlu1 %v14048_v10  ;;  %10509 = vrcp.f32 %v3993_v36  ;;  %v16879_v36 = vld [vmem:[#allocation26_spill] sm:$0xff] }
 0xa3f   : > { %9509 = vmatprep.mubr.bf16.mxu0 %v4100_v41  ;;  %10511 = vrcp.f32 %v3987_v48  ;;  %v16878_v48 = vld [vmem:[#allocation20_spill] sm:$0xff] }
 0xa40   : > { %9510 = vmatmul.mubr.bf16.gmra.mxu0 %v4101_v53  ;;  %10513 = vrcp.f32 %v3991_v57 }
 0xa42   : > { %4018 = vadd.xlane.f32.xlu1 %v14051_v38 }
 0xa43   : > { %9558 = vmatpush3.bf16.xpose.msra.mxu0 %v4428_v27 }
 0xa44   : > { %9780 = vmatprep.subr.msk.bf16.mxu0 %vm1727_vm2, %v13604_v14 }
 0xa4b   : > { %9560 = vmatpush3.bf16.xpose.msra.mxu0 %v4425_v21  ;;  %v10510_v51 = vpop.eup %10509 }
 0xa4c   : > { %9781 = vmatprep.subr.msk.bf16.mxu0 %vm1727_vm2, %v13609_v22  ;;  %v10512_v35 = vpop.eup %10511  ;;  %v4077_v52 = vmul.f32 %v10510_v51, %v13937_v45  ;;  %v16889_v51 = vld [vmem:[#allocation31_spill] sm:$0xff] }
 0xa4d   : > { %v10514_v32 = vpop.eup %10513 }
 0xa4e   : > { %v4076_v43 = vmul.f32 %v10514_v32, %v13929_v54  ;;  %v4413_v54 = vsel %vm1727_vm2, %v16874_v0, 0 }
 0xa50   : > { %v4103_v45 = vpack.c.bf16 %v4077_v52, %v4076_v43 }
 0xa51   : > { %4366 = vrot.lane.b32.xlu0 %v11989_v4, %s11180_s27  ;;  %v4419_v4 = vsel %vm1727_vm2, %v13594_v28, 0 }
 0xa53   : > { %9562 = vmatpush3.bf16.xpose.msra.mxu0 %v4422_v23  ;;  %v3989_v3 = vpop.xlane.xlu1 %3988  ;;  %4555 = vrot.lane.b32.xlu1 %v12166_v37, %s11179_s19  ;;  %v16885_v23 = vld [vmem:[#allocation18_spill] sm:$0xff] }
 0xa54   : > { %9782 = vmatprep.subr.msk.bf16.mxu0 %vm1727_vm2, %v13594_v28  ;;  %10515 = vrcp.f32 %v3989_v3  ;;  %v16871_v28 = vld [vmem:[#allocation10_spill] sm:$0xff]  ;;  %v16886_v3 = vld [vmem:[#allocation19_spill] sm:$0xff] }
 0xa55   : > { %4533 = vrot.lane.b32.xlu0 %v12154_v18, %s11180_s27  ;;  %v3995_v22 = vpop.xlane.xlu0 %3994 }
 0xa57   : > { %v3999_v14 = vpop.xlane.xlu1 %3998  ;;  %4553 = vrot.lane.b32.xlu1 %v16809_v30, %s11179_s19 }
 0xa59   : > { %4537 = vrot.lane.b32.xlu0 %v16809_v30, %s11180_s27 }
 0xa5b   : > { %9564 = vmatpush3.bf16.xpose.msra.mxu0 %v4419_v4  ;;  %v4001_v1 = vpop.xlane.xlu1 %4000  ;;  %4368 = vrot.lane.b32.xlu1 %v11982_v50, %s11180_s27  ;;  %v16872_v50 = vld [vmem:[#allocation22_spill] sm:$0xff] }
 0xa5c   : > { %9783 = vmatprep.subr.msk.bf16.mxu0 %vm1727_vm2, %v13614_v8  ;;  %10517 = vrcp.f32 %v4001_v1  ;;  %v16876_v8 = vld [vmem:[#allocation15_spill] sm:$0xff] }
 0xa5d   : > { %4541 = vrot.lane.b32.xlu0 %v16812_v61, %s11180_s27  ;;  %10519 = vrcp.f32 %v3995_v22  ;;  %v4074_v61 = vmul.f32 %v10512_v35, %v13934_v49  ;;  %v16888_v22 = vld [vmem:[#allocation30_spill] sm:$0xff] }
 0xa5e   : > { %10521 = vrcp.f32 %v3999_v14  ;;  %v16887_v14 = vld [vmem:[#allocation21_spill] sm:$0xff] }
 0xa5f   : > { %v3997_v30 = vpop.xlane.xlu1 %3996  ;;  %4370 = vrot.lane.b32.xlu1 %v16871_v28, %s11180_s27 }
 0xa60   : > { %10523 = vrcp.f32 %v3997_v30 }
 0xa61   : > { %v10516_v7 = vpop.eup %10515  ;;  %4545 = vrot.lane.b32.xlu0 %v16872_v50, %s11180_s27 }
 0xa62   : > { %v4075_v13 = vmul.f32 %v10516_v7, %v13945_v25 }
 0xa63   : > { %9566 = vmatpush3.bf16.xpose.msra.mxu0 %v4416_v26  ;;  %4551 = vrot.lane.b32.xlu1 %v16873_v9, %s11179_s19 }
 0xa64   : > { %9784 = vmatprep.subr.msk.bf16.mxu0 %vm1727_vm2, %v16874_v0  ;;  %v4102_v24 = vpack.c.bf16 %v4075_v13, %v4074_v61 }
 0xa65   : > { %5028 = vrot.lane.b32.xlu0 %v16875_v40, %s11180_s27  ;;  %v16890_v40 = vld [vmem:[#allocation8_spill] sm:$0xff] }
 0xa66   : > { %9513 = vmatprep.mubr.bf16.mxu0 %v4102_v24 }
 0xa67   : > { %4549 = vrot.lane.b32.xlu1 %v12154_v18, %s11179_s19  ;;  %9514 = vmatmul.mubr.bf16.gmra.mxu0 %v4103_v45  ;;  %v4007_v4 = vpop.xlane.xlu1 %4006  ;;  %v4611_v45 = vsel %vm1727_vm2, %v16890_v40, 0 }
 0xa69   : > { %5024 = vrot.lane.b32.xlu0 %v16876_v8, %s11180_s27  ;;  %v10518_v49 = vpop.eup %10517 }
 0xa6a   : > { %v10520_v25 = vpop.eup %10519  ;;  %v4081_v18 = vmul.f32 %v10518_v49, %v13956_v2  ;;  %v16880_v2 = vld [vmem:[#allocation73_spill] sm:$0xff]  ;;  %v4605_v49 = vsel %vm1727_vm2, %v13970_v31, 0 }
 0xa6b   : > { %9568 = vmatpush3.bf16.xpose.msra.mxu0 %v4413_v54  ;;  %4535 = vrot.lane.b32.xlu1 %v16873_v9, %s11180_s27  ;;  %v10522_v44 = vpop.eup %10521  ;;  %v4078_v41 = vmul.f32 %v10520_v25, %v13948_v60  ;;  %v16881_v60 = vld [vmem:[#allocation28_spill] sm:$0xff]  ;;  %v4003_v1 = vpop.xlane.xlu1 %4002 }
 0xa6c   : > { %v4080_v57 = vmul.f32 %v10522_v44, %v13951_v12  ;;  %v16883_v12 = vld [vmem:[#allocation13_spill] sm:$0xff]  ;;  %v4602_v44 = vsel %vm1727_vm2, %v14062_v20, 0 }
 0xa6d   : > { %v10524_v59 = vpop.eup %10523  ;;  %5022 = vrot.lane.b32.xlu0 %v16877_v46, %s11180_s27 }
 0xa6e   : > { %v4079_v53 = vmul.f32 %v10524_v59, %v13959_v11  ;;  %v4105_v21 = vpack.c.bf16 %v4081_v18, %v4080_v57  ;;  %v16884_v11 = vld [vmem:[#allocation96_spill] sm:$0xff] }
 0xa6f   : > { %4539 = vrot.lane.b32.xlu1 %v12166_v37, %s11180_s27  ;;  %v16882_v37 = vld [vmem:[#allocation25_spill] sm:$0xff] }
 0xa70   : > { %v4104_v27 = vpack.c.bf16 %v4079_v53, %v4078_v41 }
 0xa71   : > { %5016 = vrot.lane.b32.xlu0 %v16878_v48, %s11180_s27 }
 0xa72   : > { %9517 = vmatprep.mubr.bf16.mxu0 %v4104_v27 }
 0xa73   : > { %4543 = vrot.lane.b32.xlu1 %v16879_v36, %s11180_s27  ;;  %9518 = vmatmul.mubr.bf16.gmra.mxu0 %v4105_v21 }
 0xa74   : > { %9569 = vmatprep.mubr.msk.bf16.mxu0 %vm1727_vm2, %v16880_v2 }
 0xa75   : > { %5149 = vrot.lane.b32.xlu0 %v16881_v60, %s11180_s27 }
 0xa77   : > { %4547 = vrot.lane.b32.xlu1 %v16882_v37, %s11180_s27 }
 0xa7b   : > { %5026 = vrot.lane.b32.xlu1 %v16883_v12, %s11180_s27  ;;  %9570 = vmatmul.mubr.msk.bf16.vlgmr.msra.gmra.mxu0 %vm1727_vm2, %v16884_v11 }
 0xa7c   : > { %9573 = vmatprep.mubr.msk.bf16.mxu0 %vm1727_vm2, %v13974_v17 }
 0xa7f   : > { %5020 = vrot.lane.b32.xlu1 %v16885_v23, %s11180_s27 }
 0xa83   : > { %5018 = vrot.lane.b32.xlu1 %v16886_v3, %s11180_s27  ;;  %9574 = vmatmul.mubr.msk.bf16.gmra.mxu0 %vm1727_vm2, %v13968_v5 }
 0xa87   : > { %5014 = vrot.lane.b32.xlu1 %v16887_v14, %s11180_s27 }
 0xa8b   : > { %5147 = vrot.lane.b32.xlu1 %v16888_v22, %s11180_s27 }
 0xa8f   : > { %5145 = vrot.lane.b32.xlu1 %v16889_v51, %s11180_s27 }
 0xa92   : > { %v4009_v17 = vpop.xlane.xlu1 %4008 }
 0xa93   : > { %10525 = vrcp.f32 %v4009_v17 }
 0xa94   : > { %10527 = vrcp.f32 %v4003_v1 }
 0xa95   : > { %10529 = vrcp.f32 %v4007_v4 }
 0xa96   : > { %v4365_v35 = vpop.permute.xlu1 %4364  ;;  %v4005_v30 = vpop.xlane.xlu0 %4004 }
 0xa97   : > { %10531 = vrcp.f32 %v4005_v30  ;;  %9577 = vmatprep.mubr.msk.bf16.mxu0 %vm1727_vm2, %v4365_v35 }
 0xaa0   : > { %v4015_v5 = vpop.xlane.xlu0 %4014  ;;  %v10526_v28 = vpop.eup %10525 }
 0xaa1   : > { %v10528_v32 = vpop.eup %10527  ;;  %v4085_v26 = vmul.f32 %v10526_v28, %v13980_v39 }
 0xaa2   : > { %v10530_v7 = vpop.eup %10529  ;;  %v4082_v61 = vmul.f32 %v10528_v32, %v13965_v16  ;;  %v4608_v16 = vsel %vm1727_vm2, %v13849_v56, 0 }
 0xaa3   : > { %v4084_v9 = vmul.f32 %v10530_v7, %v13962_v15 }
 0xaa4   : > { %v10532_v50 = vpop.eup %10531  ;;  %v4011_v52 = vpop.xlane.xlu0 %4010 }
 0xaa5   : > { %v4083_v13 = vmul.f32 %v10532_v50, %v13984_v34  ;;  %v4107_v24 = vpack.c.bf16 %v4085_v26, %v4084_v9 }
 0xaa7   : > { %v4106_v43 = vpack.c.bf16 %v4083_v13, %v4082_v61 }
 0xaa8   : > { %v4017_v0 = vpop.xlane.xlu0 %4016 }
 0xaa9   : > { %9537 = vmatprep.mubr.bf16.mxu1 %v4106_v43  ;;  %10533 = vrcp.f32 %v4017_v0 }
 0xaaa   : > { %9538 = vmatmul.mubr.bf16.vlgmr.msra.gmra.mxu1 %v4107_v24  ;;  %10535 = vrcp.f32 %v4011_v52 }
 0xaab   : > { %9586 = vmatpush3.bf16.xpose.msra.mxu1 %v4611_v45  ;;  %10537 = vrcp.f32 %v4015_v5 }
 0xaac   : > { %9786 = vmatprep.subr.msk.bf16.mxu1 %vm1727_vm2, %v13849_v56  ;;  %v4023_v8 = vpop.xlane.xlu0 %4022 }
 0xab0   : > { %v4025_v39 = vpop.xlane.xlu0 %4024 }
 0xab3   : > { %9588 = vmatpush3.bf16.xpose.msra.mxu1 %v4608_v16 }
 0xab4   : > { %9787 = vmatprep.subr.msk.bf16.mxu1 %vm1727_vm2, %v13970_v31  ;;  %v4021_v15 = vpop.xlane.xlu0 %4020 }
 0xab6   : > { %v10534_v57 = vpop.eup %10533 }
 0xab7   : > { %v10536_v27 = vpop.eup %10535  ;;  %v4089_v60 = vmul.f32 %v10534_v57, %v14002_v19 }
 0xab8   : > { %v4031_v34 = vpop.xlane.xlu0 %4030  ;;  %v10538_v21 = vpop.eup %10537  ;;  %v4086_v37 = vmul.f32 %v10536_v27, %v13996_v6 }
 0xab9   : > { %v4088_v3 = vmul.f32 %v10538_v21, %v13992_v63 }
 0xabb   : > { %9590 = vmatpush3.bf16.xpose.msra.mxu1 %v4605_v49  ;;  %v4109_v51 = vpack.c.bf16 %v4089_v60, %v4088_v3 }
 0xabc   : > { %9788 = vmatprep.subr.msk.bf16.mxu1 %vm1727_vm2, %v14062_v20  ;;  %v4027_v54 = vpop.xlane.xlu0 %4026 }
 0xac0   : > { %v4033_v25 = vpop.xlane.xlu0 %4032 }
 0xac3   : > { %9592 = vmatpush3.bf16.xpose.msra.mxu1 %v4602_v44 }
 0xac4   : > { %v4029_v56 = vpop.xlane.xlu0 %4028 }
 0xac7   : > { %v4013_v59 = vpop.xlane.xlu1 %4012 }
 0xac8   : > { %10539 = vrcp.f32 %v4013_v59  ;;  %v4367_v46 = vpop.permute.xlu0 %4366 }
 0xac9   : > { %9578 = vmatmul.mubr.msk.bf16.gmra.mxu0 %vm1727_vm2, %v4367_v46  ;;  %10541 = vrcp.f32 %v4021_v15 }
 0xacb   : > { %v4019_v31 = vpop.xlane.xlu1 %4018 }
 0xacc   : > { %10543 = vrcp.f32 %v4019_v31  ;;  %v14166_v18 = vpop.permute.xlu0 %4533 }
 0xacd   : > { %10545 = vrcp.f32 %v4025_v39 }
 0xace   : > { %10547 = vrcp.f32 %v4029_v56 }
 0xacf   : > { %10549 = vrcp.f32 %v4023_v8  ;;  %v4556_v41 = vpop.permute.xlu1 %4555 }
 0xad0   : > { %10551 = vrcp.f32 %v4027_v54  ;;  %9789 = vmatprep.subr.msk.bf16.mxu1 %vm1727_vm2, %v4556_v41  ;;  %v14169_v20 = vpop.permute.xlu0 %4537  ;;  %v4599_v53 = vsel %vm1727_vm2, %v4556_v41, 0 }
 0xad1   : > { %9594 = vmatpush3.bf16.xpose.msra.mxu1 %v4599_v53  ;;  %10553 = vrcp.f32 %v4033_v25 }
 0xad2   : > { %10555 = vrcp.f32 %v4031_v34 }
 0xad3   : > { %v4554_v48 = vpop.permute.xlu1 %4553 }
 0xad4   : > { %9790 = vmatprep.subr.msk.bf16.mxu1 %vm1727_vm2, %v4554_v48  ;;  %v14173_v36 = vpop.permute.xlu0 %4541  ;;  %v4596_v4 = vsel %vm1727_vm2, %v4554_v48, 0 }
 0xad5   : > { %v10540_v2 = vpop.eup %10539 }
 0xad6   : > { %v4087_v12 = vmul.f32 %v10540_v2, %v14048_v10  ;;  %v10542_v11 = vpop.eup %10541 }
 0xad7   : > { %v4369_v23 = vpop.permute.xlu1 %4368  ;;  %v4091_v10 = vmul.f32 %v10542_v11, %v14015_v29 }
 0xad8   : > { %9581 = vmatprep.mubr.msk.bf16.mxu0 %vm1727_vm2, %v4369_v23  ;;  %v14180_v14 = vpop.permute.xlu0 %4545  ;;  %v4108_v22 = vpack.c.bf16 %v4087_v12, %v4086_v37 }
 0xad9   : > { %v10544_v1 = vpop.eup %10543  ;;  %9596 = vmatpush3.bf16.xpose.msra.mxu1 %v4596_v4 }
 0xada   : > { %v10546_v19 = vpop.eup %10545  ;;  %9541 = vmatprep.mubr.bf16.mxu1 %v4108_v22  ;;  %v4090_v6 = vmul.f32 %v10544_v1, %v14051_v38 }
 0xadb   : > { %v10548_v17 = vpop.eup %10547  ;;  %v4371_v35 = vpop.permute.xlu1 %4370  ;;  %9542 = vmatmul.mubr.bf16.gmra.mxu1 %v4109_v51  ;;  %v4093_v32 = vmul.f32 %v10546_v19, %v14010_v62  ;;  %v14260_v51 = vld [vmem:[%s16702_s26] sm:$0xff] }
 0xadc   : > { %v10550_v63 = vpop.eup %10549  ;;  %9582 = vmatmul.mubr.msk.bf16.gmra.mxu0 %vm1727_vm2, %v4371_v35  ;;  %v5029_v30 = vpop.permute.xlu0 %5028  ;;  %v4110_v5 = vpack.c.bf16 %v4091_v10, %v4090_v6  ;;  %v4095_v7 = vmul.f32 %v10548_v17, %v14036_v33  ;;  %v14268_v10 = vld [vmem:[%s16702_s26 + $0x8] sm:$0xff] }
 0xadd   : > { %v10552_v28 = vpop.eup %10551  ;;  %9617 = vmatprep.subr.bf16.mxu0 %v5029_v30  ;;  %v4092_v38 = vmul.f32 %v10550_v63, %v14007_v55  ;;  %v14277_v63 = vld [vmem:[%s16702_s26 + $0x18] sm:$0xff] }
 0xade   : > { %9545 = vmatprep.mubr.bf16.mxu1 %v4110_v5  ;;  %9618 = vmatpush3.bf16.msra.mxu0 %v5029_v30  ;;  %v4094_v26 = vmul.f32 %v10552_v28, %v14027_v47  ;;  %v10554_v13 = vpop.eup %10553 }
 0xadf   : > { %v4552_v50 = vpop.permute.xlu1 %4551  ;;  %v4111_v61 = vpack.c.bf16 %v4093_v32, %v4092_v38  ;;  %v10556_v62 = vpop.eup %10555  ;;  %v4097_v55 = vmul.f32 %v10554_v13, %v14034_v58  ;;  %v14287_v32 = vld [vmem:[%s16702_s26 + $0x30] sm:$0xff] }
 0xae0   : > { %9791 = vmatprep.subr.msk.bf16.mxu1 %vm1727_vm2, %v4552_v50  ;;  %v5025_v29 = vpop.permute.xlu0 %5024  ;;  %v4593_v52 = vsel %vm1727_vm2, %v4552_v50, 0  ;;  %v4112_v9 = vpack.c.bf16 %v4095_v7, %v4094_v26  ;;  %v4096_v24 = vmul.f32 %v10556_v62, %v14023_v42  ;;  %v14295_v50 = vld [vmem:[%s16702_s26 + $0x38] sm:$0xff] }
 0xae1   : > { %9598 = vmatpush3.bf16.xpose.msra.mxu1 %v4593_v52  ;;  %v14305_v52 = vld [vmem:[%s16702_s26 + $0x20] sm:$0xff] }
 0xae2   : > { %v4113_v47 = vpack.c.bf16 %v4097_v55, %v4096_v24  ;;  %v14333_v24 = vld [vmem:[%s16702_s26 + $0x50] sm:$0xff] }
 0xae3   : > { %v4550_v43 = vpop.permute.xlu1 %4549  ;;  %9546 = vmatmul.mubr.bf16.gmra.mxu1 %v4111_v61  ;;  %v14313_v61 = vld [vmem:[%s16702_s26 + $0x28] sm:$0xff] }
 0xae4   : > { %9549 = vmatprep.mubr.bf16.mxu1 %v4112_v9  ;;  %9792 = vmatprep.subr.msk.bf16.mxu1 %vm1727_vm2, %v4550_v43  ;;  %v5023_v33 = vpop.permute.xlu0 %5022  ;;  %v4590_v45 = vsel %vm1727_vm2, %v4550_v43, 0  ;;  %v16894_v9 = vld [vmem:[#allocation35_spill] sm:$0xff] }
 0xae7   : > { %v4536_v0 = vpop.permute.xlu1 %4535 }
 0xae8   : > { %v5017_v40 = vpop.permute.xlu0 %5016 }
 0xae9   : > { %9600 = vmatpush3.bf16.xpose.msra.mxu1 %v4590_v45 }
 0xaeb   : > { %v4540_v8 = vpop.permute.xlu1 %4539  ;;  %9550 = vmatmul.mubr.bf16.gmra.mxu1 %v4113_v47 }
 0xaec   : > { %9601 = vmatprep.mubr.msk.bf16.mxu1 %vm1727_vm2, %v14166_v18  ;;  %v5150_v39 = vpop.permute.xlu0 %5149 }
 0xaed   : > { %9649 = vmatprep.subr.bf16.mxu1 %v5150_v39 }
 0xaef   : > { %v4544_v16 = vpop.permute.xlu1 %4543 }
 0xaf2   : > { %v14198_v15 = vpop.f32.mrf.mxu0 }
 0xaf3   : > { %v4548_v34 = vpop.permute.xlu1 %4547  ;;  %9602 = vmatmul.mubr.msk.bf16.vlgmr.msra.gmra.mxu1 %vm1727_vm2, %v4536_v0 }
 0xaf4   : > { %9650 = vmatpush3.bf16.msra.mxu1 %v5150_v39  ;;  %v14201_v42 = vpop.f32.mrf.mxu0  ;;  %9605 = vmatprep.mubr.msk.bf16.mxu1 %vm1727_vm2, %v14169_v20 }
 0xaf6   : > { %v14205_v58 = vpop.f32.mrf.mxu0 }
 0xaf7   : > { %v5027_v54 = vpop.permute.xlu1 %5026 }
 0xaf8   : > { %9619 = vmatprep.subr.bf16.mxu0 %v5027_v54  ;;  %v14212_v44 = vpop.f32.mrf.mxu0 }
 0xaf9   : > { %9620 = vmatpush3.bf16.msra.mxu0 %v5027_v54 }
 0xafa   : > { %9621 = vmatprep.subr.bf16.mxu0 %v5025_v29 }
 0xafb   : > { %v5021_v25 = vpop.permute.xlu1 %5020  ;;  %9606 = vmatmul.mubr.msk.bf16.gmra.mxu1 %vm1727_vm2, %v4540_v8  ;;  %v14342_v8 = vld [vmem:[%s16702_s26 + $0x40] sm:$0xff] }
 0xafc   : > { %9609 = vmatprep.mubr.msk.bf16.mxu1 %vm1727_vm2, %v14173_v36 }
 0xafd   : > { %9622 = vmatpush3.bf16.msra.mxu0 %v5025_v29 }
 0xafe   : > { %9623 = vmatprep.subr.bf16.mxu0 %v5023_v33 }
 0xaff   : > { %v5019_v56 = vpop.permute.xlu1 %5018 }
 0xb00   : > { %v14214_v59 = vpop.f32.mrf.mxu0 }
 0xb01   : > { %9624 = vmatpush3.bf16.msra.mxu0 %v5023_v33 }
 0xb02   : > { %v14216_v46 = vpop.f32.mrf.mxu0  ;;  %9625 = vmatprep.subr.bf16.mxu0 %v5021_v25 }
 0xb03   : > { %v5015_v31 = vpop.permute.xlu1 %5014  ;;  %9610 = vmatmul.mubr.msk.bf16.gmra.mxu1 %vm1727_vm2, %v4544_v16  ;;  %v14350_v16 = vld [vmem:[%s16702_s26 + $0x58] sm:$0xff] }
 0xb04   : > { %v14219_v18 = vpop.f32.mrf.mxu0  ;;  %9613 = vmatprep.mubr.msk.bf16.mxu1 %vm1727_vm2, %v14180_v14  ;;  %v14251_v14 = vld [vmem:[%s16702_s26 + $0x10] sm:$0xff] }
 0xb05   : > { %9626 = vmatpush3.bf16.msra.mxu0 %v5021_v25  ;;  %v11048_v25 = vld [vmem:[%s16702_s26 + $0x48] sm:$0xff] }
 0xb06   : > { %9627 = vmatprep.subr.bf16.mxu0 %v5019_v56  ;;  %v14226_v57 = vpop.f32.mrf.mxu0 }
 0xb07   : > { %v5148_v20 = vpop.permute.xlu1 %5147 }
 0xb08   : > { %9651 = vmatprep.subr.bf16.mxu1 %v5148_v20 }
 0xb09   : > { %9628 = vmatpush3.bf16.msra.mxu0 %v5019_v56  ;;  %9652 = vmatpush3.bf16.msra.mxu1 %v5148_v20 }
 0xb0a   : > { %9629 = vmatprep.subr.bf16.mxu0 %v5017_v40 }
 0xb0b   : > { %v5146_v53 = vpop.permute.xlu1 %5145  ;;  %9614 = vmatmul.mubr.msk.bf16.gmra.mxu1 %vm1727_vm2, %v4548_v34 }
 0xb0c   : > { %9653 = vmatprep.subr.bf16.mxu1 %v5146_v53 }
 0xb0d   : > { %9630 = vmatpush3.bf16.msra.mxu0 %v5017_v40  ;;  %9654 = vmatpush3.bf16.msra.mxu1 %v5146_v53 }
 0xb0e   : > { %9631 = vmatprep.subr.bf16.mxu0 %v5015_v31 }
 0xb11   : > { %9632 = vmatpush3.bf16.msra.mxu0 %v5015_v31 }
 0xb27   : > { %v14228_v27 = vpop.f32.mrf.mxu0 }
 0xb29   : > { %v14230_v48 = vpop.f32.mrf.mxu0 }
 0xb2b   : > { %v14232_v21 = vpop.f32.mrf.mxu0 }
 0xb2d   : > { %v14236_v2 = vpop.f32.mrf.mxu0 }
 0xb33   : > { %v14238_v60 = vpop.f32.mrf.mxu0 }
 0xb34   : > { %16891 = vst [vmem:[#allocation10_spill] sm:$0xff] %v14238_v60 }
 0xb35   : > { %v14240_v37 = vpop.f32.mrf.mxu0 }
 0xb37   : > { %v14242_v12 = vpop.f32.mrf.mxu0 }
 0xb38   : > { %16892 = vst [vmem:[#allocation22_spill] sm:$0xff] %v14242_v12 }
 0xb39   : > { %v14246_v23 = vpop.f32.mrf.mxu0 }
 0xb3a   : > { %16893 = vst [vmem:[#allocation27_spill] sm:$0xff] %v14246_v23 }
 0xb3b   : > { %v9571_v3 = vpop.f32.mrf.mxu0 }
 0xb3c   : > { %v14254_v4 = vadd.f32 %v14251_v14, %v9571_v3 }
 0xb3d   : > { %v4470_v22 = vpop.f32.mrf.mxu0 }
 0xb3e   : > { %4714 = vmax.xlane.f32.xlu0 %v14254_v4  ;;  %v14263_v19 = vadd.f32 %v14260_v51, %v4470_v22 }
 0xb3f   : > { %v9572_v1 = vpop.f32.mrf.mxu0 }
 0xb40   : > { %v14280_v30 = vadd.f32 %v14277_v63, %v9572_v1 }
 0xb41   : > { %v4473_v6 = vpop.f32.mrf.mxu0 }
 0xb42   : > { %v14271_v17 = vadd.f32 %v14268_v10, %v4473_v6  ;;  %4710 = vmax.xlane.f32.xlu0 %v14263_v19 }
 0xb43   : > { %v9575_v35 = vpop.f32.mrf.mxu0 }
 0xb44   : > { %4712 = vmax.xlane.f32.xlu1 %v14271_v17  ;;  %v14290_v7 = vadd.f32 %v14287_v32, %v9575_v35 }
 0xb45   : > { %v4486_v5 = vpop.f32.mrf.mxu0 }
 0xb46   : > { %4716 = vmax.xlane.f32.xlu0 %v14280_v30  ;;  %v14308_v26 = vadd.f32 %v14305_v52, %v4486_v5  ;;  %v14376_v5 = vld [vmem:[%s16702_s26 + $0x78] sm:$0xff] }
 0xb47   : > { %v9576_v28 = vpop.f32.mrf.mxu0 }
 0xb48   : > { %v14298_v38 = vadd.f32 %v14295_v50, %v9576_v28 }
 0xb49   : > { %v4489_v29 = vpop.f32.mrf.mxu0 }
 0xb4a   : > { %4724 = vmax.xlane.f32.xlu1 %v14298_v38  ;;  %4722 = vmax.xlane.f32.xlu0 %v14290_v7  ;;  %v14316_v13 = vadd.f32 %v14313_v61, %v4489_v29 }
 0xb4e   : > { %4720 = vmax.xlane.f32.xlu1 %v14316_v13  ;;  %4718 = vmax.xlane.f32.xlu0 %v14308_v26 }
 0xb5f   : > { %5141 = vrot.lane.b32.xlu1 %v16894_v9, %s11180_s27 }
 0xb6a   : > { %v14322_v43 = vpop.f32.mrf.mxu1 }
 0xb6b   : > { %16895 = vst [vmem:[#allocation72_spill] sm:$0xff] %v14322_v43 }
 0xb6c   : > { %v14324_v62 = vpop.f32.mrf.mxu1 }
 0xb6d   : > { %16896 = vst [vmem:[#allocation11_spill] sm:$0xff] %v14324_v62 }
 0xb6e   : > { %v14326_v33 = vpop.f32.mrf.mxu1 }
 0xb6f   : > { %16897 = vst [vmem:[#allocation15_spill] sm:$0xff] %v14326_v33 }
 0xb70   : > { %v14363_v31 = vpop.f32.mrf.mxu1 }
 0xb71   : > { %16898 = vst [vmem:[#allocation17_spill] sm:$0xff] %v14363_v31 }
 0xb89   : > { %v9579_v0 = vpop.f32.mrf.mxu0 }
 0xb8a   : > { %v14336_v40 = vadd.f32 %v14333_v24, %v9579_v0 }
 0xb8b   : > { %v4502_v45 = vpop.f32.mrf.mxu0 }
 0xb8c   : > { %4730 = vmax.xlane.f32.xlu0 %v14336_v40  ;;  %v14345_v39 = vadd.f32 %v14342_v8, %v4502_v45  ;;  %v14389_v45 = vld [vmem:[%s16702_s26 + $0x68] sm:$0xff] }
 0xb8d   : > { %v9580_v47 = vpop.f32.mrf.mxu0 }
 0xb8e   : > { %v14353_v34 = vadd.f32 %v14350_v16, %v9580_v47 }
 0xb8f   : > { %v4505_v54 = vpop.f32.mrf.mxu0 }
 0xb90   : > { %4732 = vmax.xlane.f32.xlu1 %v14353_v34  ;;  %4726 = vmax.xlane.f32.xlu0 %v14345_v39  ;;  %v14360_v56 = vadd.f32 %v11048_v25, %v4505_v54 }
 0xb94   : > { %4728 = vmax.xlane.f32.xlu1 %v14360_v56 }
 0xb9b   : > { %v14365_v20 = vpop.f32.mrf.mxu1 }
 0xb9c   : > { %16899 = vst [vmem:[#allocation20_spill] sm:$0xff] %v14365_v20  ;;  %v9583_v53 = vpop.f32.mrf.mxu0 }
 0xb9d   : > { %v14367_v3 = vpop.f32.mrf.mxu1 }
 0xb9e   : > { %16900 = vst [vmem:[#allocation26_spill] sm:$0xff] %v14367_v3  ;;  %v4518_v22 = vpop.f32.mrf.mxu0 }
 0xb9f   : > { %v14369_v1 = vpop.f32.mrf.mxu1 }
 0xba0   : > { %16901 = vst [vmem:[#allocation73_spill] sm:$0xff] %v14369_v1  ;;  %v9584_v35 = vpop.f32.mrf.mxu0 }
 0xba1   : > { %v14379_v28 = vadd.f32 %v14376_v5, %v9584_v35  ;;  %v14381_v29 = vpop.f32.mrf.mxu1  ;;  %v16905_v35 = vld [vmem:[#allocation33_spill] sm:$0xff] }
 0xba2   : > { %16902 = vst [vmem:[#allocation28_spill] sm:$0xff] %v14381_v29  ;;  %v4521_v9 = vpop.f32.mrf.mxu0 }
 0xba3   : > { %v14383_v0 = vpop.f32.mrf.mxu1  ;;  %4740 = vmax.xlane.f32.xlu1 %v14379_v28  ;;  %v14392_v47 = vadd.f32 %v14389_v45, %v4521_v9 }
 0xba4   : > { %16903 = vst [vmem:[#allocation25_spill] sm:$0xff] %v14383_v0 }
 0xba5   : > { %v14394_v54 = vpop.f32.mrf.mxu1 }
 0xba6   : > { %16904 = vst [vmem:[#allocation13_spill] sm:$0xff] %v14394_v54  ;;  %5143 = vrot.lane.b32.xlu0 %v16905_v35, %s11180_s27 }
 0xba7   : > { %v14398_v6 = vpop.f32.mrf.mxu1  ;;  %4736 = vmax.xlane.f32.xlu1 %v14392_v47 }
 0xba8   : > { %16906 = vst [vmem:[#allocation96_spill] sm:$0xff] %v14398_v6 }
 0xba9   : > { %v14403_v11 = vpop.f32.mrf.mxu1 }
 0xbaa   : > { %16907 = vst [vmem:[#allocation18_spill] sm:$0xff] %v14403_v11 }
 0xbab   : > { %v14405_v36 = vpop.f32.mrf.mxu1 }
 0xbac   : > { %16908 = vst [vmem:[#allocation19_spill] sm:$0xff] %v14405_v36 }
 0xbad   : > { %v14407_v41 = vpop.f32.mrf.mxu1 }
 0xbae   : > { %16909 = vst [vmem:[#allocation21_spill] sm:$0xff] %v14407_v41 }
 0xbaf   : > { %v14409_v9 = vpop.f32.mrf.mxu1 }
 0xbb0   : > { %16910 = vst [vmem:[#allocation30_spill] sm:$0xff] %v14409_v9 }
 0xbb1   : > { %v14413_v54 = vpop.f32.mrf.mxu1 }
 0xbb2   : > { %16911 = vst [vmem:[#allocation31_spill] sm:$0xff] %v14413_v54 }
 0xbb3   : > { %v9603_v20 = vpop.f32.mrf.mxu1 }
 0xbb4   : > { %v14449_v33 = vadd.f32 %v14251_v14, %v9603_v20 }
 0xbb5   : > { %v4647_v1 = vpop.f32.mrf.mxu1 }
 0xbb7   : > { %v9604_v29 = vpop.f32.mrf.mxu1 }
 0xbb8   : > { %v14418_v55 = vadd.f32 %v14277_v63, %v9604_v29  ;;  %v11051_v63 = vld [vmem:[%s16702_s26 + $0x70] sm:$0xff] }
 0xbb9   : > { %v4650_v0 = vpop.f32.mrf.mxu1  ;;  %v14432_v29 = vadd.f32 %v11051_v63, %v9583_v53 }
 0xbba   : > { %4748 = vmax.xlane.f32.xlu1 %v14418_v55  ;;  %v14422_v11 = vadd.f32 %v14268_v10, %v4650_v0 }
 0xbbb   : > { %v9607_v6 = vpop.f32.mrf.mxu1 }
 0xbbd   : > { %v4663_v3 = vpop.f32.mrf.mxu1 }
 0xbbe   : > { %4744 = vmax.xlane.f32.xlu1 %v14422_v11 }
 0xbbf   : > { %v9608_v49 = vpop.f32.mrf.mxu1 }
 0xbc0   : > { %v14426_v36 = vadd.f32 %v14295_v50, %v9608_v49  ;;  %v11052_v49 = vld [vmem:[%s16702_s26 + $0x60] sm:$0xff] }
 0xbc1   : > { %v4666_v35 = vpop.f32.mrf.mxu1  ;;  %v14442_v50 = vadd.f32 %v11052_v49, %v4518_v22 }
 0xbc2   : > { %4756 = vmax.xlane.f32.xlu1 %v14426_v36  ;;  %v14435_v10 = vadd.f32 %v14313_v61, %v4666_v35 }
 0xbc3   : > { %v9611_v41 = vpop.f32.mrf.mxu1 }
 0xbc5   : > { %4738 = vmax.xlane.f32.xlu0 %v14432_v29  ;;  %v4679_v0 = vpop.f32.mrf.mxu1 }
 0xbc6   : > { %4752 = vmax.xlane.f32.xlu1 %v14435_v10 }
 0xbc7   : > { %v9612_v54 = vpop.f32.mrf.mxu1  ;;  %v4715_v9 = vpop.xlane.xlu0 %4714 }
 0xbc8   : > { %v4776_v53 = vsub.f32 %v14254_v4, %v4715_v9 }
 0xbc9   : > { %4734 = vmax.xlane.f32.xlu0 %v14442_v50  ;;  %v4682_v43 = vpop.f32.mrf.mxu1 }
 0xbca   : > { %v4810_v61 = vmul.f32 1.442695, %v4776_v53  ;;  %v14446_v35 = vadd.f32 %v11048_v25, %v4682_v43  ;;  %v14457_v53 = vadd.f32 %v14260_v51, %v4647_v1  ;;  %v14471_v51 = vadd.f32 %v14305_v52, %v4663_v3 }
 0xbcb   : > { %v9615_v31 = vpop.f32.mrf.mxu1  ;;  %v4711_v62 = vpop.xlane.xlu0 %4710  ;;  %v14486_v52 = vadd.f32 %v14342_v8, %v4679_v0 }
 0xbcc   : > { %10557 = vpow2.f32 %v4810_v61  ;;  %v4774_v60 = vsub.f32 %v14263_v19, %v4711_v62  ;;  %4760 = vmax.xlane.f32.xlu1 %v14446_v35  ;;  %v14454_v4 = vadd.f32 %v11051_v63, %v9615_v31  ;;  %v14466_v31 = vadd.f32 %v14287_v32, %v9607_v6 }
 0xbcd   : > { %v4713_v22 = vpop.xlane.xlu1 %4712  ;;  %4746 = vmax.xlane.f32.xlu0 %v14449_v33  ;;  %v4695_v43 = vpop.f32.mrf.mxu1  ;;  %v14478_v32 = vadd.f32 %v14333_v24, %v9611_v41  ;;  %v14494_v41 = vadd.f32 %v14350_v16, %v9612_v54 }
 0xbce   : > { %v4806_v9 = vmul.f32 1.442695, %v4774_v60  ;;  %v4775_v14 = vsub.f32 %v14271_v17, %v4713_v22  ;;  %v14463_v19 = vadd.f32 %v11052_v49, %v4695_v43 }
 0xbcf   : > { %v4717_v25 = vpop.xlane.xlu0 %4716 }
 0xbd0   : > { %10559 = vpow2.f32 %v4806_v9  ;;  %v4777_v20 = vsub.f32 %v14280_v30, %v4717_v25  ;;  %4770 = vmax.xlane.f32.xlu1 %v14454_v4  ;;  %v4808_v60 = vmul.f32 1.442695, %v4775_v14  ;;  %v9616_v9 = vpop.f32.mrf.mxu1 }
 0xbd1   : > { %4742 = vmax.xlane.f32.xlu0 %v14457_v53 }
 0xbd2   : > { %v4812_v62 = vmul.f32 1.442695, %v4777_v20  ;;  %v4698_v43 = vpop.f32.mrf.mxu1 }
 0xbd3   : > { %v4723_v17 = vpop.xlane.xlu0 %4722  ;;  %v4725_v1 = vpop.xlane.xlu1 %4724  ;;  %v14506_v16 = vadd.f32 %v14389_v45, %v4698_v43 }
 0xbd4   : > { %10561 = vpow2.f32 %v4812_v62  ;;  %4766 = vmax.xlane.f32.xlu1 %v14463_v19  ;;  %v4780_v6 = vsub.f32 %v14290_v7, %v4723_v17  ;;  %v4781_v3 = vsub.f32 %v14298_v38, %v4725_v1  ;;  %v14502_v38 = vadd.f32 %v14376_v5, %v9616_v9  ;;  %v16912_v5 = vld [vmem:[#allocation36_spill] sm:$0xff] }
 0xbd5   : > { %4754 = vmax.xlane.f32.xlu0 %v14466_v31  ;;  %10563 = vpow2.f32 %v4808_v60 }
 0xbd6   : > { %v4818_v49 = vmul.f32 1.442695, %v4780_v6  ;;  %v4820_v7 = vmul.f32 1.442695, %v4781_v3 }
 0xbd7   : > { %v4721_v61 = vpop.xlane.xlu1 %4720  ;;  %v4719_v45 = vpop.xlane.xlu0 %4718 }
 0xbd8   : > { %10565 = vpow2.f32 %v4818_v49  ;;  %v4779_v24 = vsub.f32 %v14316_v13, %v4721_v61  ;;  %v4778_v14 = vsub.f32 %v14308_v26, %v4719_v45 }
 0xbd9   : > { %v14473_v30 = vpop.eup %10557  ;;  %4750 = vmax.xlane.f32.xlu0 %v14471_v51  ;;  %10567 = vpow2.f32 %v4820_v7 }
 0xbda   : > { %4874 = vadd.xlane.f32.xlu1 %v14473_v30  ;;  %v4816_v0 = vmul.f32 1.442695, %v4779_v24  ;;  %v4814_v20 = vmul.f32 1.442695, %v4778_v14 }
 0xbdb   : > { %v5142_v62 = vpop.permute.xlu1 %5141 }
 0xbdc   : > { %10569 = vpow2.f32 %v4816_v0 }
 0xbdd   : > { %v14481_v63 = vpop.eup %10559  ;;  %4762 = vmax.xlane.f32.xlu0 %v14478_v32  ;;  %10571 = vpow2.f32 %v4814_v20 }
 0xbde   : > { %4870 = vadd.xlane.f32.xlu1 %v14481_v63 }
 0xbe1   : > { %v14489_v22 = vpop.eup %10561  ;;  %4758 = vmax.xlane.f32.xlu0 %v14486_v52 }
 0xbe2   : > { %4876 = vadd.xlane.f32.xlu1 %v14489_v22  ;;  %v14497_v8 = vpop.eup %10563 }
 0xbe5   : > { %4764 = vmax.xlane.f32.xlu0 %v14494_v41  ;;  %v14509_v13 = vpop.eup %10565 }
 0xbe6   : > { %4872 = vadd.xlane.f32.xlu1 %v14497_v8  ;;  %v14512_v54 = vpop.eup %10567 }
 0xbe9   : > { %4772 = vmax.xlane.f32.xlu0 %v14502_v38  ;;  %v14517_v25 = vpop.eup %10569 }
 0xbea   : > { %v14522_v49 = vpop.eup %10571 }
 0xbed   : > { %4768 = vmax.xlane.f32.xlu0 %v14506_v16 }
 0xbf1   : > { %4882 = vadd.xlane.f32.xlu0 %v14509_v13 }
 0xbf5   : > { %4884 = vadd.xlane.f32.xlu0 %v14512_v54 }
 0xbf7   : > { %5139 = vrot.lane.b32.xlu1 %v16912_v5, %s11180_s27 }
 0xbf9   : > { %4880 = vadd.xlane.f32.xlu0 %v14517_v25 }
 0xc15   : > { %v4731_v60 = vpop.xlane.xlu0 %4730 }
 0xc16   : > { %v4784_v17 = vsub.f32 %v14336_v40, %v4731_v60 }
 0xc18   : > { %v4826_v1 = vmul.f32 1.442695, %v4784_v17 }
 0xc19   : > { %v4733_v6 = vpop.xlane.xlu1 %4732  ;;  %v4727_v3 = vpop.xlane.xlu0 %4726 }
 0xc1a   : > { %10573 = vpow2.f32 %v4826_v1  ;;  %v4782_v61 = vsub.f32 %v14345_v39, %v4727_v3  ;;  %v4785_v7 = vsub.f32 %v14353_v34, %v4733_v6 }
 0xc1b   : > { %4878 = vadd.xlane.f32.xlu1 %v14522_v49 }
 0xc1c   : > { %v4822_v24 = vmul.f32 1.442695, %v4782_v61  ;;  %v4828_v0 = vmul.f32 1.442695, %v4785_v7 }
 0xc1d   : > { %v4729_v26 = vpop.xlane.xlu1 %4728  ;;  %v5144_v9 = vpop.permute.xlu0 %5143 }
 0xc1e   : > { %9655 = vmatprep.subr.bf16.mxu1 %v5144_v9  ;;  %10575 = vpow2.f32 %v4822_v24  ;;  %v4783_v40 = vsub.f32 %v14360_v56, %v4729_v26 }
 0xc1f   : > { %9656 = vmatpush3.bf16.msra.mxu1 %v5144_v9  ;;  %10577 = vpow2.f32 %v4828_v0 }
 0xc20   : > { %9657 = vmatprep.subr.bf16.mxu1 %v5142_v62  ;;  %v4824_v43 = vmul.f32 1.442695, %v4783_v40 }
 0xc22   : > { %10579 = vpow2.f32 %v4824_v43 }
 0xc23   : > { %9658 = vmatpush3.bf16.msra.mxu1 %v5142_v62 }
 0xc27   : > { %v14528_v5 = vpop.eup %10573 }
 0xc28   : > { %4890 = vadd.xlane.f32.xlu0 %v14528_v5 }
 0xc2b   : > { %v14531_v39 = vpop.eup %10575 }
 0xc2c   : > { %4886 = vadd.xlane.f32.xlu0 %v14531_v39  ;;  %v14534_v34 = vpop.eup %10577  ;;  %v4741_v56 = vpop.xlane.xlu1 %4740 }
 0xc2d   : > { %v4789_v17 = vsub.f32 %v14379_v28, %v4741_v56 }
 0xc2f   : > { %v14537_v45 = vpop.eup %10579  ;;  %v4836_v7 = vmul.f32 1.442695, %v4789_v17 }
 0xc30   : > { %4892 = vadd.xlane.f32.xlu0 %v14534_v34  ;;  %v4737_v14 = vpop.xlane.xlu1 %4736 }
 0xc31   : > { %v4787_v24 = vsub.f32 %v14392_v47, %v4737_v14 }
 0xc33   : > { %v4832_v43 = vmul.f32 1.442695, %v4787_v24 }
 0xc34   : > { %4888 = vadd.xlane.f32.xlu0 %v14537_v45 }
 0xc43   : > { %v4749_v20 = vpop.xlane.xlu1 %4748 }
 0xc44   : > { %v4793_v47 = vsub.f32 %v14418_v55, %v4749_v20 }
 0xc47   : > { %v4745_v62 = vpop.xlane.xlu1 %4744 }
 0xc48   : > { %v4791_v12 = vsub.f32 %v14422_v11, %v4745_v62 }
 0xc4a   : > { %v4840_v14 = vmul.f32 1.442695, %v4791_v12 }
 0xc4b   : > { %v4757_v60 = vpop.xlane.xlu1 %4756 }
 0xc4e   : > { %v4739_v1 = vpop.xlane.xlu0 %4738 }
 0xc4f   : > { %v4788_v6 = vsub.f32 %v14432_v29, %v4739_v1  ;;  %v4753_v61 = vpop.xlane.xlu1 %4752 }
 0xc51   : > { %v4834_v3 = vmul.f32 1.442695, %v4788_v6 }
 0xc52   : > { %v4735_v26 = vpop.xlane.xlu0 %4734 }
 0xc53   : > { %10581 = vpow2.f32 %v4834_v3  ;;  %v4786_v9 = vsub.f32 %v14442_v50, %v4735_v26  ;;  %v4795_v50 = vsub.f32 %v14435_v10, %v4753_v61 }
 0xc54   : > { %10583 = vpow2.f32 %v4836_v7  ;;  %v4844_v7 = vmul.f32 1.442695, %v4793_v47 }
 0xc55   : > { %v4830_v0 = vmul.f32 1.442695, %v4786_v9  ;;  %v14544_v40 = vpop.xlane.xlu1 %4760  ;;  %v4848_v62 = vmul.f32 1.442695, %v4795_v50  ;;  %v4797_v9 = vsub.f32 %v14426_v36, %v4757_v60 }
 0xc56   : > { %v4747_v28 = vpop.xlane.xlu0 %4746 }
 0xc57   : > { %10585 = vpow2.f32 %v4830_v0  ;;  %v4792_v29 = vsub.f32 %v14449_v33, %v4747_v28 }
 0xc58   : > { %10587 = vpow2.f32 %v4832_v43 }
 0xc59   : > { %v4842_v56 = vmul.f32 1.442695, %v4792_v29  ;;  %v14548_v1 = vpop.xlane.xlu1 %4770  ;;  %v4852_v29 = vmul.f32 1.442695, %v4797_v9 }
 0xc5a   : > { %v4743_v17 = vpop.xlane.xlu0 %4742 }
 0xc5b   : > { %10589 = vpow2.f32 %v4842_v56  ;;  %v4790_v6 = vsub.f32 %v14457_v53, %v4743_v17 }
 0xc5c   : > { %10591 = vpow2.f32 %v4840_v14 }
 0xc5d   : > { %v4838_v3 = vmul.f32 1.442695, %v4790_v6  ;;  %v14553_v33 = vpop.xlane.xlu1 %4766 }
 0xc5e   : > { %v4755_v11 = vpop.xlane.xlu0 %4754 }
 0xc5f   : > { %10593 = vpow2.f32 %v4838_v3  ;;  %v4796_v24 = vsub.f32 %v14466_v31, %v4755_v11 }
 0xc60   : > { %v14556_v26 = vpop.eup %10581  ;;  %10595 = vpow2.f32 %v4844_v7 }
 0xc61   : > { %4898 = vadd.xlane.f32.xlu0 %v14556_v26  ;;  %v14559_v55 = vpop.eup %10583  ;;  %10597 = vpow2.f32 %v4848_v62  ;;  %v4850_v10 = vmul.f32 1.442695, %v4796_v24 }
 0xc62   : > { %v4751_v12 = vpop.xlane.xlu0 %4750 }
 0xc63   : > { %v4794_v53 = vsub.f32 %v14471_v51, %v4751_v12  ;;  %v4875_v20 = vpop.xlane.xlu1 %4874  ;;  %10599 = vpow2.f32 %v4850_v10 }
 0xc64   : > { %v14562_v61 = vpop.eup %10585 }
 0xc65   : > { %4900 = vadd.xlane.f32.xlu0 %v14559_v55  ;;  %4894 = vadd.xlane.f32.xlu1 %v14562_v61  ;;  %v14567_v31 = vpop.eup %10587  ;;  %v4846_v0 = vmul.f32 1.442695, %v4794_v53 }
 0xc66   : > { %v4763_v6 = vpop.xlane.xlu0 %4762 }
 0xc67   : > { %v4871_v43 = vpop.xlane.xlu1 %4870  ;;  %10601 = vpow2.f32 %v4846_v0 }
 0xc68   : > { %v14569_v28 = vpop.eup %10589  ;;  %10603 = vpow2.f32 %v4852_v29 }
 0xc69   : > { %4896 = vadd.xlane.f32.xlu0 %v14567_v31  ;;  %4906 = vadd.xlane.f32.xlu1 %v14569_v28  ;;  %v14573_v51 = vpop.eup %10591 }
 0xc6a   : > { %v4759_v12 = vpop.xlane.xlu0 %4758 }
 0xc6b   : > { %v4877_v36 = vpop.xlane.xlu1 %4876 }
 0xc6c   : > { %v14575_v60 = vpop.eup %10593  ;;  %10605 = vrcp.f32 %v4877_v36 }
 0xc6d   : > { %4904 = vadd.xlane.f32.xlu0 %v14573_v51  ;;  %4902 = vadd.xlane.f32.xlu1 %v14575_v60  ;;  %10607 = vrcp.f32 %v4871_v43  ;;  %v14579_v56 = vpop.eup %10595 }
 0xc6e   : > { %10609 = vrcp.f32 %v4875_v20  ;;  %v14581_v14 = vpop.eup %10597  ;;  %v4765_v36 = vpop.xlane.xlu0 %4764 }
 0xc6f   : > { %v4873_v47 = vpop.xlane.xlu1 %4872 }
 0xc70   : > { %10611 = vrcp.f32 %v4873_v47  ;;  %v14585_v50 = vpop.eup %10599  ;;  %v16913_v47 = vld [vmem:[#allocation38_spill] sm:$0xff] }
 0xc71   : > { %4912 = vadd.xlane.f32.xlu0 %v14581_v14  ;;  %4908 = vadd.xlane.f32.xlu1 %v14579_v56 }
 0xc73   : > { %v5140_v17 = vpop.permute.xlu1 %5139 }
 0xc74   : > { %9659 = vmatprep.subr.bf16.mxu1 %v5140_v17  ;;  %v14588_v3 = vpop.eup %10601 }
 0xc75   : > { %9660 = vmatpush3.bf16.msra.mxu1 %v5140_v17  ;;  %4914 = vadd.xlane.f32.xlu1 %v14585_v50  ;;  %v14590_v7 = vpop.eup %10603  ;;  %v4773_v17 = vpop.xlane.xlu0 %4772 }
 0xc79   : > { %4910 = vadd.xlane.f32.xlu1 %v14588_v3  ;;  %v10606_v11 = vpop.eup %10605  ;;  %v4769_v23 = vpop.xlane.xlu0 %4768 }
 0xc7a   : > { %v10608_v62 = vpop.eup %10607  ;;  %v4969_v53 = vmul.f32 %v10606_v11, %v14489_v22  ;;  %v16914_v22 = vld [vmem:[#allocation40_spill] sm:$0xff] }
 0xc7b   : > { %v10610_v24 = vpop.eup %10609  ;;  %v4966_v20 = vmul.f32 %v10608_v62, %v14481_v63  ;;  %v4799_v63 = vsub.f32 %v14446_v35, %v14544_v40  ;;  %v4804_v62 = vsub.f32 %v14454_v4, %v14548_v1  ;;  %v4801_v35 = vsub.f32 %v14494_v41, %v4765_v36 }
 0xc7c   : > { %v4968_v0 = vmul.f32 %v10610_v24, %v14473_v30  ;;  %v4802_v24 = vsub.f32 %v14463_v19, %v14553_v33  ;;  %v4803_v40 = vsub.f32 %v14506_v16, %v4769_v23 }
 0xc7d   : > { %v10612_v10 = vpop.eup %10611  ;;  %4916 = vadd.xlane.f32.xlu1 %v14590_v7  ;;  %v4856_v11 = vmul.f32 1.442695, %v4799_v63  ;;  %v4883_v30 = vpop.xlane.xlu0 %4882  ;;  %v4860_v4 = vmul.f32 1.442695, %v4801_v35 }
 0xc7e   : > { %v4967_v9 = vmul.f32 %v10612_v10, %v14497_v8  ;;  %v4999_v29 = vpack.c.bf16 %v4969_v53, %v4968_v0  ;;  %v4800_v8 = vsub.f32 %v14478_v32, %v4763_v6  ;;  %v4798_v53 = vsub.f32 %v14486_v52, %v4759_v12 }
 0xc7f   : > { %10613 = vpow2.f32 %v4856_v11  ;;  %v4862_v0 = vmul.f32 1.442695, %v4802_v24  ;;  %v4805_v52 = vsub.f32 %v14502_v38, %v4773_v17  ;;  %v4864_v33 = vmul.f32 1.442695, %v4803_v40 }
 0xc80   : > { %v4998_v43 = vpack.c.bf16 %v4967_v9, %v4966_v20  ;;  %v4858_v10 = vmul.f32 1.442695, %v4800_v8  ;;  %v4866_v9 = vmul.f32 1.442695, %v4804_v62 }
 0xc81   : > { %v4885_v20 = vpop.xlane.xlu0 %4884  ;;  %v4868_v12 = vmul.f32 1.442695, %v4805_v52 }
 0xc82   : > { %9633 = vmatprep.mubr.bf16.mxu0 %v4998_v43  ;;  %10615 = vpow2.f32 %v4858_v10  ;;  %v4854_v43 = vmul.f32 1.442695, %v4798_v53 }
 0xc83   : > { %9634 = vmatmul.mubr.bf16.vlgmr.msra.gmra.mxu0 %v4999_v29  ;;  %10617 = vpow2.f32 %v4866_v9 }
 0xc84   : > { %10619 = vpow2.f32 %v4862_v0 }
 0xc85   : > { %v4881_v32 = vpop.xlane.xlu0 %4880  ;;  %10621 = vpow2.f32 %v4854_v43 }
 0xc86   : > { %10623 = vrcp.f32 %v4885_v20 }
 0xc87   : > { %5137 = vrot.lane.b32.xlu0 %v16913_v47, %s11180_s27  ;;  %10625 = vrcp.f32 %v4881_v32 }
 0xc88   : > { %10627 = vrcp.f32 %v4883_v30 }
 0xc8c   : > { %v14612_v1 = vpop.eup %10613 }
 0xc8e   : > { %5135 = vrot.lane.b32.xlu1 %v16914_v22, %s11180_s27  ;;  %s17028_s27 = scalar_lea.vmem %s16503_s8, %s11288_s25 }
 0xc8f   : > { %v14616_v6 = vpop.eup %10615 }
 0xc90   : > { %v14619_v41 = vpop.eup %10617 }
 0xc91   : > { %v14621_v23 = vpop.eup %10619 }
 0xc92   : > { %v14623_v16 = vpop.eup %10621 }
 0xc93   : > { %v10624_v29 = vpop.eup %10623 }
 0xc94   : > { %v10626_v36 = vpop.eup %10625  ;;  %v4973_v22 = vmul.f32 %v10624_v29, %v14512_v54 }
 0xc95   : > { %v10628_v47 = vpop.eup %10627  ;;  %v4971_v11 = vmul.f32 %v10626_v36, %v14517_v25  ;;  %v16915_v25 = vld [vmem:[#allocation70_spill] sm:$0xff] }
 0xc96   : > { %v4972_v8 = vmul.f32 %v10628_v47, %v14509_v13 }
 0xc98   : > { %v5001_v10 = vpack.c.bf16 %v4973_v22, %v4972_v8 }
 0xca4   : > { %v4879_v19 = vpop.xlane.xlu1 %4878 }
 0xca5   : > { %10629 = vrcp.f32 %v4879_v19 }
 0xca6   : > { %4920 = vadd.xlane.f32.xlu0 %v14612_v1  ;;  %10631 = vpow2.f32 %v4860_v4 }
 0xca7   : > { %10633 = vpow2.f32 %v4864_v33  ;;  %v16917_v33 = vld [vmem:[#allocation12_spill] sm:$0xff] }
 0xca8   : > { %10635 = vpow2.f32 %v4868_v12  ;;  %v16918_v12 = vld [vmem:[#allocation39_spill] sm:$0xff] }
 0xca9   : > { %v16919_v29 = vpack.i.bf16 %v16917_v33, %v16918_v12 }
 0xcaa   : > { %4922 = vadd.xlane.f32.xlu0 %v14616_v6 }
 0xcae   : > { %4926 = vadd.xlane.f32.xlu0 %v14621_v23 }
 0xcb1   : > { %v4891_v38 = vpop.xlane.xlu0 %4890 }
 0xcb2   : > { %v10630_v17 = vpop.eup %10629  ;;  %4930 = vadd.xlane.f32.xlu0 %v14619_v41  ;;  %4918 = vadd.xlane.f32.xlu1 %v14623_v16 }
 0xcb3   : > { %v4970_v63 = vmul.f32 %v10630_v17, %v14522_v49  ;;  %v14632_v30 = vpop.eup %10631  ;;  %v16916_v49 = vld [vmem:[#allocation76_spill] sm:$0xff] }
 0xcb4   : > { %v14635_v53 = vpop.eup %10633  ;;  %v9825_v9 = vpack.i.bf16 %v16916_v49, %v16915_v25 }
 0xcb5   : > { %v5000_v62 = vpack.c.bf16 %v4971_v11, %v4970_v63  ;;  %v4887_v24 = vpop.xlane.xlu0 %4886  ;;  %v14638_v54 = vpop.eup %10635 }
 0xcb6   : > { %4924 = vadd.xlane.f32.xlu1 %v14632_v30 }
 0xcb7   : > { %9637 = vmatprep.mubr.bf16.mxu0 %v5000_v62 }
 0xcb8   : > { %9638 = vmatmul.mubr.bf16.gmra.mxu0 %v5001_v10 }
 0xcb9   : > { %v4893_v20 = vpop.xlane.xlu0 %4892 }
 0xcba   : > { %4928 = vadd.xlane.f32.xlu1 %v14635_v53  ;;  %10637 = vrcp.f32 %v4893_v20 }
 0xcbb   : > { %10639 = vrcp.f32 %v4887_v24 }
 0xcbc   : > { %10641 = vrcp.f32 %v4891_v38  ;;  %v9835_v38 = vpack.i.bf16 %v14212_v44, %v14201_v42 }
 0xcbd   : > { %v4889_v13 = vpop.xlane.xlu0 %4888 }
 0xcbe   : > { %4932 = vadd.xlane.f32.xlu1 %v14638_v54  ;;  %10643 = vrcp.f32 %v4889_v13 }
 0xcc7   : > { %v10638_v0 = vpop.eup %10637 }
 0xcc8   : > { %9826 = vrot.lane.b32.xlu0 %v9825_v9, %s11179_s19  ;;  %v10640_v43 = vpop.eup %10639  ;;  %v4977_v4 = vmul.f32 %v10638_v0, %v14534_v34 }
 0xcc9   : > { %v10642_v35 = vpop.eup %10641  ;;  %v4974_v40 = vmul.f32 %v10640_v43, %v14531_v39  ;;  %v16920_v39 = vpack.i.bf16 %v14205_v58, %v14198_v15 }
 0xcca   : > { %v4976_v52 = vmul.f32 %v10642_v35, %v14528_v5 }
 0xccb   : > { %v10644_v32 = vpop.eup %10643 }
 0xccc   : > { %v4975_v19 = vmul.f32 %v10644_v32, %v14537_v45  ;;  %v5003_v47 = vpack.c.bf16 %v4977_v4, %v4976_v52 }
 0xcce   : > { %v5002_v36 = vpack.c.bf16 %v4975_v19, %v4974_v40 }
 0xccf   : > { %9831 = vrot.lane.b32.xlu1 %v16919_v29, %s11179_s19 }
 0xcd0   : > { %9641 = vmatprep.mubr.bf16.mxu0 %v5002_v36 }
 0xcd1   : > { %9642 = vmatmul.mubr.bf16.gmra.mxu0 %v5003_v47 }
 0xcd3   : > { %9836 = vrot.lane.b32.xlu1 %v9835_v38, %s11177_s17 }
 0xcd7   : > { %9841 = vrot.lane.b32.xlu1 %v16920_v39, %s11177_s17 }
 0xcea   : > { %v4899_v5 = vpop.xlane.xlu0 %4898 }
 0xcee   : > { %v4895_v34 = vpop.xlane.xlu1 %4894  ;;  %v4901_v45 = vpop.xlane.xlu0 %4900 }
 0xcef   : > { %10645 = vrcp.f32 %v4901_v45  ;;  %v10078_v45 = vld [vmem:[%s11318_s30 + $0x10] sm:$0xff]  }
 0xcf0   : > { %10647 = vrcp.f32 %v4895_v34  ;;  %v10077_v34 = vld [vmem:[%s11318_s30 + $0x18] sm:$0xff]  }
 0xcf1   : > { %10649 = vrcp.f32 %v4899_v5  ;;  %9681 = vmatprep.subr.bf16.mxu0 %v10077_v34 }
 0xcf2   : > { %v4907_v17 = vpop.xlane.xlu1 %4906  ;;  %v4897_v22 = vpop.xlane.xlu0 %4896  ;;  %9682 = vmatpush3.bf16.msra.mxu0 %v10077_v34 }
 0xcf3   : > { %10651 = vrcp.f32 %v4897_v22  ;;  %9683 = vmatprep.subr.bf16.mxu0 %v10078_v45 }
 0xcf6   : > { %v4903_v63 = vpop.xlane.xlu1 %4902  ;;  %v4905_v42 = vpop.xlane.xlu0 %4904  ;;  %9684 = vmatpush3.bf16.msra.mxu0 %v10078_v45 }
 0xcf7   : > { %10653 = vrcp.f32 %v4903_v63  ;;  %v10080_v63 = vld [vmem:[%s11318_s30] sm:$0xff]  }
 0xcf8   : > { %10655 = vrcp.f32 %v4905_v42 }
 0xcf9   : > { %10657 = vrcp.f32 %v4907_v17 }
 0xcfa   : > { %v4909_v44 = vpop.xlane.xlu1 %4908  ;;  %v4913_v11 = vpop.xlane.xlu0 %4912 }
 0xcfb   : > { %10659 = vrcp.f32 %v4909_v44 }
 0xcfc   : > { %v10646_v8 = vpop.eup %10645  ;;  %10661 = vrcp.f32 %v4913_v11 }
 0xcfd   : > { %v10648_v62 = vpop.eup %10647  ;;  %v4981_v20 = vmul.f32 %v10646_v8, %v14559_v55 }
 0xcfe   : > { %v4915_v15 = vpop.xlane.xlu1 %4914  ;;  %v5138_v58 = vpop.permute.xlu0 %5137  ;;  %v4978_v25 = vmul.f32 %v10648_v62, %v14562_v61 }
 0xcff   : > { %9661 = vmatprep.subr.bf16.mxu1 %v5138_v58  ;;  %v10650_v24 = vpop.eup %10649 }
 0xd00   : > { %9662 = vmatpush3.bf16.msra.mxu1 %v5138_v58  ;;  %v10652_v10 = vpop.eup %10651  ;;  %v4980_v9 = vmul.f32 %v10650_v24, %v14556_v26 }
 0xd01   : > { %v4979_v49 = vmul.f32 %v10652_v10, %v14567_v31 }
 0xd02   : > { %v4911_v13 = vpop.xlane.xlu1 %4910  ;;  %v5005_v32 = vpack.c.bf16 %v4981_v20, %v4980_v9 }
 0xd03   : > { %10663 = vrcp.f32 %v4911_v13  ;;  %v5004_v43 = vpack.c.bf16 %v4979_v49, %v4978_v25 }
 0xd04   : > { %v10654_v0 = vpop.eup %10653  ;;  %10665 = vrcp.f32 %v4915_v15 }
 0xd05   : > { %v10656_v35 = vpop.eup %10655  ;;  %v4982_v4 = vmul.f32 %v10654_v0, %v14575_v60  ;;  %9645 = vmatprep.mubr.bf16.mxu0 %v5004_v43 }
 0xd06   : > { %v4917_v40 = vpop.xlane.xlu1 %4916  ;;  %v4983_v19 = vmul.f32 %v10656_v35, %v14573_v51  ;;  %v10658_v55 = vpop.eup %10657  ;;  %9646 = vmatmul.mubr.bf16.gmra.mxu0 %v5005_v32  ;;  %v16921_v35 = vld [vmem:[#allocation75_spill] sm:$0xff]  ;;  %v16922_v32 = vld [vmem:[#allocation78_spill] sm:$0xff] }
 0xd07   : > { %10667 = vrcp.f32 %v4917_v40  ;;  %v4984_v33 = vmul.f32 %v10658_v55, %v14569_v28  ;;  %v16923_v40 = vld [vmem:[#allocation23_spill] sm:$0xff] }
 0xd08   : > { %v10660_v61 = vpop.eup %10659  ;;  %v5006_v52 = vpack.c.bf16 %v4983_v19, %v4982_v4  ;;  %v9855_v4 = vpack.i.bf16 %v16922_v32, %v16921_v35  ;;  %v16924_v19 = vld [vmem:[#allocation24_spill] sm:$0xff] }
 0xd09   : > { %v4985_v31 = vmul.f32 %v10660_v61, %v14579_v56  ;;  %v10662_v12 = vpop.eup %10661  ;;  %v16925_v55 = vpack.i.bf16 %v16923_v40, %v16924_v19  ;;  %v16942_v40 = vld [vmem:[#allocation47_spill] sm:$0xff] }
 0xd0a   : > { %9665 = vmatprep.mubr.bf16.mxu1 %v5006_v52  ;;  %v5136_v26 = vpop.permute.xlu1 %5135  ;;  %v4987_v36 = vmul.f32 %v10662_v12, %v14581_v14 }
 0xd0b   : > { %9663 = vmatprep.subr.bf16.mxu1 %v5136_v26  ;;  %v5007_v60 = vpack.c.bf16 %v4985_v31, %v4984_v33  ;;  %v16926_v33 = vpack.i.bf16 %v14219_v18, %v14214_v59 }
 0xd0c   : > { %9664 = vmatpush3.bf16.msra.mxu1 %v5136_v26  ;;  %v9865_v26 = vpack.i.bf16 %v14226_v57, %v14216_v46 }
 0xd0d   : > { %9721 = vmatprep.subr.bf16.mxu1 %v10077_v34 }
 0xd0f   : > { %9666 = vmatmul.mubr.bf16.vlgmr.msra.gmra.mxu1 %v5007_v60 }
 0xd10   : > { %v10664_v29 = vpop.eup %10663  ;;  %9725 = vmatpush3.bf16.msra.mxu1 %v10077_v34  ;;  %v16932_v34 = vpack.i.bf16 %v14232_v21, %v14228_v27  ;;  %v16938_v21 = vld [vmem:[#allocation27_spill] sm:$0xff] }
 0xd11   : > { %v4986_v51 = vmul.f32 %v10664_v29, %v14588_v3  ;;  %v10666_v47 = vpop.eup %10665  ;;  %9722 = vmatprep.subr.bf16.mxu1 %v10078_v45 }
 0xd12   : > { %v4988_v56 = vmul.f32 %v10666_v47, %v14585_v50 }
 0xd13   : > { %v5008_v38 = vpack.c.bf16 %v4987_v36, %v4986_v51 }
 0xd14   : > { %v10668_v39 = vpop.eup %10667  ;;  %9726 = vmatpush3.bf16.msra.mxu1 %v10078_v45 }
 0xd15   : > { %9669 = vmatprep.mubr.bf16.mxu1 %v5008_v38  ;;  %v4989_v28 = vmul.f32 %v10668_v39, %v14590_v7  ;;  %v10079_v7 = vld [vmem:[%s11318_s30 + $0x8] sm:$0xff]   ;;  %v16928_v39 = vld [vmem:[#allocation71_spill] sm:$0xff] }
 0xd16   : > { %9685 = vmatprep.subr.bf16.mxu0 %v10079_v7  ;;  %9723 = vmatprep.subr.bf16.mxu1 %v10079_v7 }
 0xd17   : > { %v5009_v5 = vpack.c.bf16 %v4989_v28, %v4988_v56  ;;  %9686 = vmatpush3.bf16.msra.mxu0 %v10079_v7  ;;  %v16929_v28 = vld [vmem:[#allocation48_spill] sm:$0xff] }
 0xd18   : > { %9727 = vmatpush3.bf16.msra.mxu1 %v10079_v7  ;;  %9687 = vmatprep.subr.bf16.mxu0 %v10080_v63 }
 0xd19   : > { %9670 = vmatmul.mubr.bf16.gmra.mxu1 %v5009_v5  ;;  %9724 = vmatprep.subr.bf16.mxu1 %v10080_v63 }
 0xd1b   : > { %9688 = vmatpush3.bf16.msra.mxu0 %v10080_v63 }
 0xd1c   : > { %9728 = vmatpush3.bf16.msra.mxu1 %v10080_v63  ;;  %v16934_v63 = vld [vmem:[#allocation77_spill] sm:$0xff] }
 0xd2f   : > { %v4921_v14 = vpop.xlane.xlu0 %4920 }
 0xd30   : > { %10669 = vrcp.f32 %v4921_v14 }
 0xd33   : > { %v4923_v3 = vpop.xlane.xlu0 %4922 }
 0xd37   : > { %v4927_v17 = vpop.xlane.xlu0 %4926 }
 0xd3b   : > { %v4919_v50 = vpop.xlane.xlu1 %4918  ;;  %v4931_v42 = vpop.xlane.xlu0 %4930 }
 0xd3c   : > { %10671 = vrcp.f32 %v4919_v50 }
 0xd3d   : > { %10673 = vrcp.f32 %v4923_v3  ;;  %v10670_v15 = vpop.eup %10669 }
 0xd3e   : > { %v4991_v49 = vmul.f32 %v10670_v15, %v14612_v1 }
 0xd3f   : > { %v4925_v22 = vpop.xlane.xlu1 %4924 }
 0xd40   : > { %10675 = vrcp.f32 %v4925_v22  ;;  %v16933_v22 = vld [vmem:[#allocation9_spill] sm:$0xff] }
 0xd41   : > { %10677 = vrcp.f32 %v4927_v17 }
 0xd43   : > { %v9635_v44 = vpop.f32.mrf.mxu0  ;;  %v4929_v11 = vpop.xlane.xlu1 %4928 }
 0xd44   : > { %10679 = vrcp.f32 %v4929_v11  ;;  %v16939_v11 = vld [vmem:[#allocation22_spill] sm:$0xff] }
 0xd45   : > { %v5072_v8 = vpop.f32.mrf.mxu0  ;;  %10681 = vrcp.f32 %v4931_v42  ;;  %v16936_v42 = vld [vmem:[#allocation74_spill] sm:$0xff] }
 0xd47   : > { %v9636_v58 = vpop.f32.mrf.mxu0  ;;  %v4933_v62 = vpop.xlane.xlu1 %4932 }
 0xd48   : > { %v9850_v24 = vpack.i.bf16 %v9636_v58, %v9635_v44  ;;  %10683 = vrcp.f32 %v4933_v62  ;;  %v9925_v44 = vpack.i.bf16 %v16938_v21, %v14240_v37 }
 0xd49   : > { %v10672_v10 = vpop.eup %10671  ;;  %v5075_v20 = vpop.f32.mrf.mxu0 }
 0xd4a   : > { %v9845_v13 = vpack.i.bf16 %v5075_v20, %v5072_v8  ;;  %9851 = vrot.lane.b32.xlu1 %v9850_v24, %s11175_s16  ;;  %v4990_v25 = vmul.f32 %v10672_v10, %v14623_v16  ;;  %v10674_v9 = vpop.eup %10673  ;;  %v16940_v8 = vld [vmem:[#allocation10_spill] sm:$0xff]  ;;  %v9827_v24 = vpop.permute.xlu0 %9826 }
 0xd4b   : > { %v4992_v61 = vmul.f32 %v10674_v9, %v14616_v6  ;;  %v16941_v15 = vpack.i.bf16 %v16939_v11, %v16940_v8  ;;  %v9832_v58 = vpop.permute.xlu1 %9831  ;;  %v9829_v20 = vunpack.i.h.bf16 %v9827_v24  ;;  %v16956_v8 = vld [vmem:[#allocation85_spill] sm:$0xff] }
 0xd4c   : > { %9846 = vrot.lane.b32.xlu0 %v9845_v13, %s11175_s16  ;;  %v5010_v0 = vpack.c.bf16 %v4991_v49, %v4990_v25  ;;  %v9828_v13 = vunpack.i.l.bf16 %v9827_v24  ;;  %v9834_v25 = vunpack.i.h.bf16 %v9832_v58  ;;  %v9833_v49 = vunpack.i.l.bf16 %v9832_v58  ;;  %v16959_v24 = vld [vmem:[#allocation84_spill] sm:$0xff] }
 0xd4d   : > { %v10676_v43 = vpop.eup %10675  ;;  %v5641_v19 = vsel %vm1727_vm2, %v16942_v40, %v9829_v20 }
 0xd4e   : > { %9861 = vrot.lane.b32.xlu1 %v16925_v55, %s11179_s19  ;;  %9673 = vmatprep.mubr.bf16.mxu1 %v5010_v0  ;;  %v4993_v16 = vmul.f32 %v10676_v43, %v14632_v30  ;;  %v10678_v52 = vpop.eup %10677  ;;  %v16943_v55 = vld [vmem:[#allocation32_spill] sm:$0xff] }
 0xd4f   : > { %v4994_v60 = vmul.f32 %v10678_v52, %v14621_v23  ;;  %v9837_v62 = vpop.permute.xlu1 %9836 }
 0xd50   : > { %9856 = vrot.lane.b32.xlu0 %v9855_v4, %s11179_s19  ;;  %v5011_v1 = vpack.c.bf16 %v4993_v16, %v4992_v61  ;;  %v9839_v43 = vunpack.i.h.bf16 %v9837_v62  ;;  %v9838_v35 = vunpack.i.l.bf16 %v9837_v62  ;;  %v5640_v61 = vsel %vm1727_vm2, %v16943_v55, %v9828_v13  ;;  %v16944_v16 = vld [vmem:[#allocation44_spill] sm:$0xff]  ;;  %v16958_v62 = vld [vmem:[#allocation86_spill] sm:$0xff]  ;;  %v16967_v55 = vld [vmem:[#allocation91_spill] sm:$0xff] }
 0xd51   : > { %v10680_v31 = vpop.eup %10679  ;;  %v5643_v52 = vsel %vm1727_vm2, %v16944_v16, %v9834_v25  ;;  %v16961_v13 = vld [vmem:[#allocation26_spill] sm:$0xff]  ;;  %v16962_v25 = vld [vmem:[#allocation28_spill] sm:$0xff] }
 0xd52   : > { %9871 = vrot.lane.b32.xlu1 %v16926_v33, %s11177_s17  ;;  %9674 = vmatmul.mubr.bf16.gmra.mxu1 %v5011_v1  ;;  %v4995_v6 = vmul.f32 %v10680_v31, %v14635_v53  ;;  %v10682_v12 = vpop.eup %10681  ;;  %v16927_v53 = vld [vmem:[#allocation16_spill] sm:$0xff]  ;;  %v16945_v1 = vld [vmem:[#allocation29_spill] sm:$0xff]  ;;  %v16968_v16 = vld [vmem:[#allocation90_spill] sm:$0xff] }
 0xd53   : > { %v4996_v51 = vmul.f32 %v10682_v12, %v14619_v41  ;;  %v9885_v56 = vpack.i.bf16 %v16928_v39, %v16927_v53  ;;  %v16930_v41 = vld [vmem:[#allocation79_spill] sm:$0xff]  ;;  %v9842_v10 = vpop.permute.xlu1 %9841  ;;  %v5642_v31 = vsel %vm1727_vm2, %v16945_v1, %v9833_v49  ;;  %v9985_v49 = vpack.i.bf16 %v16962_v25, %v16961_v13 }
 0xd54   : > { %9866 = vrot.lane.b32.xlu0 %v9865_v26, %s11177_s17  ;;  %v5012_v30 = vpack.c.bf16 %v4995_v6, %v4994_v60  ;;  %v16931_v5 = vpack.i.bf16 %v16929_v28, %v16930_v41  ;;  %v9844_v9 = vunpack.i.h.bf16 %v9842_v10  ;;  %v9843_v0 = vunpack.i.l.bf16 %v9842_v10 }
 0xd55   : > { %v10684_v29 = vpop.eup %10683  ;;  %v16960_v10 = vpack.i.bf16 %v16958_v62, %v16959_v24 }
 0xd56   : > { %9677 = vmatprep.mubr.bf16.mxu1 %v5012_v30  ;;  %v4997_v46 = vmul.f32 %v10684_v29, %v14638_v54  ;;  %v9895_v54 = vpack.i.bf16 %v14236_v2, %v14230_v48  ;;  %v9915_v48 = vpack.i.bf16 %v16934_v63, %v16933_v22  ;;  %v16935_v2 = vld [vmem:[#allocation14_spill] sm:$0xff]  ;;  %v5675_v33 = vsel %vm5672_vm3, %v5642_v31, %v9843_v0  ;;  %v16953_v63 = vld [vmem:[#allocation15_spill] sm:$0xff]  ;;  %v16964_v0 = vld [vmem:[#allocation20_spill] sm:$0xff] }
 0xd57   : > { %v16937_v27 = vpack.i.bf16 %v16935_v2, %v16936_v42  ;;  %v5676_v60 = vsel %vm5672_vm3, %v5643_v52, %v9844_v9  ;;  %v5673_v30 = vsel %vm5672_vm3, %v5640_v61, %v9838_v35  ;;  %v5674_v29 = vsel %vm5672_vm3, %v5641_v19, %v9839_v43  ;;  %v16963_v9 = vld [vmem:[#allocation73_spill] sm:$0xff]  ;;  %v16969_v52 = vld [vmem:[#allocation88_spill] sm:$0xff] }
 0xd58   : > { %v5013_v57 = vpack.c.bf16 %v4997_v46, %v4996_v51  ;;  %v16965_v43 = vpack.i.bf16 %v16963_v9, %v16964_v0  ;;  %v16966_v19 = vld [vmem:[#allocation89_spill] sm:$0xff]  ;;  %v16970_v1 = vpack.i.bf16 %v16968_v16, %v16969_v52 }
 0xd59   : > { %v10005_v61 = vpack.i.bf16 %v16967_v55, %v16966_v19  ;;  %v16982_v55 = vld [vmem:[#allocation51_spill] sm:$0xff]  ;;  %v16983_v16 = vld [vmem:[#allocation37_spill] sm:$0xff] }
 0xd5a   : > { %9678 = vmatmul.mubr.bf16.gmra.mxu1 %v5013_v57 }
 0xd78   : > { %v9639_v36 = vpop.f32.mrf.mxu0 }
 0xd7a   : > { %v5088_v59 = vpop.f32.mrf.mxu0 }
 0xd7c   : > { %v9640_v18 = vpop.f32.mrf.mxu0 }
 0xd7d   : > { %v9880_v47 = vpack.i.bf16 %v9640_v18, %v9639_v36 }
 0xd7e   : > { %v5091_v38 = vpop.f32.mrf.mxu0 }
 0xd7f   : > { %v9875_v23 = vpack.i.bf16 %v5091_v38, %v5088_v59  ;;  %9881 = vrot.lane.b32.xlu1 %v9880_v47, %s11175_s16 }
 0xd81   : > { %9876 = vrot.lane.b32.xlu0 %v9875_v23, %s11175_s16 }
 0xd83   : > { %9891 = vrot.lane.b32.xlu1 %v16931_v5, %s11179_s19  ;;  %v16946_v5 = vld [vmem:[#allocation81_spill] sm:$0xff] }
 0xd85   : > { %9886 = vrot.lane.b32.xlu0 %v9885_v56, %s11179_s19 }
 0xd87   : > { %9901 = vrot.lane.b32.xlu1 %v16932_v34, %s11177_s17 }
 0xd89   : > { %9896 = vrot.lane.b32.xlu0 %v9895_v54, %s11177_s17  ;;  %v16947_v54 = vld [vmem:[#allocation83_spill] sm:$0xff] }
 0xd8a   : > { %v9945_v34 = vpack.i.bf16 %v16947_v54, %v16946_v5  ;;  %v16978_v54 = vld [vmem:[#allocation34_spill] sm:$0xff] }
 0xd91   : > { %v9643_v45 = vpop.f32.mrf.mxu0 }
 0xd93   : > { %v5104_v14 = vpop.f32.mrf.mxu0 }
 0xd95   : > { %v9644_v3 = vpop.f32.mrf.mxu0 }
 0xd96   : > { %v9910_v50 = vpack.i.bf16 %v9644_v3, %v9643_v45  ;;  %v16948_v45 = vld [vmem:[#allocation82_spill] sm:$0xff] }
 0xd97   : > { %v5107_v17 = vpop.f32.mrf.mxu0 }
 0xd98   : > { %v9905_v7 = vpack.i.bf16 %v5107_v17, %v5104_v14  ;;  %9911 = vrot.lane.b32.xlu1 %v9910_v50, %s11175_s16  ;;  %v16949_v14 = vld [vmem:[#allocation80_spill] sm:$0xff]  ;;  %v16951_v17 = vld [vmem:[#allocation11_spill] sm:$0xff] }
 0xd99   : > { %v16950_v3 = vpack.i.bf16 %v16948_v45, %v16949_v14  ;;  %v16979_v45 = vld [vmem:[#allocation41_spill] sm:$0xff] }
 0xd9a   : > { %9906 = vrot.lane.b32.xlu0 %v9905_v7, %s11175_s16  ;;  %v16952_v7 = vld [vmem:[#allocation17_spill] sm:$0xff] }
 0xd9b   : > { %v9955_v22 = vpack.i.bf16 %v16952_v7, %v16951_v17 }
 0xd9c   : > { %9921 = vrot.lane.b32.xlu1 %v16937_v27, %s11179_s19 }
 0xd9e   : > { %9916 = vrot.lane.b32.xlu0 %v9915_v48, %s11179_s19  ;;  %v16954_v48 = vld [vmem:[#allocation72_spill] sm:$0xff] }
 0xd9f   : > { %v16955_v2 = vpack.i.bf16 %v16953_v63, %v16954_v48 }
 0xda0   : > { %9931 = vrot.lane.b32.xlu1 %v16941_v15, %s11177_s17  ;;  %v16957_v15 = vld [vmem:[#allocation87_spill] sm:$0xff] }
 0xda1   : > { %v9975_v58 = vpack.i.bf16 %v16957_v15, %v16956_v8 }
 0xda2   : > { %9926 = vrot.lane.b32.xlu0 %v9925_v44, %s11177_s17 }
 0xdbc   : > { %v9852_v37 = vpop.permute.xlu1 %9851 }
 0xdbd   : > { %v9854_v32 = vunpack.i.h.bf16 %v9852_v37  ;;  %v9853_v4 = vunpack.i.l.bf16 %v9852_v37 }
 0xdbe   : > { %v9847_v26 = vpop.permute.xlu0 %9846 }
 0xdbf   : > { %v9849_v6 = vunpack.i.h.bf16 %v9847_v26  ;;  %v9848_v12 = vunpack.i.l.bf16 %v9847_v26  ;;  %v5708_v51 = vsel %vm5705_vm4, %v5675_v33, %v9853_v4  ;;  %v5709_v46 = vsel %vm5705_vm4, %v5676_v60, %v9854_v32  ;;  %v16971_v26 = vld [vmem:[#allocation13_spill] sm:$0xff]  ;;  %v16972_v33 = vld [vmem:[#allocation18_spill] sm:$0xff] }
 0xdc0   : > { %v5739_v18 = vpack.c.bf16 %v5709_v46, %v5708_v51  ;;  %v9862_v4 = vpop.permute.xlu1 %9861  ;;  %v10015_v60 = vpack.i.bf16 %v16972_v33, %v16971_v26 }
 0xdc1   : > { %v5706_v57 = vsel %vm5705_vm4, %v5673_v30, %v9848_v12  ;;  %v5707_v36 = vsel %vm5705_vm4, %v5674_v29, %v9849_v6  ;;  %v16973_v12 = vld [vmem:[#allocation96_spill] sm:$0xff]  ;;  %v16974_v30 = vld [vmem:[#allocation25_spill] sm:$0xff]  ;;  %v9864_v51 = vunpack.i.h.bf16 %v9862_v4  ;;  %v9863_v46 = vunpack.i.l.bf16 %v9862_v4 }
 0xdc2   : > { %v5738_v59 = vpack.c.bf16 %v5707_v36, %v5706_v57  ;;  %v9857_v40 = vpop.permute.xlu0 %9856  ;;  %v16975_v29 = vpack.i.bf16 %v16973_v12, %v16974_v30 }
 0xdc3   : > { %v9859_v57 = vunpack.i.h.bf16 %v9857_v40  ;;  %v9858_v36 = vunpack.i.l.bf16 %v9857_v40  ;;  %v16981_v40 = vld [vmem:[#allocation43_spill] sm:$0xff] }
 0xdc4   : > { %9689 = vmatprep.mubr.msk.bf16.mxu0 %vm860_vm1, %v5738_v59  ;;  %v9872_v31 = vpop.permute.xlu1 %9871 }
 0xdc5   : > { %9690 = vmatmul.mubr.msk.bf16.vlgmr.msra.gmra.mxu0 %vm860_vm1, %v5739_v18  ;;  %v9874_v59 = vunpack.i.h.bf16 %v9872_v31  ;;  %v9873_v18 = vunpack.i.l.bf16 %v9872_v31  ;;  %v5644_v14 = vsel %vm1727_vm2, %v16979_v45, %v9858_v36 }
 0xdc6   : > { %v9647_v47 = vpop.f32.mrf.mxu0  ;;  %v9867_v6 = vpop.permute.xlu0 %9866 }
 0xdc8   : > { %v5120_v38 = vpop.f32.mrf.mxu0 }
 0xdca   : > { %v9648_v23 = vpop.f32.mrf.mxu0 }
 0xdcb   : > { %v9940_v53 = vpack.i.bf16 %v9648_v23, %v9647_v47  ;;  %v9869_v47 = vunpack.i.h.bf16 %v9867_v6 }
 0xdcc   : > { %v5123_v39 = vpop.f32.mrf.mxu0 }
 0xdcd   : > { %v9935_v56 = vpack.i.bf16 %v5123_v39, %v5120_v38  ;;  %9941 = vrot.lane.b32.xlu1 %v9940_v53, %s11175_s16  ;;  %v9868_v38 = vunpack.i.l.bf16 %v9867_v6 }
 0xdcf   : > { %v9667_v28 = vpop.f32.mrf.mxu1  ;;  %9936 = vrot.lane.b32.xlu0 %v9935_v56, %s11175_s16  ;;  %v16976_v56 = vld [vmem:[#allocation42_spill] sm:$0xff]  ;;  %v5677_v63 = vsel %vm5672_vm3, %v5644_v14, %v9868_v38 }
 0xdd1   : > { %v5193_v41 = vpop.f32.mrf.mxu1  ;;  %9951 = vrot.lane.b32.xlu1 %v16950_v3, %s11179_s19 }
 0xdd3   : > { %v9668_v50 = vpop.f32.mrf.mxu1  ;;  %9946 = vrot.lane.b32.xlu0 %v9945_v34, %s11179_s19  ;;  %v5645_v34 = vsel %vm1727_vm2, %v16978_v54, %v9859_v57  ;;  %v16986_v54 = vld [vmem:[#allocation94_spill] sm:$0xff] }
 0xdd4   : > { %v9970_v27 = vpack.i.bf16 %v9668_v50, %v9667_v28  ;;  %v5647_v28 = vsel %vm1727_vm2, %v16976_v56, %v9864_v51  ;;  %v5678_v48 = vsel %vm5672_vm3, %v5645_v34, %v9869_v47  ;;  %v16987_v34 = vld [vmem:[#allocation92_spill] sm:$0xff] }
 0xdd5   : > { %9961 = vrot.lane.b32.xlu1 %v16955_v2, %s11177_s17  ;;  %v5196_v42 = vpop.f32.mrf.mxu1  ;;  %v5680_v17 = vsel %vm5672_vm3, %v5647_v28, %v9874_v59  ;;  %v16984_v28 = vld [vmem:[#allocation93_spill] sm:$0xff]  ;;  %v16988_v45 = vpack.i.bf16 %v16986_v54, %v16987_v34  ;;  %v16999_v54 = vld [vmem:[#allocation56_spill] sm:$0xff] }
 0xdd6   : > { %v9965_v44 = vpack.i.bf16 %v5196_v42, %v5193_v41  ;;  %v16977_v41 = vld [vmem:[#allocation46_spill] sm:$0xff] }
 0xdd7   : > { %9956 = vrot.lane.b32.xlu0 %v9955_v22, %s11177_s17  ;;  %v5646_v5 = vsel %vm1727_vm2, %v16977_v41, %v9863_v46  ;;  %v16985_v41 = vld [vmem:[#allocation95_spill] sm:$0xff] }
 0xdd8   : > { %v5679_v50 = vsel %vm5672_vm3, %v5646_v5, %v9873_v18  ;;  %v10035_v5 = vpack.i.bf16 %v16985_v41, %v16984_v28 }
 0xdd9   : > { %v9671_v21 = vpop.f32.mrf.mxu1  ;;  %9971 = vrot.lane.b32.xlu1 %v9970_v27, %s11175_s16 }
 0xddb   : > { %v5209_v11 = vpop.f32.mrf.mxu1  ;;  %9966 = vrot.lane.b32.xlu0 %v9965_v44, %s11175_s16 }
 0xddd   : > { %9981 = vrot.lane.b32.xlu1 %v16960_v10, %s11179_s19  ;;  %v9672_v20 = vpop.f32.mrf.mxu1 }
 0xdde   : > { %v10000_v37 = vpack.i.bf16 %v9672_v20, %v9671_v21 }
 0xddf   : > { %9976 = vrot.lane.b32.xlu0 %v9975_v58, %s11179_s19  ;;  %v5212_v35 = vpop.f32.mrf.mxu1 }
 0xde0   : > { %v9995_v32 = vpack.i.bf16 %v5212_v35, %v5209_v11 }
 0xde1   : > { %9991 = vrot.lane.b32.xlu1 %v16965_v43, %s11177_s17 }
 0xde3   : > { %9986 = vrot.lane.b32.xlu0 %v9985_v49, %s11177_s17 }
 0xde5   : > { %10001 = vrot.lane.b32.xlu1 %v10000_v37, %s11175_s16 }
 0xde7   : > { %9996 = vrot.lane.b32.xlu0 %v9995_v32, %s11175_s16  ;;  %v16980_v32 = vld [vmem:[#allocation45_spill] sm:$0xff] }
 0xde9   : > { %10011 = vrot.lane.b32.xlu1 %v16970_v1, %s11179_s19 }
 0xdeb   : > { %10006 = vrot.lane.b32.xlu0 %v10005_v61, %s11179_s19 }
 0xded   : > { %10021 = vrot.lane.b32.xlu1 %v16975_v29, %s11177_s17 }
 0xdef   : > { %10016 = vrot.lane.b32.xlu0 %v10015_v60, %s11177_s17 }
 0xdf1   : > { %v9882_v23 = vpop.permute.xlu1 %9881 }
 0xdf2   : > { %v9884_v53 = vunpack.i.h.bf16 %v9882_v23  ;;  %v9883_v39 = vunpack.i.l.bf16 %v9882_v23 }
 0xdf3   : > { %v9877_v3 = vpop.permute.xlu0 %9876 }
 0xdf4   : > { %v9879_v7 = vunpack.i.h.bf16 %v9877_v3  ;;  %v9878_v22 = vunpack.i.l.bf16 %v9877_v3  ;;  %v5713_v2 = vsel %vm5705_vm4, %v5680_v17, %v9884_v53  ;;  %v5712_v42 = vsel %vm5705_vm4, %v5679_v50, %v9883_v39  ;;  %v16989_v3 = vld [vmem:[#allocation30_spill] sm:$0xff]  ;;  %v16990_v50 = vld [vmem:[#allocation19_spill] sm:$0xff] }
 0xdf5   : > { %v5741_v11 = vpack.c.bf16 %v5713_v2, %v5712_v42  ;;  %v9892_v8 = vpop.permute.xlu1 %9891  ;;  %v16991_v17 = vpack.i.bf16 %v16989_v3, %v16990_v50  ;;  %v17001_v3 = vld [vmem:[#allocation57_spill] sm:$0xff] }
 0xdf6   : > { %v5710_v27 = vsel %vm5705_vm4, %v5677_v63, %v9878_v22  ;;  %v5711_v21 = vsel %vm5705_vm4, %v5678_v48, %v9879_v7  ;;  %v9894_v24 = vunpack.i.h.bf16 %v9892_v8  ;;  %v9893_v10 = vunpack.i.l.bf16 %v9892_v8  ;;  %v16992_v63 = vld [vmem:[#allocation31_spill] sm:$0xff]  ;;  %v16993_v48 = vld [vmem:[#allocation21_spill] sm:$0xff] }
 0xdf7   : > { %v5740_v44 = vpack.c.bf16 %v5711_v21, %v5710_v27  ;;  %v9887_v15 = vpop.permute.xlu0 %9886  ;;  %v16994_v2 = vpack.i.bf16 %v16992_v63, %v16993_v48 }
 0xdf8   : > { %v9889_v20 = vunpack.i.h.bf16 %v9887_v15  ;;  %v9888_v13 = vunpack.i.l.bf16 %v9887_v15  ;;  %v5651_v4 = vsel %vm1727_vm2, %v16980_v32, %v9894_v24  ;;  %v5650_v19 = vsel %vm1727_vm2, %v16981_v40, %v9893_v10  ;;  %v16997_v32 = vld [vmem:[#allocation53_spill] sm:$0xff] }
 0xdf9   : > { %9693 = vmatprep.mubr.msk.bf16.mxu0 %vm860_vm1, %v5740_v44  ;;  %v9902_v58 = vpop.permute.xlu1 %9901  ;;  %v16998_v40 = vld [vmem:[#allocation49_spill] sm:$0xff] }
 0xdfa   : > { %9694 = vmatmul.mubr.msk.bf16.gmra.mxu0 %vm860_vm1, %v5741_v11  ;;  %v9904_v25 = vunpack.i.h.bf16 %v9902_v58  ;;  %v9903_v49 = vunpack.i.l.bf16 %v9902_v58  ;;  %v5649_v61 = vsel %vm1727_vm2, %v16982_v55, %v9889_v20  ;;  %v5648_v52 = vsel %vm1727_vm2, %v16983_v16, %v9888_v13 }
 0xdfb   : > { %v9897_v62 = vpop.permute.xlu0 %9896 }
 0xdfc   : > { %v9899_v9 = vunpack.i.h.bf16 %v9897_v62  ;;  %v9898_v0 = vunpack.i.l.bf16 %v9897_v62  ;;  %v5683_v31 = vsel %vm5672_vm3, %v5650_v19, %v9903_v49  ;;  %v5684_v26 = vsel %vm5672_vm3, %v5651_v4, %v9904_v25 }
 0xdfe   : > { %v5681_v6 = vsel %vm5672_vm3, %v5648_v52, %v9898_v0  ;;  %v5682_v12 = vsel %vm5672_vm3, %v5649_v61, %v9899_v9  ;;  %v16995_v0 = vld [vmem:[#allocation52_spill] sm:$0xff] }
 0xe0a   : > { %v9912_v43 = vpop.permute.xlu1 %9911 }
 0xe0b   : > { %v9914_v35 = vunpack.i.h.bf16 %v9912_v43  ;;  %v9913_v37 = vunpack.i.l.bf16 %v9912_v43 }
 0xe0c   : > { %v9907_v1 = vpop.permute.xlu0 %9906 }
 0xe0d   : > { %v9909_v33 = vunpack.i.h.bf16 %v9907_v1  ;;  %v9908_v60 = vunpack.i.l.bf16 %v9907_v1  ;;  %v5717_v30 = vsel %vm5705_vm4, %v5684_v26, %v9914_v35  ;;  %v5716_v29 = vsel %vm5705_vm4, %v5683_v31, %v9913_v37  ;;  %v16996_v35 = vld [vmem:[#allocation50_spill] sm:$0xff] }
 0xe0e   : > { %v5743_v36 = vpack.c.bf16 %v5717_v30, %v5716_v29  ;;  %v9922_v27 = vpop.permute.xlu1 %9921 }
 0xe0f   : > { %v5714_v51 = vsel %vm5705_vm4, %v5681_v6, %v9908_v60  ;;  %v5715_v46 = vsel %vm5705_vm4, %v5682_v12, %v9909_v33  ;;  %v9924_v8 = vunpack.i.h.bf16 %v9922_v27  ;;  %v9923_v15 = vunpack.i.l.bf16 %v9922_v27 }
 0xe10   : > { %v5742_v57 = vpack.c.bf16 %v5715_v46, %v5714_v51  ;;  %v9917_v21 = vpop.permute.xlu0 %9916 }
 0xe11   : > { %v9919_v58 = vunpack.i.h.bf16 %v9917_v21  ;;  %v9918_v62 = vunpack.i.l.bf16 %v9917_v21  ;;  %v5655_v43 = vsel %vm1727_vm2, %v16995_v0, %v9924_v8  ;;  %v5654_v37 = vsel %vm1727_vm2, %v16996_v35, %v9923_v15 }
 0xe12   : > { %v9675_v59 = vpop.f32.mrf.mxu1  ;;  %9697 = vmatprep.mubr.msk.bf16.mxu0 %vm860_vm1, %v5742_v57  ;;  %v9932_v44 = vpop.permute.xlu1 %9931 }
 0xe13   : > { %9698 = vmatmul.mubr.msk.bf16.gmra.mxu0 %vm860_vm1, %v5743_v36  ;;  %v9934_v24 = vunpack.i.h.bf16 %v9932_v44  ;;  %v9933_v10 = vunpack.i.l.bf16 %v9932_v44  ;;  %v5653_v4 = vsel %vm1727_vm2, %v16997_v32, %v9919_v58  ;;  %v5652_v19 = vsel %vm1727_vm2, %v16998_v40, %v9918_v62 }
 0xe14   : > { %v5225_v18 = vpop.f32.mrf.mxu1  ;;  %v9927_v11 = vpop.permute.xlu0 %9926 }
 0xe15   : > { %v9929_v20 = vunpack.i.h.bf16 %v9927_v11  ;;  %v9928_v13 = vunpack.i.l.bf16 %v9927_v11  ;;  %v5687_v61 = vsel %vm5672_vm3, %v5654_v37, %v9933_v10  ;;  %v5688_v16 = vsel %vm5672_vm3, %v5655_v43, %v9934_v24 }
 0xe16   : > { %v9676_v47 = vpop.f32.mrf.mxu1 }
 0xe17   : > { %v10030_v38 = vpack.i.bf16 %v9676_v47, %v9675_v59  ;;  %v5685_v31 = vsel %vm5672_vm3, %v5652_v19, %v9928_v13  ;;  %v5686_v26 = vsel %vm5672_vm3, %v5653_v4, %v9929_v20 }
 0xe18   : > { %v5228_v23 = vpop.f32.mrf.mxu1 }
 0xe19   : > { %v10025_v53 = vpack.i.bf16 %v5228_v23, %v5225_v18  ;;  %10031 = vrot.lane.b32.xlu1 %v10030_v38, %s11175_s16 }
 0xe1a   : > { %v9679_v39 = vpop.f32.mrf.mxu1 }
 0xe1b   : > { %10026 = vrot.lane.b32.xlu0 %v10025_v53, %s11175_s16 }
 0xe1c   : > { %v5241_v56 = vpop.f32.mrf.mxu1 }
 0xe1d   : > { %10041 = vrot.lane.b32.xlu1 %v16988_v45, %s11179_s19  ;;  %v17000_v45 = vld [vmem:[#allocation54_spill] sm:$0xff] }
 0xe1e   : > { %v9680_v14 = vpop.f32.mrf.mxu1 }
 0xe1f   : > { %10036 = vrot.lane.b32.xlu0 %v10035_v5, %s11179_s19  ;;  %v10060_v22 = vpack.i.bf16 %v9680_v14, %v9679_v39 }
 0xe20   : > { %v5244_v7 = vpop.f32.mrf.mxu1 }
 0xe21   : > { %10051 = vrot.lane.b32.xlu1 %v16991_v17, %s11177_s17  ;;  %v10055_v42 = vpack.i.bf16 %v5244_v7, %v5241_v56  ;;  %v17002_v17 = vld [vmem:[#allocation55_spill] sm:$0xff] }
 0xe23   : > { %10046 = vrot.lane.b32.xlu0 %v16994_v2, %s11177_s17  ;;  %s17007_s17 = scalar_lea.vmem %s16502_s7, %s11288_s25 }
 0xe25   : > { %10061 = vrot.lane.b32.xlu1 %v10060_v22, %s11175_s16 }
 0xe27   : > { %10056 = vrot.lane.b32.xlu0 %v10055_v42, %s11175_s16 }
 0xe3f   : > { %v9942_v25 = vpop.permute.xlu1 %9941 }
 0xe40   : > { %v9944_v49 = vunpack.i.h.bf16 %v9942_v25  ;;  %v9943_v9 = vunpack.i.l.bf16 %v9942_v25 }
 0xe41   : > { %v9937_v55 = vpop.permute.xlu0 %9936 }
 0xe42   : > { %v9939_v52 = vunpack.i.h.bf16 %v9937_v55  ;;  %v9938_v1 = vunpack.i.l.bf16 %v9937_v55  ;;  %v5721_v33 = vsel %vm5705_vm4, %v5688_v16, %v9944_v49  ;;  %v5720_v60 = vsel %vm5705_vm4, %v5687_v61, %v9943_v9  ;;  %v17003_v55 = vld [vmem:[#allocation60_spill] sm:$0xff]  ;;  %v17004_v16 = vld [vmem:[#allocation58_spill] sm:$0xff] }
 0xe43   : > { %v9952_v6 = vpop.permute.xlu1 %9951  ;;  %v5745_v46 = vpack.c.bf16 %v5721_v33, %v5720_v60 }
 0xe44   : > { %v5718_v12 = vsel %vm5705_vm4, %v5685_v31, %v9938_v1  ;;  %v5719_v30 = vsel %vm5705_vm4, %v5686_v26, %v9939_v52  ;;  %v9954_v36 = vunpack.i.h.bf16 %v9952_v6  ;;  %v9953_v59 = vunpack.i.l.bf16 %v9952_v6  ;;  %v17005_v1 = vld [vmem:[#allocation61_spill] sm:$0xff]  ;;  %v17006_v26 = vld [vmem:[#allocation59_spill] sm:$0xff] }
 0xe45   : > { %v5744_v29 = vpack.c.bf16 %v5719_v30, %v5718_v12  ;;  %v9947_v51 = vpop.permute.xlu0 %9946 }
 0xe46   : > { %v9949_v18 = vunpack.i.h.bf16 %v9947_v51  ;;  %v9948_v47 = vunpack.i.l.bf16 %v9947_v51  ;;  %v5659_v34 = vsel %vm1727_vm2, %v16999_v54, %v9954_v36  ;;  %v5658_v14 = vsel %vm1727_vm2, %v17000_v45, %v9953_v59 }
 0xe47   : > { %v9962_v57 = vpop.permute.xlu1 %9961  ;;  %9701 = vmatprep.mubr.msk.bf16.mxu0 %vm860_vm1, %v5744_v29 }
 0xe48   : > { %9702 = vmatmul.mubr.msk.bf16.gmra.mxu0 %vm860_vm1, %v5745_v46  ;;  %v9964_v23 = vunpack.i.h.bf16 %v9962_v57  ;;  %v9963_v53 = vunpack.i.l.bf16 %v9962_v57  ;;  %v5657_v50 = vsel %vm1727_vm2, %v17001_v3, %v9949_v18  ;;  %v5656_v7 = vsel %vm1727_vm2, %v17002_v17, %v9948_v47 }
 0xe49   : > { %v9957_v38 = vpop.permute.xlu0 %9956 }
 0xe4a   : > { %v9959_v39 = vunpack.i.h.bf16 %v9957_v38  ;;  %v9958_v56 = vunpack.i.l.bf16 %v9957_v38  ;;  %v5691_v63 = vsel %vm5672_vm3, %v5658_v14, %v9963_v53  ;;  %v5692_v48 = vsel %vm5672_vm3, %v5659_v34, %v9964_v23  ;;  %v11053_v34 = vld [vmem:[#allocation2] sm:$0xff] }
 0xe4b   : > { %v9972_v28 = vpop.permute.xlu1 %9971 }
 0xe4c   : > { %v9974_v41 = vunpack.i.h.bf16 %v9972_v28  ;;  %v9973_v5 = vunpack.i.l.bf16 %v9972_v28  ;;  %v5689_v27 = vsel %vm5672_vm3, %v5656_v7, %v9958_v56  ;;  %v5690_v21 = vsel %vm5672_vm3, %v5657_v50, %v9959_v39  ;;  %v11054_v50 = vld [vmem:[#allocation2 + $0x10] sm:$0xff]  ;;  %v14911_v7 = vld [vmem:[%s17007_s17] ss:$0 sm:$0xff] }
 0xe4d   : > { %v9967_v22 = vpop.permute.xlu0 %9966 }
 0xe4e   : > { %v9969_v2 = vunpack.i.h.bf16 %v9967_v22  ;;  %v9968_v42 = vunpack.i.l.bf16 %v9967_v22  ;;  %v5725_v44 = vsel %vm5705_vm4, %v5692_v48, %v9974_v41  ;;  %v5724_v11 = vsel %vm5705_vm4, %v5691_v63, %v9973_v5 }
 0xe4f   : > { %v9982_v8 = vpop.permute.xlu1 %9981  ;;  %v5747_v10 = vpack.c.bf16 %v5725_v44, %v5724_v11  ;;  %v11055_v11 = vld [vmem:[#allocation2 + $0x18] sm:$0xff] }
 0xe50   : > { %v5722_v15 = vsel %vm5705_vm4, %v5689_v27, %v9968_v42  ;;  %v5723_v58 = vsel %vm5705_vm4, %v5690_v21, %v9969_v2  ;;  %v9984_v13 = vunpack.i.h.bf16 %v9982_v8  ;;  %v9983_v25 = vunpack.i.l.bf16 %v9982_v8  ;;  %v17008_v42 = vld [vmem:[#allocation64_spill] sm:$0xff] }
 0xe51   : > { %v5746_v62 = vpack.c.bf16 %v5723_v58, %v5722_v15  ;;  %v9977_v24 = vpop.permute.xlu0 %9976 }
 0xe52   : > { %v9979_v49 = vunpack.i.h.bf16 %v9977_v24  ;;  %v9978_v9 = vunpack.i.l.bf16 %v9977_v24  ;;  %v5663_v61 = vsel %vm1727_vm2, %v17003_v55, %v9984_v13  ;;  %v5662_v52 = vsel %vm1727_vm2, %v17004_v16, %v9983_v25  ;;  %v11056_v13 = vld [vmem:[#allocation2 + $0x8] sm:$0xff] }
 0xe53   : > { %v9992_v20 = vpop.permute.xlu1 %9991  ;;  %9705 = vmatprep.mubr.msk.bf16.mxu0 %vm860_vm1, %v5746_v62  ;;  %v17009_v62 = vld [vmem:[#allocation62_spill] sm:$0xff] }
 0xe54   : > { %9706 = vmatmul.mubr.msk.bf16.gmra.mxu0 %vm860_vm1, %v5747_v10  ;;  %v9994_v43 = vunpack.i.h.bf16 %v9992_v20  ;;  %v9993_v35 = vunpack.i.l.bf16 %v9992_v20  ;;  %v5661_v31 = vsel %vm1727_vm2, %v17005_v1, %v9979_v49  ;;  %v5660_v33 = vsel %vm1727_vm2, %v17006_v26, %v9978_v9  ;;  %v17010_v49 = vld [vmem:[#allocation65_spill] sm:$0xff] }
 0xe55   : > { %v9987_v0 = vpop.permute.xlu0 %9986 }
 0xe56   : > { %v9989_v37 = vunpack.i.h.bf16 %v9987_v0  ;;  %v9988_v32 = vunpack.i.l.bf16 %v9987_v0  ;;  %v5695_v6 = vsel %vm5672_vm3, %v5662_v52, %v9993_v35  ;;  %v5696_v12 = vsel %vm5672_vm3, %v5663_v61, %v9994_v43  ;;  %v17011_v0 = vld [vmem:[#allocation63_spill] sm:$0xff] }
 0xe57   : > { %v10002_v4 = vpop.permute.xlu1 %10001 }
 0xe58   : > { %v10004_v40 = vunpack.i.h.bf16 %v10002_v4  ;;  %v10003_v19 = vunpack.i.l.bf16 %v10002_v4  ;;  %v5693_v51 = vsel %vm5672_vm3, %v5660_v33, %v9988_v32  ;;  %v5694_v46 = vsel %vm5672_vm3, %v5661_v31, %v9989_v37 }
 0xe59   : > { %v9997_v60 = vpop.permute.xlu0 %9996 }
 0xe5a   : > { %v9999_v30 = vunpack.i.h.bf16 %v9997_v60  ;;  %v9998_v29 = vunpack.i.l.bf16 %v9997_v60  ;;  %v5729_v57 = vsel %vm5705_vm4, %v5696_v12, %v10004_v40  ;;  %v5728_v36 = vsel %vm5705_vm4, %v5695_v6, %v10003_v19 }
 0xe5b   : > { %v5749_v38 = vpack.c.bf16 %v5729_v57, %v5728_v36  ;;  %v10012_v23 = vpop.permute.xlu1 %10011 }
 0xe5c   : > { %v5726_v59 = vsel %vm5705_vm4, %v5693_v51, %v9998_v29  ;;  %v5727_v18 = vsel %vm5705_vm4, %v5694_v46, %v9999_v30  ;;  %v10014_v56 = vunpack.i.h.bf16 %v10012_v23  ;;  %v10013_v5 = vunpack.i.l.bf16 %v10012_v23 }
 0xe5d   : > { %v5748_v47 = vpack.c.bf16 %v5727_v18, %v5726_v59  ;;  %v10007_v53 = vpop.permute.xlu0 %10006 }
 0xe5e   : > { %v10009_v14 = vunpack.i.h.bf16 %v10007_v53  ;;  %v10008_v3 = vunpack.i.l.bf16 %v10007_v53  ;;  %v5667_v27 = vsel %vm1727_vm2, %v17008_v42, %v10014_v56  ;;  %v5666_v24 = vsel %vm1727_vm2, %v17009_v62, %v10013_v5 }
 0xe5f   : > { %9709 = vmatprep.mubr.msk.bf16.mxu1 %vm860_vm1, %v5748_v47  ;;  %v10022_v28 = vpop.permute.xlu1 %10021 }
 0xe60   : > { %9710 = vmatmul.mubr.msk.bf16.vlgmr.msra.gmra.mxu1 %vm860_vm1, %v5749_v38  ;;  %v10024_v63 = vunpack.i.h.bf16 %v10022_v28  ;;  %v10023_v48 = vunpack.i.l.bf16 %v10022_v28  ;;  %v5665_v9 = vsel %vm1727_vm2, %v17010_v49, %v10009_v14  ;;  %v5664_v43 = vsel %vm1727_vm2, %v17011_v0, %v10008_v3  ;;  %v17013_v14 = vld [vmem:[#allocation66_spill] sm:$0xff] }
 0xe61   : > { %v10017_v54 = vpop.permute.xlu0 %10016 }
 0xe62   : > { %v10019_v21 = vunpack.i.h.bf16 %v10017_v54  ;;  %v10018_v44 = vunpack.i.l.bf16 %v10017_v54  ;;  %v5699_v4 = vsel %vm5672_vm3, %v5666_v24, %v10023_v48  ;;  %v5700_v40 = vsel %vm5672_vm3, %v5667_v27, %v10024_v63 }
 0xe64   : > { %v5697_v61 = vsel %vm5672_vm3, %v5664_v43, %v10018_v44  ;;  %v5698_v16 = vsel %vm5672_vm3, %v5665_v9, %v10019_v21  ;;  %v11057_v9 = vld [vmem:[#allocation2 + $0x30] sm:$0xff]  ;;  %v11058_v43 = vld [vmem:[#allocation2 + $0x20] sm:$0xff] }
 0xe85   : > { %v9691_v39 = vpop.f32.mrf.mxu0 }
 0xe86   : > { %v5997_v17 = vadd.f32 %v11054_v50, %v9691_v39  ;;  %v17014_v50 = vld [vmem:[#allocation69_spill] sm:$0xff] }
 0xe87   : > { %v5868_v41 = vpop.f32.mrf.mxu0 }
 0xe88   : > { %v5995_v45 = vadd.f32 %v11053_v34, %v5868_v41  ;;  %v14925_v35 = vadd.f32 %v14911_v7, %v5997_v17  ;;  %v17012_v34 = vld [vmem:[#allocation68_spill] sm:$0xff] }
 0xe89   : > { %v9692_v22 = vpop.f32.mrf.mxu0 }
 0xe8a   : > { %v14914_v2 = vadd.f32 %v14911_v7, %v5995_v45  ;;  %v5998_v8 = vadd.f32 %v11055_v11, %v9692_v22  ;;  %v6074_v29 = vsel %vm860_vm1, %v14925_v35, 0.0  ;;  %v17015_v22 = vld [vmem:[#allocation67_spill] sm:$0xff] }
 0xe8b   : > { %v10032_v15 = vpop.permute.xlu1 %10031  ;;  %v5871_v58 = vpop.f32.mrf.mxu0 }
 0xe8c   : > { %v10034_v10 = vunpack.i.h.bf16 %v10032_v15  ;;  %v10033_v20 = vunpack.i.l.bf16 %v10032_v15  ;;  %v5996_v25 = vadd.f32 %v11056_v13, %v5871_v58  ;;  %v6068_v32 = vsel %vm860_vm1, %v14914_v2, 0.0 }
 0xe8d   : > { %v10027_v37 = vpop.permute.xlu0 %10026  ;;  %6069 = vadd.xlane.f32.xlu0 %v6068_v32  ;;  %v14937_v52 = vadd.f32 %v14911_v7, %v5998_v8  ;;  %v17016_v13 = vmov 0  }
 0xe8e   : > { %v14932_v19 = vadd.f32 %v14911_v7, %v5996_v25  ;;  %v10029_v55 = vunpack.i.h.bf16 %v10027_v37  ;;  %v10028_v1 = vunpack.i.l.bf16 %v10027_v37  ;;  %v5733_v26 = vsel %vm5705_vm4, %v5700_v40, %v10034_v10 }
 0xe8f   : > { %v10042_v31 = vpop.permute.xlu1 %10041  ;;  %v5732_v33 = vsel %vm5705_vm4, %v5699_v4, %v10033_v20  ;;  %v6077_v36 = vsel %vm860_vm1, %v14937_v52, 0.0 }
 0xe90   : > { %v5731_v60 = vsel %vm5705_vm4, %v5698_v16, %v10029_v55  ;;  %v6071_v6 = vsel %vm860_vm1, %v14932_v19, 0.0  ;;  %v5730_v12 = vsel %vm5705_vm4, %v5697_v61, %v10028_v1  ;;  %v5751_v46 = vpack.c.bf16 %v5733_v26, %v5732_v33  ;;  %v11059_v61 = vld [vmem:[#allocation2 + $0x38] sm:$0xff]  ;;  %v11060_v1 = vld [vmem:[#allocation2 + $0x28] sm:$0xff] }
 0xe91   : > { %v10037_v30 = vpop.permute.xlu0 %10036  ;;  %6072 = vadd.xlane.f32.xlu1 %v6071_v6  ;;  %v5750_v51 = vpack.c.bf16 %v5731_v60, %v5730_v12  ;;  %6075 = vadd.xlane.f32.xlu0 %v6074_v29  ;;  %v10044_v59 = vunpack.i.h.bf16 %v10042_v31  ;;  %v10043_v18 = vunpack.i.l.bf16 %v10042_v31 }
 0xe92   : > { %v10039_v47 = vunpack.i.h.bf16 %v10037_v30  ;;  %v10038_v38 = vunpack.i.l.bf16 %v10037_v30 }
 0xe93   : > { %v10052_v57 = vpop.permute.xlu1 %10051  ;;  %9713 = vmatprep.mubr.msk.bf16.mxu1 %vm860_vm1, %v5750_v51  ;;  %v5671_v45 = vsel %vm1727_vm2, %v17012_v34, %v10044_v59  ;;  %v5670_v3 = vsel %vm1727_vm2, %v17013_v14, %v10043_v18 }
 0xe94   : > { %9714 = vmatmul.mubr.msk.bf16.gmra.mxu1 %vm860_vm1, %v5751_v46  ;;  %v10054_v53 = vunpack.i.h.bf16 %v10052_v57  ;;  %v10053_v39 = vunpack.i.l.bf16 %v10052_v57  ;;  %v5669_v17 = vsel %vm1727_vm2, %v17014_v50, %v10039_v47  ;;  %v5668_v63 = vsel %vm1727_vm2, %v17015_v22, %v10038_v38  ;;  %v11061_v46 = vld [vmem:[#allocation2 + $0x50] sm:$0xff] }
 0xe95   : > { %v10047_v23 = vpop.permute.xlu0 %10046  ;;  %6078 = vadd.xlane.f32.xlu0 %v6077_v36  ;;  %v11062_v36 = vld [vmem:[#allocation2 + $0x40] sm:$0xff] }
 0xe96   : > { %v10049_v56 = vunpack.i.h.bf16 %v10047_v23  ;;  %v10048_v28 = vunpack.i.l.bf16 %v10047_v23  ;;  %v5703_v42 = vsel %vm5672_vm3, %v5670_v3, %v10053_v39  ;;  %v5704_v27 = vsel %vm5672_vm3, %v5671_v45, %v10054_v53  ;;  %v11063_v53 = vld [vmem:[#allocation2 + $0x58] sm:$0xff] }
 0xe97   : > { %v10062_v41 = vpop.permute.xlu1 %10061 }
 0xe98   : > { %v10064_v5 = vunpack.i.h.bf16 %v10062_v41  ;;  %v10063_v54 = vunpack.i.l.bf16 %v10062_v41  ;;  %v5701_v11 = vsel %vm5672_vm3, %v5668_v63, %v10048_v28  ;;  %v5702_v8 = vsel %vm5672_vm3, %v5669_v17, %v10049_v56  ;;  %v11064_v56 = vld [vmem:[#allocation2 + $0x48] sm:$0xff]  ;;  %v11065_v17 = vld [vmem:[#allocation2 + $0x70] sm:$0xff]  ;;  %v11066_v63 = vld [vmem:[#allocation2 + $0x60] sm:$0xff] }
 0xe99   : > { %v10057_v48 = vpop.permute.xlu0 %10056 }
 0xe9a   : > { %v10059_v21 = vunpack.i.h.bf16 %v10057_v48  ;;  %v10058_v44 = vunpack.i.l.bf16 %v10057_v48  ;;  %v5737_v15 = vsel %vm5705_vm4, %v5704_v27, %v10064_v5  ;;  %v5736_v58 = vsel %vm5705_vm4, %v5703_v42, %v10063_v54 }
 0xe9b   : > { %v5753_v20 = vpack.c.bf16 %v5737_v15, %v5736_v58  ;;  %v11068_v15 = vld [vmem:[#allocation2 + $0x68] sm:$0xff] }
 0xe9c   : > { %v5734_v62 = vsel %vm5705_vm4, %v5701_v11, %v10058_v44  ;;  %v5735_v24 = vsel %vm5705_vm4, %v5702_v8, %v10059_v21  ;;  %v11067_v11 = vld [vmem:[#allocation2 + $0x78] sm:$0xff] }
 0xe9d   : > { %v5752_v10 = vpack.c.bf16 %v5735_v24, %v5734_v62 }
 0xe9f   : > { %9717 = vmatprep.mubr.msk.bf16.mxu1 %vm860_vm1, %v5752_v10 }
 0xea0   : > { %9718 = vmatmul.mubr.msk.bf16.gmra.mxu1 %vm860_vm1, %v5753_v20 }
 0xea1   : > { %6716 = vmatprep.mubr.bf16.mxu1 %v17016_v13 }
 0xeba   : > { %v9695_v25 = vpop.f32.mrf.mxu0 }
 0xebb   : > { %v6001_v0 = vadd.f32 %v11057_v9, %v9695_v25  ;;  %v11069_v9 = vld [vmem:[#allocation2 + $0x90] sm:$0xff] }
 0xebc   : > { %v5884_v49 = vpop.f32.mrf.mxu0 }
 0xebd   : > { %v5999_v37 = vadd.f32 %v11058_v43, %v5884_v49  ;;  %v14974_v55 = vadd.f32 %v14911_v7, %v6001_v0 }
 0xebe   : > { %v9696_v32 = vpop.f32.mrf.mxu0 }
 0xebf   : > { %v14971_v4 = vadd.f32 %v14911_v7, %v5999_v37  ;;  %v6002_v16 = vadd.f32 %v11059_v61, %v9696_v32  ;;  %v6086_v6 = vsel %vm860_vm1, %v14974_v55, 0.0 }
 0xec0   : > { %v5887_v40 = vpop.f32.mrf.mxu0 }
 0xec1   : > { %v6000_v31 = vadd.f32 %v11060_v1, %v5887_v40  ;;  %v6080_v26 = vsel %vm860_vm1, %v14971_v4, 0.0  ;;  %v14982_v60 = vadd.f32 %v14911_v7, %v6002_v16  ;;  %v11070_v40 = vld [vmem:[#allocation2 + $0x80] sm:$0xff] }
 0xec2   : > { %6081 = vadd.xlane.f32.xlu0 %v6080_v26 }
 0xec3   : > { %v14979_v33 = vadd.f32 %v14911_v7, %v6000_v31  ;;  %v6089_v30 = vsel %vm860_vm1, %v14982_v60, 0.0 }
 0xec5   : > { %v6083_v12 = vsel %vm860_vm1, %v14979_v33, 0.0 }
 0xec6   : > { %6087 = vadd.xlane.f32.xlu0 %v6086_v6  ;;  %6084 = vadd.xlane.f32.xlu1 %v6083_v12 }
 0xeca   : > { %6090 = vadd.xlane.f32.xlu1 %v6089_v30 }
 0xed3   : > { %v9699_v29 = vpop.f32.mrf.mxu0 }
 0xed4   : > { %v6005_v57 = vadd.f32 %v11061_v46, %v9699_v29  ;;  %v11071_v46 = vld [vmem:[#allocation2 + $0x98] sm:$0xff] }
 0xed5   : > { %v5900_v51 = vpop.f32.mrf.mxu0 }
 0xed6   : > { %v6003_v59 = vadd.f32 %v11062_v36, %v5900_v51  ;;  %v14994_v23 = vadd.f32 %v14911_v7, %v6005_v57  ;;  %v11072_v36 = vld [vmem:[#allocation2 + $0x88] sm:$0xff] }
 0xed7   : > { %v9700_v18 = vpop.f32.mrf.mxu0 }
 0xed8   : > { %v14991_v47 = vadd.f32 %v14911_v7, %v6003_v59  ;;  %v6006_v39 = vadd.f32 %v11063_v53, %v9700_v18  ;;  %v6098_v34 = vsel %vm860_vm1, %v14994_v23, 0.0 }
 0xed9   : > { %v5903_v38 = vpop.f32.mrf.mxu0 }
 0xeda   : > { %v6004_v28 = vadd.f32 %v11064_v56, %v5903_v38  ;;  %v6092_v41 = vsel %vm860_vm1, %v14991_v47, 0.0  ;;  %v15002_v54 = vadd.f32 %v14911_v7, %v6006_v39 }
 0xedb   : > { %6093 = vadd.xlane.f32.xlu0 %v6092_v41 }
 0xedc   : > { %v14999_v5 = vadd.f32 %v14911_v7, %v6004_v28  ;;  %v6101_v14 = vsel %vm860_vm1, %v15002_v54, 0.0 }
 0xede   : > { %v6095_v45 = vsel %vm860_vm1, %v14999_v5, 0.0 }
 0xedf   : > { %6099 = vadd.xlane.f32.xlu0 %v6098_v34  ;;  %6096 = vadd.xlane.f32.xlu1 %v6095_v45 }
 0xee3   : > { %6102 = vadd.xlane.f32.xlu1 %v6101_v14 }
 0xf08   : > { %v9703_v3 = vpop.f32.mrf.mxu0 }
 0xf09   : > { %v6009_v22 = vadd.f32 %v11065_v17, %v9703_v3 }
 0xf0a   : > { %v5916_v50 = vpop.f32.mrf.mxu0 }
 0xf0b   : > { %v6007_v48 = vadd.f32 %v11066_v63, %v5916_v50  ;;  %v15014_v44 = vadd.f32 %v14911_v7, %v6009_v22  ;;  %v11073_v63 = vld [vmem:[#allocation2 + $0xa0] sm:$0xff] }
 0xf0c   : > { %v9704_v42 = vpop.f32.mrf.mxu0 }
 0xf0d   : > { %v15011_v27 = vadd.f32 %v14911_v7, %v6007_v48  ;;  %v6010_v8 = vadd.f32 %v11067_v11, %v9704_v42  ;;  %v6110_v20 = vsel %vm860_vm1, %v15014_v44, 0.0 }
 0xf0e   : > { %v5919_v21 = vpop.f32.mrf.mxu0 }
 0xf0f   : > { %v6008_v58 = vadd.f32 %v11068_v15, %v5919_v21  ;;  %v6104_v62 = vsel %vm860_vm1, %v15011_v27, 0.0  ;;  %v15022_v10 = vadd.f32 %v14911_v7, %v6010_v8 }
 0xf10   : > { %6105 = vadd.xlane.f32.xlu0 %v6104_v62 }
 0xf11   : > { %v15019_v24 = vadd.f32 %v14911_v7, %v6008_v58  ;;  %v6113_v16 = vsel %vm860_vm1, %v15022_v10, 0.0 }
 0xf13   : > { %v6107_v25 = vsel %vm860_vm1, %v15019_v24, 0.0 }
 0xf14   : > { %6111 = vadd.xlane.f32.xlu0 %v6110_v20  ;;  %6108 = vadd.xlane.f32.xlu1 %v6107_v25  ;;  %v9707_v49 = vpop.f32.mrf.mxu0  ;;  %v11074_v25 = vld [vmem:[#allocation2 + $0xb0] sm:$0xff] }
 0xf15   : > { %v6013_v0 = vadd.f32 %v11069_v9, %v9707_v49  ;;  %v11075_v9 = vld [vmem:[#allocation2 + $0xa8] sm:$0xff] }
 0xf16   : > { %v6070_v43 = vpop.xlane.xlu0 %6069  ;;  %v5932_v37 = vpop.f32.mrf.mxu0 }
 0xf17   : > { %v6164_v32 = vmul.f32 0.015625, %v6070_v43  ;;  %v6011_v61 = vadd.f32 %v11070_v40, %v5932_v37  ;;  %v15034_v6 = vadd.f32 %v14911_v7, %v6013_v0 }
 0xf18   : > { %6114 = vadd.xlane.f32.xlu1 %v6113_v16  ;;  %v9708_v1 = vpop.f32.mrf.mxu0 }
 0xf19   : > { %v15031_v31 = vadd.f32 %v14911_v7, %v6011_v61  ;;  %17017 = vst [vmem:[#allocation8_spill] sm:$0xff] %v15034_v6  ;;  %v15037_v51 = vsub.f32 %v14914_v2, %v6164_v32  ;;  %v6014_v57 = vadd.f32 %v11071_v46, %v9708_v1  ;;  %v6122_v28 = vsel %vm860_vm1, %v15034_v6, 0.0  ;;  %v11076_v61 = vld [vmem:[#allocation2 + $0xb8] sm:$0xff] }
 0xf1a   : > { %v6073_v26 = vpop.xlane.xlu1 %6072  ;;  %v6076_v12 = vpop.xlane.xlu0 %6075 }
 0xf1b   : > { %v6165_v30 = vmul.f32 0.015625, %v6073_v26  ;;  %v5935_v29 = vpop.f32.mrf.mxu0  ;;  %v6116_v18 = vsel %vm860_vm1, %v15031_v31, 0.0  ;;  %v6166_v53 = vmul.f32 0.015625, %v6076_v12  ;;  %v15048_v56 = vadd.f32 %v14911_v7, %v6014_v57  ;;  %v10083_v57 = vld [vmem:[%s11331_s22 + $0x34] ss:$8 sps:$4 sm:$0xff]  }
 0xf1c   : > { %v6012_v59 = vadd.f32 %v11072_v36, %v5935_v29  ;;  %6117 = vadd.xlane.f32.xlu0 %v6116_v18  ;;  %v6228_v34 = vmul.f32 %v15037_v51, %v15037_v51  ;;  %v10081_v36 = vld [vmem:[%s11331_s22 + $0x30] ss:$8 sps:$4 sm:$0xff]   ;;  %6692 = vmatprep.subr.bf16.mxu1 %v10083_v57  ;;  %v10084_v18 = vld [vmem:[%s11331_s22 + $0x20] ss:$8 sps:$4 sm:$0xff]  }
 0xf1d   : > { %v15045_v39 = vsub.f32 %v14932_v19, %v6165_v30  ;;  %17019 = vst [vmem:[#allocation33_spill] sm:$0xff] %v15048_v56  ;;  %v15057_v3 = vsub.f32 %v14925_v35, %v6166_v53  ;;  %v6125_v21 = vsel %vm860_vm1, %v15048_v56, 0.0  ;;  %6693 = vmatpush1.bf16.msra.mxu1 %v10081_v36  ;;  %v10089_v53 = vld [vmem:[%s11331_s22 + $0x14] ss:$8 sps:$4 sm:$0xff]   ;;  %v11079_v57 = vld [vmem:[#allocation2 + $0xc8] sm:$0xff] }
 0xf1e   : > { %v15042_v38 = vadd.f32 %v14911_v7, %v6012_v59  ;;  %v6079_v45 = vpop.xlane.xlu0 %6078  ;;  %v6260_v42 = vsel %vm860_vm1, %v6228_v34, 0.0  ;;  %v10086_v59 = vld [vmem:[%s11331_s22 + $0x24] ss:$8 sps:$4 sm:$0xff]   ;;  %v10090_v34 = vld [vmem:[%s11331_s22] ss:$8 sps:$4 sm:$0xff]  }
 0xf1f   : > { %v6229_v17 = vmul.f32 %v15045_v39, %v15045_v39  ;;  %v6167_v22 = vmul.f32 0.015625, %v6079_v45  ;;  %v6230_v62 = vmul.f32 %v15057_v3, %v15057_v3  ;;  %6694 = vmatprep.subr.bf16.mxu1 %v10086_v59 }
 0xf20   : > { %17018 = vst [vmem:[#allocation35_spill] sm:$0xff] %v15042_v38  ;;  %v6119_v41 = vsel %vm860_vm1, %v15042_v38, 0.0  ;;  %v9711_v14 = vpop.f32.mrf.mxu1  ;;  %6123 = vadd.xlane.f32.xlu0 %v6122_v28  ;;  %v10087_v28 = vld [vmem:[%s11331_s22 + $0x10] ss:$8 sps:$4 sm:$0xff]  }
 0xf21   : > { %6120 = vadd.xlane.f32.xlu1 %v6119_v41  ;;  %v6263_v58 = vsel %vm860_vm1, %v6229_v17, 0.0  ;;  %v15071_v20 = vsub.f32 %v14937_v52, %v6167_v22  ;;  %v6017_v49 = vadd.f32 %v11074_v25, %v9711_v14  ;;  %v6266_v32 = vsel %vm860_vm1, %v6230_v62, 0.0  ;;  %6695 = vmatpush1.bf16.msra.mxu1 %v10084_v18  ;;  %v10092_v41 = vld [vmem:[%s11331_s22 + $0x4] ss:$8 sps:$4 sm:$0xff]  }
 0xf22   : > { %v5948_v50 = vpop.f32.mrf.mxu1  ;;  %6696 = vmatprep.subr.bf16.mxu1 %v10089_v53 }
 0xf23   : > { %v6015_v48 = vadd.f32 %v11073_v63, %v5948_v50  ;;  %v15080_v40 = vadd.f32 %v14911_v7, %v6017_v49  ;;  %v6231_v26 = vmul.f32 %v15071_v20, %v15071_v20 }
 0xf24   : > { %v9712_v11 = vpop.f32.mrf.mxu1  ;;  %6261 = vadd.xlane.f32.xlu0 %v6260_v42 }
 0xf25   : > { %6126 = vadd.xlane.f32.xlu1 %v6125_v21  ;;  %v15065_v8 = vadd.f32 %v14911_v7, %v6015_v48  ;;  %17021 = vst [vmem:[#allocation38_spill] sm:$0xff] %v15080_v40  ;;  %v6018_v16 = vadd.f32 %v11076_v61, %v9712_v11  ;;  %v6134_v30 = vsel %vm860_vm1, %v15080_v40, 0.0  ;;  %v6269_v29 = vsel %vm860_vm1, %v6231_v26, 0.0  ;;  %6697 = vmatpush1.bf16.msra.mxu1 %v10087_v28 }
 0xf26   : > { %v5951_v15 = vpop.f32.mrf.mxu1  ;;  %6698 = vmatprep.subr.bf16.mxu1 %v10092_v41  ;;  %v11080_v41 = vld [vmem:[#allocation2 + $0xd8] sm:$0xff] }
 0xf27   : > { %v6016_v0 = vadd.f32 %v11075_v9, %v5951_v15  ;;  %v6128_v43 = vsel %vm860_vm1, %v15065_v8, 0.0  ;;  %v15087_v12 = vadd.f32 %v14911_v7, %v6018_v16 }
 0xf28   : > { %6129 = vadd.xlane.f32.xlu0 %v6128_v43  ;;  %v11077_v43 = vld [vmem:[#allocation2 + $0xc0] sm:$0xff] }
 0xf29   : > { %6264 = vadd.xlane.f32.xlu1 %v6263_v58  ;;  %v15076_v37 = vadd.f32 %v14911_v7, %v6016_v0  ;;  %17022 = vst [vmem:[#allocation40_spill] sm:$0xff] %v15087_v12  ;;  %v6137_v46 = vsel %vm860_vm1, %v15087_v12, 0.0  ;;  %6699 = vmatpush1.bf16.msra.mxu1 %v10090_v34 }
 0xf2b   : > { %17020 = vst [vmem:[#allocation36_spill] sm:$0xff] %v15076_v37  ;;  %v6131_v1 = vsel %vm860_vm1, %v15076_v37, 0.0 }
 0xf2c   : > { %6267 = vadd.xlane.f32.xlu0 %v6266_v32 }
 0xf2d   : > { %6132 = vadd.xlane.f32.xlu1 %v6131_v1 }
 0xf30   : > { %6135 = vadd.xlane.f32.xlu0 %v6134_v30 }
 0xf31   : > { %6270 = vadd.xlane.f32.xlu1 %v6269_v29  ;;  %v11078_v29 = vld [vmem:[#allocation2 + $0xd0] sm:$0xff] }
 0xf35   : > { %6138 = vadd.xlane.f32.xlu1 %v6137_v46 }
 0xf4b   : > { %v6082_v45 = vpop.xlane.xlu0 %6081 }
 0xf4c   : > { %v6168_v14 = vmul.f32 0.015625, %v6082_v45 }
 0xf4e   : > { %v15103_v50 = vsub.f32 %v14971_v4, %v6168_v14 }
 0xf4f   : > { %v6085_v17 = vpop.xlane.xlu1 %6084  ;;  %v6088_v22 = vpop.xlane.xlu0 %6087 }
 0xf50   : > { %v6169_v63 = vmul.f32 0.015625, %v6085_v17  ;;  %v6232_v48 = vmul.f32 %v15103_v50, %v15103_v50  ;;  %v6170_v11 = vmul.f32 0.015625, %v6088_v22 }
 0xf52   : > { %v15108_v42 = vsub.f32 %v14979_v33, %v6169_v63  ;;  %v6272_v21 = vsel %vm860_vm1, %v6232_v48, 0.0  ;;  %v15115_v49 = vsub.f32 %v14974_v55, %v6170_v11 }
 0xf53   : > { %6273 = vadd.xlane.f32.xlu0 %v6272_v21  ;;  %v6091_v58 = vpop.xlane.xlu1 %6090 }
 0xf54   : > { %v6233_v15 = vmul.f32 %v15108_v42, %v15108_v42  ;;  %v9715_v62 = vpop.f32.mrf.mxu1  ;;  %v6171_v0 = vmul.f32 0.015625, %v6091_v58  ;;  %v6234_v26 = vmul.f32 %v15115_v49, %v15115_v49 }
 0xf55   : > { %v6021_v46 = vadd.f32 %v11078_v29, %v9715_v62  ;;  %v11081_v62 = vld [vmem:[#allocation2 + $0xe0] sm:$0xff] }
 0xf56   : > { %v6275_v25 = vsel %vm860_vm1, %v6233_v15, 0.0  ;;  %v5964_v9 = vpop.f32.mrf.mxu1  ;;  %v15123_v30 = vsub.f32 %v14982_v60, %v6171_v0  ;;  %v6278_v53 = vsel %vm860_vm1, %v6234_v26, 0.0 }
 0xf57   : > { %6276 = vadd.xlane.f32.xlu1 %v6275_v25  ;;  %v6019_v32 = vadd.f32 %v11077_v43, %v5964_v9  ;;  %v15132_v28 = vadd.f32 %v14911_v7, %v6021_v46 }
 0xf58   : > { %v9716_v61 = vpop.f32.mrf.mxu1  ;;  %v6235_v17 = vmul.f32 %v15123_v30, %v15123_v30 }
 0xf59   : > { %v15118_v16 = vadd.f32 %v14911_v7, %v6019_v32  ;;  %v6022_v34 = vadd.f32 %v11080_v41, %v9716_v61  ;;  %v6146_v21 = vsel %vm860_vm1, %v15132_v28, 0.0 }
 0xf5a   : > { %v5967_v1 = vpop.f32.mrf.mxu1  ;;  %v6281_v11 = vsel %vm860_vm1, %v6235_v17, 0.0 }
 0xf5b   : > { %17023 = vst [vmem:[#allocation70_spill] sm:$0xff] %v15118_v16  ;;  %v6020_v36 = vadd.f32 %v11079_v57, %v5967_v1  ;;  %v6140_v59 = vsel %vm860_vm1, %v15118_v16, 0.0  ;;  %v15139_v63 = vadd.f32 %v14911_v7, %v6022_v34  ;;  %v11082_v57 = vld [vmem:[#allocation2 + $0xe8] sm:$0xff] }
 0xf5c   : > { %6141 = vadd.xlane.f32.xlu0 %v6140_v59 }
 0xf5d   : > { %v15128_v18 = vadd.f32 %v14911_v7, %v6020_v36  ;;  %v6149_v43 = vsel %vm860_vm1, %v15139_v63, 0.0 }
 0xf5f   : > { %17024 = vst [vmem:[#allocation76_spill] sm:$0xff] %v15128_v18  ;;  %v6143_v14 = vsel %vm860_vm1, %v15128_v18, 0.0 }
 0xf60   : > { %v9719_v45 = vpop.f32.mrf.mxu1  ;;  %6279 = vadd.xlane.f32.xlu0 %v6278_v53  ;;  %6144 = vadd.xlane.f32.xlu1 %v6143_v14 }
 0xf62   : > { %v5980_v22 = vpop.f32.mrf.mxu1 }
 0xf63   : > { %v6023_v25 = vadd.f32 %v11081_v62, %v5980_v22  ;;  %v11083_v22 = vld [vmem:[#allocation2 + $0xf0] sm:$0xff] }
 0xf64   : > { %v9720_v48 = vpop.f32.mrf.mxu1  ;;  %v6094_v15 = vpop.xlane.xlu0 %6093  ;;  %6147 = vadd.xlane.f32.xlu0 %v6146_v21  ;;  %6282 = vadd.xlane.f32.xlu1 %v6281_v11  ;;  %v6025_v21 = vadd.f32 %v11083_v22, %v9719_v45  ;;  %v11084_v45 = vld [vmem:[#allocation2 + $0xf8] sm:$0xff] }
 0xf65   : > { %v6172_v58 = vmul.f32 0.015625, %v6094_v15  ;;  %v15152_v46 = vadd.f32 %v14911_v7, %v6023_v25 }
 0xf66   : > { %v5983_v0 = vpop.f32.mrf.mxu1 }
 0xf67   : > { %v15145_v9 = vsub.f32 %v14991_v47, %v6172_v58  ;;  %17025 = vst [vmem:[#allocation12_spill] sm:$0xff] %v15152_v46  ;;  %v6024_v36 = vadd.f32 %v11082_v57, %v5983_v0  ;;  %v6152_v11 = vsel %vm860_vm1, %v15152_v46, 0.0  ;;  %v15175_v0 = vadd.f32 %v14911_v7, %v6025_v21 }
 0xf68   : > { %v6100_v32 = vpop.xlane.xlu0 %6099  ;;  %v6097_v61 = vpop.xlane.xlu1 %6096  ;;  %6150 = vadd.xlane.f32.xlu1 %v6149_v43  ;;  %v6026_v43 = vadd.f32 %v11084_v45, %v9720_v48 }
 0xf69   : > { %v6174_v1 = vmul.f32 0.015625, %v6100_v32  ;;  %v6173_v26 = vmul.f32 0.015625, %v6097_v61  ;;  %v6236_v29 = vmul.f32 %v15145_v9, %v15145_v9  ;;  %v15166_v15 = vadd.f32 %v14911_v7, %v6024_v36  ;;  %17026 = vst [vmem:[#allocation39_spill] sm:$0xff] %v15175_v0 }
 0xf6b   : > { %v15155_v59 = vsub.f32 %v14994_v23, %v6174_v1  ;;  %v15158_v53 = vsub.f32 %v14999_v5, %v6173_v26  ;;  %v6284_v41 = vsel %vm860_vm1, %v6236_v29, 0.0  ;;  %v6155_v61 = vsel %vm860_vm1, %v15166_v15, 0.0 }
 0xf6c   : > { %v6103_v34 = vpop.xlane.xlu1 %6102  ;;  %6285 = vadd.xlane.f32.xlu0 %v6284_v41  ;;  %v15183_v26 = vadd.f32 %v14911_v7, %v6026_v43  ;;  %v6158_v29 = vsel %vm860_vm1, %v15175_v0, 0.0 }
 0xf6d   : > { %v6175_v14 = vmul.f32 0.015625, %v6103_v34  ;;  %v6237_v17 = vmul.f32 %v15158_v53, %v15158_v53  ;;  %v6238_v25 = vmul.f32 %v15155_v59, %v15155_v59 }
 0xf6e   : > { %17027 = vst [vmem:[#allocation75_spill] sm:$0xff] %v15183_v26  ;;  %v6161_v48 = vsel %vm860_vm1, %v15183_v26, 0.0 }
 0xf6f   : > { %v15169_v58 = vsub.f32 %v15002_v54, %v6175_v14  ;;  %v6287_v62 = vsel %vm860_vm1, %v6237_v17, 0.0  ;;  %v6290_v32 = vsel %vm860_vm1, %v6238_v25, 0.0 }
 0xf70   : > { %6153 = vadd.xlane.f32.xlu0 %v6152_v11  ;;  %6288 = vadd.xlane.f32.xlu1 %v6287_v62 }
 0xf71   : > { %v6239_v1 = vmul.f32 %v15169_v58, %v15169_v58 }
 0xf73   : > { %v6293_v57 = vsel %vm860_vm1, %v6239_v1, 0.0 }
 0xf74   : > { %6291 = vadd.xlane.f32.xlu0 %v6290_v32  ;;  %6156 = vadd.xlane.f32.xlu1 %v6155_v61 }
 0xf78   : > { %6159 = vadd.xlane.f32.xlu0 %v6158_v29  ;;  %6294 = vadd.xlane.f32.xlu1 %v6293_v57 }
 0xf7c   : > { %6162 = vadd.xlane.f32.xlu1 %v6161_v48 }
 0xf99   : > { %v6106_v36 = vpop.xlane.xlu0 %6105 }
 0xf9a   : > { %v6176_v41 = vmul.f32 0.015625, %v6106_v36 }
 0xf9c   : > { %v15191_v34 = vsub.f32 %v15011_v27, %v6176_v41 }
 0xf9d   : > { %v6112_v14 = vpop.xlane.xlu0 %6111  ;;  %v6109_v17 = vpop.xlane.xlu1 %6108 }
 0xf9e   : > { %v6178_v7 = vmul.f32 0.015625, %v6112_v14  ;;  %v6177_v22 = vmul.f32 0.015625, %v6109_v17  ;;  %v6240_v21 = vmul.f32 %v15191_v34, %v15191_v34 }
 0xfa0   : > { %v15196_v11 = vsub.f32 %v15014_v44, %v6178_v7  ;;  %v15199_v62 = vsub.f32 %v15019_v24, %v6177_v22  ;;  %v6296_v25 = vsel %vm860_vm1, %v6240_v21, 0.0 }
 0xfa1   : > { %v6115_v45 = vpop.xlane.xlu1 %6114  ;;  %6297 = vadd.xlane.f32.xlu0 %v6296_v25 }
 0xfa2   : > { %v6179_v43 = vmul.f32 0.015625, %v6115_v45  ;;  %v6242_v32 = vmul.f32 %v15196_v11, %v15196_v11  ;;  %v6241_v61 = vmul.f32 %v15199_v62, %v15199_v62 }
 0xfa4   : > { %v15207_v1 = vsub.f32 %v15022_v10, %v6179_v43  ;;  %v6302_v29 = vsel %vm860_vm1, %v6242_v32, 0.0  ;;  %v6299_v57 = vsel %vm860_vm1, %v6241_v61, 0.0 }
 0xfa5   : > { %6303 = vadd.xlane.f32.xlu0 %v6302_v29  ;;  %v6118_v48 = vpop.xlane.xlu0 %6117  ;;  %6300 = vadd.xlane.f32.xlu1 %v6299_v57 }
 0xfa6   : > { %v6180_v36 = vmul.f32 0.015625, %v6118_v48  ;;  %v6243_v41 = vmul.f32 %v15207_v1, %v15207_v1 }
 0xfa8   : > { %v15214_v14 = vsub.f32 %v15031_v31, %v6180_v36  ;;  %v6305_v17 = vsel %vm860_vm1, %v6243_v41, 0.0 }
 0xfa9   : > { %v6124_v7 = vpop.xlane.xlu0 %6123  ;;  %6306 = vadd.xlane.f32.xlu1 %v6305_v17 }
 0xfaa   : > { %v6121_v22 = vpop.xlane.xlu1 %6120  ;;  %v6182_v21 = vmul.f32 0.015625, %v6124_v7  ;;  %v6244_v45 = vmul.f32 %v15214_v14, %v15214_v14 }
 0xfab   : > { %v6181_v25 = vmul.f32 0.015625, %v6121_v22 }
 0xfac   : > { %v15220_v43 = vsub.f32 %v15034_v6, %v6182_v21  ;;  %v6308_v61 = vsel %vm860_vm1, %v6244_v45, 0.0 }
 0xfad   : > { %v15223_v32 = vsub.f32 %v15042_v38, %v6181_v25  ;;  %6309 = vadd.xlane.f32.xlu0 %v6308_v61  ;;  %v6262_v29 = vpop.xlane.xlu0 %6261 }
 0xfae   : > { %v6127_v57 = vpop.xlane.xlu1 %6126  ;;  %v6356_v48 = vmul.f32 0.015625, %v6262_v29  ;;  %v6246_v41 = vmul.f32 %v15220_v43, %v15220_v43 }
 0xfaf   : > { %v6183_v36 = vmul.f32 0.015625, %v6127_v57  ;;  %v6245_v17 = vmul.f32 %v15223_v32, %v15223_v32 }
 0xfb0   : > { %v6388_v7 = vadd.f32 1e-05, %v6356_v48  ;;  %v6314_v21 = vsel %vm860_vm1, %v6246_v41, 0.0 }
 0xfb1   : > { %v15231_v22 = vsub.f32 %v15048_v56, %v6183_v36  ;;  %v6311_v25 = vsel %vm860_vm1, %v6245_v17, 0.0  ;;  %6315 = vadd.xlane.f32.xlu0 %v6314_v21  ;;  %v6130_v45 = vpop.xlane.xlu0 %6129 }
 0xfb2   : > { %6312 = vadd.xlane.f32.xlu1 %v6311_v25  ;;  %v6265_v61 = vpop.xlane.xlu1 %6264  ;;  %10685 = vrsqrt.f32 %v6388_v7  ;;  %v6184_v29 = vmul.f32 0.015625, %v6130_v45 }
 0xfb3   : > { %v6357_v57 = vmul.f32 0.015625, %v6265_v61  ;;  %v6247_v6 = vmul.f32 %v15231_v22, %v15231_v22 }
 0xfb4   : > { %v15238_v38 = vsub.f32 %v15065_v8, %v6184_v29 }
 0xfb5   : > { %v6389_v48 = vadd.f32 1e-05, %v6357_v57  ;;  %v6317_v36 = vsel %vm860_vm1, %v6247_v6, 0.0  ;;  %v6268_v56 = vpop.xlane.xlu0 %6267 }
 0xfb6   : > { %6318 = vadd.xlane.f32.xlu1 %v6317_v36  ;;  %v6133_v41 = vpop.xlane.xlu1 %6132  ;;  %v6358_v17 = vmul.f32 0.015625, %v6268_v56  ;;  %v6248_v7 = vmul.f32 %v15238_v38, %v15238_v38 }
 0xfb7   : > { %10687 = vrsqrt.f32 %v6389_v48  ;;  %v6185_v21 = vmul.f32 0.015625, %v6133_v41 }
 0xfb8   : > { %v6390_v25 = vadd.f32 1e-05, %v6358_v17  ;;  %v6320_v61 = vsel %vm860_vm1, %v6248_v7, 0.0 }
 0xfb9   : > { %v15244_v45 = vsub.f32 %v15076_v37, %v6185_v21  ;;  %6321 = vadd.xlane.f32.xlu0 %v6320_v61  ;;  %v6136_v29 = vpop.xlane.xlu0 %6135 }
 0xfba   : > { %v6271_v57 = vpop.xlane.xlu1 %6270  ;;  %10689 = vrsqrt.f32 %v6390_v25  ;;  %v6186_v6 = vmul.f32 0.015625, %v6136_v29 }
 0xfbb   : > { %v6359_v36 = vmul.f32 0.015625, %v6271_v57  ;;  %v6249_v56 = vmul.f32 %v15244_v45, %v15244_v45 }
 0xfbc   : > { %v15250_v48 = vsub.f32 %v15080_v40, %v6186_v6 }
 0xfbd   : > { %v6391_v41 = vadd.f32 1e-05, %v6359_v36  ;;  %v6323_v17 = vsel %vm860_vm1, %v6249_v56, 0.0  ;;  %v15265_v36 = vld [vmem:[%s17028_s27] ss:$0 sm:$0xff] }
 0xfbe   : > { %6324 = vadd.xlane.f32.xlu1 %v6323_v17  ;;  %v6139_v21 = vpop.xlane.xlu1 %6138  ;;  %v6250_v25 = vmul.f32 %v15250_v48, %v15250_v48 }
 0xfbf   : > { %10691 = vrsqrt.f32 %v6391_v41  ;;  %v6187_v7 = vmul.f32 0.015625, %v6139_v21  ;;  %v10686_v61 = vpop.eup %10685 }
 0xfc0   : > { %v6452_v29 = vmul.f32 %v10686_v61, %v15037_v51  ;;  %v6326_v6 = vsel %vm860_vm1, %v6250_v25, 0.0 }
 0xfc1   : > { %v15257_v57 = vsub.f32 %v15087_v12, %v6187_v7  ;;  %6327 = vadd.xlane.f32.xlu0 %v6326_v6  ;;  %v15277_v7 = vld [vmem:[%s715_s24] ss:$0 sm:$0xff] }
 0xfc2   : > { %v6490_v17 = vmul.f32 %v15265_v36, %v6452_v29 }
 0xfc3   : > { %v6251_v56 = vmul.f32 %v15257_v57, %v15257_v57 }
 0xfc4   : > { %v10688_v41 = vpop.eup %10687  ;;  %v6528_v6 = vadd.f32 %v15277_v7, %v6490_v17 }
 0xfc5   : > { %v6453_v51 = vmul.f32 %v10688_v41, %v15045_v39  ;;  %v6329_v21 = vsel %vm860_vm1, %v6251_v56, 0.0 }
 0xfc6   : > { %6330 = vadd.xlane.f32.xlu1 %v6329_v21 }
 0xfc7   : > { %v6491_v25 = vmul.f32 %v15265_v36, %v6453_v51  ;;  %v10690_v61 = vpop.eup %10689 }
 0xfc8   : > { %v6454_v29 = vmul.f32 %v10690_v61, %v15057_v3 }
 0xfc9   : > { %v6529_v12 = vadd.f32 %v15277_v7, %v6491_v25 }
 0xfca   : > { %v6492_v41 = vmul.f32 %v15265_v36, %v6454_v29 }
 0xfcb   : > { %v6560_v40 = vpack.c.bf16 %v6529_v12, %v6528_v6 }
 0xfcc   : > { %v10692_v39 = vpop.eup %10691  ;;  %v6530_v51 = vadd.f32 %v15277_v7, %v6492_v41 }
 0xfcd   : > { %v6455_v56 = vmul.f32 %v10692_v39, %v15071_v20  ;;  %8673 = vmatmul.mubr.msk.bf16.vlgmr.msra.gmra.mxu1 %vm860_vm1, %v6560_v40 }
 0xfce   : > { %6726 = vmatprep.mubr.bf16.mxu1 %v17016_v13 }
 0xfcf   : > { %v6493_v21 = vmul.f32 %v15265_v36, %v6455_v56 }
 0xfd1   : > { %v6531_v17 = vadd.f32 %v15277_v7, %v6493_v21 }
 0xfd3   : > { %v6561_v37 = vpack.c.bf16 %v6531_v17, %v6530_v51 }
 0xfd5   : > { %8674 = vmatmul.mubr.msk.bf16.gmra.mxu1 %vm860_vm1, %v6561_v37 }
 0xfd6   : > { %6736 = vmatprep.mubr.bf16.mxu1 %v17016_v13 }
 0xfdc   : > { %v6274_v3 = vpop.xlane.xlu0 %6273 }
 0xfdd   : > { %v6360_v12 = vmul.f32 0.015625, %v6274_v3 }
 0xfdf   : > { %v6392_v20 = vadd.f32 1e-05, %v6360_v12 }
 0xfe0   : > { %v6277_v25 = vpop.xlane.xlu1 %6276 }
 0xfe1   : > { %10693 = vrsqrt.f32 %v6392_v20  ;;  %v6361_v40 = vmul.f32 0.015625, %v6277_v25 }
 0xfe3   : > { %v6393_v61 = vadd.f32 1e-05, %v6361_v40 }
 0xfe5   : > { %10695 = vrsqrt.f32 %v6393_v61  ;;  %v6142_v6 = vpop.xlane.xlu0 %6141 }
 0xfe6   : > { %v6188_v29 = vmul.f32 0.015625, %v6142_v6 }
 0xfe8   : > { %v15293_v39 = vsub.f32 %v15118_v16, %v6188_v29 }
 0xfe9   : > { %v6280_v56 = vpop.xlane.xlu0 %6279  ;;  %v6145_v41 = vpop.xlane.xlu1 %6144 }
 0xfea   : > { %v6362_v21 = vmul.f32 0.015625, %v6280_v56  ;;  %v6189_v51 = vmul.f32 0.015625, %v6145_v41  ;;  %v6252_v37 = vmul.f32 %v15293_v39, %v15293_v39 }
 0xfec   : > { %v6394_v17 = vadd.f32 1e-05, %v6362_v21  ;;  %v15298_v3 = vsub.f32 %v15128_v18, %v6189_v51  ;;  %v6332_v12 = vsel %vm860_vm1, %v6252_v37, 0.0 }
 0xfed   : > { %6333 = vadd.xlane.f32.xlu0 %v6332_v12  ;;  %v6148_v25 = vpop.xlane.xlu0 %6147  ;;  %v6283_v40 = vpop.xlane.xlu1 %6282 }
 0xfee   : > { %v10694_v20 = vpop.eup %10693  ;;  %10697 = vrsqrt.f32 %v6394_v17  ;;  %v6190_v6 = vmul.f32 0.015625, %v6148_v25  ;;  %v6363_v29 = vmul.f32 0.015625, %v6283_v40  ;;  %v6253_v56 = vmul.f32 %v15298_v3, %v15298_v3 }
 0xfef   : > { %v6456_v61 = vmul.f32 %v10694_v20, %v15103_v50 }
 0xff0   : > { %v15305_v41 = vsub.f32 %v15132_v28, %v6190_v6  ;;  %v6395_v21 = vadd.f32 1e-05, %v6363_v29  ;;  %v6335_v18 = vsel %vm860_vm1, %v6253_v56, 0.0 }
 0xff1   : > { %v6151_v37 = vpop.xlane.xlu1 %6150  ;;  %v6494_v12 = vmul.f32 %v15265_v36, %v6456_v61  ;;  %6336 = vadd.xlane.f32.xlu1 %v6335_v18 }
 0xff2   : > { %v10696_v51 = vpop.eup %10695  ;;  %10699 = vrsqrt.f32 %v6395_v21  ;;  %v6191_v50 = vmul.f32 0.015625, %v6151_v37  ;;  %v6254_v17 = vmul.f32 %v15305_v41, %v15305_v41 }
 0xff3   : > { %v6457_v16 = vmul.f32 %v10696_v51, %v15108_v42  ;;  %v6532_v42 = vadd.f32 %v15277_v7, %v6494_v12 }
 0xff4   : > { %v15313_v20 = vsub.f32 %v15139_v63, %v6191_v50  ;;  %v6338_v25 = vsel %vm860_vm1, %v6254_v17, 0.0 }
 0xff5   : > { %v6495_v40 = vmul.f32 %v15265_v36, %v6457_v16  ;;  %6339 = vadd.xlane.f32.xlu0 %v6338_v25  ;;  %v6286_v6 = vpop.xlane.xlu0 %6285 }
 0xff6   : > { %v6364_v29 = vmul.f32 0.015625, %v6286_v6  ;;  %v6255_v61 = vmul.f32 %v15313_v20, %v15313_v20 }
 0xff7   : > { %v6533_v18 = vadd.f32 %v15277_v7, %v6495_v40 }
 0xff8   : > { %v6396_v56 = vadd.f32 1e-05, %v6364_v29  ;;  %v6341_v21 = vsel %vm860_vm1, %v6255_v61, 0.0 }
 0xff9   : > { %v6562_v51 = vpack.c.bf16 %v6533_v18, %v6532_v42  ;;  %v6154_v37 = vpop.xlane.xlu0 %6153  ;;  %6342 = vadd.xlane.f32.xlu1 %v6341_v21  ;;  %v6289_v50 = vpop.xlane.xlu1 %6288 }
 0xffa   : > { %10701 = vrsqrt.f32 %v6396_v56  ;;  %v6192_v17 = vmul.f32 0.015625, %v6154_v37  ;;  %v6365_v16 = vmul.f32 0.015625, %v6289_v50 }
 0xffb   : > { %8675 = vmatmul.mubr.msk.bf16.gmra.mxu1 %vm860_vm1, %v6562_v51  ;;  %v10698_v25 = vpop.eup %10697 }
 0xffc   : > { %6746 = vmatprep.mubr.bf16.mxu1 %v17016_v13  ;;  %v15325_v6 = vsub.f32 %v15152_v46, %v6192_v17  ;;  %v6397_v12 = vadd.f32 1e-05, %v6365_v16  ;;  %v6458_v40 = vmul.f32 %v10698_v25, %v15115_v49 }
 0xffd   : > { %v6292_v29 = vpop.xlane.xlu0 %6291  ;;  %v6157_v61 = vpop.xlane.xlu1 %6156 }
 0xffe   : > { %10703 = vrsqrt.f32 %v6397_v12  ;;  %v6366_v42 = vmul.f32 0.015625, %v6292_v29  ;;  %v6193_v18 = vmul.f32 0.015625, %v6157_v61  ;;  %v6256_v56 = vmul.f32 %v15325_v6, %v15325_v6 }
 0xfff   : > { %v10700_v21 = vpop.eup %10699  ;;  %v6496_v25 = vmul.f32 %v15265_v36, %v6458_v40 }
0x1000   : > { %v6459_v51 = vmul.f32 %v10700_v21, %v15123_v30  ;;  %v6398_v37 = vadd.f32 1e-05, %v6366_v42  ;;  %v15332_v50 = vsub.f32 %v15166_v15, %v6193_v18  ;;  %v6344_v17 = vsel %vm860_vm1, %v6256_v56, 0.0 }
0x1001   : > { %6345 = vadd.xlane.f32.xlu0 %v6344_v17  ;;  %v6160_v16 = vpop.xlane.xlu0 %6159  ;;  %v6295_v49 = vpop.xlane.xlu1 %6294  ;;  %v6534_v21 = vadd.f32 %v15277_v7, %v6496_v25 }
0x1002   : > { %10705 = vrsqrt.f32 %v6398_v37  ;;  %v6194_v12 = vmul.f32 0.015625, %v6160_v16  ;;  %v6367_v29 = vmul.f32 0.015625, %v6295_v49  ;;  %v6257_v61 = vmul.f32 %v15332_v50, %v15332_v50 }
0x1003   : > { %v6497_v46 = vmul.f32 %v15265_v36, %v6459_v51 }
0x1004   : > { %v15340_v30 = vsub.f32 %v15175_v0, %v6194_v12  ;;  %v6399_v42 = vadd.f32 1e-05, %v6367_v29  ;;  %v6347_v18 = vsel %vm860_vm1, %v6257_v61, 0.0 }
0x1005   : > { %6348 = vadd.xlane.f32.xlu1 %v6347_v18  ;;  %v6163_v56 = vpop.xlane.xlu1 %6162  ;;  %v6535_v40 = vadd.f32 %v15277_v7, %v6497_v46 }
0x1006   : > { %10707 = vrsqrt.f32 %v6399_v42  ;;  %v6195_v37 = vmul.f32 0.015625, %v6163_v56  ;;  %v6258_v17 = vmul.f32 %v15340_v30, %v15340_v30 }
0x1007   : > { %v10702_v16 = vpop.eup %10701  ;;  %v6563_v49 = vpack.c.bf16 %v6535_v40, %v6534_v21 }
0x1008   : > { %v6460_v51 = vmul.f32 %v10702_v16, %v15145_v9  ;;  %v15349_v12 = vsub.f32 %v15183_v26, %v6195_v37  ;;  %v6350_v29 = vsel %vm860_vm1, %v6258_v17, 0.0 }
0x1009   : > { %8676 = vmatmul.mubr.msk.bf16.gmra.mxu1 %vm860_vm1, %v6563_v49  ;;  %6351 = vadd.xlane.f32.xlu0 %v6350_v29 }
0x100a   : > { %v6259_v46 = vmul.f32 %v15349_v12, %v15349_v12  ;;  %6756 = vmatprep.mubr.bf16.mxu1 %v17016_v13  ;;  %v6498_v9 = vmul.f32 %v15265_v36, %v6460_v51 }
0x100b   : > { %v10704_v25 = vpop.eup %10703 }
0x100c   : > { %v6461_v61 = vmul.f32 %v10704_v25, %v15158_v53  ;;  %v6353_v42 = vsel %vm860_vm1, %v6259_v46, 0.0  ;;  %v6536_v40 = vadd.f32 %v15277_v7, %v6498_v9  ;;  %v10093_v25 = vld [vmem:[%s11342_s1 + $0x78] sm:$0xff]   ;;  %v10097_v9 = vld [vmem:[%s11342_s1 + $0x68] sm:$0xff]  }
0x100d   : > { %6354 = vadd.xlane.f32.xlu1 %v6353_v42  ;;  %9057 = vmatprep.subr.bf16.mxu0 %v10093_v25  ;;  %v10096_v42 = vld [vmem:[%s11342_s1 + $0x30] sm:$0xff]  }
0x100e   : > { %v6499_v18 = vmul.f32 %v15265_v36, %v6461_v61  ;;  %v10095_v61 = vld [vmem:[%s11342_s1 + $0x70] sm:$0xff]  }
0x100f   : > { %v10706_v56 = vpop.eup %10705  ;;  %v10104_v25 = vld [vmem:[%s11342_s1 + $0x10] sm:$0xff]  }
0x1010   : > { %v6462_v21 = vmul.f32 %v10706_v56, %v15155_v59  ;;  %v6537_v37 = vadd.f32 %v15277_v7, %v6499_v18  ;;  %v10098_v18 = vld [vmem:[%s11342_s1 + $0x28] sm:$0xff]   ;;  %v10099_v56 = vld [vmem:[%s11342_s1 + $0x60] sm:$0xff]  }
0x1012   : > { %v6564_v17 = vpack.c.bf16 %v6537_v37, %v6536_v40  ;;  %v6500_v49 = vmul.f32 %v15265_v36, %v6462_v21  ;;  %v10100_v21 = vld [vmem:[%s11342_s1 + $0x20] sm:$0xff]  }
0x1013   : > { %v10708_v16 = vpop.eup %10707 }
0x1014   : > { %v6463_v53 = vmul.f32 %v10708_v16, %v15169_v58  ;;  %8677 = vmatmul.mubr.msk.bf16.gmra.mxu1 %vm860_vm1, %v6564_v17  ;;  %v6538_v51 = vadd.f32 %v15277_v7, %v6500_v49  ;;  %v10094_v58 = vld [vmem:[%s11342_s1 + $0x38] sm:$0xff]  }
0x1015   : > { %6766 = vmatprep.mubr.bf16.mxu1 %v17016_v13  ;;  %9058 = vmatpush3.bf16.msra.mxu0 %v10094_v58  ;;  %v10101_v17 = vld [vmem:[%s11342_s1 + $0x58] sm:$0xff]  }
0x1016   : > { %v6501_v59 = vmul.f32 %v15265_v36, %v6463_v53  ;;  %9059 = vmatprep.subr.bf16.mxu0 %v10095_v61  ;;  %v10102_v16 = vld [vmem:[%s11342_s1 + $0x18] sm:$0xff]  }
0x1018   : > { %v6539_v29 = vadd.f32 %v15277_v7, %v6501_v59 }
0x1019   : > { %9060 = vmatpush3.bf16.msra.mxu0 %v10096_v42 }
0x101a   : > { %v6565_v46 = vpack.c.bf16 %v6539_v29, %v6538_v51  ;;  %9061 = vmatprep.subr.bf16.mxu0 %v10097_v9 }
0x101c   : > { %8678 = vmatmul.mubr.msk.bf16.gmra.mxu1 %vm860_vm1, %v6565_v46  ;;  %v10103_v46 = vld [vmem:[%s11342_s1 + $0x50] sm:$0xff]  }
0x101d   : > { %6776 = vmatprep.mubr.bf16.mxu1 %v17016_v13  ;;  %9062 = vmatpush3.bf16.msra.mxu0 %v10098_v18  ;;  %v10105_v18 = vld [vmem:[%s11342_s1 + $0x48] sm:$0xff]  }
0x101e   : > { %9063 = vmatprep.subr.bf16.mxu0 %v10099_v56  ;;  %v10106_v56 = vld [vmem:[%s11342_s1 + $0x8] sm:$0xff]  }
0x1021   : > { %9064 = vmatpush3.bf16.msra.mxu0 %v10100_v21 }
0x1022   : > { %9065 = vmatprep.subr.bf16.mxu0 %v10101_v17  ;;  %v10107_v17 = vld [vmem:[%s11342_s1 + $0x40] sm:$0xff]  }
0x1025   : > { %9066 = vmatpush3.bf16.msra.mxu0 %v10102_v16  ;;  %v10108_v16 = vld [vmem:[%s11342_s1] sm:$0xff]   ;;  %s17043_s1 = sld [smem:[#allocation101_spill]] (!%p8770_p6) }
0x1026   : > { %9067 = vmatprep.subr.bf16.mxu0 %v10103_v46 }
0x1029   : > { %9068 = vmatpush3.bf16.msra.mxu0 %v10104_v25 }
0x102a   : > { %v6298_v40 = vpop.xlane.xlu0 %6297  ;;  %9069 = vmatprep.subr.bf16.mxu0 %v10105_v18 }
0x102b   : > { %v6368_v37 = vmul.f32 0.015625, %v6298_v40 }
0x102d   : > { %v6400_v53 = vadd.f32 1e-05, %v6368_v37  ;;  %9070 = vmatpush3.bf16.msra.mxu0 %v10106_v56 }
0x102e   : > { %v6304_v49 = vpop.xlane.xlu0 %6303  ;;  %v6301_v59 = vpop.xlane.xlu1 %6300  ;;  %9071 = vmatprep.subr.bf16.mxu0 %v10107_v17 }
0x102f   : > { %10709 = vrsqrt.f32 %v6400_v53  ;;  %v6370_v51 = vmul.f32 0.015625, %v6304_v49  ;;  %v6369_v29 = vmul.f32 0.015625, %v6301_v59 }
0x1031   : > { %v6402_v58 = vadd.f32 1e-05, %v6370_v51  ;;  %v6401_v61 = vadd.f32 1e-05, %v6369_v29  ;;  %9072 = vmatpush3.bf16.msra.mxu0 %v10108_v16 }
0x1032   : > { %v6307_v42 = vpop.xlane.xlu1 %6306 }
0x1033   : > { %v6371_v9 = vmul.f32 0.015625, %v6307_v42  ;;  %10711 = vrsqrt.f32 %v6401_v61 }
0x1034   : > { %10713 = vrsqrt.f32 %v6402_v58 }
0x1035   : > { %v6403_v21 = vadd.f32 1e-05, %v6371_v9 }
0x1036   : > { %v6310_v40 = vpop.xlane.xlu0 %6309 }
0x1037   : > { %10715 = vrsqrt.f32 %v6403_v21  ;;  %v6372_v37 = vmul.f32 0.015625, %v6310_v40 }
0x1039   : > { %v6404_v53 = vadd.f32 1e-05, %v6372_v37 }
0x103a   : > { %v6316_v59 = vpop.xlane.xlu0 %6315 }
0x103b   : > { %v6313_v49 = vpop.xlane.xlu1 %6312  ;;  %10717 = vrsqrt.f32 %v6404_v53  ;;  %v6374_v58 = vmul.f32 0.015625, %v6316_v59 }
0x103c   : > { %v6373_v51 = vmul.f32 0.015625, %v6313_v49  ;;  %v10710_v29 = vpop.eup %10709 }
0x103d   : > { %v6464_v25 = vmul.f32 %v10710_v29, %v15191_v34  ;;  %v6406_v40 = vadd.f32 1e-05, %v6374_v58 }
0x103e   : > { %v6405_v46 = vadd.f32 1e-05, %v6373_v51 }
0x103f   : > { %v6319_v61 = vpop.xlane.xlu1 %6318  ;;  %v6502_v37 = vmul.f32 %v15265_v36, %v6464_v25 }
0x1040   : > { %v6375_v42 = vmul.f32 0.015625, %v6319_v61  ;;  %10719 = vrsqrt.f32 %v6405_v46  ;;  %v10712_v9 = vpop.eup %10711 }
0x1041   : > { %v10714_v56 = vpop.eup %10713  ;;  %v6465_v21 = vmul.f32 %v10712_v9, %v15199_v62  ;;  %v6540_v29 = vadd.f32 %v15277_v7, %v6502_v37 }
0x1042   : > { %v6407_v18 = vadd.f32 1e-05, %v6375_v42  ;;  %v6322_v17 = vpop.xlane.xlu0 %6321  ;;  %v6466_v34 = vmul.f32 %v10714_v56, %v15196_v11 }
0x1043   : > { %v6503_v49 = vmul.f32 %v15265_v36, %v6465_v21  ;;  %v6376_v59 = vmul.f32 0.015625, %v6322_v17 }
0x1044   : > { %v10716_v16 = vpop.eup %10715  ;;  %10721 = vrsqrt.f32 %v6407_v18  ;;  %v6504_v42 = vmul.f32 %v15265_v36, %v6466_v34 }
0x1045   : > { %v6467_v53 = vmul.f32 %v10716_v16, %v15207_v1  ;;  %10723 = vrsqrt.f32 %v6406_v40  ;;  %v6541_v46 = vadd.f32 %v15277_v7, %v6503_v49  ;;  %v6408_v9 = vadd.f32 1e-05, %v6376_v59 }
0x1046   : > { %v6542_v21 = vadd.f32 %v15277_v7, %v6504_v42 }
0x1047   : > { %v6325_v51 = vpop.xlane.xlu1 %6324  ;;  %v6566_v58 = vpack.c.bf16 %v6541_v46, %v6540_v29  ;;  %v6505_v25 = vmul.f32 %v15265_v36, %v6467_v53 }
0x1048   : > { %v6377_v62 = vmul.f32 0.015625, %v6325_v51  ;;  %v10718_v11 = vpop.eup %10717 }
0x1049   : > { %8679 = vmatmul.mubr.msk.bf16.gmra.mxu1 %vm860_vm1, %v6566_v58  ;;  %v6543_v1 = vadd.f32 %v15277_v7, %v6505_v25  ;;  %v6468_v40 = vmul.f32 %v10718_v11, %v15214_v14 }
0x104a   : > { %v6409_v61 = vadd.f32 1e-05, %v6377_v62  ;;  %v6328_v18 = vpop.xlane.xlu0 %6327  ;;  %6786 = vmatprep.mubr.bf16.mxu1 %v17016_v13 }
0x104b   : > { %v6378_v17 = vmul.f32 0.015625, %v6328_v18  ;;  %v6567_v34 = vpack.c.bf16 %v6543_v1, %v6542_v21  ;;  %v6506_v46 = vmul.f32 %v15265_v36, %v6468_v40 }
0x104c   : > { %10725 = vrsqrt.f32 %v6409_v61 }
0x104d   : > { %v10720_v56 = vpop.eup %10719  ;;  %10727 = vrsqrt.f32 %v6408_v9  ;;  %v6410_v29 = vadd.f32 1e-05, %v6378_v17  ;;  %v6544_v25 = vadd.f32 %v15277_v7, %v6506_v46 }
0x104e   : > { %v6469_v37 = vmul.f32 %v10720_v56, %v15223_v32 }
0x104f   : > { %v6331_v16 = vpop.xlane.xlu1 %6330 }
0x1050   : > { %v6379_v49 = vmul.f32 0.015625, %v6331_v16  ;;  %v6507_v53 = vmul.f32 %v15265_v36, %v6469_v37 }
0x1051   : > { %v10722_v59 = vpop.eup %10721  ;;  %8680 = vmatmul.mubr.msk.bf16.gmra.mxu1 %vm860_vm1, %v6567_v34 }
0x1052   : > { %v6411_v51 = vadd.f32 1e-05, %v6379_v49  ;;  %v10724_v62 = vpop.eup %10723  ;;  %6796 = vmatprep.mubr.bf16.mxu1 %v17016_v13  ;;  %v6471_v14 = vmul.f32 %v10722_v59, %v15231_v22  ;;  %v6545_v32 = vadd.f32 %v15277_v7, %v6507_v53 }
0x1053   : > { %v6470_v58 = vmul.f32 %v10724_v62, %v15220_v43 }
0x1054   : > { %10729 = vrsqrt.f32 %v6411_v51  ;;  %v6568_v61 = vpack.c.bf16 %v6545_v32, %v6544_v25  ;;  %v6509_v42 = vmul.f32 %v15265_v36, %v6471_v14 }
0x1055   : > { %10731 = vrsqrt.f32 %v6410_v29  ;;  %v6508_v11 = vmul.f32 %v15265_v36, %v6470_v58 }
0x1056   : > { %v6547_v1 = vadd.f32 %v15277_v7, %v6509_v42 }
0x1057   : > { %v6546_v56 = vadd.f32 %v15277_v7, %v6508_v11 }
0x1059   : > { %v10726_v9 = vpop.eup %10725  ;;  %8681 = vmatmul.mubr.msk.bf16.gmra.mxu1 %vm860_vm1, %v6568_v61  ;;  %v6569_v21 = vpack.c.bf16 %v6547_v1, %v6546_v56  ;;  %v6584_v1 = vld [vmem:[%s11336_s28] sm:$0x3] }
0x105a   : > { %v10728_v18 = vpop.eup %10727  ;;  %6806 = vmatprep.mubr.bf16.mxu1 %v17016_v13  ;;  %v6473_v22 = vmul.f32 %v10726_v9, %v15244_v45  ;;  %v17029_v56 = vld [vmem:[#allocation7_spill] sm:$0xff] }
0x105b   : > { %v6472_v43 = vmul.f32 %v10728_v18, %v15238_v38 }
0x105c   : > { %v6511_v40 = vmul.f32 %v15265_v36, %v6473_v22 }
0x105d   : > { %v6510_v17 = vmul.f32 %v15265_v36, %v6472_v43 }
0x105e   : > { %v6549_v45 = vadd.f32 %v15277_v7, %v6511_v40 }
0x105f   : > { %v6548_v38 = vadd.f32 %v15277_v7, %v6510_v17 }
0x1061   : > { %v10730_v37 = vpop.eup %10729  ;;  %8682 = vmatmul.mubr.msk.bf16.gmra.mxu1 %vm860_vm1, %v6569_v21  ;;  %v6570_v53 = vpack.c.bf16 %v6549_v45, %v6548_v38  ;;  %v17030_v21 = vsub.s32 0, %v17029_v56 }
0x1062   : > { %v10732_v16 = vpop.eup %10731  ;;  %6816 = vmatprep.mubr.bf16.mxu1 %v17016_v13  ;;  %v6475_v49 = vmul.f32 %v10730_v37, %v15257_v57 }
0x1063   : > { %v6474_v34 = vmul.f32 %v10732_v16, %v15250_v48  ;;  %v15439_v40 = vrot.slane %v6584_v1, %v17030_v21 }
0x1064   : > { %v6513_v59 = vmul.f32 %v15265_v36, %v6475_v49  ;;  %v17031_v49 = vsub.s32 1, %v17029_v56 }
0x1065   : > { %v6512_v51 = vmul.f32 %v15265_v36, %v6474_v34 }
0x1066   : > { %v6551_v29 = vadd.f32 %v15277_v7, %v6513_v59  ;;  %v15444_v45 = vrot.slane %v6584_v1, %v17031_v49 }
0x1067   : > { %v6550_v46 = vadd.f32 %v15277_v7, %v6512_v51 }
0x1069   : > { %8683 = vmatmul.mubr.msk.bf16.gmra.mxu1 %vm860_vm1, %v6570_v53  ;;  %v6571_v57 = vpack.c.bf16 %v6551_v29, %v6550_v46 }
0x106a   : > { %6826 = vmatprep.mubr.bf16.mxu1 %v17016_v13 }
0x1071   : > { %8684 = vmatmul.mubr.msk.bf16.gmra.mxu1 %vm860_vm1, %v6571_v57 }
0x1072   : > { %6836 = vmatprep.mubr.bf16.mxu1 %v17016_v13 }
0x1076   : > { %v6334_v48 = vpop.xlane.xlu0 %6333 }
0x1077   : > { %v6380_v62 = vmul.f32 0.015625, %v6334_v48 }
0x1079   : > { %v6412_v14 = vadd.f32 1e-05, %v6380_v62 }
0x107a   : > { %v6337_v32 = vpop.xlane.xlu1 %6336 }
0x107b   : > { %10733 = vrsqrt.f32 %v6412_v14  ;;  %v6381_v58 = vmul.f32 0.015625, %v6337_v32 }
0x107d   : > { %v6413_v25 = vadd.f32 1e-05, %v6381_v58 }
0x107e   : > { %v6340_v61 = vpop.xlane.xlu0 %6339 }
0x107f   : > { %v6382_v42 = vmul.f32 0.015625, %v6340_v61  ;;  %10735 = vrsqrt.f32 %v6413_v25 }
0x1081   : > { %v6414_v9 = vadd.f32 1e-05, %v6382_v42 }
0x1082   : > { %v6343_v11 = vpop.xlane.xlu1 %6342 }
0x1083   : > { %10737 = vrsqrt.f32 %v6414_v9  ;;  %v6383_v18 = vmul.f32 0.015625, %v6343_v11 }
0x1085   : > { %v6415_v22 = vadd.f32 1e-05, %v6383_v18 }
0x1087   : > { %10739 = vrsqrt.f32 %v6415_v22 }
0x1088   : > { %v10734_v43 = vpop.eup %10733 }
0x1089   : > { %v6476_v37 = vmul.f32 %v10734_v43, %v15293_v39 }
0x108a   : > { %v6346_v17 = vpop.xlane.xlu0 %6345 }
0x108b   : > { %v6384_v16 = vmul.f32 0.015625, %v6346_v17  ;;  %v6514_v57 = vmul.f32 %v15265_v36, %v6476_v37 }
0x108c   : > { %v10736_v38 = vpop.eup %10735 }
0x108d   : > { %v6718_v34 = vpop.f32.mrf.mxu1  ;;  %v6416_v53 = vadd.f32 1e-05, %v6384_v16  ;;  %v6477_v51 = vmul.f32 %v10736_v38, %v15298_v3  ;;  %v6552_v22 = vadd.f32 %v15277_v7, %v6514_v57 }
0x108e   : > { %v15447_v59 = vadd.f32 %v6718_v34, %v15439_v40  ;;  %v6349_v46 = vpop.xlane.xlu1 %6348 }
0x108f   : > { %v6720_v29 = vpop.f32.mrf.mxu1  ;;  %10741 = vrsqrt.f32 %v6416_v53  ;;  %v6385_v62 = vmul.f32 0.015625, %v6349_v46  ;;  %v6515_v58 = vmul.f32 %v15265_v36, %v6477_v51 }
0x1090   : > { %v8689_v39 = vmul.f32 -1.702, %v15447_v59  ;;  %v15453_v48 = vadd.f32 %v6720_v29, %v15444_v45  ;;  %v10738_v14 = vpop.eup %10737 }
0x1091   : > { %v6722_v32 = vpop.f32.mrf.mxu1  ;;  %v6417_v42 = vadd.f32 1e-05, %v6385_v62  ;;  %v6478_v3 = vmul.f32 %v10738_v14, %v15305_v41  ;;  %v6553_v1 = vadd.f32 %v15277_v7, %v6515_v58 }
0x1092   : > { %v7005_v25 = vmul.f32 1.442695, %v8689_v39  ;;  %v8690_v61 = vmul.f32 -1.702, %v15453_v48  ;;  %v15459_v9 = vadd.f32 %v6722_v32, %v15439_v40  ;;  %v6352_v11 = vpop.xlane.xlu0 %6351 }
0x1093   : > { %v6724_v18 = vpop.f32.mrf.mxu1  ;;  %v6386_v56 = vmul.f32 0.015625, %v6352_v11  ;;  %v6572_v16 = vpack.c.bf16 %v6553_v1, %v6552_v22  ;;  %v6516_v57 = vmul.f32 %v15265_v36, %v6478_v3 }
0x1094   : > { %10743 = vpow2.f32 %v7005_v25  ;;  %v7007_v43 = vmul.f32 1.442695, %v8690_v61  ;;  %v15464_v21 = vadd.f32 %v6724_v18, %v15444_v45  ;;  %v10740_v37 = vpop.eup %10739  ;;  %v8691_v17 = vmul.f32 -1.702, %v15459_v9 }
0x1095   : > { %10745 = vrsqrt.f32 %v6417_v42  ;;  %v6728_v41 = vpop.f32.mrf.mxu1  ;;  %v6479_v49 = vmul.f32 %v10740_v37, %v15313_v20  ;;  %v6418_v34 = vadd.f32 1e-05, %v6386_v56  ;;  %8685 = vmatmul.mubr.msk.bf16.gmra.mxu1 %vm860_vm1, %v6572_v16  ;;  %v6554_v18 = vadd.f32 %v15277_v7, %v6516_v57 }
0x1096   : > { %10747 = vpow2.f32 %v7007_v43  ;;  %v8692_v38 = vmul.f32 -1.702, %v15464_v21  ;;  %v7009_v53 = vmul.f32 1.442695, %v8691_v17  ;;  %v15470_v51 = vadd.f32 %v6728_v41, %v15439_v40  ;;  %v6355_v46 = vpop.xlane.xlu1 %6354  ;;  %6846 = vmatprep.mubr.bf16.mxu1 %v17016_v13 }
0x1097   : > { %v6730_v29 = vpop.f32.mrf.mxu1  ;;  %10749 = vrsqrt.f32 %v6418_v34  ;;  %v6387_v20 = vmul.f32 0.015625, %v6355_v46  ;;  %v6517_v58 = vmul.f32 %v15265_v36, %v6479_v49 }
0x1098   : > { %v7011_v39 = vmul.f32 1.442695, %v8692_v38  ;;  %v15475_v62 = vadd.f32 %v6730_v29, %v15444_v45  ;;  %10751 = vpow2.f32 %v7009_v53  ;;  %v8693_v14 = vmul.f32 -1.702, %v15470_v51 }
0x1099   : > { %v6732_v32 = vpop.f32.mrf.mxu1  ;;  %v6419_v61 = vadd.f32 1e-05, %v6387_v20  ;;  %v6555_v22 = vadd.f32 %v15277_v7, %v6517_v58 }
0x109a   : > { %10753 = vpow2.f32 %v7011_v39  ;;  %v8694_v25 = vmul.f32 -1.702, %v15475_v62  ;;  %v15482_v42 = vadd.f32 %v6732_v32, %v15439_v40  ;;  %v7013_v3 = vmul.f32 1.442695, %v8693_v14 }
0x109b   : > { %v6734_v11 = vpop.f32.mrf.mxu1  ;;  %10755 = vrsqrt.f32 %v6419_v61  ;;  %v6573_v17 = vpack.c.bf16 %v6555_v22, %v6554_v18 }
0x109c   : > { %v7015_v1 = vmul.f32 1.442695, %v8694_v25  ;;  %v8695_v43 = vmul.f32 -1.702, %v15482_v42  ;;  %v15488_v56 = vadd.f32 %v6734_v11, %v15444_v45  ;;  %v10742_v37 = vpop.eup %10741  ;;  %10757 = vpow2.f32 %v7013_v3 }
0x109d   : > { %v6480_v49 = vmul.f32 %v10742_v37, %v15325_v6  ;;  %8686 = vmatmul.mubr.msk.bf16.gmra.mxu1 %vm860_vm1, %v6573_v17 }
0x109e   : > { %10759 = vpow2.f32 %v7015_v1  ;;  %v7017_v41 = vmul.f32 1.442695, %v8695_v43  ;;  %v8696_v16 = vmul.f32 -1.702, %v15488_v56  ;;  %6856 = vmatprep.mubr.bf16.mxu1 %v17016_v13 }
0x109f   : > { %v6518_v39 = vmul.f32 %v15265_v36, %v6480_v49 }
0x10a0   : > { %10761 = vpow2.f32 %v7017_v41  ;;  %v7019_v34 = vmul.f32 1.442695, %v8696_v16 }
0x10a1   : > { %v10744_v38 = vpop.eup %10743  ;;  %v6556_v3 = vadd.f32 %v15277_v7, %v6518_v39 }
0x10a2   : > { %v10746_v53 = vpop.eup %10745  ;;  %10763 = vpow2.f32 %v7019_v34  ;;  %v7133_v46 = vadd.f32 1.0, %v10744_v38 }
0x10a3   : > { %v10748_v29 = vpop.eup %10747  ;;  %v6481_v57 = vmul.f32 %v10746_v53, %v15332_v50 }
0x10a4   : > { %v7134_v20 = vadd.f32 1.0, %v10748_v29  ;;  %v10750_v14 = vpop.eup %10749  ;;  %10765 = vrcp.f32 %v7133_v46 }
0x10a5   : > { %v6519_v32 = vmul.f32 %v15265_v36, %v6481_v57  ;;  %v10752_v6 = vpop.eup %10751  ;;  %v6482_v58 = vmul.f32 %v10750_v14, %v15340_v30 }
0x10a6   : > { %v7135_v61 = vadd.f32 1.0, %v10752_v6  ;;  %10767 = vrcp.f32 %v7134_v20 }
0x10a7   : > { %v10754_v25 = vpop.eup %10753  ;;  %v6557_v11 = vadd.f32 %v15277_v7, %v6519_v32  ;;  %v6520_v37 = vmul.f32 %v15265_v36, %v6482_v58 }
0x10a8   : > { %v7136_v18 = vadd.f32 1.0, %v10754_v25  ;;  %v10756_v22 = vpop.eup %10755  ;;  %10769 = vrcp.f32 %v7135_v61 }
0x10a9   : > { %v6574_v50 = vpack.c.bf16 %v6557_v11, %v6556_v3  ;;  %v10758_v1 = vpop.eup %10757  ;;  %v6483_v43 = vmul.f32 %v10756_v22, %v15349_v12  ;;  %v6558_v38 = vadd.f32 %v15277_v7, %v6520_v37 }
0x10aa   : > { %10771 = vrcp.f32 %v7136_v18  ;;  %v7137_v49 = vadd.f32 1.0, %v10758_v1 }
0x10ab   : > { %v10760_v17 = vpop.eup %10759  ;;  %8687 = vmatmul.mubr.msk.bf16.gmra.mxu1 %vm860_vm1, %v6574_v50  ;;  %v6521_v41 = vmul.f32 %v15265_v36, %v6483_v43 }
0x10ac   : > { %v7138_v30 = vadd.f32 1.0, %v10760_v17  ;;  %6866 = vmatprep.mubr.bf16.mxu1 %v17016_v13 }
0x10ad   : > { %v10762_v16 = vpop.eup %10761  ;;  %v6559_v53 = vadd.f32 %v15277_v7, %v6521_v41 }
0x10ae   : > { %v7139_v34 = vadd.f32 1.0, %v10762_v16  ;;  %10773 = vrcp.f32 %v7138_v30 }
0x10af   : > { %v10764_v29 = vpop.eup %10763  ;;  %v6575_v46 = vpack.c.bf16 %v6559_v53, %v6558_v38 }
0x10b0   : > { %10775 = vrcp.f32 %v7139_v34  ;;  %v7140_v12 = vadd.f32 1.0, %v10764_v29 }
0x10b1   : > { %10777 = vrcp.f32 %v7137_v49  ;;  %v10766_v57 = vpop.eup %10765 }
0x10b2   : > { %10779 = vrcp.f32 %v7140_v12  ;;  %v7325_v7 = vmul.f32 %v10766_v57, %v15447_v59 }
0x10b3   : > { %8688 = vmatmul.mubr.msk.bf16.gmra.mxu1 %vm860_vm1, %v6575_v46  ;;  %v10768_v13 = vpop.eup %10767 }
0x10b4   : > { %v7326_v14 = vmul.f32 %v10768_v13, %v15453_v48 }
0x10b5   : > { %v10770_v39 = vpop.eup %10769 }
0x10b6   : > { %v7327_v20 = vmul.f32 %v10770_v39, %v15459_v9 }
0x10b7   : > { %v10772_v36 = vpop.eup %10771 }
0x10b8   : > { %v7328_v32 = vmul.f32 %v10772_v36, %v15464_v21  ;;  %v7389_v58 = vpack.c.bf16 %v7327_v20, %v7325_v7 }
0x10ba   : > { %v7390_v6 = vpack.c.bf16 %v7328_v32, %v7326_v14 }
0x10bb   : > { %v6738_v25 = vpop.f32.mrf.mxu1  ;;  %v10774_v61 = vpop.eup %10773 }
0x10bc   : > { %v15513_v3 = vadd.f32 %v6738_v25, %v15439_v40  ;;  %7581 = vmatprep.mubr.bf16.mxu0 %v7390_v6  ;;  %v7330_v1 = vmul.f32 %v10774_v61, %v15475_v62 }
0x10bd   : > { %v10776_v11 = vpop.eup %10775  ;;  %7582 = vmatmul.mubr.bf16.vlgmr.msra.gmra.mxu0 %v7389_v58  ;;  %v6740_v18 = vpop.f32.mrf.mxu1 }
0x10be   : > { %v10778_v22 = vpop.eup %10777  ;;  %v8697_v9 = vmul.f32 -1.702, %v15513_v3  ;;  %v15517_v48 = vadd.f32 %v6740_v18, %v15444_v45  ;;  %v7331_v59 = vmul.f32 %v10776_v11, %v15482_v42 }
0x10bf   : > { %v10780_v21 = vpop.eup %10779  ;;  %v6742_v50 = vpop.f32.mrf.mxu1  ;;  %v7329_v30 = vmul.f32 %v10778_v22, %v15470_v51 }
0x10c0   : > { %v7332_v43 = vmul.f32 %v10780_v21, %v15488_v56  ;;  %v7021_v37 = vmul.f32 1.442695, %v8697_v9  ;;  %v8698_v17 = vmul.f32 -1.702, %v15517_v48  ;;  %v15525_v41 = vadd.f32 %v6742_v50, %v15439_v40 }
0x10c1   : > { %v6744_v16 = vpop.f32.mrf.mxu1  ;;  %v7391_v38 = vpack.c.bf16 %v7331_v59, %v7329_v30 }
0x10c2   : > { %10781 = vpow2.f32 %v7021_v37  ;;  %v7023_v49 = vmul.f32 1.442695, %v8698_v17  ;;  %v15528_v34 = vadd.f32 %v6744_v16, %v15444_v45  ;;  %v7392_v42 = vpack.c.bf16 %v7332_v43, %v7330_v1 }
0x10c3   : > { %v8699_v62 = vmul.f32 -1.702, %v15525_v41 }
0x10c4   : > { %10783 = vpow2.f32 %v7023_v49  ;;  %v8700_v56 = vmul.f32 -1.702, %v15528_v34  ;;  %7589 = vmatprep.mubr.bf16.mxu0 %v7392_v42 }
0x10c5   : > { %v7025_v53 = vmul.f32 1.442695, %v8699_v62  ;;  %7590 = vmatmul.mubr.bf16.gmra.mxu0 %v7391_v38 }
0x10c6   : > { %v7027_v51 = vmul.f32 1.442695, %v8700_v56 }
0x10c7   : > { %10785 = vpow2.f32 %v7025_v53 }
0x10c8   : > { %10787 = vpow2.f32 %v7027_v51 }
0x10c9   : > { %v6748_v29 = vpop.f32.mrf.mxu1 }
0x10ca   : > { %v15533_v12 = vadd.f32 %v6748_v29, %v15439_v40 }
0x10cb   : > { %v6750_v46 = vpop.f32.mrf.mxu1 }
0x10cc   : > { %v8701_v57 = vmul.f32 -1.702, %v15533_v12  ;;  %v15537_v13 = vadd.f32 %v6750_v46, %v15444_v45 }
0x10cd   : > { %v6752_v39 = vpop.f32.mrf.mxu1 }
0x10ce   : > { %v7029_v20 = vmul.f32 1.442695, %v8701_v57  ;;  %v8702_v14 = vmul.f32 -1.702, %v15537_v13  ;;  %v15541_v32 = vadd.f32 %v6752_v39, %v15439_v40 }
0x10cf   : > { %v10782_v36 = vpop.eup %10781  ;;  %v6754_v7 = vpop.f32.mrf.mxu1 }
0x10d0   : > { %10789 = vpow2.f32 %v7029_v20  ;;  %v7031_v58 = vmul.f32 1.442695, %v8702_v14  ;;  %v8703_v25 = vmul.f32 -1.702, %v15541_v32  ;;  %v15545_v61 = vadd.f32 %v6754_v7, %v15444_v45 }
0x10d1   : > { %v10784_v6 = vpop.eup %10783  ;;  %v7141_v11 = vadd.f32 1.0, %v10782_v36 }
0x10d2   : > { %v7142_v18 = vadd.f32 1.0, %v10784_v6  ;;  %10791 = vpow2.f32 %v7031_v58  ;;  %v7033_v22 = vmul.f32 1.442695, %v8703_v25  ;;  %v8704_v9 = vmul.f32 -1.702, %v15545_v61 }
0x10d4   : > { %v10786_v21 = vpop.eup %10785  ;;  %10793 = vrcp.f32 %v7142_v18  ;;  %v7035_v1 = vmul.f32 1.442695, %v8704_v9  ;;  %v6758_v43 = vpop.f32.mrf.mxu1 }
0x10d5   : > { %v10788_v59 = vpop.eup %10787  ;;  %v7143_v50 = vadd.f32 1.0, %v10786_v21  ;;  %10795 = vpow2.f32 %v7033_v22  ;;  %v15549_v17 = vadd.f32 %v6758_v43, %v15439_v40 }
0x10d6   : > { %10797 = vrcp.f32 %v7141_v11  ;;  %v7144_v37 = vadd.f32 1.0, %v10788_v59  ;;  %v6760_v30 = vpop.f32.mrf.mxu1 }
0x10d7   : > { %10799 = vrcp.f32 %v7143_v50  ;;  %v8705_v16 = vmul.f32 -1.702, %v15549_v17  ;;  %v15553_v49 = vadd.f32 %v6760_v30, %v15444_v45 }
0x10d8   : > { %10801 = vrcp.f32 %v7144_v37  ;;  %v6762_v42 = vpop.f32.mrf.mxu1 }
0x10d9   : > { %10803 = vpow2.f32 %v7035_v1  ;;  %v7037_v38 = vmul.f32 1.442695, %v8705_v16  ;;  %v8706_v62 = vmul.f32 -1.702, %v15553_v49  ;;  %v15557_v56 = vadd.f32 %v6762_v42, %v15439_v40 }
0x10da   : > { %v6764_v53 = vpop.f32.mrf.mxu1 }
0x10db   : > { %v7039_v51 = vmul.f32 1.442695, %v8706_v62  ;;  %v8707_v29 = vmul.f32 -1.702, %v15557_v56  ;;  %v15561_v46 = vadd.f32 %v6764_v53, %v15444_v45  ;;  %10805 = vpow2.f32 %v7037_v38 }
0x10dc   : > { %v6768_v57 = vpop.f32.mrf.mxu1 }
0x10dd   : > { %v10790_v39 = vpop.eup %10789  ;;  %10807 = vpow2.f32 %v7039_v51  ;;  %v7041_v36 = vmul.f32 1.442695, %v8707_v29  ;;  %v8708_v20 = vmul.f32 -1.702, %v15561_v46  ;;  %v15565_v14 = vadd.f32 %v6768_v57, %v15439_v40 }
0x10de   : > { %v7145_v7 = vadd.f32 1.0, %v10790_v39  ;;  %v6770_v6 = vpop.f32.mrf.mxu1 }
0x10df   : > { %v10792_v58 = vpop.eup %10791  ;;  %10809 = vpow2.f32 %v7041_v36  ;;  %v7043_v25 = vmul.f32 1.442695, %v8708_v20  ;;  %v8709_v11 = vmul.f32 -1.702, %v15565_v14  ;;  %v15569_v9 = vadd.f32 %v6770_v6, %v15444_v45 }
0x10e0   : > { %v7146_v22 = vadd.f32 1.0, %v10792_v58  ;;  %v6772_v21 = vpop.f32.mrf.mxu1 }
0x10e1   : > { %v10794_v18 = vpop.eup %10793  ;;  %10811 = vpow2.f32 %v7043_v25  ;;  %v7045_v50 = vmul.f32 1.442695, %v8709_v11  ;;  %v15572_v1 = vadd.f32 %v6772_v21, %v15439_v40  ;;  %v8710_v30 = vmul.f32 -1.702, %v15569_v9 }
0x10e2   : > { %v10796_v59 = vpop.eup %10795  ;;  %10813 = vrcp.f32 %v7145_v7  ;;  %v6774_v16 = vpop.f32.mrf.mxu1  ;;  %v7334_v51 = vmul.f32 %v10794_v18, %v15517_v48 }
0x10e3   : > { %v10798_v43 = vpop.eup %10797  ;;  %v7147_v37 = vadd.f32 1.0, %v10796_v59  ;;  %10815 = vrcp.f32 %v7146_v22  ;;  %v8711_v38 = vmul.f32 -1.702, %v15572_v1  ;;  %v15577_v62 = vadd.f32 %v6774_v16, %v15444_v45 }
0x10e4   : > { %v10800_v42 = vpop.eup %10799  ;;  %10817 = vpow2.f32 %v7045_v50  ;;  %v7047_v57 = vmul.f32 1.442695, %v8710_v30  ;;  %v7333_v6 = vmul.f32 %v10798_v43, %v15513_v3 }
0x10e5   : > { %v10802_v53 = vpop.eup %10801  ;;  %v7335_v29 = vmul.f32 %v10800_v42, %v15525_v41  ;;  %10819 = vrcp.f32 %v7147_v37  ;;  %v7049_v20 = vmul.f32 1.442695, %v8711_v38  ;;  %v8712_v7 = vmul.f32 -1.702, %v15577_v62 }
0x10e6   : > { %v10804_v39 = vpop.eup %10803  ;;  %v7336_v36 = vmul.f32 %v10802_v53, %v15528_v34  ;;  %10821 = vpow2.f32 %v7047_v57 }
0x10e7   : > { %v7148_v58 = vadd.f32 1.0, %v10804_v39  ;;  %10823 = vpow2.f32 %v7049_v20  ;;  %v7051_v25 = vmul.f32 1.442695, %v8712_v7  ;;  %v7393_v22 = vpack.c.bf16 %v7335_v29, %v7333_v6 }
0x10e8   : > { %v7394_v11 = vpack.c.bf16 %v7336_v36, %v7334_v51  ;;  %v10806_v48 = vpop.eup %10805 }
0x10e9   : > { %10825 = vrcp.f32 %v7148_v58  ;;  %v7149_v21 = vadd.f32 1.0, %v10806_v48 }
0x10ea   : > { %10827 = vpow2.f32 %v7051_v25  ;;  %7597 = vmatprep.mubr.bf16.mxu0 %v7394_v11  ;;  %v10808_v41 = vpop.eup %10807 }
0x10eb   : > { %7598 = vmatmul.mubr.bf16.gmra.mxu0 %v7393_v22  ;;  %v7150_v18 = vadd.f32 1.0, %v10808_v41 }
0x10ec   : > { %v10810_v34 = vpop.eup %10809 }
0x10ed   : > { %v7151_v59 = vadd.f32 1.0, %v10810_v34  ;;  %10829 = vrcp.f32 %v7150_v18 }
0x10ee   : > { %v10812_v50 = vpop.eup %10811 }
0x10ef   : > { %v10814_v37 = vpop.eup %10813  ;;  %10831 = vrcp.f32 %v7151_v59  ;;  %v7152_v3 = vadd.f32 1.0, %v10812_v50 }
0x10f0   : > { %v10816_v43 = vpop.eup %10815  ;;  %10833 = vrcp.f32 %v7149_v21  ;;  %v7337_v6 = vmul.f32 %v10814_v37, %v15533_v12 }
0x10f1   : > { %v10818_v30 = vpop.eup %10817  ;;  %10835 = vrcp.f32 %v7152_v3  ;;  %v7338_v20 = vmul.f32 %v10816_v43, %v15537_v13 }
0x10f2   : > { %v10820_v16 = vpop.eup %10819  ;;  %v7153_v53 = vadd.f32 1.0, %v10818_v30 }
0x10f3   : > { %v10822_v42 = vpop.eup %10821  ;;  %v7339_v57 = vmul.f32 %v10820_v16, %v15541_v32 }
0x10f4   : > { %v10824_v38 = vpop.eup %10823  ;;  %v7154_v51 = vadd.f32 1.0, %v10822_v42 }
0x10f5   : > { %v7155_v39 = vadd.f32 1.0, %v10824_v38  ;;  %v7395_v11 = vpack.c.bf16 %v7339_v57, %v7337_v6 }
0x10f6   : > { %v10826_v29 = vpop.eup %10825  ;;  %10837 = vrcp.f32 %v7154_v51 }
0x10f7   : > { %v10828_v36 = vpop.eup %10827  ;;  %v7340_v7 = vmul.f32 %v10826_v29, %v15545_v61  ;;  %10839 = vrcp.f32 %v7155_v39 }
0x10f8   : > { %v7156_v58 = vadd.f32 1.0, %v10828_v36  ;;  %10841 = vrcp.f32 %v7153_v53 }
0x10f9   : > { %v7396_v25 = vpack.c.bf16 %v7340_v7, %v7338_v20 }
0x10fa   : > { %10843 = vrcp.f32 %v7156_v58  ;;  %v10830_v22 = vpop.eup %10829 }
0x10fb   : > { %7605 = vmatprep.mubr.bf16.mxu0 %v7396_v25  ;;  %v7342_v13 = vmul.f32 %v10830_v22, %v15553_v49 }
0x10fc   : > { %7606 = vmatmul.mubr.bf16.gmra.mxu0 %v7395_v11  ;;  %v10832_v48 = vpop.eup %10831 }
0x10fd   : > { %v10834_v32 = vpop.eup %10833  ;;  %v7343_v18 = vmul.f32 %v10832_v48, %v15557_v56 }
0x10fe   : > { %v10836_v41 = vpop.eup %10835  ;;  %v7341_v12 = vmul.f32 %v10834_v32, %v15549_v17 }
0x10ff   : > { %v7344_v61 = vmul.f32 %v10836_v41, %v15561_v46 }
0x1100   : > { %v7397_v21 = vpack.c.bf16 %v7343_v18, %v7341_v12 }
0x1101   : > { %v7398_v34 = vpack.c.bf16 %v7344_v61, %v7342_v13 }
0x1103   : > { %v10838_v59 = vpop.eup %10837  ;;  %7613 = vmatprep.mubr.bf16.mxu0 %v7398_v34 }
0x1104   : > { %v10840_v50 = vpop.eup %10839  ;;  %7614 = vmatmul.mubr.bf16.gmra.mxu0 %v7397_v21  ;;  %v7346_v30 = vmul.f32 %v10838_v59, %v15569_v9 }
0x1105   : > { %v10842_v37 = vpop.eup %10841  ;;  %v7347_v43 = vmul.f32 %v10840_v50, %v15572_v1 }
0x1106   : > { %v7345_v49 = vmul.f32 %v10842_v37, %v15565_v14 }
0x1107   : > { %v10844_v3 = vpop.eup %10843 }
0x1108   : > { %v7348_v56 = vmul.f32 %v10844_v3, %v15577_v62  ;;  %v7399_v46 = vpack.c.bf16 %v7347_v43, %v7345_v49 }
0x1109   : > { %v6778_v42 = vpop.f32.mrf.mxu1 }
0x110a   : > { %v7400_v16 = vpack.c.bf16 %v7348_v56, %v7346_v30  ;;  %v15597_v17 = vadd.f32 %v6778_v42, %v15439_v40 }
0x110b   : > { %v6780_v38 = vpop.f32.mrf.mxu1 }
0x110c   : > { %7621 = vmatprep.mubr.bf16.mxu0 %v7400_v16  ;;  %v8713_v53 = vmul.f32 -1.702, %v15597_v17  ;;  %v15601_v51 = vadd.f32 %v6780_v38, %v15444_v45 }
0x110d   : > { %7622 = vmatmul.mubr.bf16.gmra.mxu0 %v7399_v46  ;;  %v6782_v1 = vpop.f32.mrf.mxu1 }
0x110e   : > { %v7053_v9 = vmul.f32 1.442695, %v8713_v53  ;;  %v8714_v62 = vmul.f32 -1.702, %v15601_v51  ;;  %v15605_v14 = vadd.f32 %v6782_v1, %v15439_v40 }
0x110f   : > { %v6784_v29 = vpop.f32.mrf.mxu1 }
0x1110   : > { %10845 = vpow2.f32 %v7053_v9  ;;  %v7055_v57 = vmul.f32 1.442695, %v8714_v62  ;;  %v8715_v39 = vmul.f32 -1.702, %v15605_v14  ;;  %v15609_v36 = vadd.f32 %v6784_v29, %v15444_v45 }
0x1111   : > { %v6788_v20 = vpop.f32.mrf.mxu1 }
0x1112   : > { %10847 = vpow2.f32 %v7055_v57  ;;  %v7057_v7 = vmul.f32 1.442695, %v8715_v39  ;;  %v8716_v6 = vmul.f32 -1.702, %v15609_v36  ;;  %v15613_v58 = vadd.f32 %v6788_v20, %v15439_v40 }
0x1113   : > { %v6790_v25 = vpop.f32.mrf.mxu1 }
0x1114   : > { %10849 = vpow2.f32 %v7057_v7  ;;  %v7059_v11 = vmul.f32 1.442695, %v8716_v6  ;;  %v8717_v22 = vmul.f32 -1.702, %v15613_v58  ;;  %v15617_v48 = vadd.f32 %v6790_v25, %v15444_v45 }
0x1115   : > { %v6792_v32 = vpop.f32.mrf.mxu1 }
0x1116   : > { %10851 = vpow2.f32 %v7059_v11  ;;  %v7061_v41 = vmul.f32 1.442695, %v8717_v22  ;;  %v8718_v18 = vmul.f32 -1.702, %v15617_v48  ;;  %v15621_v13 = vadd.f32 %v6792_v32, %v15439_v40 }
0x1117   : > { %v6794_v61 = vpop.f32.mrf.mxu1 }
0x1118   : > { %10853 = vpow2.f32 %v7061_v41  ;;  %v7063_v12 = vmul.f32 1.442695, %v8718_v18  ;;  %v8719_v34 = vmul.f32 -1.702, %v15621_v13  ;;  %v15625_v21 = vadd.f32 %v6794_v61, %v15444_v45 }
0x1119   : > { %v6798_v59 = vpop.f32.mrf.mxu1 }
0x111a   : > { %10855 = vpow2.f32 %v7063_v12  ;;  %v7065_v50 = vmul.f32 1.442695, %v8719_v34  ;;  %v8720_v37 = vmul.f32 -1.702, %v15625_v21  ;;  %v15629_v3 = vadd.f32 %v6798_v59, %v15439_v40 }
0x111b   : > { %v6800_v43 = vpop.f32.mrf.mxu1 }
0x111c   : > { %10857 = vpow2.f32 %v7065_v50  ;;  %v7067_v30 = vmul.f32 1.442695, %v8720_v37  ;;  %v8721_v56 = vmul.f32 -1.702, %v15629_v3  ;;  %v15633_v49 = vadd.f32 %v6800_v43, %v15444_v45 }
0x111d   : > { %v10846_v16 = vpop.eup %10845  ;;  %v6802_v46 = vpop.f32.mrf.mxu1 }
0x111e   : > { %v7157_v42 = vadd.f32 1.0, %v10846_v16  ;;  %10859 = vpow2.f32 %v7067_v30  ;;  %v7069_v38 = vmul.f32 1.442695, %v8721_v56  ;;  %v8722_v53 = vmul.f32 -1.702, %v15633_v49 }
0x111f   : > { %v10848_v1 = vpop.eup %10847  ;;  %v15637_v9 = vadd.f32 %v6802_v46, %v15439_v40  ;;  %v6804_v62 = vpop.f32.mrf.mxu1 }
0x1120   : > { %10861 = vrcp.f32 %v7157_v42  ;;  %v7158_v29 = vadd.f32 1.0, %v10848_v1  ;;  %v7071_v57 = vmul.f32 1.442695, %v8722_v53  ;;  %v15640_v39 = vadd.f32 %v6804_v62, %v15444_v45 }
0x1121   : > { %v10850_v20 = vpop.eup %10849  ;;  %10863 = vpow2.f32 %v7069_v38  ;;  %v8723_v7 = vmul.f32 -1.702, %v15637_v9  ;;  %v6808_v6 = vpop.f32.mrf.mxu1 }
0x1122   : > { %10865 = vrcp.f32 %v7158_v29  ;;  %v7159_v25 = vadd.f32 1.0, %v10850_v20  ;;  %v8724_v11 = vmul.f32 -1.702, %v15640_v39  ;;  %v15645_v22 = vadd.f32 %v6808_v6, %v15439_v40 }
0x1123   : > { %v10852_v32 = vpop.eup %10851  ;;  %10867 = vpow2.f32 %v7071_v57  ;;  %v7073_v41 = vmul.f32 1.442695, %v8723_v7  ;;  %v6810_v18 = vpop.f32.mrf.mxu1 }
0x1124   : > { %10869 = vrcp.f32 %v7159_v25  ;;  %v7160_v61 = vadd.f32 1.0, %v10852_v32  ;;  %v7075_v12 = vmul.f32 1.442695, %v8724_v11  ;;  %v8725_v34 = vmul.f32 -1.702, %v15645_v22 }
0x1125   : > { %v10854_v59 = vpop.eup %10853  ;;  %10871 = vpow2.f32 %v7073_v41  ;;  %v15649_v50 = vadd.f32 %v6810_v18, %v15444_v45  ;;  %v6812_v37 = vpop.f32.mrf.mxu1 }
0x1126   : > { %10873 = vrcp.f32 %v7160_v61  ;;  %v7161_v43 = vadd.f32 1.0, %v10854_v59  ;;  %v7077_v30 = vmul.f32 1.442695, %v8725_v34  ;;  %v15652_v56 = vadd.f32 %v6812_v37, %v15439_v40 }
0x1127   : > { %v10856_v16 = vpop.eup %10855  ;;  %10875 = vpow2.f32 %v7075_v12  ;;  %v8726_v46 = vmul.f32 -1.702, %v15649_v50  ;;  %v6814_v42 = vpop.f32.mrf.mxu1 }
0x1128   : > { %10877 = vrcp.f32 %v7161_v43  ;;  %v7162_v38 = vadd.f32 1.0, %v10856_v16  ;;  %v8727_v53 = vmul.f32 -1.702, %v15652_v56  ;;  %v15657_v1 = vadd.f32 %v6814_v42, %v15444_v45 }
0x1129   : > { %v10858_v62 = vpop.eup %10857  ;;  %10879 = vpow2.f32 %v7077_v30  ;;  %v7079_v29 = vmul.f32 1.442695, %v8726_v46  ;;  %v6818_v57 = vpop.f32.mrf.mxu1 }
0x112a   : > { %10881 = vrcp.f32 %v7162_v38  ;;  %v7163_v20 = vadd.f32 1.0, %v10858_v62  ;;  %v7081_v7 = vmul.f32 1.442695, %v8727_v53  ;;  %v8728_v6 = vmul.f32 -1.702, %v15657_v1 }
0x112b   : > { %v10860_v25 = vpop.eup %10859  ;;  %10883 = vpow2.f32 %v7079_v29  ;;  %v15661_v11 = vadd.f32 %v6818_v57, %v15439_v40  ;;  %v6820_v32 = vpop.f32.mrf.mxu1 }
0x112c   : > { %10885 = vrcp.f32 %v7163_v20  ;;  %v7164_v41 = vadd.f32 1.0, %v10860_v25  ;;  %v7083_v18 = vmul.f32 1.442695, %v8728_v6  ;;  %v15664_v61 = vadd.f32 %v6820_v32, %v15444_v45 }
0x112d   : > { %v10862_v12 = vpop.eup %10861  ;;  %10887 = vpow2.f32 %v7081_v7  ;;  %v8729_v34 = vmul.f32 -1.702, %v15661_v11  ;;  %v6822_v59 = vpop.f32.mrf.mxu1 }
0x112e   : > { %v10864_v37 = vpop.eup %10863  ;;  %10889 = vrcp.f32 %v7164_v41  ;;  %v8730_v43 = vmul.f32 -1.702, %v15664_v61  ;;  %v15669_v30 = vadd.f32 %v6822_v59, %v15439_v40  ;;  %v7349_v59 = vmul.f32 %v10862_v12, %v15597_v17 }
0x112f   : > { %v10866_v16 = vpop.eup %10865  ;;  %v7165_v46 = vadd.f32 1.0, %v10864_v37  ;;  %10891 = vpow2.f32 %v7083_v18  ;;  %v7085_v42 = vmul.f32 1.442695, %v8729_v34  ;;  %v6824_v38 = vpop.f32.mrf.mxu1 }
0x1130   : > { %v10868_v53 = vpop.eup %10867  ;;  %v7087_v62 = vmul.f32 1.442695, %v8730_v43  ;;  %v8731_v29 = vmul.f32 -1.702, %v15669_v30  ;;  %v15673_v57 = vadd.f32 %v6824_v38, %v15444_v45 }
0x1131   : > { %v10870_v20 = vpop.eup %10869  ;;  %10893 = vrcp.f32 %v7165_v46  ;;  %v7166_v7 = vadd.f32 1.0, %v10868_v53  ;;  %v6828_v6 = vpop.f32.mrf.mxu1  ;;  %v7350_v46 = vmul.f32 %v10866_v16, %v15601_v51 }
0x1132   : > { %v10872_v25 = vpop.eup %10871  ;;  %v7351_v32 = vmul.f32 %v10870_v20, %v15605_v14  ;;  %10895 = vpow2.f32 %v7085_v42  ;;  %v7089_v41 = vmul.f32 1.442695, %v8731_v29  ;;  %v8732_v18 = vmul.f32 -1.702, %v15673_v57 }
0x1133   : > { %v10874_v34 = vpop.eup %10873  ;;  %10897 = vrcp.f32 %v7166_v7  ;;  %v7167_v37 = vadd.f32 1.0, %v10872_v25  ;;  %v15679_v43 = vadd.f32 %v6828_v6, %v15439_v40  ;;  %v6830_v38 = vpop.f32.mrf.mxu1 }
0x1134   : > { %v10876_v26 = vpop.eup %10875  ;;  %v7352_v53 = vmul.f32 %v10874_v34, %v15609_v36  ;;  %10899 = vpow2.f32 %v7087_v62  ;;  %v7091_v14 = vmul.f32 1.442695, %v8732_v18  ;;  %v15685_v17 = vadd.f32 %v6830_v38, %v15444_v45 }
0x1135   : > { %v10878_v42 = vpop.eup %10877  ;;  %10901 = vrcp.f32 %v7167_v37  ;;  %v7168_v29 = vadd.f32 1.0, %v10876_v26  ;;  %v8733_v20 = vmul.f32 -1.702, %v15679_v43  ;;  %v6832_v12 = vpop.f32.mrf.mxu1  ;;  %v7401_v6 = vpack.c.bf16 %v7351_v32, %v7349_v59 }
0x1136   : > { %v10880_v7 = vpop.eup %10879  ;;  %10903 = vpow2.f32 %v7089_v41  ;;  %v15688_v25 = vadd.f32 %v6832_v12, %v15439_v40  ;;  %v7402_v51 = vpack.c.bf16 %v7352_v53, %v7350_v46  ;;  %v8734_v18 = vmul.f32 -1.702, %v15685_v17 }
0x1137   : > { %v10882_v16 = vpop.eup %10881  ;;  %10905 = vrcp.f32 %v7168_v29  ;;  %v7169_v36 = vadd.f32 1.0, %v10880_v7  ;;  %v7093_v62 = vmul.f32 1.442695, %v8733_v20  ;;  %v6834_v26 = vpop.f32.mrf.mxu1 }
0x1138   : > { %v10884_v34 = vpop.eup %10883  ;;  %10907 = vpow2.f32 %v7091_v14  ;;  %v8735_v37 = vmul.f32 -1.702, %v15688_v25  ;;  %v15693_v38 = vadd.f32 %v6834_v26, %v15444_v45  ;;  %7629 = vmatprep.mubr.bf16.mxu0 %v7402_v51  ;;  %v7095_v59 = vmul.f32 1.442695, %v8734_v18 }
0x1139   : > { %v10886_v32 = vpop.eup %10885  ;;  %10909 = vrcp.f32 %v7169_v36  ;;  %v7170_v41 = vadd.f32 1.0, %v10884_v34  ;;  %7630 = vmatmul.mubr.bf16.gmra.mxu0 %v7401_v6  ;;  %v7354_v26 = vmul.f32 %v10882_v16, %v15617_v48  ;;  %v7353_v18 = vmul.f32 %v10878_v42, %v15613_v58 }
0x113a   : > { %v10888_v46 = vpop.eup %10887  ;;  %10911 = vpow2.f32 %v7093_v62  ;;  %v7097_v53 = vmul.f32 1.442695, %v8735_v37  ;;  %v8736_v29 = vmul.f32 -1.702, %v15693_v38  ;;  %v7355_v12 = vmul.f32 %v10886_v32, %v15621_v13 }
0x113b   : > { %v10890_v20 = vpop.eup %10889  ;;  %10913 = vrcp.f32 %v7170_v41  ;;  %v7171_v14 = vadd.f32 1.0, %v10888_v46 }
0x113c   : > { %v10892_v7 = vpop.eup %10891  ;;  %v7356_v51 = vmul.f32 %v10890_v20, %v15625_v21  ;;  %10915 = vpow2.f32 %v7095_v59  ;;  %v7099_v36 = vmul.f32 1.442695, %v8736_v29  ;;  %v7403_v0 = vpack.c.bf16 %v7355_v12, %v7353_v18 }
0x113d   : > { %10917 = vrcp.f32 %v7171_v14  ;;  %v7172_v6 = vadd.f32 1.0, %v10892_v7 }
0x113e   : > { %v10894_v62 = vpop.eup %10893  ;;  %10919 = vpow2.f32 %v7097_v53  ;;  %v7404_v34 = vpack.c.bf16 %v7356_v51, %v7354_v26 }
0x113f   : > { %v10896_v37 = vpop.eup %10895  ;;  %10921 = vrcp.f32 %v7172_v6  ;;  %v7357_v12 = vmul.f32 %v10894_v62, %v15629_v3 }
0x1140   : > { %v10898_v13 = vpop.eup %10897  ;;  %10923 = vpow2.f32 %v7099_v36  ;;  %7637 = vmatprep.mubr.bf16.mxu0 %v7404_v34  ;;  %v7173_v41 = vadd.f32 1.0, %v10896_v37 }
0x1141   : > { %v10900_v32 = vpop.eup %10899  ;;  %7638 = vmatmul.mubr.bf16.gmra.mxu0 %v7403_v0  ;;  %v7358_v53 = vmul.f32 %v10898_v13, %v15633_v49 }
0x1142   : > { %v10902_v48 = vpop.eup %10901  ;;  %v7174_v16 = vadd.f32 1.0, %v10900_v32 }
0x1143   : > { %v10904_v21 = vpop.eup %10903  ;;  %v7359_v58 = vmul.f32 %v10902_v48, %v15637_v9 }
0x1144   : > { %v10906_v59 = vpop.eup %10905  ;;  %v7175_v42 = vadd.f32 1.0, %v10904_v21  ;;  %10925 = vrcp.f32 %v7174_v16 }
0x1145   : > { %v10908_v46 = vpop.eup %10907  ;;  %v7360_v29 = vmul.f32 %v10906_v59, %v15640_v39  ;;  %v7405_v51 = vpack.c.bf16 %v7359_v58, %v7357_v12 }
0x1146   : > { %v10910_v20 = vpop.eup %10909  ;;  %10927 = vrcp.f32 %v7175_v42  ;;  %v7176_v14 = vadd.f32 1.0, %v10908_v46 }
0x1147   : > { %v10912_v0 = vpop.eup %10911  ;;  %10929 = vrcp.f32 %v7173_v41  ;;  %v7406_v7 = vpack.c.bf16 %v7360_v29, %v7358_v53  ;;  %v7361_v32 = vmul.f32 %v10910_v20, %v15645_v22 }
0x1148   : > { %v10914_v26 = vpop.eup %10913  ;;  %10931 = vrcp.f32 %v7176_v14  ;;  %v7177_v6 = vadd.f32 1.0, %v10912_v0 }
0x1149   : > { %v10916_v36 = vpop.eup %10915  ;;  %7645 = vmatprep.mubr.bf16.mxu0 %v7406_v7  ;;  %v7362_v62 = vmul.f32 %v10914_v26, %v15649_v50 }
0x114a   : > { %v10918_v9 = vpop.eup %10917  ;;  %v7178_v18 = vadd.f32 1.0, %v10916_v36  ;;  %7646 = vmatmul.mubr.bf16.gmra.mxu0 %v7405_v51 }
0x114b   : > { %v10920_v49 = vpop.eup %10919  ;;  %v7363_v34 = vmul.f32 %v10918_v9, %v15652_v56 }
0x114c   : > { %v10922_v39 = vpop.eup %10921  ;;  %v7179_v37 = vadd.f32 1.0, %v10920_v49  ;;  %10933 = vrcp.f32 %v7178_v18 }
0x114d   : > { %v10924_v3 = vpop.eup %10923  ;;  %v7364_v13 = vmul.f32 %v10922_v39, %v15657_v1  ;;  %v7407_v21 = vpack.c.bf16 %v7363_v34, %v7361_v32 }
0x114e   : > { %10935 = vrcp.f32 %v7179_v37  ;;  %v7180_v48 = vadd.f32 1.0, %v10924_v3 }
0x114f   : > { %10937 = vrcp.f32 %v7177_v6  ;;  %v7408_v16 = vpack.c.bf16 %v7364_v13, %v7362_v62 }
0x1150   : > { %10939 = vrcp.f32 %v7180_v48 }
0x1151   : > { %7653 = vmatprep.mubr.bf16.mxu0 %v7408_v16  ;;  %v10926_v41 = vpop.eup %10925 }
0x1152   : > { %7654 = vmatmul.mubr.bf16.gmra.mxu0 %v7407_v21  ;;  %v7366_v1 = vmul.f32 %v10926_v41, %v15664_v61 }
0x1153   : > { %v10928_v59 = vpop.eup %10927 }
0x1154   : > { %v10930_v56 = vpop.eup %10929  ;;  %v7367_v42 = vmul.f32 %v10928_v59, %v15669_v30 }
0x1155   : > { %v10932_v58 = vpop.eup %10931  ;;  %v6838_v50 = vpop.f32.mrf.mxu1  ;;  %v7365_v53 = vmul.f32 %v10930_v56, %v15661_v11 }
0x1156   : > { %v7368_v46 = vmul.f32 %v10932_v58, %v15673_v57  ;;  %v15712_v22 = vadd.f32 %v6838_v50, %v15439_v40 }
0x1157   : > { %v6840_v29 = vpop.f32.mrf.mxu1  ;;  %v7409_v0 = vpack.c.bf16 %v7367_v42, %v7365_v53 }
0x1158   : > { %v8737_v20 = vmul.f32 -1.702, %v15712_v22  ;;  %v15717_v12 = vadd.f32 %v6840_v29, %v15444_v45  ;;  %v7410_v14 = vpack.c.bf16 %v7368_v46, %v7366_v1 }
0x1159   : > { %v6842_v7 = vpop.f32.mrf.mxu1  ;;  %v10934_v30 = vpop.eup %10933 }
0x115a   : > { %v7101_v26 = vmul.f32 1.442695, %v8737_v20  ;;  %v8738_v61 = vmul.f32 -1.702, %v15717_v12  ;;  %7661 = vmatprep.mubr.bf16.mxu0 %v7410_v14  ;;  %v15721_v57 = vadd.f32 %v6842_v7, %v15439_v40  ;;  %v7370_v37 = vmul.f32 %v10934_v30, %v15685_v17 }
0x115b   : > { %v10936_v51 = vpop.eup %10935  ;;  %7662 = vmatmul.mubr.bf16.gmra.mxu0 %v7409_v0  ;;  %v6844_v11 = vpop.f32.mrf.mxu1 }
0x115c   : > { %v10938_v36 = vpop.eup %10937  ;;  %10941 = vpow2.f32 %v7101_v26  ;;  %v7103_v9 = vmul.f32 1.442695, %v8738_v61  ;;  %v8739_v18 = vmul.f32 -1.702, %v15721_v57  ;;  %v7371_v6 = vmul.f32 %v10936_v51, %v15688_v25 }
0x115d   : > { %v10940_v49 = vpop.eup %10939  ;;  %v15726_v39 = vadd.f32 %v6844_v11, %v15444_v45  ;;  %v6848_v34 = vpop.f32.mrf.mxu1  ;;  %v7369_v13 = vmul.f32 %v10938_v36, %v15679_v43 }
0x115e   : > { %v7372_v3 = vmul.f32 %v10940_v49, %v15693_v38  ;;  %10943 = vpow2.f32 %v7103_v9  ;;  %v7105_v62 = vmul.f32 1.442695, %v8739_v18  ;;  %v15733_v48 = vadd.f32 %v6848_v34, %v15439_v40 }
0x115f   : > { %v8740_v32 = vmul.f32 -1.702, %v15726_v39  ;;  %v6850_v16 = vpop.f32.mrf.mxu1  ;;  %v7411_v41 = vpack.c.bf16 %v7371_v6, %v7369_v13 }
0x1160   : > { %10945 = vpow2.f32 %v7105_v62  ;;  %v15736_v25 = vadd.f32 %v6850_v16, %v15444_v45  ;;  %v7412_v21 = vpack.c.bf16 %v7372_v3, %v7370_v37  ;;  %v8741_v17 = vmul.f32 -1.702, %v15733_v48 }
0x1161   : > { %v7107_v59 = vmul.f32 1.442695, %v8740_v32  ;;  %v6852_v38 = vpop.f32.mrf.mxu1 }
0x1162   : > { %v8742_v56 = vmul.f32 -1.702, %v15736_v25  ;;  %7669 = vmatprep.mubr.bf16.mxu0 %v7412_v21  ;;  %v15741_v43 = vadd.f32 %v6852_v38, %v15439_v40  ;;  %v7109_v58 = vmul.f32 1.442695, %v8741_v17 }
0x1163   : > { %10947 = vpow2.f32 %v7107_v59  ;;  %7670 = vmatmul.mubr.bf16.gmra.mxu0 %v7411_v41  ;;  %v6854_v42 = vpop.f32.mrf.mxu1 }
0x1164   : > { %v7111_v50 = vmul.f32 1.442695, %v8742_v56  ;;  %v8743_v1 = vmul.f32 -1.702, %v15741_v43  ;;  %v15745_v46 = vadd.f32 %v6854_v42, %v15444_v45  ;;  %10949 = vpow2.f32 %v7109_v58 }
0x1166   : > { %10951 = vpow2.f32 %v7111_v50  ;;  %v7113_v53 = vmul.f32 1.442695, %v8743_v1  ;;  %v8744_v29 = vmul.f32 -1.702, %v15745_v46 }
0x1168   : > { %10953 = vpow2.f32 %v7113_v53  ;;  %v7115_v20 = vmul.f32 1.442695, %v8744_v29 }
0x1169   : > { %v10942_v14 = vpop.eup %10941 }
0x116a   : > { %10955 = vpow2.f32 %v7115_v20  ;;  %v7181_v26 = vadd.f32 1.0, %v10942_v14 }
0x116b   : > { %v6858_v0 = vpop.f32.mrf.mxu1  ;;  %v10944_v30 = vpop.eup %10943 }
0x116c   : > { %v15749_v7 = vadd.f32 %v6858_v0, %v15439_v40  ;;  %v7182_v9 = vadd.f32 1.0, %v10944_v30  ;;  %10957 = vrcp.f32 %v7181_v26 }
0x116d   : > { %v6860_v61 = vpop.f32.mrf.mxu1  ;;  %v10946_v36 = vpop.eup %10945 }
0x116e   : > { %v8745_v51 = vmul.f32 -1.702, %v15749_v7  ;;  %v15753_v11 = vadd.f32 %v6860_v61, %v15444_v45  ;;  %v7183_v49 = vadd.f32 1.0, %v10946_v36 }
0x116f   : > { %v6862_v18 = vpop.f32.mrf.mxu1 }
0x1170   : > { %v8746_v6 = vmul.f32 -1.702, %v15753_v11  ;;  %v15757_v34 = vadd.f32 %v6862_v18, %v15439_v40  ;;  %v10948_v3 = vpop.eup %10947  ;;  %10959 = vrcp.f32 %v7183_v49  ;;  %v7117_v62 = vmul.f32 1.442695, %v8745_v51 }
0x1171   : > { %v6864_v37 = vpop.f32.mrf.mxu1  ;;  %10961 = vrcp.f32 %v7182_v9  ;;  %v7184_v16 = vadd.f32 1.0, %v10948_v3  ;;  %v10950_v59 = vpop.eup %10949 }
0x1172   : > { %v7119_v13 = vmul.f32 1.442695, %v8746_v6  ;;  %v15760_v32 = vadd.f32 %v6864_v37, %v15444_v45  ;;  %v8747_v21 = vmul.f32 -1.702, %v15757_v34  ;;  %v7185_v58 = vadd.f32 1.0, %v10950_v59 }
0x1173   : > { %v6868_v41 = vpop.f32.mrf.mxu1  ;;  %v10952_v56 = vpop.eup %10951 }
0x1174   : > { %10963 = vpow2.f32 %v7119_v13  ;;  %v8748_v17 = vmul.f32 -1.702, %v15760_v32  ;;  %v15765_v38 = vadd.f32 %v6868_v41, %v15439_v40  ;;  %v7121_v42 = vmul.f32 1.442695, %v8747_v21 }
0x1175   : > { %10965 = vrcp.f32 %v7184_v16  ;;  %v6870_v50 = vpop.f32.mrf.mxu1  ;;  %v7186_v1 = vadd.f32 1.0, %v10952_v56  ;;  %v10954_v20 = vpop.eup %10953  ;;  %v15785_v56 = vld [vmem:[%s732_s4] ss:$0 sm:$0xff] }
0x1176   : > { %10967 = vpow2.f32 %v7117_v62  ;;  %v8749_v53 = vmul.f32 -1.702, %v15765_v38  ;;  %v15769_v29 = vadd.f32 %v6870_v50, %v15444_v45  ;;  %v7123_v14 = vmul.f32 1.442695, %v8748_v17 }
0x1177   : > { %10969 = vrcp.f32 %v7185_v58  ;;  %v6872_v0 = vpop.f32.mrf.mxu1  ;;  %v7187_v30 = vadd.f32 1.0, %v10954_v20  ;;  %v10956_v61 = vpop.eup %10955 }
0x1178   : > { %10971 = vrcp.f32 %v7186_v1  ;;  %v8750_v26 = vmul.f32 -1.702, %v15769_v29  ;;  %v7125_v51 = vmul.f32 1.442695, %v8749_v53  ;;  %v15773_v36 = vadd.f32 %v6872_v0, %v15439_v40 }
0x1179   : > { %10973 = vpow2.f32 %v7121_v42  ;;  %v6874_v9 = vpop.f32.mrf.mxu1  ;;  %v7188_v18 = vadd.f32 1.0, %v10956_v61  ;;  %v10958_v16 = vpop.eup %10957 }
0x117a   : > { %10975 = vrcp.f32 %v7187_v30  ;;  %v7127_v49 = vmul.f32 1.442695, %v8750_v26  ;;  %v15776_v6 = vadd.f32 %v6874_v9, %v15444_v45  ;;  %v8751_v37 = vmul.f32 -1.702, %v15773_v36 }
0x117b   : > { %10977 = vpow2.f32 %v7123_v14  ;;  %v7373_v26 = vmul.f32 %v10958_v16, %v15712_v22 }
0x117c   : > { %10979 = vrcp.f32 %v7188_v18  ;;  %v8752_v3 = vmul.f32 -1.702, %v15776_v6  ;;  %v7129_v62 = vmul.f32 1.442695, %v8751_v37 }
0x117d   : > { %10981 = vpow2.f32 %v7125_v51  ;;  %v9073_v13 = vpop.f32.mrf.mxu0  ;;  %v10960_v21 = vpop.eup %10959 }
0x117e   : > { %10983 = vpow2.f32 %v7127_v49  ;;  %v7131_v40 = vmul.f32 1.442695, %v8752_v3  ;;  %v10962_v59 = vpop.eup %10961  ;;  %v7375_v50 = vmul.f32 %v10960_v21, %v15721_v57 }
0x117f   : > { %10985 = vpow2.f32 %v7129_v62  ;;  %v9074_v41 = vpop.f32.mrf.mxu0  ;;  %v7374_v20 = vmul.f32 %v10962_v59, %v15717_v12 }
0x1180   : > { %10987 = vpow2.f32 %v7131_v40  ;;  %v9075_v45 = vadd.f32 %v9074_v41, %v9073_v13  ;;  %v7413_v3 = vpack.c.bf16 %v7375_v50, %v7373_v26 }
0x1181   : > { %v10964_v17 = vpop.eup %10963  ;;  %v9076_v58 = vpop.f32.mrf.mxu0 }
0x1182   : > { %v10966_v42 = vpop.eup %10965  ;;  %v7710_v1 = vadd.f32 %v9075_v45, %v14914_v2  ;;  %v7190_v61 = vadd.f32 1.0, %v10964_v17 }
0x1183   : > { %v10968_v53 = vpop.eup %10967  ;;  %v7376_v14 = vmul.f32 %v10966_v42, %v15726_v39  ;;  %v9077_v0 = vpop.f32.mrf.mxu0 }
0x1184   : > { %v10970_v30 = vpop.eup %10969  ;;  %v15793_v51 = vadd.f32 %v15785_v56, %v7710_v1  ;;  %v9078_v9 = vadd.f32 %v9077_v0, %v9076_v58  ;;  %v7189_v2 = vadd.f32 1.0, %v10968_v53  ;;  %10989 = vrcp.f32 %v7190_v61 }
0x1185   : > { %v10972_v18 = vpop.eup %10971  ;;  %v9079_v49 = vpop.f32.mrf.mxu0  ;;  %v7414_v37 = vpack.c.bf16 %v7376_v14, %v7374_v20  ;;  %v7377_v1 = vmul.f32 %v10970_v30, %v15733_v48 }
0x1186   : > { %v10974_v57 = vpop.eup %10973  ;;  %7781 = vst.msk [vmem:[#allocation2] sm:$0xff] %vm860_vm1, %v15793_v51  ;;  %v7711_v12 = vadd.f32 %v9078_v9, %v14932_v19  ;;  %v7378_v19 = vmul.f32 %v10972_v18, %v15736_v25 }
0x1187   : > { %v10976_v39 = vpop.eup %10975  ;;  %v7191_v62 = vadd.f32 1.0, %v10974_v57  ;;  %7677 = vmatprep.mubr.bf16.mxu0 %v7414_v37  ;;  %v9080_v22 = vpop.f32.mrf.mxu0 }
0x1188   : > { %v10978_v13 = vpop.eup %10977  ;;  %v15799_v16 = vadd.f32 %v15785_v56, %v7711_v12  ;;  %7678 = vmatmul.mubr.bf16.gmra.mxu0 %v7413_v3  ;;  %v9081_v40 = vadd.f32 %v9080_v22, %v9079_v49  ;;  %v7379_v41 = vmul.f32 %v10976_v39, %v15741_v43 }
0x1189   : > { %v10980_v21 = vpop.eup %10979  ;;  %10991 = vrcp.f32 %v7191_v62  ;;  %v7192_v59 = vadd.f32 1.0, %v10978_v13  ;;  %v9082_v45 = vpop.f32.mrf.mxu0 }
0x118a   : > { %v10982_v17 = vpop.eup %10981  ;;  %v7380_v58 = vmul.f32 %v10980_v21, %v15745_v46  ;;  %10993 = vrcp.f32 %v7189_v2  ;;  %7782 = vst.msk [vmem:[#allocation2 + $0x8] sm:$0xff] %vm860_vm1, %v15799_v16  ;;  %v7712_v42 = vadd.f32 %v9081_v40, %v14925_v35  ;;  %v7415_v46 = vpack.c.bf16 %v7379_v41, %v7377_v1 }
0x118b   : > { %v10984_v50 = vpop.eup %10983  ;;  %10995 = vrcp.f32 %v7192_v59  ;;  %v9083_v53 = vpop.f32.mrf.mxu0  ;;  %v7193_v9 = vadd.f32 1.0, %v10982_v17 }
0x118c   : > { %v10986_v43 = vpop.eup %10985  ;;  %v7194_v20 = vadd.f32 1.0, %v10984_v50  ;;  %v15809_v14 = vadd.f32 %v15785_v56, %v7712_v42  ;;  %v9084_v0 = vadd.f32 %v9083_v53, %v9082_v45  ;;  %v7416_v25 = vpack.c.bf16 %v7380_v58, %v7378_v19 }
0x118d   : > { %v10988_v26 = vpop.eup %10987  ;;  %v7195_v61 = vadd.f32 1.0, %v10986_v43 }
0x118e   : > { %10997 = vrcp.f32 %v7194_v20  ;;  %v7196_v18 = vadd.f32 1.0, %v10988_v26  ;;  %7783 = vst.msk [vmem:[#allocation2 + $0x10] sm:$0xff] %vm860_vm1, %v15809_v14  ;;  %v7713_v35 = vadd.f32 %v9084_v0, %v14937_v52  ;;  %7685 = vmatprep.mubr.bf16.mxu0 %v7416_v25 }
0x118f   : > { %10999 = vrcp.f32 %v7195_v61 }
0x1190   : > { %11001 = vrcp.f32 %v7196_v18  ;;  %v15815_v48 = vadd.f32 %v15785_v56, %v7713_v35  ;;  %7686 = vmatmul.mubr.bf16.gmra.mxu0 %v7415_v46 }
0x1191   : > { %11003 = vrcp.f32 %v7193_v9  ;;  %v10990_v30 = vpop.eup %10989 }
0x1192   : > { %7784 = vst.msk [vmem:[#allocation2 + $0x18] sm:$0xff] %vm860_vm1, %v15815_v48  ;;  %v7382_v2 = vmul.f32 %v10990_v30, %v15753_v11 }
0x1196   : > { %v10992_v49 = vpop.eup %10991 }
0x1197   : > { %v10994_v37 = vpop.eup %10993  ;;  %v7383_v3 = vmul.f32 %v10992_v49, %v15757_v34 }
0x1198   : > { %v10996_v57 = vpop.eup %10995  ;;  %v7381_v12 = vmul.f32 %v10994_v37, %v15749_v7 }
0x1199   : > { %v7384_v52 = vmul.f32 %v10996_v57, %v15760_v32 }
0x119a   : > { %v7417_v13 = vpack.c.bf16 %v7383_v3, %v7381_v12 }
0x119b   : > { %v10998_v39 = vpop.eup %10997  ;;  %v7418_v62 = vpack.c.bf16 %v7384_v52, %v7382_v2 }
0x119c   : > { %v11000_v22 = vpop.eup %10999  ;;  %v7386_v21 = vmul.f32 %v10998_v39, %v15769_v29 }
0x119d   : > { %v11002_v40 = vpop.eup %11001  ;;  %7693 = vmatprep.mubr.bf16.mxu0 %v7418_v62  ;;  %v7387_v34 = vmul.f32 %v11000_v22, %v15773_v36 }
0x119e   : > { %v7388_v41 = vmul.f32 %v11002_v40, %v15776_v6  ;;  %7694 = vmatmul.mubr.bf16.gmra.mxu0 %v7417_v13  ;;  %v11004_v59 = vpop.eup %11003 }
0x119f   : > { %v7385_v11 = vmul.f32 %v11004_v59, %v15765_v38 }
0x11a0   : > { %v7420_v45 = vpack.c.bf16 %v7388_v41, %v7386_v21 }
0x11a1   : > { %v7419_v32 = vpack.c.bf16 %v7387_v34, %v7385_v11 }
0x11a2   : > { %7701 = vmatprep.mubr.bf16.mxu0 %v7420_v45 }
0x11a6   : > { %7702 = vmatmul.mubr.bf16.gmra.mxu0 %v7419_v32 }
0x11ab   : > { %v9085_v7 = vpop.f32.mrf.mxu0 }
0x11ad   : > { %v9086_v17 = vpop.f32.mrf.mxu0 }
0x11ae   : > { %v9087_v19 = vadd.f32 %v9086_v17, %v9085_v7 }
0x11af   : > { %v9088_v58 = vpop.f32.mrf.mxu0 }
0x11b0   : > { %v7714_v42 = vadd.f32 %v9087_v19, %v14971_v4 }
0x11b1   : > { %v9089_v50 = vpop.f32.mrf.mxu0 }
0x11b2   : > { %v15829_v29 = vadd.f32 %v15785_v56, %v7714_v42  ;;  %v9090_v6 = vadd.f32 %v9089_v50, %v9088_v58 }
0x11b4   : > { %7785 = vst.msk [vmem:[#allocation2 + $0x20] sm:$0xff] %vm860_vm1, %v15829_v29  ;;  %v7715_v36 = vadd.f32 %v9090_v6, %v14979_v33 }
0x11b6   : > { %v15835_v38 = vadd.f32 %v15785_v56, %v7715_v36 }
0x11b8   : > { %7786 = vst.msk [vmem:[#allocation2 + $0x28] sm:$0xff] %vm860_vm1, %v15835_v38 }
0x11bc   : > { %v9091_v1 = vpop.f32.mrf.mxu0 }
0x11be   : > { %v9092_v53 = vpop.f32.mrf.mxu0 }
0x11bf   : > { %v9093_v43 = vadd.f32 %v9092_v53, %v9091_v1 }
0x11c0   : > { %v9094_v4 = vpop.f32.mrf.mxu0 }
0x11c1   : > { %v7716_v20 = vadd.f32 %v9093_v43, %v14974_v55 }
0x11c2   : > { %v9095_v0 = vpop.f32.mrf.mxu0 }
0x11c3   : > { %v15841_v25 = vadd.f32 %v15785_v56, %v7716_v20  ;;  %v9096_v26 = vadd.f32 %v9095_v0, %v9094_v4 }
0x11c4   : > { %v9097_v46 = vpop.f32.mrf.mxu0 }
0x11c5   : > { %7787 = vst.msk [vmem:[#allocation2 + $0x30] sm:$0xff] %vm860_vm1, %v15841_v25  ;;  %v7717_v33 = vadd.f32 %v9096_v26, %v14982_v60 }
0x11c6   : > { %v9098_v9 = vpop.f32.mrf.mxu0 }
0x11c7   : > { %v15847_v61 = vadd.f32 %v15785_v56, %v7717_v33  ;;  %v9099_v18 = vadd.f32 %v9098_v9, %v9097_v46 }
0x11c8   : > { %v9100_v55 = vpop.f32.mrf.mxu0 }
0x11c9   : > { %7788 = vst.msk [vmem:[#allocation2 + $0x38] sm:$0xff] %vm860_vm1, %v15847_v61  ;;  %v7718_v35 = vadd.f32 %v9099_v18, %v14991_v47 }
0x11ca   : > { %v9101_v30 = vpop.f32.mrf.mxu0 }
0x11cb   : > { %v15853_v49 = vadd.f32 %v15785_v56, %v7718_v35  ;;  %v9102_v37 = vadd.f32 %v9101_v30, %v9100_v55 }
0x11cd   : > { %v9103_v57 = vpop.f32.mrf.mxu0  ;;  %7789 = vst.msk [vmem:[#allocation2 + $0x40] sm:$0xff] %vm860_vm1, %v15853_v49  ;;  %v7719_v60 = vadd.f32 %v9102_v37, %v14999_v5 }
0x11cf   : > { %v9104_v3 = vpop.f32.mrf.mxu0  ;;  %v15859_v2 = vadd.f32 %v15785_v56, %v7719_v60 }
0x11d0   : > { %v9105_v52 = vadd.f32 %v9104_v3, %v9103_v57  ;;  %v17034_v3 = vld [vmem:[#allocation33_spill] sm:$0xff] }
0x11d1   : > { %v9106_v12 = vpop.f32.mrf.mxu0  ;;  %7790 = vst.msk [vmem:[#allocation2 + $0x48] sm:$0xff] %vm860_vm1, %v15859_v2 }
0x11d2   : > { %v7720_v47 = vadd.f32 %v9105_v52, %v14994_v23 }
0x11d3   : > { %v9107_v39 = vpop.f32.mrf.mxu0 }
0x11d4   : > { %v15865_v62 = vadd.f32 %v15785_v56, %v7720_v47  ;;  %v9108_v22 = vadd.f32 %v9107_v39, %v9106_v12 }
0x11d6   : > { %7791 = vst.msk [vmem:[#allocation2 + $0x50] sm:$0xff] %vm860_vm1, %v15865_v62  ;;  %v7721_v5 = vadd.f32 %v9108_v22, %v15002_v54 }
0x11d8   : > { %v15871_v13 = vadd.f32 %v15785_v56, %v7721_v5 }
0x11da   : > { %7792 = vst.msk [vmem:[#allocation2 + $0x58] sm:$0xff] %vm860_vm1, %v15871_v13 }
0x11f9   : > { %v9109_v40 = vpop.f32.mrf.mxu0 }
0x11fb   : > { %v9110_v21 = vpop.f32.mrf.mxu0 }
0x11fc   : > { %v9111_v41 = vadd.f32 %v9110_v21, %v9109_v40 }
0x11fd   : > { %v9112_v23 = vpop.f32.mrf.mxu0 }
0x11fe   : > { %v7722_v59 = vadd.f32 %v9111_v41, %v15011_v27 }
0x11ff   : > { %v9113_v34 = vpop.f32.mrf.mxu0 }
0x1200   : > { %v15877_v45 = vadd.f32 %v15785_v56, %v7722_v59  ;;  %v9114_v11 = vadd.f32 %v9113_v34, %v9112_v23  ;;  %v17035_v34 = vld [vmem:[#allocation36_spill] sm:$0xff] }
0x1201   : > { %v9115_v32 = vpop.f32.mrf.mxu0 }
0x1202   : > { %7793 = vst.msk [vmem:[#allocation2 + $0x60] sm:$0xff] %vm860_vm1, %v15877_v45  ;;  %v7723_v54 = vadd.f32 %v9114_v11, %v15019_v24 }
0x1203   : > { %v9116_v7 = vpop.f32.mrf.mxu0 }
0x1204   : > { %v15883_v17 = vadd.f32 %v15785_v56, %v7723_v54  ;;  %v9117_v19 = vadd.f32 %v9116_v7, %v9115_v32 }
0x1205   : > { %v9118_v58 = vpop.f32.mrf.mxu0 }
0x1206   : > { %7794 = vst.msk [vmem:[#allocation2 + $0x68] sm:$0xff] %vm860_vm1, %v15883_v17  ;;  %v7724_v27 = vadd.f32 %v9117_v19, %v15014_v44 }
0x1207   : > { %v9119_v42 = vpop.f32.mrf.mxu0 }
0x1208   : > { %v15889_v50 = vadd.f32 %v15785_v56, %v7724_v27  ;;  %v9120_v6 = vadd.f32 %v9119_v42, %v9118_v58 }
0x120a   : > { %7795 = vst.msk [vmem:[#allocation2 + $0x70] sm:$0xff] %vm860_vm1, %v15889_v50  ;;  %v7725_v24 = vadd.f32 %v9120_v6, %v15022_v10  ;;  %v9121_v36 = vpop.f32.mrf.mxu0  ;;  %v17032_v10 = vld [vmem:[#allocation35_spill] sm:$0xff] }
0x120c   : > { %v15895_v1 = vadd.f32 %v15785_v56, %v7725_v24  ;;  %v9122_v53 = vpop.f32.mrf.mxu0  ;;  %v17037_v24 = vld [vmem:[#allocation40_spill] sm:$0xff] }
0x120d   : > { %v9123_v43 = vadd.f32 %v9122_v53, %v9121_v36 }
0x120e   : > { %7796 = vst.msk [vmem:[#allocation2 + $0x78] sm:$0xff] %vm860_vm1, %v15895_v1  ;;  %v9124_v44 = vpop.f32.mrf.mxu0 }
0x120f   : > { %v7726_v4 = vadd.f32 %v9123_v43, %v15031_v31  ;;  %v17033_v31 = vld [vmem:[#allocation8_spill] sm:$0xff] }
0x1210   : > { %v9125_v20 = vpop.f32.mrf.mxu0 }
0x1211   : > { %v15901_v0 = vadd.f32 %v15785_v56, %v7726_v4  ;;  %v9126_v26 = vadd.f32 %v9125_v20, %v9124_v44 }
0x1212   : > { %v9127_v33 = vpop.f32.mrf.mxu0 }
0x1213   : > { %7797 = vst.msk [vmem:[#allocation2 + $0x80] sm:$0xff] %vm860_vm1, %v15901_v0  ;;  %v7727_v46 = vadd.f32 %v9126_v26, %v17032_v10  ;;  %v17038_v26 = vld [vmem:[#allocation70_spill] sm:$0xff] }
0x1214   : > { %v9128_v9 = vpop.f32.mrf.mxu0 }
0x1215   : > { %v15907_v18 = vadd.f32 %v15785_v56, %v7727_v46  ;;  %v9129_v55 = vadd.f32 %v9128_v9, %v9127_v33 }
0x1216   : > { %v9130_v35 = vpop.f32.mrf.mxu0 }
0x1217   : > { %7798 = vst.msk [vmem:[#allocation2 + $0x88] sm:$0xff] %vm860_vm1, %v15907_v18  ;;  %v7728_v30 = vadd.f32 %v9129_v55, %v17033_v31 }
0x1218   : > { %v9131_v37 = vpop.f32.mrf.mxu0 }
0x1219   : > { %v15913_v57 = vadd.f32 %v15785_v56, %v7728_v30  ;;  %v9132_v60 = vadd.f32 %v9131_v37, %v9130_v35  ;;  %v17039_v35 = vld [vmem:[#allocation76_spill] sm:$0xff] }
0x121b   : > { %7799 = vst.msk [vmem:[#allocation2 + $0x90] sm:$0xff] %vm860_vm1, %v15913_v57  ;;  %v7729_v52 = vadd.f32 %v9132_v60, %v17034_v3  ;;  %v9133_v12 = vpop.f32.mrf.mxu0 }
0x121d   : > { %v15919_v47 = vadd.f32 %v15785_v56, %v7729_v52  ;;  %v9134_v39 = vpop.f32.mrf.mxu0 }
0x121e   : > { %v9135_v22 = vadd.f32 %v9134_v39, %v9133_v12 }
0x121f   : > { %7800 = vst.msk [vmem:[#allocation2 + $0x98] sm:$0xff] %vm860_vm1, %v15919_v47  ;;  %v9136_v5 = vpop.f32.mrf.mxu0 }
0x1220   : > { %v7730_v40 = vadd.f32 %v9135_v22, %v15065_v8  ;;  %v17036_v8 = vld [vmem:[#allocation38_spill] sm:$0xff] }
0x1221   : > { %v9137_v21 = vpop.f32.mrf.mxu0 }
0x1222   : > { %v15925_v41 = vadd.f32 %v15785_v56, %v7730_v40  ;;  %v9138_v23 = vadd.f32 %v9137_v21, %v9136_v5 }
0x1223   : > { %v9139_v59 = vpop.f32.mrf.mxu0 }
0x1224   : > { %7801 = vst.msk [vmem:[#allocation2 + $0xa0] sm:$0xff] %vm860_vm1, %v15925_v41  ;;  %v7731_v11 = vadd.f32 %v9138_v23, %v17035_v34  ;;  %v17040_v34 = vld [vmem:[#allocation12_spill] sm:$0xff] }
0x1225   : > { %v9140_v32 = vpop.f32.mrf.mxu0 }
0x1226   : > { %v15931_v54 = vadd.f32 %v15785_v56, %v7731_v11  ;;  %v9141_v7 = vadd.f32 %v9140_v32, %v9139_v59 }
0x1227   : > { %v9142_v19 = vpop.f32.mrf.mxu0 }
0x1228   : > { %7802 = vst.msk [vmem:[#allocation2 + $0xa8] sm:$0xff] %vm860_vm1, %v15931_v54  ;;  %v7732_v58 = vadd.f32 %v9141_v7, %v17036_v8 }
0x1229   : > { %v9143_v27 = vpop.f32.mrf.mxu0 }
0x122a   : > { %v15937_v42 = vadd.f32 %v15785_v56, %v7732_v58  ;;  %v9144_v6 = vadd.f32 %v9143_v27, %v9142_v19 }
0x122c   : > { %7803 = vst.msk [vmem:[#allocation2 + $0xb0] sm:$0xff] %vm860_vm1, %v15937_v42  ;;  %v7733_v36 = vadd.f32 %v9144_v6, %v17037_v24 }
0x122e   : > { %v15943_v53 = vadd.f32 %v15785_v56, %v7733_v36  ;;  %v17041_v36 = vld [vmem:[#allocation39_spill] sm:$0xff] }
0x1230   : > { %7804 = vst.msk [vmem:[#allocation2 + $0xb8] sm:$0xff] %vm860_vm1, %v15943_v53 }
0x1248   : > { %v9145_v43 = vpop.f32.mrf.mxu0 }
0x124a   : > { %v9146_v44 = vpop.f32.mrf.mxu0 }
0x124b   : > { %v9147_v4 = vadd.f32 %v9146_v44, %v9145_v43 }
0x124c   : > { %v9148_v20 = vpop.f32.mrf.mxu0 }
0x124d   : > { %v7734_v33 = vadd.f32 %v9147_v4, %v17038_v26 }
0x124e   : > { %v9149_v10 = vpop.f32.mrf.mxu0 }
0x124f   : > { %v15949_v46 = vadd.f32 %v15785_v56, %v7734_v33  ;;  %v9150_v9 = vadd.f32 %v9149_v10, %v9148_v20 }
0x1250   : > { %v9151_v55 = vpop.f32.mrf.mxu0 }
0x1251   : > { %7805 = vst.msk [vmem:[#allocation2 + $0xc0] sm:$0xff] %vm860_vm1, %v15949_v46  ;;  %v7735_v31 = vadd.f32 %v9150_v9, %v17039_v35 }
0x1252   : > { %v9152_v30 = vpop.f32.mrf.mxu0 }
0x1253   : > { %v15955_v37 = vadd.f32 %v15785_v56, %v7735_v31  ;;  %v9153_v60 = vadd.f32 %v9152_v30, %v9151_v55 }
0x1254   : > { %v9154_v3 = vpop.f32.mrf.mxu0 }
0x1255   : > { %7806 = vst.msk [vmem:[#allocation2 + $0xc8] sm:$0xff] %vm860_vm1, %v15955_v37  ;;  %v7736_v52 = vadd.f32 %v9153_v60, %v15132_v28 }
0x1256   : > { %v9155_v12 = vpop.f32.mrf.mxu0 }
0x1257   : > { %v15961_v39 = vadd.f32 %v15785_v56, %v7736_v52  ;;  %v9156_v22 = vadd.f32 %v9155_v12, %v9154_v3 }
0x1259   : > { %7807 = vst.msk [vmem:[#allocation2 + $0xd0] sm:$0xff] %vm860_vm1, %v15961_v39  ;;  %v7737_v5 = vadd.f32 %v9156_v22, %v15139_v63 }
0x125b   : > { %v15967_v40 = vadd.f32 %v15785_v56, %v7737_v5 }
0x125d   : > { %7808 = vst.msk [vmem:[#allocation2 + $0xd8] sm:$0xff] %vm860_vm1, %v15967_v40 }
0x125e   : > { %v9157_v21 = vpop.f32.mrf.mxu0 }
0x1260   : > { %v9158_v23 = vpop.f32.mrf.mxu0 }
0x1261   : > { %v9159_v59 = vadd.f32 %v9158_v23, %v9157_v21 }
0x1262   : > { %v9160_v28 = vpop.f32.mrf.mxu0 }
0x1263   : > { %v7738_v11 = vadd.f32 %v9159_v59, %v17040_v34 }
0x1264   : > { %v9161_v32 = vpop.f32.mrf.mxu0 }
0x1265   : > { %v15973_v7 = vadd.f32 %v15785_v56, %v7738_v11  ;;  %v9162_v19 = vadd.f32 %v9161_v32, %v9160_v28 }
0x1266   : > { %v9163_v8 = vpop.f32.mrf.mxu0 }
0x1267   : > { %7809 = vst.msk [vmem:[#allocation2 + $0xe0] sm:$0xff] %vm860_vm1, %v15973_v7  ;;  %v7739_v63 = vadd.f32 %v9162_v19, %v15166_v15  ;;  %v17042_v15 = vld [vmem:[#allocation75_spill] sm:$0xff] }
0x1268   : > { %v9164_v58 = vpop.f32.mrf.mxu0 }
0x1269   : > { %v15979_v27 = vadd.f32 %v15785_v56, %v7739_v63  ;;  %v9165_v6 = vadd.f32 %v9164_v58, %v9163_v8 }
0x126a   : > { %v9166_v24 = vpop.f32.mrf.mxu0 }
0x126b   : > { %7810 = vst.msk [vmem:[#allocation2 + $0xe8] sm:$0xff] %vm860_vm1, %v15979_v27  ;;  %v7740_v43 = vadd.f32 %v9165_v6, %v17041_v36 }
0x126c   : > { %v9167_v44 = vpop.f32.mrf.mxu0 }
0x126d   : > { %v15985_v4 = vadd.f32 %v15785_v56, %v7740_v43  ;;  %v9168_v20 = vadd.f32 %v9167_v44, %v9166_v24 }
0x126f   : > { %7811 = vst.msk [vmem:[#allocation2 + $0xf0] sm:$0xff] %vm860_vm1, %v15985_v4  ;;  %v7741_v26 = vadd.f32 %v9168_v20, %v17042_v15  ;;  %7816 = sbr.rel (%p8770_p6) target bundleno = 5097 (0x13e9), region = 92 }
0x1271   : > { %v15991_v33 = vadd.f32 %v15785_v56, %v7741_v26 }
0x1273   : > { %7812 = vst.msk [vmem:[#allocation2 + $0xf8] sm:$0xff] %vm860_vm1, %v15991_v33 }
0x1274   : > { %v7819_v10 = vsel %vm860_vm1, %v15793_v51, 0.0  ;;  %v7825_v9 = vsel %vm860_vm1, %v15809_v14, 0.0  ;;  %v7822_v55 = vsel %vm860_vm1, %v15799_v16, 0.0  ;;  %v7828_v56 = vsel %vm860_vm1, %v15815_v48, 0.0 }
0x1275   : > { %7820 = vadd.xlane.f32.xlu0 %v7819_v10  ;;  %7826 = vadd.xlane.f32.xlu1 %v7825_v9  ;;  %v7831_v35 = vsel %vm860_vm1, %v15829_v29, 0.0  ;;  %v7834_v31 = vsel %vm860_vm1, %v15835_v38, 0.0  ;;  %v7837_v30 = vsel %vm860_vm1, %v15841_v25, 0.0  ;;  %v7840_v60 = vsel %vm860_vm1, %v15847_v61, 0.0 }
0x1276   : > { %v7843_v3 = vsel %vm860_vm1, %v15853_v49, 0.0  ;;  %v7846_v52 = vsel %vm860_vm1, %v15859_v2, 0.0  ;;  %v7849_v12 = vsel %vm860_vm1, %v15865_v62, 0.0  ;;  %v7852_v22 = vsel %vm860_vm1, %v15871_v13, 0.0 }
0x1277   : > { %v7855_v5 = vsel %vm860_vm1, %v15877_v45, 0.0  ;;  %v7858_v21 = vsel %vm860_vm1, %v15883_v17, 0.0  ;;  %v7861_v23 = vsel %vm860_vm1, %v15889_v50, 0.0  ;;  %v7864_v59 = vsel %vm860_vm1, %v15895_v1, 0.0 }
0x1278   : > { %v7867_v28 = vsel %vm860_vm1, %v15901_v0, 0.0  ;;  %v7870_v34 = vsel %vm860_vm1, %v15907_v18, 0.0  ;;  %v7873_v11 = vsel %vm860_vm1, %v15913_v57, 0.0  ;;  %v7876_v32 = vsel %vm860_vm1, %v15919_v47, 0.0 }
0x1279   : > { %7823 = vadd.xlane.f32.xlu0 %v7822_v55  ;;  %7829 = vadd.xlane.f32.xlu1 %v7828_v56  ;;  %v7879_v19 = vsel %vm860_vm1, %v15925_v41, 0.0  ;;  %v7882_v8 = vsel %vm860_vm1, %v15931_v54, 0.0  ;;  %v7885_v63 = vsel %vm860_vm1, %v15937_v42, 0.0  ;;  %v7888_v58 = vsel %vm860_vm1, %v15943_v53, 0.0 }
0x127a   : > { %v7891_v6 = vsel %vm860_vm1, %v15949_v46, 0.0  ;;  %v7894_v24 = vsel %vm860_vm1, %v15955_v37, 0.0  ;;  %v7897_v36 = vsel %vm860_vm1, %v15961_v39, 0.0  ;;  %v7900_v43 = vsel %vm860_vm1, %v15967_v40, 0.0 }
0x127b   : > { %v7903_v44 = vsel %vm860_vm1, %v15973_v7, 0.0  ;;  %v7906_v20 = vsel %vm860_vm1, %v15979_v27, 0.0  ;;  %v7909_v15 = vsel %vm860_vm1, %v15985_v4, 0.0  ;;  %v7912_v26 = vsel %vm860_vm1, %v15991_v33, 0.0 }
0x127d   : > { %7832 = vadd.xlane.f32.xlu0 %v7831_v35  ;;  %7835 = vadd.xlane.f32.xlu1 %v7834_v31 }
0x1281   : > { %7838 = vadd.xlane.f32.xlu0 %v7837_v30  ;;  %7841 = vadd.xlane.f32.xlu1 %v7840_v60 }
0x1285   : > { %7844 = vadd.xlane.f32.xlu0 %v7843_v3  ;;  %7847 = vadd.xlane.f32.xlu1 %v7846_v52 }
0x1289   : > { %7850 = vadd.xlane.f32.xlu0 %v7849_v12  ;;  %7853 = vadd.xlane.f32.xlu1 %v7852_v22 }
0x128d   : > { %7856 = vadd.xlane.f32.xlu0 %v7855_v5  ;;  %7859 = vadd.xlane.f32.xlu1 %v7858_v21 }
0x1291   : > { %7862 = vadd.xlane.f32.xlu0 %v7861_v23  ;;  %7865 = vadd.xlane.f32.xlu1 %v7864_v59 }
0x1295   : > { %7868 = vadd.xlane.f32.xlu0 %v7867_v28  ;;  %7871 = vadd.xlane.f32.xlu1 %v7870_v34 }
0x1299   : > { %7874 = vadd.xlane.f32.xlu0 %v7873_v11  ;;  %7877 = vadd.xlane.f32.xlu1 %v7876_v32 }
0x129d   : > { %7880 = vadd.xlane.f32.xlu0 %v7879_v19  ;;  %7883 = vadd.xlane.f32.xlu1 %v7882_v8 }
0x12a1   : > { %7886 = vadd.xlane.f32.xlu0 %v7885_v63  ;;  %7889 = vadd.xlane.f32.xlu1 %v7888_v58 }
0x12a5   : > { %7892 = vadd.xlane.f32.xlu0 %v7891_v6  ;;  %7895 = vadd.xlane.f32.xlu1 %v7894_v24 }
0x12a9   : > { %7898 = vadd.xlane.f32.xlu0 %v7897_v36  ;;  %7901 = vadd.xlane.f32.xlu1 %v7900_v43 }
0x12ad   : > { %7904 = vadd.xlane.f32.xlu0 %v7903_v44  ;;  %7907 = vadd.xlane.f32.xlu1 %v7906_v20 }
0x12b1   : > { %7910 = vadd.xlane.f32.xlu0 %v7909_v15  ;;  %7913 = vadd.xlane.f32.xlu1 %v7912_v26 }
0x12fe   : > { %v7821_v10 = vpop.xlane.xlu0 %7820  ;;  %v7827_v9 = vpop.xlane.xlu1 %7826 }
0x12ff   : > { %v7915_v55 = vmul.f32 0.015625, %v7821_v10  ;;  %v7917_v56 = vmul.f32 0.015625, %v7827_v9 }
0x1301   : > { %v16061_v35 = vsub.f32 %v15793_v51, %v7915_v55  ;;  %v16064_v31 = vsub.f32 %v15809_v14, %v7917_v56 }
0x1302   : > { %v7824_v30 = vpop.xlane.xlu0 %7823  ;;  %v7830_v60 = vpop.xlane.xlu1 %7829 }
0x1303   : > { %v7916_v3 = vmul.f32 0.015625, %v7824_v30  ;;  %v7918_v52 = vmul.f32 0.015625, %v7830_v60  ;;  %v7979_v12 = vmul.f32 %v16061_v35, %v16061_v35  ;;  %v7981_v22 = vmul.f32 %v16064_v31, %v16064_v31 }
0x1305   : > { %v16071_v5 = vsub.f32 %v15799_v16, %v7916_v3  ;;  %v16074_v21 = vsub.f32 %v15815_v48, %v7918_v52  ;;  %v8011_v51 = vsel %vm860_vm1, %v7979_v12, 0.0  ;;  %v8017_v59 = vsel %vm860_vm1, %v7981_v22, 0.0 }
0x1306   : > { %8012 = vadd.xlane.f32.xlu0 %v8011_v51  ;;  %v7833_v14 = vpop.xlane.xlu0 %7832  ;;  %v7836_v23 = vpop.xlane.xlu1 %7835 }
0x1307   : > { %v7919_v28 = vmul.f32 0.015625, %v7833_v14  ;;  %v7920_v34 = vmul.f32 0.015625, %v7836_v23  ;;  %v7980_v11 = vmul.f32 %v16071_v5, %v16071_v5  ;;  %v7982_v32 = vmul.f32 %v16074_v21, %v16074_v21 }
0x1309   : > { %v16083_v16 = vsub.f32 %v15829_v29, %v7919_v28  ;;  %v16086_v48 = vsub.f32 %v15835_v38, %v7920_v34  ;;  %v8014_v19 = vsel %vm860_vm1, %v7980_v11, 0.0  ;;  %v8020_v58 = vsel %vm860_vm1, %v7982_v32, 0.0 }
0x130a   : > { %8018 = vadd.xlane.f32.xlu0 %v8017_v59  ;;  %8015 = vadd.xlane.f32.xlu1 %v8014_v19  ;;  %v7839_v8 = vpop.xlane.xlu0 %7838  ;;  %v7842_v63 = vpop.xlane.xlu1 %7841 }
0x130b   : > { %v7921_v6 = vmul.f32 0.015625, %v7839_v8  ;;  %v7922_v24 = vmul.f32 0.015625, %v7842_v63  ;;  %v7983_v36 = vmul.f32 %v16083_v16, %v16083_v16  ;;  %v7984_v29 = vmul.f32 %v16086_v48, %v16086_v48 }
0x130d   : > { %v16095_v43 = vsub.f32 %v15841_v25, %v7921_v6  ;;  %v16098_v38 = vsub.f32 %v15847_v61, %v7922_v24  ;;  %v8023_v44 = vsel %vm860_vm1, %v7983_v36, 0.0  ;;  %v8026_v26 = vsel %vm860_vm1, %v7984_v29, 0.0 }
0x130e   : > { %8021 = vadd.xlane.f32.xlu1 %v8020_v58  ;;  %8024 = vadd.xlane.f32.xlu0 %v8023_v44  ;;  %v7845_v20 = vpop.xlane.xlu0 %7844  ;;  %v7848_v15 = vpop.xlane.xlu1 %7847 }
0x130f   : > { %v7923_v10 = vmul.f32 0.015625, %v7845_v20  ;;  %v7924_v9 = vmul.f32 0.015625, %v7848_v15  ;;  %v7985_v55 = vmul.f32 %v16095_v43, %v16095_v43  ;;  %v7986_v25 = vmul.f32 %v16098_v38, %v16098_v38 }
0x1311   : > { %v16107_v56 = vsub.f32 %v15853_v49, %v7923_v10  ;;  %v16110_v61 = vsub.f32 %v15859_v2, %v7924_v9  ;;  %v8029_v30 = vsel %vm860_vm1, %v7985_v55, 0.0  ;;  %v8032_v52 = vsel %vm860_vm1, %v7986_v25, 0.0 }
0x1312   : > { %8027 = vadd.xlane.f32.xlu1 %v8026_v26  ;;  %8030 = vadd.xlane.f32.xlu0 %v8029_v30  ;;  %v7851_v60 = vpop.xlane.xlu0 %7850  ;;  %v7854_v3 = vpop.xlane.xlu1 %7853 }
0x1313   : > { %v7925_v12 = vmul.f32 0.015625, %v7851_v60  ;;  %v7926_v22 = vmul.f32 0.015625, %v7854_v3  ;;  %v7987_v51 = vmul.f32 %v16107_v56, %v16107_v56  ;;  %v7988_v49 = vmul.f32 %v16110_v61, %v16110_v61 }
0x1315   : > { %v16119_v14 = vsub.f32 %v15865_v62, %v7925_v12  ;;  %v16122_v2 = vsub.f32 %v15871_v13, %v7926_v22  ;;  %v8035_v23 = vsel %vm860_vm1, %v7987_v51, 0.0  ;;  %v8038_v34 = vsel %vm860_vm1, %v7988_v49, 0.0 }
0x1316   : > { %8033 = vadd.xlane.f32.xlu1 %v8032_v52  ;;  %8036 = vadd.xlane.f32.xlu0 %v8035_v23  ;;  %v7857_v59 = vpop.xlane.xlu0 %7856  ;;  %v7860_v28 = vpop.xlane.xlu1 %7859 }
0x1317   : > { %v7927_v11 = vmul.f32 0.015625, %v7857_v59  ;;  %v7928_v32 = vmul.f32 0.015625, %v7860_v28  ;;  %v7989_v19 = vmul.f32 %v16119_v14, %v16119_v14  ;;  %v7990_v62 = vmul.f32 %v16122_v2, %v16122_v2 }
0x1319   : > { %v16131_v8 = vsub.f32 %v15877_v45, %v7927_v11  ;;  %v16134_v13 = vsub.f32 %v15883_v17, %v7928_v32  ;;  %v8041_v63 = vsel %vm860_vm1, %v7989_v19, 0.0  ;;  %v8044_v24 = vsel %vm860_vm1, %v7990_v62, 0.0 }
0x131a   : > { %8039 = vadd.xlane.f32.xlu1 %v8038_v34  ;;  %8042 = vadd.xlane.f32.xlu0 %v8041_v63  ;;  %v7863_v58 = vpop.xlane.xlu0 %7862  ;;  %v7866_v6 = vpop.xlane.xlu1 %7865 }
0x131b   : > { %v7929_v36 = vmul.f32 0.015625, %v7863_v58  ;;  %v7930_v29 = vmul.f32 0.015625, %v7866_v6  ;;  %v7991_v44 = vmul.f32 %v16131_v8, %v16131_v8  ;;  %v7992_v45 = vmul.f32 %v16134_v13, %v16134_v13 }
0x131d   : > { %v16143_v20 = vsub.f32 %v15889_v50, %v7929_v36  ;;  %v16146_v17 = vsub.f32 %v15895_v1, %v7930_v29  ;;  %v8047_v15 = vsel %vm860_vm1, %v7991_v44, 0.0  ;;  %v8050_v9 = vsel %vm860_vm1, %v7992_v45, 0.0 }
0x131e   : > { %8045 = vadd.xlane.f32.xlu1 %v8044_v24  ;;  %8048 = vadd.xlane.f32.xlu0 %v8047_v15  ;;  %v7869_v26 = vpop.xlane.xlu0 %7868  ;;  %v7872_v10 = vpop.xlane.xlu1 %7871 }
0x131f   : > { %v7931_v55 = vmul.f32 0.015625, %v7869_v26  ;;  %v7932_v25 = vmul.f32 0.015625, %v7872_v10  ;;  %v7993_v30 = vmul.f32 %v16143_v20, %v16143_v20  ;;  %v7994_v50 = vmul.f32 %v16146_v17, %v16146_v17 }
0x1321   : > { %v16155_v60 = vsub.f32 %v15901_v0, %v7931_v55  ;;  %v16158_v1 = vsub.f32 %v15907_v18, %v7932_v25  ;;  %v8053_v3 = vsel %vm860_vm1, %v7993_v30, 0.0  ;;  %v8056_v22 = vsel %vm860_vm1, %v7994_v50, 0.0 }
0x1322   : > { %8051 = vadd.xlane.f32.xlu1 %v8050_v9  ;;  %8054 = vadd.xlane.f32.xlu0 %v8053_v3  ;;  %v7875_v52 = vpop.xlane.xlu0 %7874  ;;  %v7878_v12 = vpop.xlane.xlu1 %7877 }
0x1323   : > { %v7933_v51 = vmul.f32 0.015625, %v7875_v52  ;;  %v7934_v49 = vmul.f32 0.015625, %v7878_v12  ;;  %v7995_v23 = vmul.f32 %v16155_v60, %v16155_v60  ;;  %v7996_v0 = vmul.f32 %v16158_v1, %v16158_v1 }
0x1325   : > { %v16167_v59 = vsub.f32 %v15913_v57, %v7933_v51  ;;  %v16170_v18 = vsub.f32 %v15919_v47, %v7934_v49  ;;  %v8059_v28 = vsel %vm860_vm1, %v7995_v23, 0.0  ;;  %v8062_v32 = vsel %vm860_vm1, %v7996_v0, 0.0 }
0x1326   : > { %8057 = vadd.xlane.f32.xlu1 %v8056_v22  ;;  %8060 = vadd.xlane.f32.xlu0 %v8059_v28  ;;  %v7881_v34 = vpop.xlane.xlu0 %7880  ;;  %v7884_v11 = vpop.xlane.xlu1 %7883 }
0x1327   : > { %v7935_v19 = vmul.f32 0.015625, %v7881_v34  ;;  %v7936_v62 = vmul.f32 0.015625, %v7884_v11  ;;  %v7997_v63 = vmul.f32 %v16167_v59, %v16167_v59  ;;  %v7998_v57 = vmul.f32 %v16170_v18, %v16170_v18 }
0x1329   : > { %v16179_v58 = vsub.f32 %v15925_v41, %v7935_v19  ;;  %v16182_v47 = vsub.f32 %v15931_v54, %v7936_v62  ;;  %v8065_v6 = vsel %vm860_vm1, %v7997_v63, 0.0  ;;  %v8068_v29 = vsel %vm860_vm1, %v7998_v57, 0.0 }
0x132a   : > { %8063 = vadd.xlane.f32.xlu1 %v8062_v32  ;;  %8066 = vadd.xlane.f32.xlu0 %v8065_v6  ;;  %v7887_v24 = vpop.xlane.xlu0 %7886  ;;  %v7890_v36 = vpop.xlane.xlu1 %7889 }
0x132b   : > { %v7937_v44 = vmul.f32 0.015625, %v7887_v24  ;;  %v7938_v45 = vmul.f32 0.015625, %v7890_v36  ;;  %v7999_v15 = vmul.f32 %v16179_v58, %v16179_v58  ;;  %v8000_v41 = vmul.f32 %v16182_v47, %v16182_v47 }
0x132d   : > { %v16191_v26 = vsub.f32 %v15937_v42, %v7937_v44  ;;  %v16194_v54 = vsub.f32 %v15943_v53, %v7938_v45  ;;  %v8071_v10 = vsel %vm860_vm1, %v7999_v15, 0.0  ;;  %v8074_v25 = vsel %vm860_vm1, %v8000_v41, 0.0 }
0x132e   : > { %8069 = vadd.xlane.f32.xlu1 %v8068_v29  ;;  %8072 = vadd.xlane.f32.xlu0 %v8071_v10  ;;  %v7893_v9 = vpop.xlane.xlu0 %7892  ;;  %v7896_v55 = vpop.xlane.xlu1 %7895 }
0x132f   : > { %v7939_v30 = vmul.f32 0.015625, %v7893_v9  ;;  %v7940_v50 = vmul.f32 0.015625, %v7896_v55  ;;  %v8001_v3 = vmul.f32 %v16191_v26, %v16191_v26  ;;  %v8002_v42 = vmul.f32 %v16194_v54, %v16194_v54 }
0x1331   : > { %v16203_v52 = vsub.f32 %v15949_v46, %v7939_v30  ;;  %v16206_v53 = vsub.f32 %v15955_v37, %v7940_v50  ;;  %v8077_v12 = vsel %vm860_vm1, %v8001_v3, 0.0  ;;  %v8080_v49 = vsel %vm860_vm1, %v8002_v42, 0.0 }
0x1332   : > { %8075 = vadd.xlane.f32.xlu1 %v8074_v25  ;;  %8078 = vadd.xlane.f32.xlu0 %v8077_v12  ;;  %v7899_v22 = vpop.xlane.xlu0 %7898  ;;  %v7902_v51 = vpop.xlane.xlu1 %7901 }
0x1333   : > { %v7941_v23 = vmul.f32 0.015625, %v7899_v22  ;;  %v7942_v0 = vmul.f32 0.015625, %v7902_v51  ;;  %v8003_v28 = vmul.f32 %v16203_v52, %v16203_v52  ;;  %v8004_v46 = vmul.f32 %v16206_v53, %v16206_v53 }
0x1335   : > { %v16215_v34 = vsub.f32 %v15961_v39, %v7941_v23  ;;  %v16218_v37 = vsub.f32 %v15967_v40, %v7942_v0  ;;  %v8083_v11 = vsel %vm860_vm1, %v8003_v28, 0.0  ;;  %v8086_v62 = vsel %vm860_vm1, %v8004_v46, 0.0 }
0x1336   : > { %8081 = vadd.xlane.f32.xlu1 %v8080_v49  ;;  %8084 = vadd.xlane.f32.xlu0 %v8083_v11  ;;  %v7905_v32 = vpop.xlane.xlu0 %7904  ;;  %v7908_v19 = vpop.xlane.xlu1 %7907 }
0x1337   : > { %v7943_v63 = vmul.f32 0.015625, %v7905_v32  ;;  %v7944_v57 = vmul.f32 0.015625, %v7908_v19  ;;  %v8005_v6 = vmul.f32 %v16215_v34, %v16215_v34  ;;  %v8006_v39 = vmul.f32 %v16218_v37, %v16218_v37 }
0x1339   : > { %v16227_v24 = vsub.f32 %v15973_v7, %v7943_v63  ;;  %v16230_v40 = vsub.f32 %v15979_v27, %v7944_v57  ;;  %v8089_v36 = vsel %vm860_vm1, %v8005_v6, 0.0  ;;  %v8092_v45 = vsel %vm860_vm1, %v8006_v39, 0.0 }
0x133a   : > { %8087 = vadd.xlane.f32.xlu1 %v8086_v62  ;;  %8090 = vadd.xlane.f32.xlu0 %v8089_v36  ;;  %v7911_v29 = vpop.xlane.xlu0 %7910  ;;  %v7914_v44 = vpop.xlane.xlu1 %7913 }
0x133b   : > { %v7945_v15 = vmul.f32 0.015625, %v7911_v29  ;;  %v7946_v41 = vmul.f32 0.015625, %v7914_v44  ;;  %v8007_v10 = vmul.f32 %v16227_v24, %v16227_v24  ;;  %v8008_v7 = vmul.f32 %v16230_v40, %v16230_v40 }
0x133d   : > { %v16239_v9 = vsub.f32 %v15985_v4, %v7945_v15  ;;  %v16242_v27 = vsub.f32 %v15991_v33, %v7946_v41  ;;  %v8095_v55 = vsel %vm860_vm1, %v8007_v10, 0.0  ;;  %v8098_v25 = vsel %vm860_vm1, %v8008_v7, 0.0 }
0x133e   : > { %8093 = vadd.xlane.f32.xlu1 %v8092_v45  ;;  %8096 = vadd.xlane.f32.xlu0 %v8095_v55  ;;  %v16255_v55 = vld [vmem:[%s17043_s1] ss:$0 sm:$0xff] }
0x133f   : > { %v8009_v30 = vmul.f32 %v16239_v9, %v16239_v9  ;;  %v8010_v50 = vmul.f32 %v16242_v27, %v16242_v27 }
0x1341   : > { %v8101_v3 = vsel %vm860_vm1, %v8009_v30, 0.0  ;;  %v8104_v4 = vsel %vm860_vm1, %v8010_v50, 0.0 }
0x1342   : > { %8099 = vadd.xlane.f32.xlu1 %v8098_v25  ;;  %8102 = vadd.xlane.f32.xlu0 %v8101_v3  ;;  %v16261_v3 = vld [vmem:[%s17044_s29] ss:$0 sm:$0xff] }
0x1346   : > { %8105 = vadd.xlane.f32.xlu1 %v8104_v4 }
0x138f   : > { %v8013_v33 = vpop.xlane.xlu0 %8012 }
0x1390   : > { %v8107_v42 = vmul.f32 0.015625, %v8013_v33 }
0x1392   : > { %v8139_v12 = vadd.f32 1e-05, %v8107_v42 }
0x1393   : > { %v8016_v22 = vpop.xlane.xlu1 %8015  ;;  %v8019_v51 = vpop.xlane.xlu0 %8018 }
0x1394   : > { %11085 = vrsqrt.f32 %v8139_v12  ;;  %v8108_v49 = vmul.f32 0.015625, %v8016_v22  ;;  %v8109_v23 = vmul.f32 0.015625, %v8019_v51 }
0x1396   : > { %v8140_v0 = vadd.f32 1e-05, %v8108_v49  ;;  %v8141_v28 = vadd.f32 1e-05, %v8109_v23 }
0x1397   : > { %v8022_v46 = vpop.xlane.xlu1 %8021  ;;  %v8025_v11 = vpop.xlane.xlu0 %8024 }
0x1398   : > { %11087 = vrsqrt.f32 %v8140_v0  ;;  %v8110_v32 = vmul.f32 0.015625, %v8022_v46  ;;  %v8111_v19 = vmul.f32 0.015625, %v8025_v11 }
0x1399   : > { %11089 = vrsqrt.f32 %v8141_v28 }
0x139a   : > { %v8142_v62 = vadd.f32 1e-05, %v8110_v32  ;;  %v8143_v63 = vadd.f32 1e-05, %v8111_v19 }
0x139b   : > { %v8028_v57 = vpop.xlane.xlu1 %8027  ;;  %v8031_v6 = vpop.xlane.xlu0 %8030 }
0x139c   : > { %11091 = vrsqrt.f32 %v8142_v62  ;;  %v8112_v39 = vmul.f32 0.015625, %v8028_v57  ;;  %v8113_v36 = vmul.f32 0.015625, %v8031_v6 }
0x139d   : > { %11093 = vrsqrt.f32 %v8143_v63 }
0x139e   : > { %v8144_v29 = vadd.f32 1e-05, %v8112_v39  ;;  %v8145_v44 = vadd.f32 1e-05, %v8113_v36 }
0x139f   : > { %v8034_v45 = vpop.xlane.xlu1 %8033  ;;  %v8037_v15 = vpop.xlane.xlu0 %8036 }
0x13a0   : > { %11095 = vrsqrt.f32 %v8144_v29  ;;  %v8114_v41 = vmul.f32 0.015625, %v8034_v45  ;;  %v8115_v10 = vmul.f32 0.015625, %v8037_v15 }
0x13a1   : > { %v11086_v7 = vpop.eup %11085  ;;  %11097 = vrsqrt.f32 %v8145_v44 }
0x13a2   : > { %v8203_v25 = vmul.f32 %v11086_v7, %v16061_v35  ;;  %v8146_v30 = vadd.f32 1e-05, %v8114_v41  ;;  %v8147_v50 = vadd.f32 1e-05, %v8115_v10 }
0x13a3   : > { %v8040_v4 = vpop.xlane.xlu1 %8039  ;;  %v8043_v33 = vpop.xlane.xlu0 %8042 }
0x13a4   : > { %v8241_v42 = vmul.f32 %v16255_v55, %v8203_v25  ;;  %11099 = vrsqrt.f32 %v8146_v30  ;;  %v8116_v12 = vmul.f32 0.015625, %v8040_v4  ;;  %v8117_v22 = vmul.f32 0.015625, %v8043_v33 }
0x13a5   : > { %v11088_v51 = vpop.eup %11087  ;;  %11101 = vrsqrt.f32 %v8147_v50 }
0x13a6   : > { %v11090_v49 = vpop.eup %11089  ;;  %v8279_v23 = vadd.f32 %v16261_v3, %v8241_v42  ;;  %v8204_v35 = vmul.f32 %v11088_v51, %v16071_v5  ;;  %v8148_v0 = vadd.f32 1e-05, %v8116_v12  ;;  %v8149_v28 = vadd.f32 1e-05, %v8117_v22 }
0x13a7   : > { %v8205_v46 = vmul.f32 %v11090_v49, %v16064_v31  ;;  %v8046_v11 = vpop.xlane.xlu1 %8045  ;;  %v8049_v32 = vpop.xlane.xlu0 %8048 }
0x13a8   : > { %8311 = vst.msk [vmem:[%s17045_s18] sm:$0xff] %vm860_vm1, %v8279_v23  ;;  %v8242_v19 = vmul.f32 %v16255_v55, %v8204_v35  ;;  %11103 = vrsqrt.f32 %v8148_v0  ;;  %v8118_v62 = vmul.f32 0.015625, %v8046_v11  ;;  %v8119_v63 = vmul.f32 0.015625, %v8049_v32 }
0x13a9   : > { %v11092_v57 = vpop.eup %11091  ;;  %v8243_v6 = vmul.f32 %v16255_v55, %v8205_v46  ;;  %11105 = vrsqrt.f32 %v8149_v28 }
0x13aa   : > { %v11094_v5 = vpop.eup %11093  ;;  %v8280_v39 = vadd.f32 %v16261_v3, %v8242_v19  ;;  %v8206_v31 = vmul.f32 %v11092_v57, %v16074_v21  ;;  %v8150_v36 = vadd.f32 1e-05, %v8118_v62  ;;  %v8151_v29 = vadd.f32 1e-05, %v8119_v63 }
0x13ab   : > { %v8281_v44 = vadd.f32 %v16261_v3, %v8243_v6  ;;  %v8207_v45 = vmul.f32 %v11094_v5, %v16083_v16  ;;  %v8052_v15 = vpop.xlane.xlu1 %8051  ;;  %v8055_v41 = vpop.xlane.xlu0 %8054 }
0x13ac   : > { %8312 = vst.msk [vmem:[%s17045_s18 + $0x8] sm:$0xff] %vm860_vm1, %v8280_v39  ;;  %v8244_v10 = vmul.f32 %v16255_v55, %v8206_v31  ;;  %11107 = vrsqrt.f32 %v8150_v36  ;;  %v8120_v7 = vmul.f32 0.015625, %v8052_v15  ;;  %v8121_v25 = vmul.f32 0.015625, %v8055_v41 }
0x13ad   : > { %v11096_v30 = vpop.eup %11095  ;;  %8313 = vst.msk [vmem:[%s17045_s18 + $0x10] sm:$0xff] %vm860_vm1, %v8281_v44  ;;  %v8245_v21 = vmul.f32 %v16255_v55, %v8207_v45  ;;  %11109 = vrsqrt.f32 %v8151_v29 }
0x13ae   : > { %v11098_v16 = vpop.eup %11097  ;;  %v8282_v50 = vadd.f32 %v16261_v3, %v8244_v10  ;;  %v8208_v4 = vmul.f32 %v11096_v30, %v16086_v48  ;;  %v8152_v33 = vadd.f32 1e-05, %v8120_v7  ;;  %v8153_v42 = vadd.f32 1e-05, %v8121_v25 }
0x13af   : > { %v8283_v12 = vadd.f32 %v16261_v3, %v8245_v21  ;;  %v8209_v22 = vmul.f32 %v11098_v16, %v16095_v43  ;;  %v8058_v51 = vpop.xlane.xlu1 %8057  ;;  %v8061_v49 = vpop.xlane.xlu0 %8060 }
0x13b0   : > { %8314 = vst.msk [vmem:[%s17045_s18 + $0x18] sm:$0xff] %vm860_vm1, %v8282_v50  ;;  %v8246_v23 = vmul.f32 %v16255_v55, %v8208_v4  ;;  %11111 = vrsqrt.f32 %v8152_v33  ;;  %v8122_v35 = vmul.f32 0.015625, %v8058_v51  ;;  %v8123_v0 = vmul.f32 0.015625, %v8061_v49 }
0x13b1   : > { %v11100_v28 = vpop.eup %11099  ;;  %8315 = vst.msk [vmem:[%s17045_s18 + $0x20] sm:$0xff] %vm860_vm1, %v8283_v12  ;;  %v8247_v48 = vmul.f32 %v16255_v55, %v8209_v22  ;;  %11113 = vrsqrt.f32 %v8153_v42 }
0x13b2   : > { %v11102_v43 = vpop.eup %11101  ;;  %v8284_v46 = vadd.f32 %v16261_v3, %v8246_v23  ;;  %v8210_v11 = vmul.f32 %v11100_v28, %v16098_v38  ;;  %v8154_v32 = vadd.f32 1e-05, %v8122_v35  ;;  %v8155_v19 = vadd.f32 1e-05, %v8123_v0 }
0x13b3   : > { %v8285_v62 = vadd.f32 %v16261_v3, %v8247_v48  ;;  %v8211_v63 = vmul.f32 %v11102_v43, %v16107_v56  ;;  %v8064_v57 = vpop.xlane.xlu1 %8063  ;;  %v8067_v6 = vpop.xlane.xlu0 %8066 }
0x13b4   : > { %8316 = vst.msk [vmem:[%s17045_s18 + $0x28] sm:$0xff] %vm860_vm1, %v8284_v46  ;;  %v8248_v5 = vmul.f32 %v16255_v55, %v8210_v11  ;;  %11115 = vrsqrt.f32 %v8154_v32  ;;  %v8124_v39 = vmul.f32 0.015625, %v8064_v57  ;;  %v8125_v31 = vmul.f32 0.015625, %v8067_v6 }
0x13b5   : > { %v11104_v36 = vpop.eup %11103  ;;  %8317 = vst.msk [vmem:[%s17045_s18 + $0x30] sm:$0xff] %vm860_vm1, %v8285_v62  ;;  %v8249_v38 = vmul.f32 %v16255_v55, %v8211_v63  ;;  %11117 = vrsqrt.f32 %v8155_v19 }
0x13b6   : > { %v11106_v56 = vpop.eup %11105  ;;  %v8286_v29 = vadd.f32 %v16261_v3, %v8248_v5  ;;  %v8212_v44 = vmul.f32 %v11104_v36, %v16110_v61  ;;  %v8156_v45 = vadd.f32 1e-05, %v8124_v39  ;;  %v8157_v15 = vadd.f32 1e-05, %v8125_v31 }
0x13b7   : > { %v8287_v41 = vadd.f32 %v16261_v3, %v8249_v38  ;;  %v8213_v10 = vmul.f32 %v11106_v56, %v16119_v14  ;;  %v8070_v7 = vpop.xlane.xlu1 %8069  ;;  %v8073_v25 = vpop.xlane.xlu0 %8072 }
0x13b8   : > { %8318 = vst.msk [vmem:[%s17045_s18 + $0x38] sm:$0xff] %vm860_vm1, %v8286_v29  ;;  %v8250_v30 = vmul.f32 %v16255_v55, %v8212_v44  ;;  %11119 = vrsqrt.f32 %v8156_v45  ;;  %v8126_v21 = vmul.f32 0.015625, %v8070_v7  ;;  %v8127_v16 = vmul.f32 0.015625, %v8073_v25 }
0x13b9   : > { %v11108_v50 = vpop.eup %11107  ;;  %8319 = vst.msk [vmem:[%s17045_s18 + $0x40] sm:$0xff] %vm860_vm1, %v8287_v41  ;;  %v8251_v61 = vmul.f32 %v16255_v55, %v8213_v10  ;;  %11121 = vrsqrt.f32 %v8157_v15 }
0x13ba   : > { %v11110_v14 = vpop.eup %11109  ;;  %v8288_v4 = vadd.f32 %v16261_v3, %v8250_v30  ;;  %v8214_v33 = vmul.f32 %v11108_v50, %v16122_v2  ;;  %v8158_v42 = vadd.f32 1e-05, %v8126_v21  ;;  %v8159_v12 = vadd.f32 1e-05, %v8127_v16 }
0x13bb   : > { %v8289_v22 = vadd.f32 %v16261_v3, %v8251_v61  ;;  %v8215_v51 = vmul.f32 %v11110_v14, %v16131_v8  ;;  %v8076_v49 = vpop.xlane.xlu1 %8075  ;;  %v8079_v23 = vpop.xlane.xlu0 %8078 }
0x13bc   : > { %8320 = vst.msk [vmem:[%s17045_s18 + $0x48] sm:$0xff] %vm860_vm1, %v8288_v4  ;;  %v8252_v35 = vmul.f32 %v16255_v55, %v8214_v33  ;;  %11123 = vrsqrt.f32 %v8158_v42  ;;  %v8128_v0 = vmul.f32 0.015625, %v8076_v49  ;;  %v8129_v28 = vmul.f32 0.015625, %v8079_v23 }
0x13bd   : > { %v11112_v48 = vpop.eup %11111  ;;  %8321 = vst.msk [vmem:[%s17045_s18 + $0x50] sm:$0xff] %vm860_vm1, %v8289_v22  ;;  %v8253_v2 = vmul.f32 %v16255_v55, %v8215_v51  ;;  %11125 = vrsqrt.f32 %v8159_v12 }
0x13be   : > { %v11114_v8 = vpop.eup %11113  ;;  %v8290_v43 = vadd.f32 %v16261_v3, %v8252_v35  ;;  %v8216_v46 = vmul.f32 %v11112_v48, %v16134_v13  ;;  %v8160_v11 = vadd.f32 1e-05, %v8128_v0  ;;  %v8161_v32 = vadd.f32 1e-05, %v8129_v28 }
0x13bf   : > { %v8291_v19 = vadd.f32 %v16261_v3, %v8253_v2  ;;  %v8217_v62 = vmul.f32 %v11114_v8, %v16143_v20  ;;  %v8082_v63 = vpop.xlane.xlu1 %8081  ;;  %v8085_v57 = vpop.xlane.xlu0 %8084 }
0x13c0   : > { %8322 = vst.msk [vmem:[%s17045_s18 + $0x58] sm:$0xff] %vm860_vm1, %v8290_v43  ;;  %v8254_v6 = vmul.f32 %v16255_v55, %v8216_v46  ;;  %11127 = vrsqrt.f32 %v8160_v11  ;;  %v8130_v5 = vmul.f32 0.015625, %v8082_v63  ;;  %v8131_v39 = vmul.f32 0.015625, %v8085_v57 }
0x13c1   : > { %v11116_v31 = vpop.eup %11115  ;;  %8323 = vst.msk [vmem:[%s17045_s18 + $0x60] sm:$0xff] %vm860_vm1, %v8291_v19  ;;  %v8255_v13 = vmul.f32 %v16255_v55, %v8217_v62  ;;  %11129 = vrsqrt.f32 %v8161_v32 }
0x13c2   : > { %v11118_v20 = vpop.eup %11117  ;;  %v8292_v36 = vadd.f32 %v16261_v3, %v8254_v6  ;;  %v8218_v38 = vmul.f32 %v11116_v31, %v16146_v17  ;;  %v8162_v56 = vadd.f32 1e-05, %v8130_v5  ;;  %v8163_v29 = vadd.f32 1e-05, %v8131_v39 }
0x13c3   : > { %v8293_v44 = vadd.f32 %v16261_v3, %v8255_v13  ;;  %v8219_v45 = vmul.f32 %v11118_v20, %v16155_v60  ;;  %v8088_v15 = vpop.xlane.xlu1 %8087  ;;  %v8091_v41 = vpop.xlane.xlu0 %8090 }
0x13c4   : > { %8324 = vst.msk [vmem:[%s17045_s18 + $0x68] sm:$0xff] %vm860_vm1, %v8292_v36  ;;  %v8256_v10 = vmul.f32 %v16255_v55, %v8218_v38  ;;  %11131 = vrsqrt.f32 %v8162_v56  ;;  %v8132_v7 = vmul.f32 0.015625, %v8088_v15  ;;  %v8133_v25 = vmul.f32 0.015625, %v8091_v41 }
0x13c5   : > { %v11120_v30 = vpop.eup %11119  ;;  %8325 = vst.msk [vmem:[%s17045_s18 + $0x70] sm:$0xff] %vm860_vm1, %v8293_v44  ;;  %v8257_v17 = vmul.f32 %v16255_v55, %v8219_v45  ;;  %11133 = vrsqrt.f32 %v8163_v29 }
0x13c6   : > { %v11122_v60 = vpop.eup %11121  ;;  %v8294_v21 = vadd.f32 %v16261_v3, %v8256_v10  ;;  %v8220_v16 = vmul.f32 %v11120_v30, %v16158_v1  ;;  %v8164_v50 = vadd.f32 1e-05, %v8132_v7  ;;  %v8165_v61 = vadd.f32 1e-05, %v8133_v25 }
0x13c7   : > { %v8295_v14 = vadd.f32 %v16261_v3, %v8257_v17  ;;  %v8221_v4 = vmul.f32 %v11122_v60, %v16167_v59  ;;  %v8094_v33 = vpop.xlane.xlu1 %8093  ;;  %v8097_v42 = vpop.xlane.xlu0 %8096 }
0x13c8   : > { %8326 = vst.msk [vmem:[%s17045_s18 + $0x78] sm:$0xff] %vm860_vm1, %v8294_v21  ;;  %v8258_v12 = vmul.f32 %v16255_v55, %v8220_v16  ;;  %11135 = vrsqrt.f32 %v8164_v50  ;;  %v8134_v22 = vmul.f32 0.015625, %v8094_v33  ;;  %v8135_v51 = vmul.f32 0.015625, %v8097_v42 }
0x13c9   : > { %v11124_v49 = vpop.eup %11123  ;;  %8327 = vst.msk [vmem:[%s17045_s18 + $0x80] sm:$0xff] %vm860_vm1, %v8295_v14  ;;  %v8259_v1 = vmul.f32 %v16255_v55, %v8221_v4  ;;  %11137 = vrsqrt.f32 %v8165_v61 }
0x13ca   : > { %v11126_v59 = vpop.eup %11125  ;;  %v8296_v23 = vadd.f32 %v16261_v3, %v8258_v12  ;;  %v8222_v35 = vmul.f32 %v11124_v49, %v16170_v18  ;;  %v8166_v0 = vadd.f32 1e-05, %v8134_v22  ;;  %v8167_v28 = vadd.f32 1e-05, %v8135_v51 }
0x13cb   : > { %v8297_v48 = vadd.f32 %v16261_v3, %v8259_v1  ;;  %v8223_v2 = vmul.f32 %v11126_v59, %v16179_v58  ;;  %v8100_v8 = vpop.xlane.xlu1 %8099  ;;  %v8103_v43 = vpop.xlane.xlu0 %8102 }
0x13cc   : > { %8328 = vst.msk [vmem:[%s17045_s18 + $0x88] sm:$0xff] %vm860_vm1, %v8296_v23  ;;  %v8260_v46 = vmul.f32 %v16255_v55, %v8222_v35  ;;  %11139 = vrsqrt.f32 %v8166_v0  ;;  %v8136_v11 = vmul.f32 0.015625, %v8100_v8  ;;  %v8137_v32 = vmul.f32 0.015625, %v8103_v43 }
0x13cd   : > { %v11128_v19 = vpop.eup %11127  ;;  %8329 = vst.msk [vmem:[%s17045_s18 + $0x90] sm:$0xff] %vm860_vm1, %v8297_v48  ;;  %v8261_v18 = vmul.f32 %v16255_v55, %v8223_v2  ;;  %11141 = vrsqrt.f32 %v8167_v28 }
0x13ce   : > { %v11130_v58 = vpop.eup %11129  ;;  %v8298_v62 = vadd.f32 %v16261_v3, %v8260_v46  ;;  %v8224_v63 = vmul.f32 %v11128_v19, %v16182_v47  ;;  %v8168_v57 = vadd.f32 1e-05, %v8136_v11  ;;  %v8169_v6 = vadd.f32 1e-05, %v8137_v32 }
0x13cf   : > { %v8299_v5 = vadd.f32 %v16261_v3, %v8261_v18  ;;  %v8225_v39 = vmul.f32 %v11130_v58, %v16191_v26  ;;  %v8106_v31 = vpop.xlane.xlu1 %8105 }
0x13d0   : > { %8330 = vst.msk [vmem:[%s17045_s18 + $0x98] sm:$0xff] %vm860_vm1, %v8298_v62  ;;  %v8262_v13 = vmul.f32 %v16255_v55, %v8224_v63  ;;  %11143 = vrsqrt.f32 %v8168_v57  ;;  %v8138_v20 = vmul.f32 0.015625, %v8106_v31 }
0x13d1   : > { %v11132_v36 = vpop.eup %11131  ;;  %8331 = vst.msk [vmem:[%s17045_s18 + $0xa0] sm:$0xff] %vm860_vm1, %v8299_v5  ;;  %v8263_v47 = vmul.f32 %v16255_v55, %v8225_v39  ;;  %11145 = vrsqrt.f32 %v8169_v6 }
0x13d2   : > { %v11134_v26 = vpop.eup %11133  ;;  %v8300_v38 = vadd.f32 %v16261_v3, %v8262_v13  ;;  %v8226_v56 = vmul.f32 %v11132_v36, %v16194_v54  ;;  %v8170_v29 = vadd.f32 1e-05, %v8138_v20 }
0x13d3   : > { %v8301_v44 = vadd.f32 %v16261_v3, %v8263_v47  ;;  %v8227_v45 = vmul.f32 %v11134_v26, %v16203_v52 }
0x13d4   : > { %8332 = vst.msk [vmem:[%s17045_s18 + $0xa8] sm:$0xff] %vm860_vm1, %v8300_v38  ;;  %v8264_v15 = vmul.f32 %v16255_v55, %v8226_v56  ;;  %11147 = vrsqrt.f32 %v8170_v29 }
0x13d5   : > { %v11136_v41 = vpop.eup %11135  ;;  %8333 = vst.msk [vmem:[%s17045_s18 + $0xb0] sm:$0xff] %vm860_vm1, %v8301_v44  ;;  %v8265_v54 = vmul.f32 %v16255_v55, %v8227_v45 }
0x13d6   : > { %v11138_v10 = vpop.eup %11137  ;;  %v8302_v7 = vadd.f32 %v16261_v3, %v8264_v15  ;;  %v8228_v52 = vmul.f32 %v11136_v41, %v16206_v53 }
0x13d7   : > { %v8303_v25 = vadd.f32 %v16261_v3, %v8265_v54  ;;  %v8229_v30 = vmul.f32 %v11138_v10, %v16215_v34 }
0x13d8   : > { %8334 = vst.msk [vmem:[%s17045_s18 + $0xb8] sm:$0xff] %vm860_vm1, %v8302_v7  ;;  %v8266_v17 = vmul.f32 %v16255_v55, %v8228_v52 }
0x13d9   : > { %v11140_v60 = vpop.eup %11139  ;;  %8335 = vst.msk [vmem:[%s17045_s18 + $0xc0] sm:$0xff] %vm860_vm1, %v8303_v25  ;;  %v8267_v21 = vmul.f32 %v16255_v55, %v8229_v30 }
0x13da   : > { %v11142_v53 = vpop.eup %11141  ;;  %v8304_v16 = vadd.f32 %v16261_v3, %v8266_v17  ;;  %v8230_v34 = vmul.f32 %v11140_v60, %v16218_v37 }
0x13db   : > { %v8305_v50 = vadd.f32 %v16261_v3, %v8267_v21  ;;  %v8231_v61 = vmul.f32 %v11142_v53, %v16227_v24 }
0x13dc   : > { %8336 = vst.msk [vmem:[%s17045_s18 + $0xc8] sm:$0xff] %vm860_vm1, %v8304_v16  ;;  %v8268_v14 = vmul.f32 %v16255_v55, %v8230_v34 }
0x13dd   : > { %v11144_v4 = vpop.eup %11143  ;;  %8337 = vst.msk [vmem:[%s17045_s18 + $0xd0] sm:$0xff] %vm860_vm1, %v8305_v50  ;;  %v8269_v33 = vmul.f32 %v16255_v55, %v8231_v61 }
0x13de   : > { %v11146_v37 = vpop.eup %11145  ;;  %v8306_v42 = vadd.f32 %v16261_v3, %v8268_v14  ;;  %v8232_v24 = vmul.f32 %v11144_v4, %v16230_v40 }
0x13df   : > { %v8307_v12 = vadd.f32 %v16261_v3, %v8269_v33  ;;  %v8233_v22 = vmul.f32 %v11146_v37, %v16239_v9 }
0x13e0   : > { %8338 = vst.msk [vmem:[%s17045_s18 + $0xd8] sm:$0xff] %vm860_vm1, %v8306_v42  ;;  %v8270_v51 = vmul.f32 %v16255_v55, %v8232_v24 }
0x13e1   : > { %v11148_v49 = vpop.eup %11147  ;;  %8339 = vst.msk [vmem:[%s17045_s18 + $0xe0] sm:$0xff] %vm860_vm1, %v8307_v12  ;;  %v8271_v1 = vmul.f32 %v16255_v55, %v8233_v22 }
0x13e2   : > { %v8308_v40 = vadd.f32 %v16261_v3, %v8270_v51  ;;  %v8234_v59 = vmul.f32 %v11148_v49, %v16242_v27 }
0x13e3   : > { %v8309_v9 = vadd.f32 %v16261_v3, %v8271_v1 }
0x13e4   : > { %8340 = vst.msk [vmem:[%s17045_s18 + $0xe8] sm:$0xff] %vm860_vm1, %v8308_v40  ;;  %v8272_v23 = vmul.f32 %v16255_v55, %v8234_v59 }
0x13e5   : > { %8341 = vst.msk [vmem:[%s17045_s18 + $0xf0] sm:$0xff] %vm860_vm1, %v8309_v9 }
0x13e6   : > { %v8310_v35 = vadd.f32 %v16261_v3, %v8272_v23 }
0x13e8   : > { %8342 = vst.msk [vmem:[%s17045_s18 + $0xf8] sm:$0xff] %vm860_vm1, %v8310_v35 }
0x13e9 PF: > { %s17046_s28 = sld [smem:[#allocation4_spill]] }
0x13ea   : > { %s17047_s21 = sld [smem:[#allocation3_spill]] }
0x13eb   : > { %s17048_s22 = sld [smem:[#allocation5_spill]] }
0x13ef   : > { %s26_s23 = sadd.s32 1, %s17046_s28  }
0x13f0   : > { %p23_p7 = scmp.ge.s32.totalorder %s26_s23, 4  }
0x13f2   :  { %25 = sbr.rel (!%p23_p7) target bundleno = 8 (0x8), region = 158 }

</bundles_post_ra>
